<compile_context>
chip_gen: v6e
topology: v6e:2x2x1
jax: 0.10.0
libtpu: 0.0.40
codegen_flags: <defaults>
</compile_context>

<pallas_src>
import functools
import math

import jax
import jax.numpy as jnp
from jax.experimental import pallas as pl
from jax.experimental.pallas import tpu as pltpu


# ---------------------------------------------------------------------------
# Pallas kernel: the entire OhsumedGRU forward pass
# ---------------------------------------------------------------------------
def _sigmoid(x):
    return 1.0 / (1.0 + jnp.exp(-x))


def _ohsumed_gru_kernel(ids_ref, emb_ref,
                        wih_r_ref, wih_z_ref, wih_n_ref,
                        whh_r_ref, whh_z_ref, whh_n_ref,
                        bih_r_ref, bih_z_ref, bih_n_ref,
                        bhh_r_ref, bhh_z_ref, bhh_n_ref,
                        wa1_ref, wa2_ref, wcls_ref,
                        hs_ref, logits_ref,
                        *, T, B, H, V):
    f32 = jnp.float32

    # ---- embedding lookup: exact one-hot GEMM against the VMEM-resident table ----
    emb = emb_ref[...]                                                # (V, D)
    iota_v = jax.lax.broadcasted_iota(jnp.int32, (B, V), 1)
    xs0 = []
    for t in range(T):
        onehot = (ids_ref[t] == iota_v).astype(f32)                   # (B, V)
        xs0.append(jnp.dot(onehot, emb, preferred_element_type=f32))  # (B, D)

    # ---- one GRU direction (PyTorch gate equations; gates pre-split host-side) ----
    def run_direction(xs, cell, reverse):
        wir, wiz, win = wih_r_ref[cell], wih_z_ref[cell], wih_n_ref[cell]   # (D, H)
        whr, whz, whn = whh_r_ref[cell], whh_z_ref[cell], whh_n_ref[cell]   # (H, H)
        bir, biz, bin_ = bih_r_ref[cell], bih_z_ref[cell], bih_n_ref[cell]  # (1, H)
        bhr, bhz, bhn = bhh_r_ref[cell], bhh_z_ref[cell], bhh_n_ref[cell]   # (1, H)
        h = jnp.zeros((B, H), f32)
        outs = [None] * T
        order = range(T - 1, -1, -1) if reverse else range(T)
        for t in order:
            x_t = xs[t]                                               # (B, D)
            r = _sigmoid(jnp.dot(x_t, wir, preferred_element_type=f32) + bir
                         + jnp.dot(h, whr, preferred_element_type=f32) + bhr)
            z = _sigmoid(jnp.dot(x_t, wiz, preferred_element_type=f32) + biz
                         + jnp.dot(h, whz, preferred_element_type=f32) + bhz)
            n = jnp.tanh(jnp.dot(x_t, win, preferred_element_type=f32) + bin_
                         + r * (jnp.dot(h, whn, preferred_element_type=f32) + bhn))
            h = (1.0 - z) * n + z * h
            outs[t] = h
        return outs

    # ---- layer 0 (input = embeddings), layer 1 (input = concat(fwd, bwd)) ----
    f0 = run_direction(xs0, 0, reverse=False)
    b0 = run_direction(xs0, 1, reverse=True)
    xs1 = [jnp.concatenate([f0[t], b0[t]], axis=1) for t in range(T)]       # (B, 2H=D)
    f1 = run_direction(xs1, 2, reverse=False)
    b1 = run_direction(xs1, 3, reverse=True)
    outs = [jnp.concatenate([f1[t], b1[t]], axis=1) for t in range(T)]      # (B, D)

    # ---- additive attention pooling (softmax over time) ----
    wa1 = wa1_ref[...]                                                # (D, D)
    wa2 = wa2_ref[...]                                                # (D, 1)
    scores = []
    for t in range(T):
        u = jnp.tanh(jnp.dot(outs[t], wa1, preferred_element_type=f32))     # (B, D)
        scores.append(jnp.dot(u, wa2, preferred_element_type=f32))          # (B, 1)
    m = scores[0]
    for t in range(1, T):
        m = jnp.maximum(m, scores[t])
    exps = [jnp.exp(s - m) for s in scores]
    denom = exps[0]
    acc = exps[0] * outs[0]
    for t in range(1, T):
        denom = denom + exps[t]
        acc = acc + exps[t] * outs[t]
    hs = acc / denom                                                  # (B, D)

    # ---- classifier (Linear, bias=False) ----
    hs_ref[...] = hs
    logits_ref[...] = jnp.dot(hs, wcls_ref[...], preferred_element_type=f32)


# ---------------------------------------------------------------------------
# pallas_call wrapper
# ---------------------------------------------------------------------------
def _full_spec(shape):
    """Full-array block (block_shape == array shape) for a grid=(1,) call."""
    return pl.BlockSpec(shape, lambda i: (0,) * len(shape))


def ohsumed_gru_forward(params, xs):
    """xs: (B, T) int32 token ids -> (hs (B, w_dim), logits (B, n_classes))."""
    B, T = xs.shape
    V, D = params["emb"].shape
    H = D // 2
    C = params["wcls"].shape[1]

    # time-major ids so the kernel can take static per-step slabs: ids_tm[t, b, 0] = xs[b, t]
    ids_tm = jnp.transpose(xs.astype(jnp.int32), (1, 0))[:, :, None]   # (T, B, 1)

    in_arrays = (
        ids_tm, params["emb"],
        params["wih_r"], params["wih_z"], params["wih_n"],
        params["whh_r"], params["whh_z"], params["whh_n"],
        params["bih_r"], params["bih_z"], params["bih_n"],
        params["bhh_r"], params["bhh_z"], params["bhh_n"],
        params["wa1"], params["wa2"], params["wcls"],
    )

    kern = functools.partial(_ohsumed_gru_kernel, T=T, B=B, H=H, V=V)

    hs, logits = pl.pallas_call(
        kern,
        out_shape=(jax.ShapeDtypeStruct((B, D), jnp.float32),
                   jax.ShapeDtypeStruct((B, C), jnp.float32)),
        grid=(1,),
        in_specs=[_full_spec(a.shape) for a in in_arrays],
        out_specs=(_full_spec((B, D)), _full_spec((B, C))),
        compiler_params=pltpu.CompilerParams(
            dimension_semantics=("arbitrary",)),
    )(*in_arrays)
    return hs, logits


# ---------------------------------------------------------------------------
# Deterministic parameter init (matches PyTorch module shapes/semantics)
# ---------------------------------------------------------------------------
def init_params(key, n_vocab, w_dim, n_classes):
    D = w_dim
    H = D // 2
    ks = iter(jax.random.split(key, 64))

    def uniform(k, shape, bound):
        return jax.random.uniform(k, shape, jnp.float32, -bound, bound)

    # nn.Embedding default init: N(0, 1)
    emb = jax.random.normal(next(ks), (n_vocab, D), jnp.float32)

    # nn.GRU: 2 layers x 2 directions.  PyTorch stores weight_ih as (3H, in) with rows
    # ordered [r; z; n], init U(-1/sqrt(H), 1/sqrt(H)).  Both layers have input size D
    # (layer 1 consumes the 2H = D concat of layer-0 outputs).  We pre-transpose and
    # pre-split per gate so the kernel never has to slice along the lane axis.
    gbound = 1.0 / math.sqrt(H)
    wih_r, wih_z, wih_n = [], [], []
    whh_r, whh_z, whh_n = [], [], []
    bih_r, bih_z, bih_n = [], [], []
    bhh_r, bhh_z, bhh_n = [], [], []
    for _cell in range(4):                      # order: [l0_fwd, l0_bwd, l1_fwd, l1_bwd]
        w_ih = uniform(next(ks), (3 * H, D), gbound)
        w_hh = uniform(next(ks), (3 * H, H), gbound)
        b_ih = uniform(next(ks), (3 * H,), gbound)
        b_hh = uniform(next(ks), (3 * H,), gbound)
        w_ih_t, w_hh_t = w_ih.T, w_hh.T         # (D, 3H), (H, 3H), cols [r | z | n]
        wih_r.append(w_ih_t[:, 0:H]); wih_z.append(w_ih_t[:, H:2 * H]); wih_n.append(w_ih_t[:, 2 * H:])
        whh_r.append(w_hh_t[:, 0:H]); whh_z.append(w_hh_t[:, H:2 * H]); whh_n.append(w_hh_t[:, 2 * H:])
        bih_r.append(b_ih[0:H][None, :]); bih_z.append(b_ih[H:2 * H][None, :]); bih_n.append(b_ih[2 * H:][None, :])
        bhh_r.append(b_hh[0:H][None, :]); bhh_z.append(b_hh[H:2 * H][None, :]); bhh_n.append(b_hh[2 * H:][None, :])

    stack = lambda lst: jnp.stack(lst, axis=0)

    # attention: Linear(D, D, bias=False) -> Tanh -> Linear(D, 1, bias=False)
    abound = 1.0 / math.sqrt(D)
    wa1 = uniform(next(ks), (D, D), abound).T            # stored (in, out): kernel does x @ wa1
    wa2 = uniform(next(ks), (1, D), abound).T            # (D, 1)
    # classifier: Linear(D, n_classes, bias=False), stored transposed as (D, C)
    wcls = uniform(next(ks), (n_classes, D), abound).T

    return {
        "emb": emb,
        "wih_r": stack(wih_r), "wih_z": stack(wih_z), "wih_n": stack(wih_n),
        "whh_r": stack(whh_r), "whh_z": stack(whh_z), "whh_n": stack(whh_n),
        "bih_r": stack(bih_r), "bih_z": stack(bih_z), "bih_n": stack(bih_n),
        "bhh_r": stack(bhh_r), "bhh_z": stack(bhh_z), "bhh_n": stack(bhh_n),
        "wa1": wa1, "wa2": wa2, "wcls": wcls,
    }


# ---------------------------------------------------------------------------
if __name__ == "__main__":
    key = jax.random.PRNGKey(0)
    pkey, xkey = jax.random.split(key)

    N_VOCAB, W_DIM, N_CLASSES = 100, 32, 7     # w_dim=32 -> GRU hidden = 16 per direction
    B, T = 2, 8

    params = init_params(pkey, N_VOCAB, W_DIM, N_CLASSES)
    xs = jax.random.randint(xkey, (B, T), 0, N_VOCAB, dtype=jnp.int32)

    hs, logits = ohsumed_gru_forward(params, xs)
    jax.block_until_ready((hs, logits))

    assert hs.shape == (B, W_DIM), hs.shape
    assert logits.shape == (B, N_CLASSES), logits.shape
    assert bool(jnp.isfinite(hs).all()) and bool(jnp.isfinite(logits).all())
    print("KERNEL_OK")
</pallas_src>

<mosaic_0001>
module attributes {stable_mosaic.version = 11 : i64} {
  func.func @_ohsumed_gru_kernel(%arg0: i32, %arg1: memref<8x2x1xi32, #tpu.memory_space<vmem>>, %arg2: memref<100x32xf32, #tpu.memory_space<vmem>>, %arg3: memref<4x32x16xf32, #tpu.memory_space<vmem>>, %arg4: memref<4x32x16xf32, #tpu.memory_space<vmem>>, %arg5: memref<4x32x16xf32, #tpu.memory_space<vmem>>, %arg6: memref<4x16x16xf32, #tpu.memory_space<vmem>>, %arg7: memref<4x16x16xf32, #tpu.memory_space<vmem>>, %arg8: memref<4x16x16xf32, #tpu.memory_space<vmem>>, %arg9: memref<4x1x16xf32, #tpu.memory_space<vmem>>, %arg10: memref<4x1x16xf32, #tpu.memory_space<vmem>>, %arg11: memref<4x1x16xf32, #tpu.memory_space<vmem>>, %arg12: memref<4x1x16xf32, #tpu.memory_space<vmem>>, %arg13: memref<4x1x16xf32, #tpu.memory_space<vmem>>, %arg14: memref<4x1x16xf32, #tpu.memory_space<vmem>>, %arg15: memref<32x32xf32, #tpu.memory_space<vmem>>, %arg16: memref<32x1xf32, #tpu.memory_space<vmem>>, %arg17: memref<32x7xf32, #tpu.memory_space<vmem>>, %arg18: memref<2x32xf32, #tpu.memory_space<vmem>>, %arg19: memref<2x7xf32, #tpu.memory_space<vmem>>) attributes {dimension_semantics = [#tpu.dimension_semantics<arbitrary>], iteration_bounds = array<i64: 1>, scalar_prefetch = 0 : i64, scratch_operands = 0 : i64, tpu.core_type = #tpu.core_type<tc>, window_params = [{pipeline_mode = #tpu.pipeline_mode<synchronous>, transform_indices = @transform_0, window_bounds = array<i64: 8, 2, 1>}, {pipeline_mode = #tpu.pipeline_mode<synchronous>, transform_indices = @transform_1, window_bounds = array<i64: 100, 32>}, {pipeline_mode = #tpu.pipeline_mode<synchronous>, transform_indices = @transform_2, window_bounds = array<i64: 4, 32, 16>}, {pipeline_mode = #tpu.pipeline_mode<synchronous>, transform_indices = @transform_3, window_bounds = array<i64: 4, 32, 16>}, {pipeline_mode = #tpu.pipeline_mode<synchronous>, transform_indices = @transform_4, window_bounds = array<i64: 4, 32, 16>}, {pipeline_mode = #tpu.pipeline_mode<synchronous>, transform_indices = @transform_5, window_bounds = array<i64: 4, 16, 16>}, {pipeline_mode = #tpu.pipeline_mode<synchronous>, transform_indices = @transform_6, window_bounds = array<i64: 4, 16, 16>}, {pipeline_mode = #tpu.pipeline_mode<synchronous>, transform_indices = @transform_7, window_bounds = array<i64: 4, 16, 16>}, {pipeline_mode = #tpu.pipeline_mode<synchronous>, transform_indices = @transform_8, window_bounds = array<i64: 4, 1, 16>}, {pipeline_mode = #tpu.pipeline_mode<synchronous>, transform_indices = @transform_9, window_bounds = array<i64: 4, 1, 16>}, {pipeline_mode = #tpu.pipeline_mode<synchronous>, transform_indices = @transform_10, window_bounds = array<i64: 4, 1, 16>}, {pipeline_mode = #tpu.pipeline_mode<synchronous>, transform_indices = @transform_11, window_bounds = array<i64: 4, 1, 16>}, {pipeline_mode = #tpu.pipeline_mode<synchronous>, transform_indices = @transform_12, window_bounds = array<i64: 4, 1, 16>}, {pipeline_mode = #tpu.pipeline_mode<synchronous>, transform_indices = @transform_13, window_bounds = array<i64: 4, 1, 16>}, {pipeline_mode = #tpu.pipeline_mode<synchronous>, transform_indices = @transform_14, window_bounds = array<i64: 32, 32>}, {pipeline_mode = #tpu.pipeline_mode<synchronous>, transform_indices = @transform_15, window_bounds = array<i64: 32, 1>}, {pipeline_mode = #tpu.pipeline_mode<synchronous>, transform_indices = @transform_16, window_bounds = array<i64: 32, 7>}, {pipeline_mode = #tpu.pipeline_mode<synchronous>, transform_indices = @transform_17, window_bounds = array<i64: 2, 32>}, {pipeline_mode = #tpu.pipeline_mode<synchronous>, transform_indices = @transform_18, window_bounds = array<i64: 2, 7>}]} {
    %c0 = arith.constant 0 : index
    %c0_0 = arith.constant 0 : index
    %0 = vector.load %arg2[%c0, %c0_0] : memref<100x32xf32, #tpu.memory_space<vmem>>, vector<100x32xf32>
    %1 = tpu.iota {dimensions = array<i32: 1>} : vector<2x100xi32>
    %c0_1 = arith.constant 0 : index
    %c0_2 = arith.constant 0 : index
    %c0_3 = arith.constant 0 : index
    %2 = vector.load %arg1[%c0_1, %c0_2, %c0_3] : memref<8x2x1xi32, #tpu.memory_space<vmem>>, vector<1x2x1xi32>
    %3 = vector.shape_cast %2 : vector<1x2x1xi32> to vector<2x1xi32>
    %4 = vector.broadcast %3 : vector<2x1xi32> to vector<2x100xi32>
    %5 = arith.cmpi eq, %4, %1 : vector<2x100xi32>
    %6 = arith.extui %5 : vector<2x100xi1> to vector<2x100xi32>
    %7 = arith.sitofp %6 : vector<2x100xi32> to vector<2x100xf32>
    %cst = arith.constant dense<0.000000e+00> : vector<2x32xf32>
    %8 = tpu.matmul %7, %0, %cst {dimension_numbers = #tpu.dot_dimension_numbers<[1], [0], [0], [1], [0, 0, 1, 1], [], []>} : vector<2x100xf32>, vector<100x32xf32>, vector<2x32xf32> -> vector<2x32xf32>
    %c1 = arith.constant 1 : index
    %c0_4 = arith.constant 0 : index
    %c0_5 = arith.constant 0 : index
    %9 = vector.load %arg1[%c1, %c0_4, %c0_5] : memref<8x2x1xi32, #tpu.memory_space<vmem>>, vector<1x2x1xi32>
    %10 = vector.shape_cast %9 : vector<1x2x1xi32> to vector<2x1xi32>
    %11 = vector.broadcast %10 : vector<2x1xi32> to vector<2x100xi32>
    %12 = arith.cmpi eq, %11, %1 : vector<2x100xi32>
    %13 = arith.extui %12 : vector<2x100xi1> to vector<2x100xi32>
    %14 = arith.sitofp %13 : vector<2x100xi32> to vector<2x100xf32>
    %cst_6 = arith.constant dense<0.000000e+00> : vector<2x32xf32>
    %15 = tpu.matmul %14, %0, %cst_6 {dimension_numbers = #tpu.dot_dimension_numbers<[1], [0], [0], [1], [0, 0, 1, 1], [], []>} : vector<2x100xf32>, vector<100x32xf32>, vector<2x32xf32> -> vector<2x32xf32>
    %c2 = arith.constant 2 : index
    %c0_7 = arith.constant 0 : index
    %c0_8 = arith.constant 0 : index
    %16 = vector.load %arg1[%c2, %c0_7, %c0_8] : memref<8x2x1xi32, #tpu.memory_space<vmem>>, vector<1x2x1xi32>
    %17 = vector.shape_cast %16 : vector<1x2x1xi32> to vector<2x1xi32>
    %18 = vector.broadcast %17 : vector<2x1xi32> to vector<2x100xi32>
    %19 = arith.cmpi eq, %18, %1 : vector<2x100xi32>
    %20 = arith.extui %19 : vector<2x100xi1> to vector<2x100xi32>
    %21 = arith.sitofp %20 : vector<2x100xi32> to vector<2x100xf32>
    %cst_9 = arith.constant dense<0.000000e+00> : vector<2x32xf32>
    %22 = tpu.matmul %21, %0, %cst_9 {dimension_numbers = #tpu.dot_dimension_numbers<[1], [0], [0], [1], [0, 0, 1, 1], [], []>} : vector<2x100xf32>, vector<100x32xf32>, vector<2x32xf32> -> vector<2x32xf32>
    %c3 = arith.constant 3 : index
    %c0_10 = arith.constant 0 : index
    %c0_11 = arith.constant 0 : index
    %23 = vector.load %arg1[%c3, %c0_10, %c0_11] : memref<8x2x1xi32, #tpu.memory_space<vmem>>, vector<1x2x1xi32>
    %24 = vector.shape_cast %23 : vector<1x2x1xi32> to vector<2x1xi32>
    %25 = vector.broadcast %24 : vector<2x1xi32> to vector<2x100xi32>
    %26 = arith.cmpi eq, %25, %1 : vector<2x100xi32>
    %27 = arith.extui %26 : vector<2x100xi1> to vector<2x100xi32>
    %28 = arith.sitofp %27 : vector<2x100xi32> to vector<2x100xf32>
    %cst_12 = arith.constant dense<0.000000e+00> : vector<2x32xf32>
    %29 = tpu.matmul %28, %0, %cst_12 {dimension_numbers = #tpu.dot_dimension_numbers<[1], [0], [0], [1], [0, 0, 1, 1], [], []>} : vector<2x100xf32>, vector<100x32xf32>, vector<2x32xf32> -> vector<2x32xf32>
    %c4 = arith.constant 4 : index
    %c0_13 = arith.constant 0 : index
    %c0_14 = arith.constant 0 : index
    %30 = vector.load %arg1[%c4, %c0_13, %c0_14] : memref<8x2x1xi32, #tpu.memory_space<vmem>>, vector<1x2x1xi32>
    %31 = vector.shape_cast %30 : vector<1x2x1xi32> to vector<2x1xi32>
    %32 = vector.broadcast %31 : vector<2x1xi32> to vector<2x100xi32>
    %33 = arith.cmpi eq, %32, %1 : vector<2x100xi32>
    %34 = arith.extui %33 : vector<2x100xi1> to vector<2x100xi32>
    %35 = arith.sitofp %34 : vector<2x100xi32> to vector<2x100xf32>
    %cst_15 = arith.constant dense<0.000000e+00> : vector<2x32xf32>
    %36 = tpu.matmul %35, %0, %cst_15 {dimension_numbers = #tpu.dot_dimension_numbers<[1], [0], [0], [1], [0, 0, 1, 1], [], []>} : vector<2x100xf32>, vector<100x32xf32>, vector<2x32xf32> -> vector<2x32xf32>
    %c5 = arith.constant 5 : index
    %c0_16 = arith.constant 0 : index
    %c0_17 = arith.constant 0 : index
    %37 = vector.load %arg1[%c5, %c0_16, %c0_17] : memref<8x2x1xi32, #tpu.memory_space<vmem>>, vector<1x2x1xi32>
    %38 = vector.shape_cast %37 : vector<1x2x1xi32> to vector<2x1xi32>
    %39 = vector.broadcast %38 : vector<2x1xi32> to vector<2x100xi32>
    %40 = arith.cmpi eq, %39, %1 : vector<2x100xi32>
    %41 = arith.extui %40 : vector<2x100xi1> to vector<2x100xi32>
    %42 = arith.sitofp %41 : vector<2x100xi32> to vector<2x100xf32>
    %cst_18 = arith.constant dense<0.000000e+00> : vector<2x32xf32>
    %43 = tpu.matmul %42, %0, %cst_18 {dimension_numbers = #tpu.dot_dimension_numbers<[1], [0], [0], [1], [0, 0, 1, 1], [], []>} : vector<2x100xf32>, vector<100x32xf32>, vector<2x32xf32> -> vector<2x32xf32>
    %c6 = arith.constant 6 : index
    %c0_19 = arith.constant 0 : index
    %c0_20 = arith.constant 0 : index
    %44 = vector.load %arg1[%c6, %c0_19, %c0_20] : memref<8x2x1xi32, #tpu.memory_space<vmem>>, vector<1x2x1xi32>
    %45 = vector.shape_cast %44 : vector<1x2x1xi32> to vector<2x1xi32>
    %46 = vector.broadcast %45 : vector<2x1xi32> to vector<2x100xi32>
    %47 = arith.cmpi eq, %46, %1 : vector<2x100xi32>
    %48 = arith.extui %47 : vector<2x100xi1> to vector<2x100xi32>
    %49 = arith.sitofp %48 : vector<2x100xi32> to vector<2x100xf32>
    %cst_21 = arith.constant dense<0.000000e+00> : vector<2x32xf32>
    %50 = tpu.matmul %49, %0, %cst_21 {dimension_numbers = #tpu.dot_dimension_numbers<[1], [0], [0], [1], [0, 0, 1, 1], [], []>} : vector<2x100xf32>, vector<100x32xf32>, vector<2x32xf32> -> vector<2x32xf32>
    %c7 = arith.constant 7 : index
    %c0_22 = arith.constant 0 : index
    %c0_23 = arith.constant 0 : index
    %51 = vector.load %arg1[%c7, %c0_22, %c0_23] : memref<8x2x1xi32, #tpu.memory_space<vmem>>, vector<1x2x1xi32>
    %52 = vector.shape_cast %51 : vector<1x2x1xi32> to vector<2x1xi32>
    %53 = vector.broadcast %52 : vector<2x1xi32> to vector<2x100xi32>
    %54 = arith.cmpi eq, %53, %1 : vector<2x100xi32>
    %55 = arith.extui %54 : vector<2x100xi1> to vector<2x100xi32>
    %56 = arith.sitofp %55 : vector<2x100xi32> to vector<2x100xf32>
    %cst_24 = arith.constant dense<0.000000e+00> : vector<2x32xf32>
    %57 = tpu.matmul %56, %0, %cst_24 {dimension_numbers = #tpu.dot_dimension_numbers<[1], [0], [0], [1], [0, 0, 1, 1], [], []>} : vector<2x100xf32>, vector<100x32xf32>, vector<2x32xf32> -> vector<2x32xf32>
    %c0_25 = arith.constant 0 : index
    %c0_26 = arith.constant 0 : index
    %c0_27 = arith.constant 0 : index
    %58 = vector.load %arg3[%c0_25, %c0_26, %c0_27] : memref<4x32x16xf32, #tpu.memory_space<vmem>>, vector<1x32x16xf32>
    %59 = vector.shape_cast %58 : vector<1x32x16xf32> to vector<32x16xf32>
    %c0_28 = arith.constant 0 : index
    %c0_29 = arith.constant 0 : index
    %c0_30 = arith.constant 0 : index
    %60 = vector.load %arg4[%c0_28, %c0_29, %c0_30] : memref<4x32x16xf32, #tpu.memory_space<vmem>>, vector<1x32x16xf32>
    %61 = vector.shape_cast %60 : vector<1x32x16xf32> to vector<32x16xf32>
    %c0_31 = arith.constant 0 : index
    %c0_32 = arith.constant 0 : index
    %c0_33 = arith.constant 0 : index
    %62 = vector.load %arg5[%c0_31, %c0_32, %c0_33] : memref<4x32x16xf32, #tpu.memory_space<vmem>>, vector<1x32x16xf32>
    %63 = vector.shape_cast %62 : vector<1x32x16xf32> to vector<32x16xf32>
    %c0_34 = arith.constant 0 : index
    %c0_35 = arith.constant 0 : index
    %c0_36 = arith.constant 0 : index
    %64 = vector.load %arg6[%c0_34, %c0_35, %c0_36] : memref<4x16x16xf32, #tpu.memory_space<vmem>>, vector<1x16x16xf32>
    %65 = vector.shape_cast %64 : vector<1x16x16xf32> to vector<16x16xf32>
    %c0_37 = arith.constant 0 : index
    %c0_38 = arith.constant 0 : index
    %c0_39 = arith.constant 0 : index
    %66 = vector.load %arg7[%c0_37, %c0_38, %c0_39] : memref<4x16x16xf32, #tpu.memory_space<vmem>>, vector<1x16x16xf32>
    %67 = vector.shape_cast %66 : vector<1x16x16xf32> to vector<16x16xf32>
    %c0_40 = arith.constant 0 : index
    %c0_41 = arith.constant 0 : index
    %c0_42 = arith.constant 0 : index
    %68 = vector.load %arg8[%c0_40, %c0_41, %c0_42] : memref<4x16x16xf32, #tpu.memory_space<vmem>>, vector<1x16x16xf32>
    %69 = vector.shape_cast %68 : vector<1x16x16xf32> to vector<16x16xf32>
    %c0_43 = arith.constant 0 : index
    %c0_44 = arith.constant 0 : index
    %c0_45 = arith.constant 0 : index
    %70 = vector.load %arg9[%c0_43, %c0_44, %c0_45] : memref<4x1x16xf32, #tpu.memory_space<vmem>>, vector<1x1x16xf32>
    %71 = vector.shape_cast %70 : vector<1x1x16xf32> to vector<1x16xf32>
    %c0_46 = arith.constant 0 : index
    %c0_47 = arith.constant 0 : index
    %c0_48 = arith.constant 0 : index
    %72 = vector.load %arg10[%c0_46, %c0_47, %c0_48] : memref<4x1x16xf32, #tpu.memory_space<vmem>>, vector<1x1x16xf32>
    %73 = vector.shape_cast %72 : vector<1x1x16xf32> to vector<1x16xf32>
    %c0_49 = arith.constant 0 : index
    %c0_50 = arith.constant 0 : index
    %c0_51 = arith.constant 0 : index
    %74 = vector.load %arg11[%c0_49, %c0_50, %c0_51] : memref<4x1x16xf32, #tpu.memory_space<vmem>>, vector<1x1x16xf32>
    %75 = vector.shape_cast %74 : vector<1x1x16xf32> to vector<1x16xf32>
    %c0_52 = arith.constant 0 : index
    %c0_53 = arith.constant 0 : index
    %c0_54 = arith.constant 0 : index
    %76 = vector.load %arg12[%c0_52, %c0_53, %c0_54] : memref<4x1x16xf32, #tpu.memory_space<vmem>>, vector<1x1x16xf32>
    %77 = vector.shape_cast %76 : vector<1x1x16xf32> to vector<1x16xf32>
    %c0_55 = arith.constant 0 : index
    %c0_56 = arith.constant 0 : index
    %c0_57 = arith.constant 0 : index
    %78 = vector.load %arg13[%c0_55, %c0_56, %c0_57] : memref<4x1x16xf32, #tpu.memory_space<vmem>>, vector<1x1x16xf32>
    %79 = vector.shape_cast %78 : vector<1x1x16xf32> to vector<1x16xf32>
    %c0_58 = arith.constant 0 : index
    %c0_59 = arith.constant 0 : index
    %c0_60 = arith.constant 0 : index
    %80 = vector.load %arg14[%c0_58, %c0_59, %c0_60] : memref<4x1x16xf32, #tpu.memory_space<vmem>>, vector<1x1x16xf32>
    %81 = vector.shape_cast %80 : vector<1x1x16xf32> to vector<1x16xf32>
    %cst_61 = arith.constant 0.000000e+00 : f32
    %82 = vector.broadcast %cst_61 : f32 to vector<2x16xf32>
    %cst_62 = arith.constant dense<0.000000e+00> : vector<2x16xf32>
    %83 = tpu.matmul %8, %59, %cst_62 {dimension_numbers = #tpu.dot_dimension_numbers<[1], [0], [0], [1], [0, 0, 1, 1], [], []>} : vector<2x32xf32>, vector<32x16xf32>, vector<2x16xf32> -> vector<2x16xf32>
    %84 = vector.broadcast %71 : vector<1x16xf32> to vector<2x16xf32>
    %85 = arith.addf %83, %84 : vector<2x16xf32>
    %cst_63 = arith.constant dense<0.000000e+00> : vector<2x16xf32>
    %86 = tpu.matmul %82, %65, %cst_63 {dimension_numbers = #tpu.dot_dimension_numbers<[1], [0], [0], [1], [0, 0, 1, 1], [], []>} : vector<2x16xf32>, vector<16x16xf32>, vector<2x16xf32> -> vector<2x16xf32>
    %87 = arith.addf %85, %86 : vector<2x16xf32>
    %88 = vector.broadcast %77 : vector<1x16xf32> to vector<2x16xf32>
    %89 = arith.addf %87, %88 : vector<2x16xf32>
    %cst_64 = arith.constant 0.000000e+00 : f32
    %90 = vector.broadcast %cst_64 : f32 to vector<2x16xf32>
    %91 = arith.subf %90, %89 : vector<2x16xf32>
    %92 = math.exp %91 : vector<2x16xf32>
    %cst_65 = arith.constant 1.000000e+00 : f32
    %93 = vector.broadcast %cst_65 : f32 to vector<2x16xf32>
    %94 = arith.addf %93, %92 : vector<2x16xf32>
    %cst_66 = arith.constant 1.000000e+00 : f32
    %95 = vector.broadcast %cst_66 : f32 to vector<2x16xf32>
    %96 = arith.divf %95, %94 : vector<2x16xf32>
    %cst_67 = arith.constant dense<0.000000e+00> : vector<2x16xf32>
    %97 = tpu.matmul %8, %61, %cst_67 {dimension_numbers = #tpu.dot_dimension_numbers<[1], [0], [0], [1], [0, 0, 1, 1], [], []>} : vector<2x32xf32>, vector<32x16xf32>, vector<2x16xf32> -> vector<2x16xf32>
    %98 = vector.broadcast %73 : vector<1x16xf32> to vector<2x16xf32>
    %99 = arith.addf %97, %98 : vector<2x16xf32>
    %cst_68 = arith.constant dense<0.000000e+00> : vector<2x16xf32>
    %100 = tpu.matmul %82, %67, %cst_68 {dimension_numbers = #tpu.dot_dimension_numbers<[1], [0], [0], [1], [0, 0, 1, 1], [], []>} : vector<2x16xf32>, vector<16x16xf32>, vector<2x16xf32> -> vector<2x16xf32>
    %101 = arith.addf %99, %100 : vector<2x16xf32>
    %102 = vector.broadcast %79 : vector<1x16xf32> to vector<2x16xf32>
    %103 = arith.addf %101, %102 : vector<2x16xf32>
    %cst_69 = arith.constant 0.000000e+00 : f32
    %104 = vector.broadcast %cst_69 : f32 to vector<2x16xf32>
    %105 = arith.subf %104, %103 : vector<2x16xf32>
    %106 = math.exp %105 : vector<2x16xf32>
    %cst_70 = arith.constant 1.000000e+00 : f32
    %107 = vector.broadcast %cst_70 : f32 to vector<2x16xf32>
    %108 = arith.addf %107, %106 : vector<2x16xf32>
    %cst_71 = arith.constant 1.000000e+00 : f32
    %109 = vector.broadcast %cst_71 : f32 to vector<2x16xf32>
    %110 = arith.divf %109, %108 : vector<2x16xf32>
    %cst_72 = arith.constant dense<0.000000e+00> : vector<2x16xf32>
    %111 = tpu.matmul %8, %63, %cst_72 {dimension_numbers = #tpu.dot_dimension_numbers<[1], [0], [0], [1], [0, 0, 1, 1], [], []>} : vector<2x32xf32>, vector<32x16xf32>, vector<2x16xf32> -> vector<2x16xf32>
    %112 = vector.broadcast %75 : vector<1x16xf32> to vector<2x16xf32>
    %113 = arith.addf %111, %112 : vector<2x16xf32>
    %cst_73 = arith.constant dense<0.000000e+00> : vector<2x16xf32>
    %114 = tpu.matmul %82, %69, %cst_73 {dimension_numbers = #tpu.dot_dimension_numbers<[1], [0], [0], [1], [0, 0, 1, 1], [], []>} : vector<2x16xf32>, vector<16x16xf32>, vector<2x16xf32> -> vector<2x16xf32>
    %115 = vector.broadcast %81 : vector<1x16xf32> to vector<2x16xf32>
    %116 = arith.addf %114, %115 : vector<2x16xf32>
    %117 = arith.mulf %96, %116 : vector<2x16xf32>
    %118 = arith.addf %113, %117 : vector<2x16xf32>
    %119 = math.tanh %118 : vector<2x16xf32>
    %cst_74 = arith.constant 1.000000e+00 : f32
    %120 = vector.broadcast %cst_74 : f32 to vector<2x16xf32>
    %121 = arith.subf %120, %110 : vector<2x16xf32>
    %122 = arith.mulf %121, %119 : vector<2x16xf32>
    %123 = arith.mulf %110, %82 : vector<2x16xf32>
    %124 = arith.addf %122, %123 : vector<2x16xf32>
    %cst_75 = arith.constant dense<0.000000e+00> : vector<2x16xf32>
    %125 = tpu.matmul %15, %59, %cst_75 {dimension_numbers = #tpu.dot_dimension_numbers<[1], [0], [0], [1], [0, 0, 1, 1], [], []>} : vector<2x32xf32>, vector<32x16xf32>, vector<2x16xf32> -> vector<2x16xf32>
    %126 = vector.broadcast %71 : vector<1x16xf32> to vector<2x16xf32>
    %127 = arith.addf %125, %126 : vector<2x16xf32>
    %cst_76 = arith.constant dense<0.000000e+00> : vector<2x16xf32>
    %128 = tpu.matmul %124, %65, %cst_76 {dimension_numbers = #tpu.dot_dimension_numbers<[1], [0], [0], [1], [0, 0, 1, 1], [], []>} : vector<2x16xf32>, vector<16x16xf32>, vector<2x16xf32> -> vector<2x16xf32>
    %129 = arith.addf %127, %128 : vector<2x16xf32>
    %130 = vector.broadcast %77 : vector<1x16xf32> to vector<2x16xf32>
    %131 = arith.addf %129, %130 : vector<2x16xf32>
    %cst_77 = arith.constant 0.000000e+00 : f32
    %132 = vector.broadcast %cst_77 : f32 to vector<2x16xf32>
    %133 = arith.subf %132, %131 : vector<2x16xf32>
    %134 = math.exp %133 : vector<2x16xf32>
    %cst_78 = arith.constant 1.000000e+00 : f32
    %135 = vector.broadcast %cst_78 : f32 to vector<2x16xf32>
    %136 = arith.addf %135, %134 : vector<2x16xf32>
    %cst_79 = arith.constant 1.000000e+00 : f32
    %137 = vector.broadcast %cst_79 : f32 to vector<2x16xf32>
    %138 = arith.divf %137, %136 : vector<2x16xf32>
    %cst_80 = arith.constant dense<0.000000e+00> : vector<2x16xf32>
    %139 = tpu.matmul %15, %61, %cst_80 {dimension_numbers = #tpu.dot_dimension_numbers<[1], [0], [0], [1], [0, 0, 1, 1], [], []>} : vector<2x32xf32>, vector<32x16xf32>, vector<2x16xf32> -> vector<2x16xf32>
    %140 = vector.broadcast %73 : vector<1x16xf32> to vector<2x16xf32>
    %141 = arith.addf %139, %140 : vector<2x16xf32>
    %cst_81 = arith.constant dense<0.000000e+00> : vector<2x16xf32>
    %142 = tpu.matmul %124, %67, %cst_81 {dimension_numbers = #tpu.dot_dimension_numbers<[1], [0], [0], [1], [0, 0, 1, 1], [], []>} : vector<2x16xf32>, vector<16x16xf32>, vector<2x16xf32> -> vector<2x16xf32>
    %143 = arith.addf %141, %142 : vector<2x16xf32>
    %144 = vector.broadcast %79 : vector<1x16xf32> to vector<2x16xf32>
    %145 = arith.addf %143, %144 : vector<2x16xf32>
    %cst_82 = arith.constant 0.000000e+00 : f32
    %146 = vector.broadcast %cst_82 : f32 to vector<2x16xf32>
    %147 = arith.subf %146, %145 : vector<2x16xf32>
    %148 = math.exp %147 : vector<2x16xf32>
    %cst_83 = arith.constant 1.000000e+00 : f32
    %149 = vector.broadcast %cst_83 : f32 to vector<2x16xf32>
    %150 = arith.addf %149, %148 : vector<2x16xf32>
    %cst_84 = arith.constant 1.000000e+00 : f32
    %151 = vector.broadcast %cst_84 : f32 to vector<2x16xf32>
    %152 = arith.divf %151, %150 : vector<2x16xf32>
    %cst_85 = arith.constant dense<0.000000e+00> : vector<2x16xf32>
    %153 = tpu.matmul %15, %63, %cst_85 {dimension_numbers = #tpu.dot_dimension_numbers<[1], [0], [0], [1], [0, 0, 1, 1], [], []>} : vector<2x32xf32>, vector<32x16xf32>, vector<2x16xf32> -> vector<2x16xf32>
    %154 = vector.broadcast %75 : vector<1x16xf32> to vector<2x16xf32>
    %155 = arith.addf %153, %154 : vector<2x16xf32>
    %cst_86 = arith.constant dense<0.000000e+00> : vector<2x16xf32>
    %156 = tpu.matmul %124, %69, %cst_86 {dimension_numbers = #tpu.dot_dimension_numbers<[1], [0], [0], [1], [0, 0, 1, 1], [], []>} : vector<2x16xf32>, vector<16x16xf32>, vector<2x16xf32> -> vector<2x16xf32>
    %157 = vector.broadcast %81 : vector<1x16xf32> to vector<2x16xf32>
    %158 = arith.addf %156, %157 : vector<2x16xf32>
    %159 = arith.mulf %138, %158 : vector<2x16xf32>
    %160 = arith.addf %155, %159 : vector<2x16xf32>
    %161 = math.tanh %160 : vector<2x16xf32>
    %cst_87 = arith.constant 1.000000e+00 : f32
    %162 = vector.broadcast %cst_87 : f32 to vector<2x16xf32>
    %163 = arith.subf %162, %152 : vector<2x16xf32>
    %164 = arith.mulf %163, %161 : vector<2x16xf32>
    %165 = arith.mulf %152, %124 : vector<2x16xf32>
    %166 = arith.addf %164, %165 : vector<2x16xf32>
    %cst_88 = arith.constant dense<0.000000e+00> : vector<2x16xf32>
    %167 = tpu.matmul %22, %59, %cst_88 {dimension_numbers = #tpu.dot_dimension_numbers<[1], [0], [0], [1], [0, 0, 1, 1], [], []>} : vector<2x32xf32>, vector<32x16xf32>, vector<2x16xf32> -> vector<2x16xf32>
    %168 = vector.broadcast %71 : vector<1x16xf32> to vector<2x16xf32>
    %169 = arith.addf %167, %168 : vector<2x16xf32>
    %cst_89 = arith.constant dense<0.000000e+00> : vector<2x16xf32>
    %170 = tpu.matmul %166, %65, %cst_89 {dimension_numbers = #tpu.dot_dimension_numbers<[1], [0], [0], [1], [0, 0, 1, 1], [], []>} : vector<2x16xf32>, vector<16x16xf32>, vector<2x16xf32> -> vector<2x16xf32>
    %171 = arith.addf %169, %170 : vector<2x16xf32>
    %172 = vector.broadcast %77 : vector<1x16xf32> to vector<2x16xf32>
    %173 = arith.addf %171, %172 : vector<2x16xf32>
    %cst_90 = arith.constant 0.000000e+00 : f32
    %174 = vector.broadcast %cst_90 : f32 to vector<2x16xf32>
    %175 = arith.subf %174, %173 : vector<2x16xf32>
    %176 = math.exp %175 : vector<2x16xf32>
    %cst_91 = arith.constant 1.000000e+00 : f32
    %177 = vector.broadcast %cst_91 : f32 to vector<2x16xf32>
    %178 = arith.addf %177, %176 : vector<2x16xf32>
    %cst_92 = arith.constant 1.000000e+00 : f32
    %179 = vector.broadcast %cst_92 : f32 to vector<2x16xf32>
    %180 = arith.divf %179, %178 : vector<2x16xf32>
    %cst_93 = arith.constant dense<0.000000e+00> : vector<2x16xf32>
    %181 = tpu.matmul %22, %61, %cst_93 {dimension_numbers = #tpu.dot_dimension_numbers<[1], [0], [0], [1], [0, 0, 1, 1], [], []>} : vector<2x32xf32>, vector<32x16xf32>, vector<2x16xf32> -> vector<2x16xf32>
    %182 = vector.broadcast %73 : vector<1x16xf32> to vector<2x16xf32>
    %183 = arith.addf %181, %182 : vector<2x16xf32>
    %cst_94 = arith.constant dense<0.000000e+00> : vector<2x16xf32>
    %184 = tpu.matmul %166, %67, %cst_94 {dimension_numbers = #tpu.dot_dimension_numbers<[1], [0], [0], [1], [0, 0, 1, 1], [], []>} : vector<2x16xf32>, vector<16x16xf32>, vector<2x16xf32> -> vector<2x16xf32>
    %185 = arith.addf %183, %184 : vector<2x16xf32>
    %186 = vector.broadcast %79 : vector<1x16xf32> to vector<2x16xf32>
    %187 = arith.addf %185, %186 : vector<2x16xf32>
    %cst_95 = arith.constant 0.000000e+00 : f32
    %188 = vector.broadcast %cst_95 : f32 to vector<2x16xf32>
    %189 = arith.subf %188, %187 : vector<2x16xf32>
    %190 = math.exp %189 : vector<2x16xf32>
    %cst_96 = arith.constant 1.000000e+00 : f32
    %191 = vector.broadcast %cst_96 : f32 to vector<2x16xf32>
    %192 = arith.addf %191, %190 : vector<2x16xf32>
    %cst_97 = arith.constant 1.000000e+00 : f32
    %193 = vector.broadcast %cst_97 : f32 to vector<2x16xf32>
    %194 = arith.divf %193, %192 : vector<2x16xf32>
    %cst_98 = arith.constant dense<0.000000e+00> : vector<2x16xf32>
    %195 = tpu.matmul %22, %63, %cst_98 {dimension_numbers = #tpu.dot_dimension_numbers<[1], [0], [0], [1], [0, 0, 1, 1], [], []>} : vector<2x32xf32>, vector<32x16xf32>, vector<2x16xf32> -> vector<2x16xf32>
    %196 = vector.broadcast %75 : vector<1x16xf32> to vector<2x16xf32>
    %197 = arith.addf %195, %196 : vector<2x16xf32>
    %cst_99 = arith.constant dense<0.000000e+00> : vector<2x16xf32>
    %198 = tpu.matmul %166, %69, %cst_99 {dimension_numbers = #tpu.dot_dimension_numbers<[1], [0], [0], [1], [0, 0, 1, 1], [], []>} : vector<2x16xf32>, vector<16x16xf32>, vector<2x16xf32> -> vector<2x16xf32>
    %199 = vector.broadcast %81 : vector<1x16xf32> to vector<2x16xf32>
    %200 = arith.addf %198, %199 : vector<2x16xf32>
    %201 = arith.mulf %180, %200 : vector<2x16xf32>
    %202 = arith.addf %197, %201 : vector<2x16xf32>
    %203 = math.tanh %202 : vector<2x16xf32>
    %cst_100 = arith.constant 1.000000e+00 : f32
    %204 = vector.broadcast %cst_100 : f32 to vector<2x16xf32>
    %205 = arith.subf %204, %194 : vector<2x16xf32>
    %206 = arith.mulf %205, %203 : vector<2x16xf32>
    %207 = arith.mulf %194, %166 : vector<2x16xf32>
    %208 = arith.addf %206, %207 : vector<2x16xf32>
    %cst_101 = arith.constant dense<0.000000e+00> : vector<2x16xf32>
    %209 = tpu.matmul %29, %59, %cst_101 {dimension_numbers = #tpu.dot_dimension_numbers<[1], [0], [0], [1], [0, 0, 1, 1], [], []>} : vector<2x32xf32>, vector<32x16xf32>, vector<2x16xf32> -> vector<2x16xf32>
    %210 = vector.broadcast %71 : vector<1x16xf32> to vector<2x16xf32>
    %211 = arith.addf %209, %210 : vector<2x16xf32>
    %cst_102 = arith.constant dense<0.000000e+00> : vector<2x16xf32>
    %212 = tpu.matmul %208, %65, %cst_102 {dimension_numbers = #tpu.dot_dimension_numbers<[1], [0], [0], [1], [0, 0, 1, 1], [], []>} : vector<2x16xf32>, vector<16x16xf32>, vector<2x16xf32> -> vector<2x16xf32>
    %213 = arith.addf %211, %212 : vector<2x16xf32>
    %214 = vector.broadcast %77 : vector<1x16xf32> to vector<2x16xf32>
    %215 = arith.addf %213, %214 : vector<2x16xf32>
    %cst_103 = arith.constant 0.000000e+00 : f32
    %216 = vector.broadcast %cst_103 : f32 to vector<2x16xf32>
    %217 = arith.subf %216, %215 : vector<2x16xf32>
    %218 = math.exp %217 : vector<2x16xf32>
    %cst_104 = arith.constant 1.000000e+00 : f32
    %219 = vector.broadcast %cst_104 : f32 to vector<2x16xf32>
    %220 = arith.addf %219, %218 : vector<2x16xf32>
    %cst_105 = arith.constant 1.000000e+00 : f32
    %221 = vector.broadcast %cst_105 : f32 to vector<2x16xf32>
    %222 = arith.divf %221, %220 : vector<2x16xf32>
    %cst_106 = arith.constant dense<0.000000e+00> : vector<2x16xf32>
    %223 = tpu.matmul %29, %61, %cst_106 {dimension_numbers = #tpu.dot_dimension_numbers<[1], [0], [0], [1], [0, 0, 1, 1], [], []>} : vector<2x32xf32>, vector<32x16xf32>, vector<2x16xf32> -> vector<2x16xf32>
    %224 = vector.broadcast %73 : vector<1x16xf32> to vector<2x16xf32>
    %225 = arith.addf %223, %224 : vector<2x16xf32>
    %cst_107 = arith.constant dense<0.000000e+00> : vector<2x16xf32>
    %226 = tpu.matmul %208, %67, %cst_107 {dimension_numbers = #tpu.dot_dimension_numbers<[1], [0], [0], [1], [0, 0, 1, 1], [], []>} : vector<2x16xf32>, vector<16x16xf32>, vector<2x16xf32> -> vector<2x16xf32>
    %227 = arith.addf %225, %226 : vector<2x16xf32>
    %228 = vector.broadcast %79 : vector<1x16xf32> to vector<2x16xf32>
    %229 = arith.addf %227, %228 : vector<2x16xf32>
    %cst_108 = arith.constant 0.000000e+00 : f32
    %230 = vector.broadcast %cst_108 : f32 to vector<2x16xf32>
    %231 = arith.subf %230, %229 : vector<2x16xf32>
    %232 = math.exp %231 : vector<2x16xf32>
    %cst_109 = arith.constant 1.000000e+00 : f32
    %233 = vector.broadcast %cst_109 : f32 to vector<2x16xf32>
    %234 = arith.addf %233, %232 : vector<2x16xf32>
    %cst_110 = arith.constant 1.000000e+00 : f32
    %235 = vector.broadcast %cst_110 : f32 to vector<2x16xf32>
    %236 = arith.divf %235, %234 : vector<2x16xf32>
    %cst_111 = arith.constant dense<0.000000e+00> : vector<2x16xf32>
    %237 = tpu.matmul %29, %63, %cst_111 {dimension_numbers = #tpu.dot_dimension_numbers<[1], [0], [0], [1], [0, 0, 1, 1], [], []>} : vector<2x32xf32>, vector<32x16xf32>, vector<2x16xf32> -> vector<2x16xf32>
    %238 = vector.broadcast %75 : vector<1x16xf32> to vector<2x16xf32>
    %239 = arith.addf %237, %238 : vector<2x16xf32>
    %cst_112 = arith.constant dense<0.000000e+00> : vector<2x16xf32>
    %240 = tpu.matmul %208, %69, %cst_112 {dimension_numbers = #tpu.dot_dimension_numbers<[1], [0], [0], [1], [0, 0, 1, 1], [], []>} : vector<2x16xf32>, vector<16x16xf32>, vector<2x16xf32> -> vector<2x16xf32>
    %241 = vector.broadcast %81 : vector<1x16xf32> to vector<2x16xf32>
    %242 = arith.addf %240, %241 : vector<2x16xf32>
    %243 = arith.mulf %222, %242 : vector<2x16xf32>
    %244 = arith.addf %239, %243 : vector<2x16xf32>
    %245 = math.tanh %244 : vector<2x16xf32>
    %cst_113 = arith.constant 1.000000e+00 : f32
    %246 = vector.broadcast %cst_113 : f32 to vector<2x16xf32>
    %247 = arith.subf %246, %236 : vector<2x16xf32>
    %248 = arith.mulf %247, %245 : vector<2x16xf32>
    %249 = arith.mulf %236, %208 : vector<2x16xf32>
    %250 = arith.addf %248, %249 : vector<2x16xf32>
    %cst_114 = arith.constant dense<0.000000e+00> : vector<2x16xf32>
    %251 = tpu.matmul %36, %59, %cst_114 {dimension_numbers = #tpu.dot_dimension_numbers<[1], [0], [0], [1], [0, 0, 1, 1], [], []>} : vector<2x32xf32>, vector<32x16xf32>, vector<2x16xf32> -> vector<2x16xf32>
    %252 = vector.broadcast %71 : vector<1x16xf32> to vector<2x16xf32>
    %253 = arith.addf %251, %252 : vector<2x16xf32>
    %cst_115 = arith.constant dense<0.000000e+00> : vector<2x16xf32>
    %254 = tpu.matmul %250, %65, %cst_115 {dimension_numbers = #tpu.dot_dimension_numbers<[1], [0], [0], [1], [0, 0, 1, 1], [], []>} : vector<2x16xf32>, vector<16x16xf32>, vector<2x16xf32> -> vector<2x16xf32>
    %255 = arith.addf %253, %254 : vector<2x16xf32>
    %256 = vector.broadcast %77 : vector<1x16xf32> to vector<2x16xf32>
    %257 = arith.addf %255, %256 : vector<2x16xf32>
    %cst_116 = arith.constant 0.000000e+00 : f32
    %258 = vector.broadcast %cst_116 : f32 to vector<2x16xf32>
    %259 = arith.subf %258, %257 : vector<2x16xf32>
    %260 = math.exp %259 : vector<2x16xf32>
    %cst_117 = arith.constant 1.000000e+00 : f32
    %261 = vector.broadcast %cst_117 : f32 to vector<2x16xf32>
    %262 = arith.addf %261, %260 : vector<2x16xf32>
    %cst_118 = arith.constant 1.000000e+00 : f32
    %263 = vector.broadcast %cst_118 : f32 to vector<2x16xf32>
    %264 = arith.divf %263, %262 : vector<2x16xf32>
    %cst_119 = arith.constant dense<0.000000e+00> : vector<2x16xf32>
    %265 = tpu.matmul %36, %61, %cst_119 {dimension_numbers = #tpu.dot_dimension_numbers<[1], [0], [0], [1], [0, 0, 1, 1], [], []>} : vector<2x32xf32>, vector<32x16xf32>, vector<2x16xf32> -> vector<2x16xf32>
    %266 = vector.broadcast %73 : vector<1x16xf32> to vector<2x16xf32>
    %267 = arith.addf %265, %266 : vector<2x16xf32>
    %cst_120 = arith.constant dense<0.000000e+00> : vector<2x16xf32>
    %268 = tpu.matmul %250, %67, %cst_120 {dimension_numbers = #tpu.dot_dimension_numbers<[1], [0], [0], [1], [0, 0, 1, 1], [], []>} : vector<2x16xf32>, vector<16x16xf32>, vector<2x16xf32> -> vector<2x16xf32>
    %269 = arith.addf %267, %268 : vector<2x16xf32>
    %270 = vector.broadcast %79 : vector<1x16xf32> to vector<2x16xf32>
    %271 = arith.addf %269, %270 : vector<2x16xf32>
    %cst_121 = arith.constant 0.000000e+00 : f32
    %272 = vector.broadcast %cst_121 : f32 to vector<2x16xf32>
    %273 = arith.subf %272, %271 : vector<2x16xf32>
    %274 = math.exp %273 : vector<2x16xf32>
    %cst_122 = arith.constant 1.000000e+00 : f32
    %275 = vector.broadcast %cst_122 : f32 to vector<2x16xf32>
    %276 = arith.addf %275, %274 : vector<2x16xf32>
    %cst_123 = arith.constant 1.000000e+00 : f32
    %277 = vector.broadcast %cst_123 : f32 to vector<2x16xf32>
    %278 = arith.divf %277, %276 : vector<2x16xf32>
    %cst_124 = arith.constant dense<0.000000e+00> : vector<2x16xf32>
    %279 = tpu.matmul %36, %63, %cst_124 {dimension_numbers = #tpu.dot_dimension_numbers<[1], [0], [0], [1], [0, 0, 1, 1], [], []>} : vector<2x32xf32>, vector<32x16xf32>, vector<2x16xf32> -> vector<2x16xf32>
    %280 = vector.broadcast %75 : vector<1x16xf32> to vector<2x16xf32>
    %281 = arith.addf %279, %280 : vector<2x16xf32>
    %cst_125 = arith.constant dense<0.000000e+00> : vector<2x16xf32>
    %282 = tpu.matmul %250, %69, %cst_125 {dimension_numbers = #tpu.dot_dimension_numbers<[1], [0], [0], [1], [0, 0, 1, 1], [], []>} : vector<2x16xf32>, vector<16x16xf32>, vector<2x16xf32> -> vector<2x16xf32>
    %283 = vector.broadcast %81 : vector<1x16xf32> to vector<2x16xf32>
    %284 = arith.addf %282, %283 : vector<2x16xf32>
    %285 = arith.mulf %264, %284 : vector<2x16xf32>
    %286 = arith.addf %281, %285 : vector<2x16xf32>
    %287 = math.tanh %286 : vector<2x16xf32>
    %cst_126 = arith.constant 1.000000e+00 : f32
    %288 = vector.broadcast %cst_126 : f32 to vector<2x16xf32>
    %289 = arith.subf %288, %278 : vector<2x16xf32>
    %290 = arith.mulf %289, %287 : vector<2x16xf32>
    %291 = arith.mulf %278, %250 : vector<2x16xf32>
    %292 = arith.addf %290, %291 : vector<2x16xf32>
    %cst_127 = arith.constant dense<0.000000e+00> : vector<2x16xf32>
    %293 = tpu.matmul %43, %59, %cst_127 {dimension_numbers = #tpu.dot_dimension_numbers<[1], [0], [0], [1], [0, 0, 1, 1], [], []>} : vector<2x32xf32>, vector<32x16xf32>, vector<2x16xf32> -> vector<2x16xf32>
    %294 = vector.broadcast %71 : vector<1x16xf32> to vector<2x16xf32>
    %295 = arith.addf %293, %294 : vector<2x16xf32>
    %cst_128 = arith.constant dense<0.000000e+00> : vector<2x16xf32>
    %296 = tpu.matmul %292, %65, %cst_128 {dimension_numbers = #tpu.dot_dimension_numbers<[1], [0], [0], [1], [0, 0, 1, 1], [], []>} : vector<2x16xf32>, vector<16x16xf32>, vector<2x16xf32> -> vector<2x16xf32>
    %297 = arith.addf %295, %296 : vector<2x16xf32>
    %298 = vector.broadcast %77 : vector<1x16xf32> to vector<2x16xf32>
    %299 = arith.addf %297, %298 : vector<2x16xf32>
    %cst_129 = arith.constant 0.000000e+00 : f32
    %300 = vector.broadcast %cst_129 : f32 to vector<2x16xf32>
    %301 = arith.subf %300, %299 : vector<2x16xf32>
    %302 = math.exp %301 : vector<2x16xf32>
    %cst_130 = arith.constant 1.000000e+00 : f32
    %303 = vector.broadcast %cst_130 : f32 to vector<2x16xf32>
    %304 = arith.addf %303, %302 : vector<2x16xf32>
    %cst_131 = arith.constant 1.000000e+00 : f32
    %305 = vector.broadcast %cst_131 : f32 to vector<2x16xf32>
    %306 = arith.divf %305, %304 : vector<2x16xf32>
    %cst_132 = arith.constant dense<0.000000e+00> : vector<2x16xf32>
    %307 = tpu.matmul %43, %61, %cst_132 {dimension_numbers = #tpu.dot_dimension_numbers<[1], [0], [0], [1], [0, 0, 1, 1], [], []>} : vector<2x32xf32>, vector<32x16xf32>, vector<2x16xf32> -> vector<2x16xf32>
    %308 = vector.broadcast %73 : vector<1x16xf32> to vector<2x16xf32>
    %309 = arith.addf %307, %308 : vector<2x16xf32>
    %cst_133 = arith.constant dense<0.000000e+00> : vector<2x16xf32>
    %310 = tpu.matmul %292, %67, %cst_133 {dimension_numbers = #tpu.dot_dimension_numbers<[1], [0], [0], [1], [0, 0, 1, 1], [], []>} : vector<2x16xf32>, vector<16x16xf32>, vector<2x16xf32> -> vector<2x16xf32>
    %311 = arith.addf %309, %310 : vector<2x16xf32>
    %312 = vector.broadcast %79 : vector<1x16xf32> to vector<2x16xf32>
    %313 = arith.addf %311, %312 : vector<2x16xf32>
    %cst_134 = arith.constant 0.000000e+00 : f32
    %314 = vector.broadcast %cst_134 : f32 to vector<2x16xf32>
    %315 = arith.subf %314, %313 : vector<2x16xf32>
    %316 = math.exp %315 : vector<2x16xf32>
    %cst_135 = arith.constant 1.000000e+00 : f32
    %317 = vector.broadcast %cst_135 : f32 to vector<2x16xf32>
    %318 = arith.addf %317, %316 : vector<2x16xf32>
    %cst_136 = arith.constant 1.000000e+00 : f32
    %319 = vector.broadcast %cst_136 : f32 to vector<2x16xf32>
    %320 = arith.divf %319, %318 : vector<2x16xf32>
    %cst_137 = arith.constant dense<0.000000e+00> : vector<2x16xf32>
    %321 = tpu.matmul %43, %63, %cst_137 {dimension_numbers = #tpu.dot_dimension_numbers<[1], [0], [0], [1], [0, 0, 1, 1], [], []>} : vector<2x32xf32>, vector<32x16xf32>, vector<2x16xf32> -> vector<2x16xf32>
    %322 = vector.broadcast %75 : vector<1x16xf32> to vector<2x16xf32>
    %323 = arith.addf %321, %322 : vector<2x16xf32>
    %cst_138 = arith.constant dense<0.000000e+00> : vector<2x16xf32>
    %324 = tpu.matmul %292, %69, %cst_138 {dimension_numbers = #tpu.dot_dimension_numbers<[1], [0], [0], [1], [0, 0, 1, 1], [], []>} : vector<2x16xf32>, vector<16x16xf32>, vector<2x16xf32> -> vector<2x16xf32>
    %325 = vector.broadcast %81 : vector<1x16xf32> to vector<2x16xf32>
    %326 = arith.addf %324, %325 : vector<2x16xf32>
    %327 = arith.mulf %306, %326 : vector<2x16xf32>
    %328 = arith.addf %323, %327 : vector<2x16xf32>
    %329 = math.tanh %328 : vector<2x16xf32>
    %cst_139 = arith.constant 1.000000e+00 : f32
    %330 = vector.broadcast %cst_139 : f32 to vector<2x16xf32>
    %331 = arith.subf %330, %320 : vector<2x16xf32>
    %332 = arith.mulf %331, %329 : vector<2x16xf32>
    %333 = arith.mulf %320, %292 : vector<2x16xf32>
    %334 = arith.addf %332, %333 : vector<2x16xf32>
    %cst_140 = arith.constant dense<0.000000e+00> : vector<2x16xf32>
    %335 = tpu.matmul %50, %59, %cst_140 {dimension_numbers = #tpu.dot_dimension_numbers<[1], [0], [0], [1], [0, 0, 1, 1], [], []>} : vector<2x32xf32>, vector<32x16xf32>, vector<2x16xf32> -> vector<2x16xf32>
    %336 = vector.broadcast %71 : vector<1x16xf32> to vector<2x16xf32>
    %337 = arith.addf %335, %336 : vector<2x16xf32>
    %cst_141 = arith.constant dense<0.000000e+00> : vector<2x16xf32>
    %338 = tpu.matmul %334, %65, %cst_141 {dimension_numbers = #tpu.dot_dimension_numbers<[1], [0], [0], [1], [0, 0, 1, 1], [], []>} : vector<2x16xf32>, vector<16x16xf32>, vector<2x16xf32> -> vector<2x16xf32>
    %339 = arith.addf %337, %338 : vector<2x16xf32>
    %340 = vector.broadcast %77 : vector<1x16xf32> to vector<2x16xf32>
    %341 = arith.addf %339, %340 : vector<2x16xf32>
    %cst_142 = arith.constant 0.000000e+00 : f32
    %342 = vector.broadcast %cst_142 : f32 to vector<2x16xf32>
    %343 = arith.subf %342, %341 : vector<2x16xf32>
    %344 = math.exp %343 : vector<2x16xf32>
    %cst_143 = arith.constant 1.000000e+00 : f32
    %345 = vector.broadcast %cst_143 : f32 to vector<2x16xf32>
    %346 = arith.addf %345, %344 : vector<2x16xf32>
    %cst_144 = arith.constant 1.000000e+00 : f32
    %347 = vector.broadcast %cst_144 : f32 to vector<2x16xf32>
    %348 = arith.divf %347, %346 : vector<2x16xf32>
    %cst_145 = arith.constant dense<0.000000e+00> : vector<2x16xf32>
    %349 = tpu.matmul %50, %61, %cst_145 {dimension_numbers = #tpu.dot_dimension_numbers<[1], [0], [0], [1], [0, 0, 1, 1], [], []>} : vector<2x32xf32>, vector<32x16xf32>, vector<2x16xf32> -> vector<2x16xf32>
    %350 = vector.broadcast %73 : vector<1x16xf32> to vector<2x16xf32>
    %351 = arith.addf %349, %350 : vector<2x16xf32>
    %cst_146 = arith.constant dense<0.000000e+00> : vector<2x16xf32>
    %352 = tpu.matmul %334, %67, %cst_146 {dimension_numbers = #tpu.dot_dimension_numbers<[1], [0], [0], [1], [0, 0, 1, 1], [], []>} : vector<2x16xf32>, vector<16x16xf32>, vector<2x16xf32> -> vector<2x16xf32>
    %353 = arith.addf %351, %352 : vector<2x16xf32>
    %354 = vector.broadcast %79 : vector<1x16xf32> to vector<2x16xf32>
    %355 = arith.addf %353, %354 : vector<2x16xf32>
    %cst_147 = arith.constant 0.000000e+00 : f32
    %356 = vector.broadcast %cst_147 : f32 to vector<2x16xf32>
    %357 = arith.subf %356, %355 : vector<2x16xf32>
    %358 = math.exp %357 : vector<2x16xf32>
    %cst_148 = arith.constant 1.000000e+00 : f32
    %359 = vector.broadcast %cst_148 : f32 to vector<2x16xf32>
    %360 = arith.addf %359, %358 : vector<2x16xf32>
    %cst_149 = arith.constant 1.000000e+00 : f32
    %361 = vector.broadcast %cst_149 : f32 to vector<2x16xf32>
    %362 = arith.divf %361, %360 : vector<2x16xf32>
    %cst_150 = arith.constant dense<0.000000e+00> : vector<2x16xf32>
    %363 = tpu.matmul %50, %63, %cst_150 {dimension_numbers = #tpu.dot_dimension_numbers<[1], [0], [0], [1], [0, 0, 1, 1], [], []>} : vector<2x32xf32>, vector<32x16xf32>, vector<2x16xf32> -> vector<2x16xf32>
    %364 = vector.broadcast %75 : vector<1x16xf32> to vector<2x16xf32>
    %365 = arith.addf %363, %364 : vector<2x16xf32>
    %cst_151 = arith.constant dense<0.000000e+00> : vector<2x16xf32>
    %366 = tpu.matmul %334, %69, %cst_151 {dimension_numbers = #tpu.dot_dimension_numbers<[1], [0], [0], [1], [0, 0, 1, 1], [], []>} : vector<2x16xf32>, vector<16x16xf32>, vector<2x16xf32> -> vector<2x16xf32>
    %367 = vector.broadcast %81 : vector<1x16xf32> to vector<2x16xf32>
    %368 = arith.addf %366, %367 : vector<2x16xf32>
    %369 = arith.mulf %348, %368 : vector<2x16xf32>
    %370 = arith.addf %365, %369 : vector<2x16xf32>
    %371 = math.tanh %370 : vector<2x16xf32>
    %cst_152 = arith.constant 1.000000e+00 : f32
    %372 = vector.broadcast %cst_152 : f32 to vector<2x16xf32>
    %373 = arith.subf %372, %362 : vector<2x16xf32>
    %374 = arith.mulf %373, %371 : vector<2x16xf32>
    %375 = arith.mulf %362, %334 : vector<2x16xf32>
    %376 = arith.addf %374, %375 : vector<2x16xf32>
    %cst_153 = arith.constant dense<0.000000e+00> : vector<2x16xf32>
    %377 = tpu.matmul %57, %59, %cst_153 {dimension_numbers = #tpu.dot_dimension_numbers<[1], [0], [0], [1], [0, 0, 1, 1], [], []>} : vector<2x32xf32>, vector<32x16xf32>, vector<2x16xf32> -> vector<2x16xf32>
    %378 = vector.broadcast %71 : vector<1x16xf32> to vector<2x16xf32>
    %379 = arith.addf %377, %378 : vector<2x16xf32>
    %cst_154 = arith.constant dense<0.000000e+00> : vector<2x16xf32>
    %380 = tpu.matmul %376, %65, %cst_154 {dimension_numbers = #tpu.dot_dimension_numbers<[1], [0], [0], [1], [0, 0, 1, 1], [], []>} : vector<2x16xf32>, vector<16x16xf32>, vector<2x16xf32> -> vector<2x16xf32>
    %381 = arith.addf %379, %380 : vector<2x16xf32>
    %382 = vector.broadcast %77 : vector<1x16xf32> to vector<2x16xf32>
    %383 = arith.addf %381, %382 : vector<2x16xf32>
    %cst_155 = arith.constant 0.000000e+00 : f32
    %384 = vector.broadcast %cst_155 : f32 to vector<2x16xf32>
    %385 = arith.subf %384, %383 : vector<2x16xf32>
    %386 = math.exp %385 : vector<2x16xf32>
    %cst_156 = arith.constant 1.000000e+00 : f32
    %387 = vector.broadcast %cst_156 : f32 to vector<2x16xf32>
    %388 = arith.addf %387, %386 : vector<2x16xf32>
    %cst_157 = arith.constant 1.000000e+00 : f32
    %389 = vector.broadcast %cst_157 : f32 to vector<2x16xf32>
    %390 = arith.divf %389, %388 : vector<2x16xf32>
    %cst_158 = arith.constant dense<0.000000e+00> : vector<2x16xf32>
    %391 = tpu.matmul %57, %61, %cst_158 {dimension_numbers = #tpu.dot_dimension_numbers<[1], [0], [0], [1], [0, 0, 1, 1], [], []>} : vector<2x32xf32>, vector<32x16xf32>, vector<2x16xf32> -> vector<2x16xf32>
    %392 = vector.broadcast %73 : vector<1x16xf32> to vector<2x16xf32>
    %393 = arith.addf %391, %392 : vector<2x16xf32>
    %cst_159 = arith.constant dense<0.000000e+00> : vector<2x16xf32>
    %394 = tpu.matmul %376, %67, %cst_159 {dimension_numbers = #tpu.dot_dimension_numbers<[1], [0], [0], [1], [0, 0, 1, 1], [], []>} : vector<2x16xf32>, vector<16x16xf32>, vector<2x16xf32> -> vector<2x16xf32>
    %395 = arith.addf %393, %394 : vector<2x16xf32>
    %396 = vector.broadcast %79 : vector<1x16xf32> to vector<2x16xf32>
    %397 = arith.addf %395, %396 : vector<2x16xf32>
    %cst_160 = arith.constant 0.000000e+00 : f32
    %398 = vector.broadcast %cst_160 : f32 to vector<2x16xf32>
    %399 = arith.subf %398, %397 : vector<2x16xf32>
    %400 = math.exp %399 : vector<2x16xf32>
    %cst_161 = arith.constant 1.000000e+00 : f32
    %401 = vector.broadcast %cst_161 : f32 to vector<2x16xf32>
    %402 = arith.addf %401, %400 : vector<2x16xf32>
    %cst_162 = arith.constant 1.000000e+00 : f32
    %403 = vector.broadcast %cst_162 : f32 to vector<2x16xf32>
    %404 = arith.divf %403, %402 : vector<2x16xf32>
    %cst_163 = arith.constant dense<0.000000e+00> : vector<2x16xf32>
    %405 = tpu.matmul %57, %63, %cst_163 {dimension_numbers = #tpu.dot_dimension_numbers<[1], [0], [0], [1], [0, 0, 1, 1], [], []>} : vector<2x32xf32>, vector<32x16xf32>, vector<2x16xf32> -> vector<2x16xf32>
    %406 = vector.broadcast %75 : vector<1x16xf32> to vector<2x16xf32>
    %407 = arith.addf %405, %406 : vector<2x16xf32>
    %cst_164 = arith.constant dense<0.000000e+00> : vector<2x16xf32>
    %408 = tpu.matmul %376, %69, %cst_164 {dimension_numbers = #tpu.dot_dimension_numbers<[1], [0], [0], [1], [0, 0, 1, 1], [], []>} : vector<2x16xf32>, vector<16x16xf32>, vector<2x16xf32> -> vector<2x16xf32>
    %409 = vector.broadcast %81 : vector<1x16xf32> to vector<2x16xf32>
    %410 = arith.addf %408, %409 : vector<2x16xf32>
    %411 = arith.mulf %390, %410 : vector<2x16xf32>
    %412 = arith.addf %407, %411 : vector<2x16xf32>
    %413 = math.tanh %412 : vector<2x16xf32>
    %cst_165 = arith.constant 1.000000e+00 : f32
    %414 = vector.broadcast %cst_165 : f32 to vector<2x16xf32>
    %415 = arith.subf %414, %404 : vector<2x16xf32>
    %416 = arith.mulf %415, %413 : vector<2x16xf32>
    %417 = arith.mulf %404, %376 : vector<2x16xf32>
    %418 = arith.addf %416, %417 : vector<2x16xf32>
    %c1_166 = arith.constant 1 : index
    %c0_167 = arith.constant 0 : index
    %c0_168 = arith.constant 0 : index
    %419 = vector.load %arg3[%c1_166, %c0_167, %c0_168] : memref<4x32x16xf32, #tpu.memory_space<vmem>>, vector<1x32x16xf32>
    %420 = vector.shape_cast %419 : vector<1x32x16xf32> to vector<32x16xf32>
    %c1_169 = arith.constant 1 : index
    %c0_170 = arith.constant 0 : index
    %c0_171 = arith.constant 0 : index
    %421 = vector.load %arg4[%c1_169, %c0_170, %c0_171] : memref<4x32x16xf32, #tpu.memory_space<vmem>>, vector<1x32x16xf32>
    %422 = vector.shape_cast %421 : vector<1x32x16xf32> to vector<32x16xf32>
    %c1_172 = arith.constant 1 : index
    %c0_173 = arith.constant 0 : index
    %c0_174 = arith.constant 0 : index
    %423 = vector.load %arg5[%c1_172, %c0_173, %c0_174] : memref<4x32x16xf32, #tpu.memory_space<vmem>>, vector<1x32x16xf32>
    %424 = vector.shape_cast %423 : vector<1x32x16xf32> to vector<32x16xf32>
    %c1_175 = arith.constant 1 : index
    %c0_176 = arith.constant 0 : index
    %c0_177 = arith.constant 0 : index
    %425 = vector.load %arg6[%c1_175, %c0_176, %c0_177] : memref<4x16x16xf32, #tpu.memory_space<vmem>>, vector<1x16x16xf32>
    %426 = vector.shape_cast %425 : vector<1x16x16xf32> to vector<16x16xf32>
    %c1_178 = arith.constant 1 : index
    %c0_179 = arith.constant 0 : index
    %c0_180 = arith.constant 0 : index
    %427 = vector.load %arg7[%c1_178, %c0_179, %c0_180] : memref<4x16x16xf32, #tpu.memory_space<vmem>>, vector<1x16x16xf32>
    %428 = vector.shape_cast %427 : vector<1x16x16xf32> to vector<16x16xf32>
    %c1_181 = arith.constant 1 : index
    %c0_182 = arith.constant 0 : index
    %c0_183 = arith.constant 0 : index
    %429 = vector.load %arg8[%c1_181, %c0_182, %c0_183] : memref<4x16x16xf32, #tpu.memory_space<vmem>>, vector<1x16x16xf32>
    %430 = vector.shape_cast %429 : vector<1x16x16xf32> to vector<16x16xf32>
    %c1_184 = arith.constant 1 : index
    %c0_185 = arith.constant 0 : index
    %c0_186 = arith.constant 0 : index
    %431 = vector.load %arg9[%c1_184, %c0_185, %c0_186] : memref<4x1x16xf32, #tpu.memory_space<vmem>>, vector<1x1x16xf32>
    %432 = vector.shape_cast %431 : vector<1x1x16xf32> to vector<1x16xf32>
    %c1_187 = arith.constant 1 : index
    %c0_188 = arith.constant 0 : index
    %c0_189 = arith.constant 0 : index
    %433 = vector.load %arg10[%c1_187, %c0_188, %c0_189] : memref<4x1x16xf32, #tpu.memory_space<vmem>>, vector<1x1x16xf32>
    %434 = vector.shape_cast %433 : vector<1x1x16xf32> to vector<1x16xf32>
    %c1_190 = arith.constant 1 : index
    %c0_191 = arith.constant 0 : index
    %c0_192 = arith.constant 0 : index
    %435 = vector.load %arg11[%c1_190, %c0_191, %c0_192] : memref<4x1x16xf32, #tpu.memory_space<vmem>>, vector<1x1x16xf32>
    %436 = vector.shape_cast %435 : vector<1x1x16xf32> to vector<1x16xf32>
    %c1_193 = arith.constant 1 : index
    %c0_194 = arith.constant 0 : index
    %c0_195 = arith.constant 0 : index
    %437 = vector.load %arg12[%c1_193, %c0_194, %c0_195] : memref<4x1x16xf32, #tpu.memory_space<vmem>>, vector<1x1x16xf32>
    %438 = vector.shape_cast %437 : vector<1x1x16xf32> to vector<1x16xf32>
    %c1_196 = arith.constant 1 : index
    %c0_197 = arith.constant 0 : index
    %c0_198 = arith.constant 0 : index
    %439 = vector.load %arg13[%c1_196, %c0_197, %c0_198] : memref<4x1x16xf32, #tpu.memory_space<vmem>>, vector<1x1x16xf32>
    %440 = vector.shape_cast %439 : vector<1x1x16xf32> to vector<1x16xf32>
    %c1_199 = arith.constant 1 : index
    %c0_200 = arith.constant 0 : index
    %c0_201 = arith.constant 0 : index
    %441 = vector.load %arg14[%c1_199, %c0_200, %c0_201] : memref<4x1x16xf32, #tpu.memory_space<vmem>>, vector<1x1x16xf32>
    %442 = vector.shape_cast %441 : vector<1x1x16xf32> to vector<1x16xf32>
    %cst_202 = arith.constant 0.000000e+00 : f32
    %443 = vector.broadcast %cst_202 : f32 to vector<2x16xf32>
    %cst_203 = arith.constant dense<0.000000e+00> : vector<2x16xf32>
    %444 = tpu.matmul %57, %420, %cst_203 {dimension_numbers = #tpu.dot_dimension_numbers<[1], [0], [0], [1], [0, 0, 1, 1], [], []>} : vector<2x32xf32>, vector<32x16xf32>, vector<2x16xf32> -> vector<2x16xf32>
    %445 = vector.broadcast %432 : vector<1x16xf32> to vector<2x16xf32>
    %446 = arith.addf %444, %445 : vector<2x16xf32>
    %cst_204 = arith.constant dense<0.000000e+00> : vector<2x16xf32>
    %447 = tpu.matmul %443, %426, %cst_204 {dimension_numbers = #tpu.dot_dimension_numbers<[1], [0], [0], [1], [0, 0, 1, 1], [], []>} : vector<2x16xf32>, vector<16x16xf32>, vector<2x16xf32> -> vector<2x16xf32>
    %448 = arith.addf %446, %447 : vector<2x16xf32>
    %449 = vector.broadcast %438 : vector<1x16xf32> to vector<2x16xf32>
    %450 = arith.addf %448, %449 : vector<2x16xf32>
    %cst_205 = arith.constant 0.000000e+00 : f32
    %451 = vector.broadcast %cst_205 : f32 to vector<2x16xf32>
    %452 = arith.subf %451, %450 : vector<2x16xf32>
    %453 = math.exp %452 : vector<2x16xf32>
    %cst_206 = arith.constant 1.000000e+00 : f32
    %454 = vector.broadcast %cst_206 : f32 to vector<2x16xf32>
    %455 = arith.addf %454, %453 : vector<2x16xf32>
    %cst_207 = arith.constant 1.000000e+00 : f32
    %456 = vector.broadcast %cst_207 : f32 to vector<2x16xf32>
    %457 = arith.divf %456, %455 : vector<2x16xf32>
    %cst_208 = arith.constant dense<0.000000e+00> : vector<2x16xf32>
    %458 = tpu.matmul %57, %422, %cst_208 {dimension_numbers = #tpu.dot_dimension_numbers<[1], [0], [0], [1], [0, 0, 1, 1], [], []>} : vector<2x32xf32>, vector<32x16xf32>, vector<2x16xf32> -> vector<2x16xf32>
    %459 = vector.broadcast %434 : vector<1x16xf32> to vector<2x16xf32>
    %460 = arith.addf %458, %459 : vector<2x16xf32>
    %cst_209 = arith.constant dense<0.000000e+00> : vector<2x16xf32>
    %461 = tpu.matmul %443, %428, %cst_209 {dimension_numbers = #tpu.dot_dimension_numbers<[1], [0], [0], [1], [0, 0, 1, 1], [], []>} : vector<2x16xf32>, vector<16x16xf32>, vector<2x16xf32> -> vector<2x16xf32>
    %462 = arith.addf %460, %461 : vector<2x16xf32>
    %463 = vector.broadcast %440 : vector<1x16xf32> to vector<2x16xf32>
    %464 = arith.addf %462, %463 : vector<2x16xf32>
    %cst_210 = arith.constant 0.000000e+00 : f32
    %465 = vector.broadcast %cst_210 : f32 to vector<2x16xf32>
    %466 = arith.subf %465, %464 : vector<2x16xf32>
    %467 = math.exp %466 : vector<2x16xf32>
    %cst_211 = arith.constant 1.000000e+00 : f32
    %468 = vector.broadcast %cst_211 : f32 to vector<2x16xf32>
    %469 = arith.addf %468, %467 : vector<2x16xf32>
    %cst_212 = arith.constant 1.000000e+00 : f32
    %470 = vector.broadcast %cst_212 : f32 to vector<2x16xf32>
    %471 = arith.divf %470, %469 : vector<2x16xf32>
    %cst_213 = arith.constant dense<0.000000e+00> : vector<2x16xf32>
    %472 = tpu.matmul %57, %424, %cst_213 {dimension_numbers = #tpu.dot_dimension_numbers<[1], [0], [0], [1], [0, 0, 1, 1], [], []>} : vector<2x32xf32>, vector<32x16xf32>, vector<2x16xf32> -> vector<2x16xf32>
    %473 = vector.broadcast %436 : vector<1x16xf32> to vector<2x16xf32>
    %474 = arith.addf %472, %473 : vector<2x16xf32>
    %cst_214 = arith.constant dense<0.000000e+00> : vector<2x16xf32>
    %475 = tpu.matmul %443, %430, %cst_214 {dimension_numbers = #tpu.dot_dimension_numbers<[1], [0], [0], [1], [0, 0, 1, 1], [], []>} : vector<2x16xf32>, vector<16x16xf32>, vector<2x16xf32> -> vector<2x16xf32>
    %476 = vector.broadcast %442 : vector<1x16xf32> to vector<2x16xf32>
    %477 = arith.addf %475, %476 : vector<2x16xf32>
    %478 = arith.mulf %457, %477 : vector<2x16xf32>
    %479 = arith.addf %474, %478 : vector<2x16xf32>
    %480 = math.tanh %479 : vector<2x16xf32>
    %cst_215 = arith.constant 1.000000e+00 : f32
    %481 = vector.broadcast %cst_215 : f32 to vector<2x16xf32>
    %482 = arith.subf %481, %471 : vector<2x16xf32>
    %483 = arith.mulf %482, %480 : vector<2x16xf32>
    %484 = arith.mulf %471, %443 : vector<2x16xf32>
    %485 = arith.addf %483, %484 : vector<2x16xf32>
    %cst_216 = arith.constant dense<0.000000e+00> : vector<2x16xf32>
    %486 = tpu.matmul %50, %420, %cst_216 {dimension_numbers = #tpu.dot_dimension_numbers<[1], [0], [0], [1], [0, 0, 1, 1], [], []>} : vector<2x32xf32>, vector<32x16xf32>, vector<2x16xf32> -> vector<2x16xf32>
    %487 = vector.broadcast %432 : vector<1x16xf32> to vector<2x16xf32>
    %488 = arith.addf %486, %487 : vector<2x16xf32>
    %cst_217 = arith.constant dense<0.000000e+00> : vector<2x16xf32>
    %489 = tpu.matmul %485, %426, %cst_217 {dimension_numbers = #tpu.dot_dimension_numbers<[1], [0], [0], [1], [0, 0, 1, 1], [], []>} : vector<2x16xf32>, vector<16x16xf32>, vector<2x16xf32> -> vector<2x16xf32>
    %490 = arith.addf %488, %489 : vector<2x16xf32>
    %491 = vector.broadcast %438 : vector<1x16xf32> to vector<2x16xf32>
    %492 = arith.addf %490, %491 : vector<2x16xf32>
    %cst_218 = arith.constant 0.000000e+00 : f32
    %493 = vector.broadcast %cst_218 : f32 to vector<2x16xf32>
    %494 = arith.subf %493, %492 : vector<2x16xf32>
    %495 = math.exp %494 : vector<2x16xf32>
    %cst_219 = arith.constant 1.000000e+00 : f32
    %496 = vector.broadcast %cst_219 : f32 to vector<2x16xf32>
    %497 = arith.addf %496, %495 : vector<2x16xf32>
    %cst_220 = arith.constant 1.000000e+00 : f32
    %498 = vector.broadcast %cst_220 : f32 to vector<2x16xf32>
    %499 = arith.divf %498, %497 : vector<2x16xf32>
    %cst_221 = arith.constant dense<0.000000e+00> : vector<2x16xf32>
    %500 = tpu.matmul %50, %422, %cst_221 {dimension_numbers = #tpu.dot_dimension_numbers<[1], [0], [0], [1], [0, 0, 1, 1], [], []>} : vector<2x32xf32>, vector<32x16xf32>, vector<2x16xf32> -> vector<2x16xf32>
    %501 = vector.broadcast %434 : vector<1x16xf32> to vector<2x16xf32>
    %502 = arith.addf %500, %501 : vector<2x16xf32>
    %cst_222 = arith.constant dense<0.000000e+00> : vector<2x16xf32>
    %503 = tpu.matmul %485, %428, %cst_222 {dimension_numbers = #tpu.dot_dimension_numbers<[1], [0], [0], [1], [0, 0, 1, 1], [], []>} : vector<2x16xf32>, vector<16x16xf32>, vector<2x16xf32> -> vector<2x16xf32>
    %504 = arith.addf %502, %503 : vector<2x16xf32>
    %505 = vector.broadcast %440 : vector<1x16xf32> to vector<2x16xf32>
    %506 = arith.addf %504, %505 : vector<2x16xf32>
    %cst_223 = arith.constant 0.000000e+00 : f32
    %507 = vector.broadcast %cst_223 : f32 to vector<2x16xf32>
    %508 = arith.subf %507, %506 : vector<2x16xf32>
    %509 = math.exp %508 : vector<2x16xf32>
    %cst_224 = arith.constant 1.000000e+00 : f32
    %510 = vector.broadcast %cst_224 : f32 to vector<2x16xf32>
    %511 = arith.addf %510, %509 : vector<2x16xf32>
    %cst_225 = arith.constant 1.000000e+00 : f32
    %512 = vector.broadcast %cst_225 : f32 to vector<2x16xf32>
    %513 = arith.divf %512, %511 : vector<2x16xf32>
    %cst_226 = arith.constant dense<0.000000e+00> : vector<2x16xf32>
    %514 = tpu.matmul %50, %424, %cst_226 {dimension_numbers = #tpu.dot_dimension_numbers<[1], [0], [0], [1], [0, 0, 1, 1], [], []>} : vector<2x32xf32>, vector<32x16xf32>, vector<2x16xf32> -> vector<2x16xf32>
    %515 = vector.broadcast %436 : vector<1x16xf32> to vector<2x16xf32>
    %516 = arith.addf %514, %515 : vector<2x16xf32>
    %cst_227 = arith.constant dense<0.000000e+00> : vector<2x16xf32>
    %517 = tpu.matmul %485, %430, %cst_227 {dimension_numbers = #tpu.dot_dimension_numbers<[1], [0], [0], [1], [0, 0, 1, 1], [], []>} : vector<2x16xf32>, vector<16x16xf32>, vector<2x16xf32> -> vector<2x16xf32>
    %518 = vector.broadcast %442 : vector<1x16xf32> to vector<2x16xf32>
    %519 = arith.addf %517, %518 : vector<2x16xf32>
    %520 = arith.mulf %499, %519 : vector<2x16xf32>
    %521 = arith.addf %516, %520 : vector<2x16xf32>
    %522 = math.tanh %521 : vector<2x16xf32>
    %cst_228 = arith.constant 1.000000e+00 : f32
    %523 = vector.broadcast %cst_228 : f32 to vector<2x16xf32>
    %524 = arith.subf %523, %513 : vector<2x16xf32>
    %525 = arith.mulf %524, %522 : vector<2x16xf32>
    %526 = arith.mulf %513, %485 : vector<2x16xf32>
    %527 = arith.addf %525, %526 : vector<2x16xf32>
    %cst_229 = arith.constant dense<0.000000e+00> : vector<2x16xf32>
    %528 = tpu.matmul %43, %420, %cst_229 {dimension_numbers = #tpu.dot_dimension_numbers<[1], [0], [0], [1], [0, 0, 1, 1], [], []>} : vector<2x32xf32>, vector<32x16xf32>, vector<2x16xf32> -> vector<2x16xf32>
    %529 = vector.broadcast %432 : vector<1x16xf32> to vector<2x16xf32>
    %530 = arith.addf %528, %529 : vector<2x16xf32>
    %cst_230 = arith.constant dense<0.000000e+00> : vector<2x16xf32>
    %531 = tpu.matmul %527, %426, %cst_230 {dimension_numbers = #tpu.dot_dimension_numbers<[1], [0], [0], [1], [0, 0, 1, 1], [], []>} : vector<2x16xf32>, vector<16x16xf32>, vector<2x16xf32> -> vector<2x16xf32>
    %532 = arith.addf %530, %531 : vector<2x16xf32>
    %533 = vector.broadcast %438 : vector<1x16xf32> to vector<2x16xf32>
    %534 = arith.addf %532, %533 : vector<2x16xf32>
    %cst_231 = arith.constant 0.000000e+00 : f32
    %535 = vector.broadcast %cst_231 : f32 to vector<2x16xf32>
    %536 = arith.subf %535, %534 : vector<2x16xf32>
    %537 = math.exp %536 : vector<2x16xf32>
    %cst_232 = arith.constant 1.000000e+00 : f32
    %538 = vector.broadcast %cst_232 : f32 to vector<2x16xf32>
    %539 = arith.addf %538, %537 : vector<2x16xf32>
    %cst_233 = arith.constant 1.000000e+00 : f32
    %540 = vector.broadcast %cst_233 : f32 to vector<2x16xf32>
    %541 = arith.divf %540, %539 : vector<2x16xf32>
    %cst_234 = arith.constant dense<0.000000e+00> : vector<2x16xf32>
    %542 = tpu.matmul %43, %422, %cst_234 {dimension_numbers = #tpu.dot_dimension_numbers<[1], [0], [0], [1], [0, 0, 1, 1], [], []>} : vector<2x32xf32>, vector<32x16xf32>, vector<2x16xf32> -> vector<2x16xf32>
    %543 = vector.broadcast %434 : vector<1x16xf32> to vector<2x16xf32>
    %544 = arith.addf %542, %543 : vector<2x16xf32>
    %cst_235 = arith.constant dense<0.000000e+00> : vector<2x16xf32>
    %545 = tpu.matmul %527, %428, %cst_235 {dimension_numbers = #tpu.dot_dimension_numbers<[1], [0], [0], [1], [0, 0, 1, 1], [], []>} : vector<2x16xf32>, vector<16x16xf32>, vector<2x16xf32> -> vector<2x16xf32>
    %546 = arith.addf %544, %545 : vector<2x16xf32>
    %547 = vector.broadcast %440 : vector<1x16xf32> to vector<2x16xf32>
    %548 = arith.addf %546, %547 : vector<2x16xf32>
    %cst_236 = arith.constant 0.000000e+00 : f32
    %549 = vector.broadcast %cst_236 : f32 to vector<2x16xf32>
    %550 = arith.subf %549, %548 : vector<2x16xf32>
    %551 = math.exp %550 : vector<2x16xf32>
    %cst_237 = arith.constant 1.000000e+00 : f32
    %552 = vector.broadcast %cst_237 : f32 to vector<2x16xf32>
    %553 = arith.addf %552, %551 : vector<2x16xf32>
    %cst_238 = arith.constant 1.000000e+00 : f32
    %554 = vector.broadcast %cst_238 : f32 to vector<2x16xf32>
    %555 = arith.divf %554, %553 : vector<2x16xf32>
    %cst_239 = arith.constant dense<0.000000e+00> : vector<2x16xf32>
    %556 = tpu.matmul %43, %424, %cst_239 {dimension_numbers = #tpu.dot_dimension_numbers<[1], [0], [0], [1], [0, 0, 1, 1], [], []>} : vector<2x32xf32>, vector<32x16xf32>, vector<2x16xf32> -> vector<2x16xf32>
    %557 = vector.broadcast %436 : vector<1x16xf32> to vector<2x16xf32>
    %558 = arith.addf %556, %557 : vector<2x16xf32>
    %cst_240 = arith.constant dense<0.000000e+00> : vector<2x16xf32>
    %559 = tpu.matmul %527, %430, %cst_240 {dimension_numbers = #tpu.dot_dimension_numbers<[1], [0], [0], [1], [0, 0, 1, 1], [], []>} : vector<2x16xf32>, vector<16x16xf32>, vector<2x16xf32> -> vector<2x16xf32>
    %560 = vector.broadcast %442 : vector<1x16xf32> to vector<2x16xf32>
    %561 = arith.addf %559, %560 : vector<2x16xf32>
    %562 = arith.mulf %541, %561 : vector<2x16xf32>
    %563 = arith.addf %558, %562 : vector<2x16xf32>
    %564 = math.tanh %563 : vector<2x16xf32>
    %cst_241 = arith.constant 1.000000e+00 : f32
    %565 = vector.broadcast %cst_241 : f32 to vector<2x16xf32>
    %566 = arith.subf %565, %555 : vector<2x16xf32>
    %567 = arith.mulf %566, %564 : vector<2x16xf32>
    %568 = arith.mulf %555, %527 : vector<2x16xf32>
    %569 = arith.addf %567, %568 : vector<2x16xf32>
    %cst_242 = arith.constant dense<0.000000e+00> : vector<2x16xf32>
    %570 = tpu.matmul %36, %420, %cst_242 {dimension_numbers = #tpu.dot_dimension_numbers<[1], [0], [0], [1], [0, 0, 1, 1], [], []>} : vector<2x32xf32>, vector<32x16xf32>, vector<2x16xf32> -> vector<2x16xf32>
    %571 = vector.broadcast %432 : vector<1x16xf32> to vector<2x16xf32>
    %572 = arith.addf %570, %571 : vector<2x16xf32>
    %cst_243 = arith.constant dense<0.000000e+00> : vector<2x16xf32>
    %573 = tpu.matmul %569, %426, %cst_243 {dimension_numbers = #tpu.dot_dimension_numbers<[1], [0], [0], [1], [0, 0, 1, 1], [], []>} : vector<2x16xf32>, vector<16x16xf32>, vector<2x16xf32> -> vector<2x16xf32>
    %574 = arith.addf %572, %573 : vector<2x16xf32>
    %575 = vector.broadcast %438 : vector<1x16xf32> to vector<2x16xf32>
    %576 = arith.addf %574, %575 : vector<2x16xf32>
    %cst_244 = arith.constant 0.000000e+00 : f32
    %577 = vector.broadcast %cst_244 : f32 to vector<2x16xf32>
    %578 = arith.subf %577, %576 : vector<2x16xf32>
    %579 = math.exp %578 : vector<2x16xf32>
    %cst_245 = arith.constant 1.000000e+00 : f32
    %580 = vector.broadcast %cst_245 : f32 to vector<2x16xf32>
    %581 = arith.addf %580, %579 : vector<2x16xf32>
    %cst_246 = arith.constant 1.000000e+00 : f32
    %582 = vector.broadcast %cst_246 : f32 to vector<2x16xf32>
    %583 = arith.divf %582, %581 : vector<2x16xf32>
    %cst_247 = arith.constant dense<0.000000e+00> : vector<2x16xf32>
    %584 = tpu.matmul %36, %422, %cst_247 {dimension_numbers = #tpu.dot_dimension_numbers<[1], [0], [0], [1], [0, 0, 1, 1], [], []>} : vector<2x32xf32>, vector<32x16xf32>, vector<2x16xf32> -> vector<2x16xf32>
    %585 = vector.broadcast %434 : vector<1x16xf32> to vector<2x16xf32>
    %586 = arith.addf %584, %585 : vector<2x16xf32>
    %cst_248 = arith.constant dense<0.000000e+00> : vector<2x16xf32>
    %587 = tpu.matmul %569, %428, %cst_248 {dimension_numbers = #tpu.dot_dimension_numbers<[1], [0], [0], [1], [0, 0, 1, 1], [], []>} : vector<2x16xf32>, vector<16x16xf32>, vector<2x16xf32> -> vector<2x16xf32>
    %588 = arith.addf %586, %587 : vector<2x16xf32>
    %589 = vector.broadcast %440 : vector<1x16xf32> to vector<2x16xf32>
    %590 = arith.addf %588, %589 : vector<2x16xf32>
    %cst_249 = arith.constant 0.000000e+00 : f32
    %591 = vector.broadcast %cst_249 : f32 to vector<2x16xf32>
    %592 = arith.subf %591, %590 : vector<2x16xf32>
    %593 = math.exp %592 : vector<2x16xf32>
    %cst_250 = arith.constant 1.000000e+00 : f32
    %594 = vector.broadcast %cst_250 : f32 to vector<2x16xf32>
    %595 = arith.addf %594, %593 : vector<2x16xf32>
    %cst_251 = arith.constant 1.000000e+00 : f32
    %596 = vector.broadcast %cst_251 : f32 to vector<2x16xf32>
    %597 = arith.divf %596, %595 : vector<2x16xf32>
    %cst_252 = arith.constant dense<0.000000e+00> : vector<2x16xf32>
    %598 = tpu.matmul %36, %424, %cst_252 {dimension_numbers = #tpu.dot_dimension_numbers<[1], [0], [0], [1], [0, 0, 1, 1], [], []>} : vector<2x32xf32>, vector<32x16xf32>, vector<2x16xf32> -> vector<2x16xf32>
    %599 = vector.broadcast %436 : vector<1x16xf32> to vector<2x16xf32>
    %600 = arith.addf %598, %599 : vector<2x16xf32>
    %cst_253 = arith.constant dense<0.000000e+00> : vector<2x16xf32>
    %601 = tpu.matmul %569, %430, %cst_253 {dimension_numbers = #tpu.dot_dimension_numbers<[1], [0], [0], [1], [0, 0, 1, 1], [], []>} : vector<2x16xf32>, vector<16x16xf32>, vector<2x16xf32> -> vector<2x16xf32>
    %602 = vector.broadcast %442 : vector<1x16xf32> to vector<2x16xf32>
    %603 = arith.addf %601, %602 : vector<2x16xf32>
    %604 = arith.mulf %583, %603 : vector<2x16xf32>
    %605 = arith.addf %600, %604 : vector<2x16xf32>
    %606 = math.tanh %605 : vector<2x16xf32>
    %cst_254 = arith.constant 1.000000e+00 : f32
    %607 = vector.broadcast %cst_254 : f32 to vector<2x16xf32>
    %608 = arith.subf %607, %597 : vector<2x16xf32>
    %609 = arith.mulf %608, %606 : vector<2x16xf32>
    %610 = arith.mulf %597, %569 : vector<2x16xf32>
    %611 = arith.addf %609, %610 : vector<2x16xf32>
    %cst_255 = arith.constant dense<0.000000e+00> : vector<2x16xf32>
    %612 = tpu.matmul %29, %420, %cst_255 {dimension_numbers = #tpu.dot_dimension_numbers<[1], [0], [0], [1], [0, 0, 1, 1], [], []>} : vector<2x32xf32>, vector<32x16xf32>, vector<2x16xf32> -> vector<2x16xf32>
    %613 = vector.broadcast %432 : vector<1x16xf32> to vector<2x16xf32>
    %614 = arith.addf %612, %613 : vector<2x16xf32>
    %cst_256 = arith.constant dense<0.000000e+00> : vector<2x16xf32>
    %615 = tpu.matmul %611, %426, %cst_256 {dimension_numbers = #tpu.dot_dimension_numbers<[1], [0], [0], [1], [0, 0, 1, 1], [], []>} : vector<2x16xf32>, vector<16x16xf32>, vector<2x16xf32> -> vector<2x16xf32>
    %616 = arith.addf %614, %615 : vector<2x16xf32>
    %617 = vector.broadcast %438 : vector<1x16xf32> to vector<2x16xf32>
    %618 = arith.addf %616, %617 : vector<2x16xf32>
    %cst_257 = arith.constant 0.000000e+00 : f32
    %619 = vector.broadcast %cst_257 : f32 to vector<2x16xf32>
    %620 = arith.subf %619, %618 : vector<2x16xf32>
    %621 = math.exp %620 : vector<2x16xf32>
    %cst_258 = arith.constant 1.000000e+00 : f32
    %622 = vector.broadcast %cst_258 : f32 to vector<2x16xf32>
    %623 = arith.addf %622, %621 : vector<2x16xf32>
    %cst_259 = arith.constant 1.000000e+00 : f32
    %624 = vector.broadcast %cst_259 : f32 to vector<2x16xf32>
    %625 = arith.divf %624, %623 : vector<2x16xf32>
    %cst_260 = arith.constant dense<0.000000e+00> : vector<2x16xf32>
    %626 = tpu.matmul %29, %422, %cst_260 {dimension_numbers = #tpu.dot_dimension_numbers<[1], [0], [0], [1], [0, 0, 1, 1], [], []>} : vector<2x32xf32>, vector<32x16xf32>, vector<2x16xf32> -> vector<2x16xf32>
    %627 = vector.broadcast %434 : vector<1x16xf32> to vector<2x16xf32>
    %628 = arith.addf %626, %627 : vector<2x16xf32>
    %cst_261 = arith.constant dense<0.000000e+00> : vector<2x16xf32>
    %629 = tpu.matmul %611, %428, %cst_261 {dimension_numbers = #tpu.dot_dimension_numbers<[1], [0], [0], [1], [0, 0, 1, 1], [], []>} : vector<2x16xf32>, vector<16x16xf32>, vector<2x16xf32> -> vector<2x16xf32>
    %630 = arith.addf %628, %629 : vector<2x16xf32>
    %631 = vector.broadcast %440 : vector<1x16xf32> to vector<2x16xf32>
    %632 = arith.addf %630, %631 : vector<2x16xf32>
    %cst_262 = arith.constant 0.000000e+00 : f32
    %633 = vector.broadcast %cst_262 : f32 to vector<2x16xf32>
    %634 = arith.subf %633, %632 : vector<2x16xf32>
    %635 = math.exp %634 : vector<2x16xf32>
    %cst_263 = arith.constant 1.000000e+00 : f32
    %636 = vector.broadcast %cst_263 : f32 to vector<2x16xf32>
    %637 = arith.addf %636, %635 : vector<2x16xf32>
    %cst_264 = arith.constant 1.000000e+00 : f32
    %638 = vector.broadcast %cst_264 : f32 to vector<2x16xf32>
    %639 = arith.divf %638, %637 : vector<2x16xf32>
    %cst_265 = arith.constant dense<0.000000e+00> : vector<2x16xf32>
    %640 = tpu.matmul %29, %424, %cst_265 {dimension_numbers = #tpu.dot_dimension_numbers<[1], [0], [0], [1], [0, 0, 1, 1], [], []>} : vector<2x32xf32>, vector<32x16xf32>, vector<2x16xf32> -> vector<2x16xf32>
    %641 = vector.broadcast %436 : vector<1x16xf32> to vector<2x16xf32>
    %642 = arith.addf %640, %641 : vector<2x16xf32>
    %cst_266 = arith.constant dense<0.000000e+00> : vector<2x16xf32>
    %643 = tpu.matmul %611, %430, %cst_266 {dimension_numbers = #tpu.dot_dimension_numbers<[1], [0], [0], [1], [0, 0, 1, 1], [], []>} : vector<2x16xf32>, vector<16x16xf32>, vector<2x16xf32> -> vector<2x16xf32>
    %644 = vector.broadcast %442 : vector<1x16xf32> to vector<2x16xf32>
    %645 = arith.addf %643, %644 : vector<2x16xf32>
    %646 = arith.mulf %625, %645 : vector<2x16xf32>
    %647 = arith.addf %642, %646 : vector<2x16xf32>
    %648 = math.tanh %647 : vector<2x16xf32>
    %cst_267 = arith.constant 1.000000e+00 : f32
    %649 = vector.broadcast %cst_267 : f32 to vector<2x16xf32>
    %650 = arith.subf %649, %639 : vector<2x16xf32>
    %651 = arith.mulf %650, %648 : vector<2x16xf32>
    %652 = arith.mulf %639, %611 : vector<2x16xf32>
    %653 = arith.addf %651, %652 : vector<2x16xf32>
    %cst_268 = arith.constant dense<0.000000e+00> : vector<2x16xf32>
    %654 = tpu.matmul %22, %420, %cst_268 {dimension_numbers = #tpu.dot_dimension_numbers<[1], [0], [0], [1], [0, 0, 1, 1], [], []>} : vector<2x32xf32>, vector<32x16xf32>, vector<2x16xf32> -> vector<2x16xf32>
    %655 = vector.broadcast %432 : vector<1x16xf32> to vector<2x16xf32>
    %656 = arith.addf %654, %655 : vector<2x16xf32>
    %cst_269 = arith.constant dense<0.000000e+00> : vector<2x16xf32>
    %657 = tpu.matmul %653, %426, %cst_269 {dimension_numbers = #tpu.dot_dimension_numbers<[1], [0], [0], [1], [0, 0, 1, 1], [], []>} : vector<2x16xf32>, vector<16x16xf32>, vector<2x16xf32> -> vector<2x16xf32>
    %658 = arith.addf %656, %657 : vector<2x16xf32>
    %659 = vector.broadcast %438 : vector<1x16xf32> to vector<2x16xf32>
    %660 = arith.addf %658, %659 : vector<2x16xf32>
    %cst_270 = arith.constant 0.000000e+00 : f32
    %661 = vector.broadcast %cst_270 : f32 to vector<2x16xf32>
    %662 = arith.subf %661, %660 : vector<2x16xf32>
    %663 = math.exp %662 : vector<2x16xf32>
    %cst_271 = arith.constant 1.000000e+00 : f32
    %664 = vector.broadcast %cst_271 : f32 to vector<2x16xf32>
    %665 = arith.addf %664, %663 : vector<2x16xf32>
    %cst_272 = arith.constant 1.000000e+00 : f32
    %666 = vector.broadcast %cst_272 : f32 to vector<2x16xf32>
    %667 = arith.divf %666, %665 : vector<2x16xf32>
    %cst_273 = arith.constant dense<0.000000e+00> : vector<2x16xf32>
    %668 = tpu.matmul %22, %422, %cst_273 {dimension_numbers = #tpu.dot_dimension_numbers<[1], [0], [0], [1], [0, 0, 1, 1], [], []>} : vector<2x32xf32>, vector<32x16xf32>, vector<2x16xf32> -> vector<2x16xf32>
    %669 = vector.broadcast %434 : vector<1x16xf32> to vector<2x16xf32>
    %670 = arith.addf %668, %669 : vector<2x16xf32>
    %cst_274 = arith.constant dense<0.000000e+00> : vector<2x16xf32>
    %671 = tpu.matmul %653, %428, %cst_274 {dimension_numbers = #tpu.dot_dimension_numbers<[1], [0], [0], [1], [0, 0, 1, 1], [], []>} : vector<2x16xf32>, vector<16x16xf32>, vector<2x16xf32> -> vector<2x16xf32>
    %672 = arith.addf %670, %671 : vector<2x16xf32>
    %673 = vector.broadcast %440 : vector<1x16xf32> to vector<2x16xf32>
    %674 = arith.addf %672, %673 : vector<2x16xf32>
    %cst_275 = arith.constant 0.000000e+00 : f32
    %675 = vector.broadcast %cst_275 : f32 to vector<2x16xf32>
    %676 = arith.subf %675, %674 : vector<2x16xf32>
    %677 = math.exp %676 : vector<2x16xf32>
    %cst_276 = arith.constant 1.000000e+00 : f32
    %678 = vector.broadcast %cst_276 : f32 to vector<2x16xf32>
    %679 = arith.addf %678, %677 : vector<2x16xf32>
    %cst_277 = arith.constant 1.000000e+00 : f32
    %680 = vector.broadcast %cst_277 : f32 to vector<2x16xf32>
    %681 = arith.divf %680, %679 : vector<2x16xf32>
    %cst_278 = arith.constant dense<0.000000e+00> : vector<2x16xf32>
    %682 = tpu.matmul %22, %424, %cst_278 {dimension_numbers = #tpu.dot_dimension_numbers<[1], [0], [0], [1], [0, 0, 1, 1], [], []>} : vector<2x32xf32>, vector<32x16xf32>, vector<2x16xf32> -> vector<2x16xf32>
    %683 = vector.broadcast %436 : vector<1x16xf32> to vector<2x16xf32>
    %684 = arith.addf %682, %683 : vector<2x16xf32>
    %cst_279 = arith.constant dense<0.000000e+00> : vector<2x16xf32>
    %685 = tpu.matmul %653, %430, %cst_279 {dimension_numbers = #tpu.dot_dimension_numbers<[1], [0], [0], [1], [0, 0, 1, 1], [], []>} : vector<2x16xf32>, vector<16x16xf32>, vector<2x16xf32> -> vector<2x16xf32>
    %686 = vector.broadcast %442 : vector<1x16xf32> to vector<2x16xf32>
    %687 = arith.addf %685, %686 : vector<2x16xf32>
    %688 = arith.mulf %667, %687 : vector<2x16xf32>
    %689 = arith.addf %684, %688 : vector<2x16xf32>
    %690 = math.tanh %689 : vector<2x16xf32>
    %cst_280 = arith.constant 1.000000e+00 : f32
    %691 = vector.broadcast %cst_280 : f32 to vector<2x16xf32>
    %692 = arith.subf %691, %681 : vector<2x16xf32>
    %693 = arith.mulf %692, %690 : vector<2x16xf32>
    %694 = arith.mulf %681, %653 : vector<2x16xf32>
    %695 = arith.addf %693, %694 : vector<2x16xf32>
    %cst_281 = arith.constant dense<0.000000e+00> : vector<2x16xf32>
    %696 = tpu.matmul %15, %420, %cst_281 {dimension_numbers = #tpu.dot_dimension_numbers<[1], [0], [0], [1], [0, 0, 1, 1], [], []>} : vector<2x32xf32>, vector<32x16xf32>, vector<2x16xf32> -> vector<2x16xf32>
    %697 = vector.broadcast %432 : vector<1x16xf32> to vector<2x16xf32>
    %698 = arith.addf %696, %697 : vector<2x16xf32>
    %cst_282 = arith.constant dense<0.000000e+00> : vector<2x16xf32>
    %699 = tpu.matmul %695, %426, %cst_282 {dimension_numbers = #tpu.dot_dimension_numbers<[1], [0], [0], [1], [0, 0, 1, 1], [], []>} : vector<2x16xf32>, vector<16x16xf32>, vector<2x16xf32> -> vector<2x16xf32>
    %700 = arith.addf %698, %699 : vector<2x16xf32>
    %701 = vector.broadcast %438 : vector<1x16xf32> to vector<2x16xf32>
    %702 = arith.addf %700, %701 : vector<2x16xf32>
    %cst_283 = arith.constant 0.000000e+00 : f32
    %703 = vector.broadcast %cst_283 : f32 to vector<2x16xf32>
    %704 = arith.subf %703, %702 : vector<2x16xf32>
    %705 = math.exp %704 : vector<2x16xf32>
    %cst_284 = arith.constant 1.000000e+00 : f32
    %706 = vector.broadcast %cst_284 : f32 to vector<2x16xf32>
    %707 = arith.addf %706, %705 : vector<2x16xf32>
    %cst_285 = arith.constant 1.000000e+00 : f32
    %708 = vector.broadcast %cst_285 : f32 to vector<2x16xf32>
    %709 = arith.divf %708, %707 : vector<2x16xf32>
    %cst_286 = arith.constant dense<0.000000e+00> : vector<2x16xf32>
    %710 = tpu.matmul %15, %422, %cst_286 {dimension_numbers = #tpu.dot_dimension_numbers<[1], [0], [0], [1], [0, 0, 1, 1], [], []>} : vector<2x32xf32>, vector<32x16xf32>, vector<2x16xf32> -> vector<2x16xf32>
    %711 = vector.broadcast %434 : vector<1x16xf32> to vector<2x16xf32>
    %712 = arith.addf %710, %711 : vector<2x16xf32>
    %cst_287 = arith.constant dense<0.000000e+00> : vector<2x16xf32>
    %713 = tpu.matmul %695, %428, %cst_287 {dimension_numbers = #tpu.dot_dimension_numbers<[1], [0], [0], [1], [0, 0, 1, 1], [], []>} : vector<2x16xf32>, vector<16x16xf32>, vector<2x16xf32> -> vector<2x16xf32>
    %714 = arith.addf %712, %713 : vector<2x16xf32>
    %715 = vector.broadcast %440 : vector<1x16xf32> to vector<2x16xf32>
    %716 = arith.addf %714, %715 : vector<2x16xf32>
    %cst_288 = arith.constant 0.000000e+00 : f32
    %717 = vector.broadcast %cst_288 : f32 to vector<2x16xf32>
    %718 = arith.subf %717, %716 : vector<2x16xf32>
    %719 = math.exp %718 : vector<2x16xf32>
    %cst_289 = arith.constant 1.000000e+00 : f32
    %720 = vector.broadcast %cst_289 : f32 to vector<2x16xf32>
    %721 = arith.addf %720, %719 : vector<2x16xf32>
    %cst_290 = arith.constant 1.000000e+00 : f32
    %722 = vector.broadcast %cst_290 : f32 to vector<2x16xf32>
    %723 = arith.divf %722, %721 : vector<2x16xf32>
    %cst_291 = arith.constant dense<0.000000e+00> : vector<2x16xf32>
    %724 = tpu.matmul %15, %424, %cst_291 {dimension_numbers = #tpu.dot_dimension_numbers<[1], [0], [0], [1], [0, 0, 1, 1], [], []>} : vector<2x32xf32>, vector<32x16xf32>, vector<2x16xf32> -> vector<2x16xf32>
    %725 = vector.broadcast %436 : vector<1x16xf32> to vector<2x16xf32>
    %726 = arith.addf %724, %725 : vector<2x16xf32>
    %cst_292 = arith.constant dense<0.000000e+00> : vector<2x16xf32>
    %727 = tpu.matmul %695, %430, %cst_292 {dimension_numbers = #tpu.dot_dimension_numbers<[1], [0], [0], [1], [0, 0, 1, 1], [], []>} : vector<2x16xf32>, vector<16x16xf32>, vector<2x16xf32> -> vector<2x16xf32>
    %728 = vector.broadcast %442 : vector<1x16xf32> to vector<2x16xf32>
    %729 = arith.addf %727, %728 : vector<2x16xf32>
    %730 = arith.mulf %709, %729 : vector<2x16xf32>
    %731 = arith.addf %726, %730 : vector<2x16xf32>
    %732 = math.tanh %731 : vector<2x16xf32>
    %cst_293 = arith.constant 1.000000e+00 : f32
    %733 = vector.broadcast %cst_293 : f32 to vector<2x16xf32>
    %734 = arith.subf %733, %723 : vector<2x16xf32>
    %735 = arith.mulf %734, %732 : vector<2x16xf32>
    %736 = arith.mulf %723, %695 : vector<2x16xf32>
    %737 = arith.addf %735, %736 : vector<2x16xf32>
    %cst_294 = arith.constant dense<0.000000e+00> : vector<2x16xf32>
    %738 = tpu.matmul %8, %420, %cst_294 {dimension_numbers = #tpu.dot_dimension_numbers<[1], [0], [0], [1], [0, 0, 1, 1], [], []>} : vector<2x32xf32>, vector<32x16xf32>, vector<2x16xf32> -> vector<2x16xf32>
    %739 = vector.broadcast %432 : vector<1x16xf32> to vector<2x16xf32>
    %740 = arith.addf %738, %739 : vector<2x16xf32>
    %cst_295 = arith.constant dense<0.000000e+00> : vector<2x16xf32>
    %741 = tpu.matmul %737, %426, %cst_295 {dimension_numbers = #tpu.dot_dimension_numbers<[1], [0], [0], [1], [0, 0, 1, 1], [], []>} : vector<2x16xf32>, vector<16x16xf32>, vector<2x16xf32> -> vector<2x16xf32>
    %742 = arith.addf %740, %741 : vector<2x16xf32>
    %743 = vector.broadcast %438 : vector<1x16xf32> to vector<2x16xf32>
    %744 = arith.addf %742, %743 : vector<2x16xf32>
    %cst_296 = arith.constant 0.000000e+00 : f32
    %745 = vector.broadcast %cst_296 : f32 to vector<2x16xf32>
    %746 = arith.subf %745, %744 : vector<2x16xf32>
    %747 = math.exp %746 : vector<2x16xf32>
    %cst_297 = arith.constant 1.000000e+00 : f32
    %748 = vector.broadcast %cst_297 : f32 to vector<2x16xf32>
    %749 = arith.addf %748, %747 : vector<2x16xf32>
    %cst_298 = arith.constant 1.000000e+00 : f32
    %750 = vector.broadcast %cst_298 : f32 to vector<2x16xf32>
    %751 = arith.divf %750, %749 : vector<2x16xf32>
    %cst_299 = arith.constant dense<0.000000e+00> : vector<2x16xf32>
    %752 = tpu.matmul %8, %422, %cst_299 {dimension_numbers = #tpu.dot_dimension_numbers<[1], [0], [0], [1], [0, 0, 1, 1], [], []>} : vector<2x32xf32>, vector<32x16xf32>, vector<2x16xf32> -> vector<2x16xf32>
    %753 = vector.broadcast %434 : vector<1x16xf32> to vector<2x16xf32>
    %754 = arith.addf %752, %753 : vector<2x16xf32>
    %cst_300 = arith.constant dense<0.000000e+00> : vector<2x16xf32>
    %755 = tpu.matmul %737, %428, %cst_300 {dimension_numbers = #tpu.dot_dimension_numbers<[1], [0], [0], [1], [0, 0, 1, 1], [], []>} : vector<2x16xf32>, vector<16x16xf32>, vector<2x16xf32> -> vector<2x16xf32>
    %756 = arith.addf %754, %755 : vector<2x16xf32>
    %757 = vector.broadcast %440 : vector<1x16xf32> to vector<2x16xf32>
    %758 = arith.addf %756, %757 : vector<2x16xf32>
    %cst_301 = arith.constant 0.000000e+00 : f32
    %759 = vector.broadcast %cst_301 : f32 to vector<2x16xf32>
    %760 = arith.subf %759, %758 : vector<2x16xf32>
    %761 = math.exp %760 : vector<2x16xf32>
    %cst_302 = arith.constant 1.000000e+00 : f32
    %762 = vector.broadcast %cst_302 : f32 to vector<2x16xf32>
    %763 = arith.addf %762, %761 : vector<2x16xf32>
    %cst_303 = arith.constant 1.000000e+00 : f32
    %764 = vector.broadcast %cst_303 : f32 to vector<2x16xf32>
    %765 = arith.divf %764, %763 : vector<2x16xf32>
    %cst_304 = arith.constant dense<0.000000e+00> : vector<2x16xf32>
    %766 = tpu.matmul %8, %424, %cst_304 {dimension_numbers = #tpu.dot_dimension_numbers<[1], [0], [0], [1], [0, 0, 1, 1], [], []>} : vector<2x32xf32>, vector<32x16xf32>, vector<2x16xf32> -> vector<2x16xf32>
    %767 = vector.broadcast %436 : vector<1x16xf32> to vector<2x16xf32>
    %768 = arith.addf %766, %767 : vector<2x16xf32>
    %cst_305 = arith.constant dense<0.000000e+00> : vector<2x16xf32>
    %769 = tpu.matmul %737, %430, %cst_305 {dimension_numbers = #tpu.dot_dimension_numbers<[1], [0], [0], [1], [0, 0, 1, 1], [], []>} : vector<2x16xf32>, vector<16x16xf32>, vector<2x16xf32> -> vector<2x16xf32>
    %770 = vector.broadcast %442 : vector<1x16xf32> to vector<2x16xf32>
    %771 = arith.addf %769, %770 : vector<2x16xf32>
    %772 = arith.mulf %751, %771 : vector<2x16xf32>
    %773 = arith.addf %768, %772 : vector<2x16xf32>
    %774 = math.tanh %773 : vector<2x16xf32>
    %cst_306 = arith.constant 1.000000e+00 : f32
    %775 = vector.broadcast %cst_306 : f32 to vector<2x16xf32>
    %776 = arith.subf %775, %765 : vector<2x16xf32>
    %777 = arith.mulf %776, %774 : vector<2x16xf32>
    %778 = arith.mulf %765, %737 : vector<2x16xf32>
    %779 = arith.addf %777, %778 : vector<2x16xf32>
    %780 = tpu.concatenate %124, %779 in 1 : vector<2x16xf32>, vector<2x16xf32> -> vector<2x32xf32>
    %781 = tpu.concatenate %166, %737 in 1 : vector<2x16xf32>, vector<2x16xf32> -> vector<2x32xf32>
    %782 = tpu.concatenate %208, %695 in 1 : vector<2x16xf32>, vector<2x16xf32> -> vector<2x32xf32>
    %783 = tpu.concatenate %250, %653 in 1 : vector<2x16xf32>, vector<2x16xf32> -> vector<2x32xf32>
    %784 = tpu.concatenate %292, %611 in 1 : vector<2x16xf32>, vector<2x16xf32> -> vector<2x32xf32>
    %785 = tpu.concatenate %334, %569 in 1 : vector<2x16xf32>, vector<2x16xf32> -> vector<2x32xf32>
    %786 = tpu.concatenate %376, %527 in 1 : vector<2x16xf32>, vector<2x16xf32> -> vector<2x32xf32>
    %787 = tpu.concatenate %418, %485 in 1 : vector<2x16xf32>, vector<2x16xf32> -> vector<2x32xf32>
    %c2_307 = arith.constant 2 : index
    %c0_308 = arith.constant 0 : index
    %c0_309 = arith.constant 0 : index
    %788 = vector.load %arg3[%c2_307, %c0_308, %c0_309] : memref<4x32x16xf32, #tpu.memory_space<vmem>>, vector<1x32x16xf32>
    %789 = vector.shape_cast %788 : vector<1x32x16xf32> to vector<32x16xf32>
    %c2_310 = arith.constant 2 : index
    %c0_311 = arith.constant 0 : index
    %c0_312 = arith.constant 0 : index
    %790 = vector.load %arg4[%c2_310, %c0_311, %c0_312] : memref<4x32x16xf32, #tpu.memory_space<vmem>>, vector<1x32x16xf32>
    %791 = vector.shape_cast %790 : vector<1x32x16xf32> to vector<32x16xf32>
    %c2_313 = arith.constant 2 : index
    %c0_314 = arith.constant 0 : index
    %c0_315 = arith.constant 0 : index
    %792 = vector.load %arg5[%c2_313, %c0_314, %c0_315] : memref<4x32x16xf32, #tpu.memory_space<vmem>>, vector<1x32x16xf32>
    %793 = vector.shape_cast %792 : vector<1x32x16xf32> to vector<32x16xf32>
    %c2_316 = arith.constant 2 : index
    %c0_317 = arith.constant 0 : index
    %c0_318 = arith.constant 0 : index
    %794 = vector.load %arg6[%c2_316, %c0_317, %c0_318] : memref<4x16x16xf32, #tpu.memory_space<vmem>>, vector<1x16x16xf32>
    %795 = vector.shape_cast %794 : vector<1x16x16xf32> to vector<16x16xf32>
    %c2_319 = arith.constant 2 : index
    %c0_320 = arith.constant 0 : index
    %c0_321 = arith.constant 0 : index
    %796 = vector.load %arg7[%c2_319, %c0_320, %c0_321] : memref<4x16x16xf32, #tpu.memory_space<vmem>>, vector<1x16x16xf32>
    %797 = vector.shape_cast %796 : vector<1x16x16xf32> to vector<16x16xf32>
    %c2_322 = arith.constant 2 : index
    %c0_323 = arith.constant 0 : index
    %c0_324 = arith.constant 0 : index
    %798 = vector.load %arg8[%c2_322, %c0_323, %c0_324] : memref<4x16x16xf32, #tpu.memory_space<vmem>>, vector<1x16x16xf32>
    %799 = vector.shape_cast %798 : vector<1x16x16xf32> to vector<16x16xf32>
    %c2_325 = arith.constant 2 : index
    %c0_326 = arith.constant 0 : index
    %c0_327 = arith.constant 0 : index
    %800 = vector.load %arg9[%c2_325, %c0_326, %c0_327] : memref<4x1x16xf32, #tpu.memory_space<vmem>>, vector<1x1x16xf32>
    %801 = vector.shape_cast %800 : vector<1x1x16xf32> to vector<1x16xf32>
    %c2_328 = arith.constant 2 : index
    %c0_329 = arith.constant 0 : index
    %c0_330 = arith.constant 0 : index
    %802 = vector.load %arg10[%c2_328, %c0_329, %c0_330] : memref<4x1x16xf32, #tpu.memory_space<vmem>>, vector<1x1x16xf32>
    %803 = vector.shape_cast %802 : vector<1x1x16xf32> to vector<1x16xf32>
    %c2_331 = arith.constant 2 : index
    %c0_332 = arith.constant 0 : index
    %c0_333 = arith.constant 0 : index
    %804 = vector.load %arg11[%c2_331, %c0_332, %c0_333] : memref<4x1x16xf32, #tpu.memory_space<vmem>>, vector<1x1x16xf32>
    %805 = vector.shape_cast %804 : vector<1x1x16xf32> to vector<1x16xf32>
    %c2_334 = arith.constant 2 : index
    %c0_335 = arith.constant 0 : index
    %c0_336 = arith.constant 0 : index
    %806 = vector.load %arg12[%c2_334, %c0_335, %c0_336] : memref<4x1x16xf32, #tpu.memory_space<vmem>>, vector<1x1x16xf32>
    %807 = vector.shape_cast %806 : vector<1x1x16xf32> to vector<1x16xf32>
    %c2_337 = arith.constant 2 : index
    %c0_338 = arith.constant 0 : index
    %c0_339 = arith.constant 0 : index
    %808 = vector.load %arg13[%c2_337, %c0_338, %c0_339] : memref<4x1x16xf32, #tpu.memory_space<vmem>>, vector<1x1x16xf32>
    %809 = vector.shape_cast %808 : vector<1x1x16xf32> to vector<1x16xf32>
    %c2_340 = arith.constant 2 : index
    %c0_341 = arith.constant 0 : index
    %c0_342 = arith.constant 0 : index
    %810 = vector.load %arg14[%c2_340, %c0_341, %c0_342] : memref<4x1x16xf32, #tpu.memory_space<vmem>>, vector<1x1x16xf32>
    %811 = vector.shape_cast %810 : vector<1x1x16xf32> to vector<1x16xf32>
    %cst_343 = arith.constant 0.000000e+00 : f32
    %812 = vector.broadcast %cst_343 : f32 to vector<2x16xf32>
    %cst_344 = arith.constant dense<0.000000e+00> : vector<2x16xf32>
    %813 = tpu.matmul %780, %789, %cst_344 {dimension_numbers = #tpu.dot_dimension_numbers<[1], [0], [0], [1], [0, 0, 1, 1], [], []>} : vector<2x32xf32>, vector<32x16xf32>, vector<2x16xf32> -> vector<2x16xf32>
    %814 = vector.broadcast %801 : vector<1x16xf32> to vector<2x16xf32>
    %815 = arith.addf %813, %814 : vector<2x16xf32>
    %cst_345 = arith.constant dense<0.000000e+00> : vector<2x16xf32>
    %816 = tpu.matmul %812, %795, %cst_345 {dimension_numbers = #tpu.dot_dimension_numbers<[1], [0], [0], [1], [0, 0, 1, 1], [], []>} : vector<2x16xf32>, vector<16x16xf32>, vector<2x16xf32> -> vector<2x16xf32>
    %817 = arith.addf %815, %816 : vector<2x16xf32>
    %818 = vector.broadcast %807 : vector<1x16xf32> to vector<2x16xf32>
    %819 = arith.addf %817, %818 : vector<2x16xf32>
    %cst_346 = arith.constant 0.000000e+00 : f32
    %820 = vector.broadcast %cst_346 : f32 to vector<2x16xf32>
    %821 = arith.subf %820, %819 : vector<2x16xf32>
    %822 = math.exp %821 : vector<2x16xf32>
    %cst_347 = arith.constant 1.000000e+00 : f32
    %823 = vector.broadcast %cst_347 : f32 to vector<2x16xf32>
    %824 = arith.addf %823, %822 : vector<2x16xf32>
    %cst_348 = arith.constant 1.000000e+00 : f32
    %825 = vector.broadcast %cst_348 : f32 to vector<2x16xf32>
    %826 = arith.divf %825, %824 : vector<2x16xf32>
    %cst_349 = arith.constant dense<0.000000e+00> : vector<2x16xf32>
    %827 = tpu.matmul %780, %791, %cst_349 {dimension_numbers = #tpu.dot_dimension_numbers<[1], [0], [0], [1], [0, 0, 1, 1], [], []>} : vector<2x32xf32>, vector<32x16xf32>, vector<2x16xf32> -> vector<2x16xf32>
    %828 = vector.broadcast %803 : vector<1x16xf32> to vector<2x16xf32>
    %829 = arith.addf %827, %828 : vector<2x16xf32>
    %cst_350 = arith.constant dense<0.000000e+00> : vector<2x16xf32>
    %830 = tpu.matmul %812, %797, %cst_350 {dimension_numbers = #tpu.dot_dimension_numbers<[1], [0], [0], [1], [0, 0, 1, 1], [], []>} : vector<2x16xf32>, vector<16x16xf32>, vector<2x16xf32> -> vector<2x16xf32>
    %831 = arith.addf %829, %830 : vector<2x16xf32>
    %832 = vector.broadcast %809 : vector<1x16xf32> to vector<2x16xf32>
    %833 = arith.addf %831, %832 : vector<2x16xf32>
    %cst_351 = arith.constant 0.000000e+00 : f32
    %834 = vector.broadcast %cst_351 : f32 to vector<2x16xf32>
    %835 = arith.subf %834, %833 : vector<2x16xf32>
    %836 = math.exp %835 : vector<2x16xf32>
    %cst_352 = arith.constant 1.000000e+00 : f32
    %837 = vector.broadcast %cst_352 : f32 to vector<2x16xf32>
    %838 = arith.addf %837, %836 : vector<2x16xf32>
    %cst_353 = arith.constant 1.000000e+00 : f32
    %839 = vector.broadcast %cst_353 : f32 to vector<2x16xf32>
    %840 = arith.divf %839, %838 : vector<2x16xf32>
    %cst_354 = arith.constant dense<0.000000e+00> : vector<2x16xf32>
    %841 = tpu.matmul %780, %793, %cst_354 {dimension_numbers = #tpu.dot_dimension_numbers<[1], [0], [0], [1], [0, 0, 1, 1], [], []>} : vector<2x32xf32>, vector<32x16xf32>, vector<2x16xf32> -> vector<2x16xf32>
    %842 = vector.broadcast %805 : vector<1x16xf32> to vector<2x16xf32>
    %843 = arith.addf %841, %842 : vector<2x16xf32>
    %cst_355 = arith.constant dense<0.000000e+00> : vector<2x16xf32>
    %844 = tpu.matmul %812, %799, %cst_355 {dimension_numbers = #tpu.dot_dimension_numbers<[1], [0], [0], [1], [0, 0, 1, 1], [], []>} : vector<2x16xf32>, vector<16x16xf32>, vector<2x16xf32> -> vector<2x16xf32>
    %845 = vector.broadcast %811 : vector<1x16xf32> to vector<2x16xf32>
    %846 = arith.addf %844, %845 : vector<2x16xf32>
    %847 = arith.mulf %826, %846 : vector<2x16xf32>
    %848 = arith.addf %843, %847 : vector<2x16xf32>
    %849 = math.tanh %848 : vector<2x16xf32>
    %cst_356 = arith.constant 1.000000e+00 : f32
    %850 = vector.broadcast %cst_356 : f32 to vector<2x16xf32>
    %851 = arith.subf %850, %840 : vector<2x16xf32>
    %852 = arith.mulf %851, %849 : vector<2x16xf32>
    %853 = arith.mulf %840, %812 : vector<2x16xf32>
    %854 = arith.addf %852, %853 : vector<2x16xf32>
    %cst_357 = arith.constant dense<0.000000e+00> : vector<2x16xf32>
    %855 = tpu.matmul %781, %789, %cst_357 {dimension_numbers = #tpu.dot_dimension_numbers<[1], [0], [0], [1], [0, 0, 1, 1], [], []>} : vector<2x32xf32>, vector<32x16xf32>, vector<2x16xf32> -> vector<2x16xf32>
    %856 = vector.broadcast %801 : vector<1x16xf32> to vector<2x16xf32>
    %857 = arith.addf %855, %856 : vector<2x16xf32>
    %cst_358 = arith.constant dense<0.000000e+00> : vector<2x16xf32>
    %858 = tpu.matmul %854, %795, %cst_358 {dimension_numbers = #tpu.dot_dimension_numbers<[1], [0], [0], [1], [0, 0, 1, 1], [], []>} : vector<2x16xf32>, vector<16x16xf32>, vector<2x16xf32> -> vector<2x16xf32>
    %859 = arith.addf %857, %858 : vector<2x16xf32>
    %860 = vector.broadcast %807 : vector<1x16xf32> to vector<2x16xf32>
    %861 = arith.addf %859, %860 : vector<2x16xf32>
    %cst_359 = arith.constant 0.000000e+00 : f32
    %862 = vector.broadcast %cst_359 : f32 to vector<2x16xf32>
    %863 = arith.subf %862, %861 : vector<2x16xf32>
    %864 = math.exp %863 : vector<2x16xf32>
    %cst_360 = arith.constant 1.000000e+00 : f32
    %865 = vector.broadcast %cst_360 : f32 to vector<2x16xf32>
    %866 = arith.addf %865, %864 : vector<2x16xf32>
    %cst_361 = arith.constant 1.000000e+00 : f32
    %867 = vector.broadcast %cst_361 : f32 to vector<2x16xf32>
    %868 = arith.divf %867, %866 : vector<2x16xf32>
    %cst_362 = arith.constant dense<0.000000e+00> : vector<2x16xf32>
    %869 = tpu.matmul %781, %791, %cst_362 {dimension_numbers = #tpu.dot_dimension_numbers<[1], [0], [0], [1], [0, 0, 1, 1], [], []>} : vector<2x32xf32>, vector<32x16xf32>, vector<2x16xf32> -> vector<2x16xf32>
    %870 = vector.broadcast %803 : vector<1x16xf32> to vector<2x16xf32>
    %871 = arith.addf %869, %870 : vector<2x16xf32>
    %cst_363 = arith.constant dense<0.000000e+00> : vector<2x16xf32>
    %872 = tpu.matmul %854, %797, %cst_363 {dimension_numbers = #tpu.dot_dimension_numbers<[1], [0], [0], [1], [0, 0, 1, 1], [], []>} : vector<2x16xf32>, vector<16x16xf32>, vector<2x16xf32> -> vector<2x16xf32>
    %873 = arith.addf %871, %872 : vector<2x16xf32>
    %874 = vector.broadcast %809 : vector<1x16xf32> to vector<2x16xf32>
    %875 = arith.addf %873, %874 : vector<2x16xf32>
    %cst_364 = arith.constant 0.000000e+00 : f32
    %876 = vector.broadcast %cst_364 : f32 to vector<2x16xf32>
    %877 = arith.subf %876, %875 : vector<2x16xf32>
    %878 = math.exp %877 : vector<2x16xf32>
    %cst_365 = arith.constant 1.000000e+00 : f32
    %879 = vector.broadcast %cst_365 : f32 to vector<2x16xf32>
    %880 = arith.addf %879, %878 : vector<2x16xf32>
    %cst_366 = arith.constant 1.000000e+00 : f32
    %881 = vector.broadcast %cst_366 : f32 to vector<2x16xf32>
    %882 = arith.divf %881, %880 : vector<2x16xf32>
    %cst_367 = arith.constant dense<0.000000e+00> : vector<2x16xf32>
    %883 = tpu.matmul %781, %793, %cst_367 {dimension_numbers = #tpu.dot_dimension_numbers<[1], [0], [0], [1], [0, 0, 1, 1], [], []>} : vector<2x32xf32>, vector<32x16xf32>, vector<2x16xf32> -> vector<2x16xf32>
    %884 = vector.broadcast %805 : vector<1x16xf32> to vector<2x16xf32>
    %885 = arith.addf %883, %884 : vector<2x16xf32>
    %cst_368 = arith.constant dense<0.000000e+00> : vector<2x16xf32>
    %886 = tpu.matmul %854, %799, %cst_368 {dimension_numbers = #tpu.dot_dimension_numbers<[1], [0], [0], [1], [0, 0, 1, 1], [], []>} : vector<2x16xf32>, vector<16x16xf32>, vector<2x16xf32> -> vector<2x16xf32>
    %887 = vector.broadcast %811 : vector<1x16xf32> to vector<2x16xf32>
    %888 = arith.addf %886, %887 : vector<2x16xf32>
    %889 = arith.mulf %868, %888 : vector<2x16xf32>
    %890 = arith.addf %885, %889 : vector<2x16xf32>
    %891 = math.tanh %890 : vector<2x16xf32>
    %cst_369 = arith.constant 1.000000e+00 : f32
    %892 = vector.broadcast %cst_369 : f32 to vector<2x16xf32>
    %893 = arith.subf %892, %882 : vector<2x16xf32>
    %894 = arith.mulf %893, %891 : vector<2x16xf32>
    %895 = arith.mulf %882, %854 : vector<2x16xf32>
    %896 = arith.addf %894, %895 : vector<2x16xf32>
    %cst_370 = arith.constant dense<0.000000e+00> : vector<2x16xf32>
    %897 = tpu.matmul %782, %789, %cst_370 {dimension_numbers = #tpu.dot_dimension_numbers<[1], [0], [0], [1], [0, 0, 1, 1], [], []>} : vector<2x32xf32>, vector<32x16xf32>, vector<2x16xf32> -> vector<2x16xf32>
    %898 = vector.broadcast %801 : vector<1x16xf32> to vector<2x16xf32>
    %899 = arith.addf %897, %898 : vector<2x16xf32>
    %cst_371 = arith.constant dense<0.000000e+00> : vector<2x16xf32>
    %900 = tpu.matmul %896, %795, %cst_371 {dimension_numbers = #tpu.dot_dimension_numbers<[1], [0], [0], [1], [0, 0, 1, 1], [], []>} : vector<2x16xf32>, vector<16x16xf32>, vector<2x16xf32> -> vector<2x16xf32>
    %901 = arith.addf %899, %900 : vector<2x16xf32>
    %902 = vector.broadcast %807 : vector<1x16xf32> to vector<2x16xf32>
    %903 = arith.addf %901, %902 : vector<2x16xf32>
    %cst_372 = arith.constant 0.000000e+00 : f32
    %904 = vector.broadcast %cst_372 : f32 to vector<2x16xf32>
    %905 = arith.subf %904, %903 : vector<2x16xf32>
    %906 = math.exp %905 : vector<2x16xf32>
    %cst_373 = arith.constant 1.000000e+00 : f32
    %907 = vector.broadcast %cst_373 : f32 to vector<2x16xf32>
    %908 = arith.addf %907, %906 : vector<2x16xf32>
    %cst_374 = arith.constant 1.000000e+00 : f32
    %909 = vector.broadcast %cst_374 : f32 to vector<2x16xf32>
    %910 = arith.divf %909, %908 : vector<2x16xf32>
    %cst_375 = arith.constant dense<0.000000e+00> : vector<2x16xf32>
    %911 = tpu.matmul %782, %791, %cst_375 {dimension_numbers = #tpu.dot_dimension_numbers<[1], [0], [0], [1], [0, 0, 1, 1], [], []>} : vector<2x32xf32>, vector<32x16xf32>, vector<2x16xf32> -> vector<2x16xf32>
    %912 = vector.broadcast %803 : vector<1x16xf32> to vector<2x16xf32>
    %913 = arith.addf %911, %912 : vector<2x16xf32>
    %cst_376 = arith.constant dense<0.000000e+00> : vector<2x16xf32>
    %914 = tpu.matmul %896, %797, %cst_376 {dimension_numbers = #tpu.dot_dimension_numbers<[1], [0], [0], [1], [0, 0, 1, 1], [], []>} : vector<2x16xf32>, vector<16x16xf32>, vector<2x16xf32> -> vector<2x16xf32>
    %915 = arith.addf %913, %914 : vector<2x16xf32>
    %916 = vector.broadcast %809 : vector<1x16xf32> to vector<2x16xf32>
    %917 = arith.addf %915, %916 : vector<2x16xf32>
    %cst_377 = arith.constant 0.000000e+00 : f32
    %918 = vector.broadcast %cst_377 : f32 to vector<2x16xf32>
    %919 = arith.subf %918, %917 : vector<2x16xf32>
    %920 = math.exp %919 : vector<2x16xf32>
    %cst_378 = arith.constant 1.000000e+00 : f32
    %921 = vector.broadcast %cst_378 : f32 to vector<2x16xf32>
    %922 = arith.addf %921, %920 : vector<2x16xf32>
    %cst_379 = arith.constant 1.000000e+00 : f32
    %923 = vector.broadcast %cst_379 : f32 to vector<2x16xf32>
    %924 = arith.divf %923, %922 : vector<2x16xf32>
    %cst_380 = arith.constant dense<0.000000e+00> : vector<2x16xf32>
    %925 = tpu.matmul %782, %793, %cst_380 {dimension_numbers = #tpu.dot_dimension_numbers<[1], [0], [0], [1], [0, 0, 1, 1], [], []>} : vector<2x32xf32>, vector<32x16xf32>, vector<2x16xf32> -> vector<2x16xf32>
    %926 = vector.broadcast %805 : vector<1x16xf32> to vector<2x16xf32>
    %927 = arith.addf %925, %926 : vector<2x16xf32>
    %cst_381 = arith.constant dense<0.000000e+00> : vector<2x16xf32>
    %928 = tpu.matmul %896, %799, %cst_381 {dimension_numbers = #tpu.dot_dimension_numbers<[1], [0], [0], [1], [0, 0, 1, 1], [], []>} : vector<2x16xf32>, vector<16x16xf32>, vector<2x16xf32> -> vector<2x16xf32>
    %929 = vector.broadcast %811 : vector<1x16xf32> to vector<2x16xf32>
    %930 = arith.addf %928, %929 : vector<2x16xf32>
    %931 = arith.mulf %910, %930 : vector<2x16xf32>
    %932 = arith.addf %927, %931 : vector<2x16xf32>
    %933 = math.tanh %932 : vector<2x16xf32>
    %cst_382 = arith.constant 1.000000e+00 : f32
    %934 = vector.broadcast %cst_382 : f32 to vector<2x16xf32>
    %935 = arith.subf %934, %924 : vector<2x16xf32>
    %936 = arith.mulf %935, %933 : vector<2x16xf32>
    %937 = arith.mulf %924, %896 : vector<2x16xf32>
    %938 = arith.addf %936, %937 : vector<2x16xf32>
    %cst_383 = arith.constant dense<0.000000e+00> : vector<2x16xf32>
    %939 = tpu.matmul %783, %789, %cst_383 {dimension_numbers = #tpu.dot_dimension_numbers<[1], [0], [0], [1], [0, 0, 1, 1], [], []>} : vector<2x32xf32>, vector<32x16xf32>, vector<2x16xf32> -> vector<2x16xf32>
    %940 = vector.broadcast %801 : vector<1x16xf32> to vector<2x16xf32>
    %941 = arith.addf %939, %940 : vector<2x16xf32>
    %cst_384 = arith.constant dense<0.000000e+00> : vector<2x16xf32>
    %942 = tpu.matmul %938, %795, %cst_384 {dimension_numbers = #tpu.dot_dimension_numbers<[1], [0], [0], [1], [0, 0, 1, 1], [], []>} : vector<2x16xf32>, vector<16x16xf32>, vector<2x16xf32> -> vector<2x16xf32>
    %943 = arith.addf %941, %942 : vector<2x16xf32>
    %944 = vector.broadcast %807 : vector<1x16xf32> to vector<2x16xf32>
    %945 = arith.addf %943, %944 : vector<2x16xf32>
    %cst_385 = arith.constant 0.000000e+00 : f32
    %946 = vector.broadcast %cst_385 : f32 to vector<2x16xf32>
    %947 = arith.subf %946, %945 : vector<2x16xf32>
    %948 = math.exp %947 : vector<2x16xf32>
    %cst_386 = arith.constant 1.000000e+00 : f32
    %949 = vector.broadcast %cst_386 : f32 to vector<2x16xf32>
    %950 = arith.addf %949, %948 : vector<2x16xf32>
    %cst_387 = arith.constant 1.000000e+00 : f32
    %951 = vector.broadcast %cst_387 : f32 to vector<2x16xf32>
    %952 = arith.divf %951, %950 : vector<2x16xf32>
    %cst_388 = arith.constant dense<0.000000e+00> : vector<2x16xf32>
    %953 = tpu.matmul %783, %791, %cst_388 {dimension_numbers = #tpu.dot_dimension_numbers<[1], [0], [0], [1], [0, 0, 1, 1], [], []>} : vector<2x32xf32>, vector<32x16xf32>, vector<2x16xf32> -> vector<2x16xf32>
    %954 = vector.broadcast %803 : vector<1x16xf32> to vector<2x16xf32>
    %955 = arith.addf %953, %954 : vector<2x16xf32>
    %cst_389 = arith.constant dense<0.000000e+00> : vector<2x16xf32>
    %956 = tpu.matmul %938, %797, %cst_389 {dimension_numbers = #tpu.dot_dimension_numbers<[1], [0], [0], [1], [0, 0, 1, 1], [], []>} : vector<2x16xf32>, vector<16x16xf32>, vector<2x16xf32> -> vector<2x16xf32>
    %957 = arith.addf %955, %956 : vector<2x16xf32>
    %958 = vector.broadcast %809 : vector<1x16xf32> to vector<2x16xf32>
    %959 = arith.addf %957, %958 : vector<2x16xf32>
    %cst_390 = arith.constant 0.000000e+00 : f32
    %960 = vector.broadcast %cst_390 : f32 to vector<2x16xf32>
    %961 = arith.subf %960, %959 : vector<2x16xf32>
    %962 = math.exp %961 : vector<2x16xf32>
    %cst_391 = arith.constant 1.000000e+00 : f32
    %963 = vector.broadcast %cst_391 : f32 to vector<2x16xf32>
    %964 = arith.addf %963, %962 : vector<2x16xf32>
    %cst_392 = arith.constant 1.000000e+00 : f32
    %965 = vector.broadcast %cst_392 : f32 to vector<2x16xf32>
    %966 = arith.divf %965, %964 : vector<2x16xf32>
    %cst_393 = arith.constant dense<0.000000e+00> : vector<2x16xf32>
    %967 = tpu.matmul %783, %793, %cst_393 {dimension_numbers = #tpu.dot_dimension_numbers<[1], [0], [0], [1], [0, 0, 1, 1], [], []>} : vector<2x32xf32>, vector<32x16xf32>, vector<2x16xf32> -> vector<2x16xf32>
    %968 = vector.broadcast %805 : vector<1x16xf32> to vector<2x16xf32>
    %969 = arith.addf %967, %968 : vector<2x16xf32>
    %cst_394 = arith.constant dense<0.000000e+00> : vector<2x16xf32>
    %970 = tpu.matmul %938, %799, %cst_394 {dimension_numbers = #tpu.dot_dimension_numbers<[1], [0], [0], [1], [0, 0, 1, 1], [], []>} : vector<2x16xf32>, vector<16x16xf32>, vector<2x16xf32> -> vector<2x16xf32>
    %971 = vector.broadcast %811 : vector<1x16xf32> to vector<2x16xf32>
    %972 = arith.addf %970, %971 : vector<2x16xf32>
    %973 = arith.mulf %952, %972 : vector<2x16xf32>
    %974 = arith.addf %969, %973 : vector<2x16xf32>
    %975 = math.tanh %974 : vector<2x16xf32>
    %cst_395 = arith.constant 1.000000e+00 : f32
    %976 = vector.broadcast %cst_395 : f32 to vector<2x16xf32>
    %977 = arith.subf %976, %966 : vector<2x16xf32>
    %978 = arith.mulf %977, %975 : vector<2x16xf32>
    %979 = arith.mulf %966, %938 : vector<2x16xf32>
    %980 = arith.addf %978, %979 : vector<2x16xf32>
    %cst_396 = arith.constant dense<0.000000e+00> : vector<2x16xf32>
    %981 = tpu.matmul %784, %789, %cst_396 {dimension_numbers = #tpu.dot_dimension_numbers<[1], [0], [0], [1], [0, 0, 1, 1], [], []>} : vector<2x32xf32>, vector<32x16xf32>, vector<2x16xf32> -> vector<2x16xf32>
    %982 = vector.broadcast %801 : vector<1x16xf32> to vector<2x16xf32>
    %983 = arith.addf %981, %982 : vector<2x16xf32>
    %cst_397 = arith.constant dense<0.000000e+00> : vector<2x16xf32>
    %984 = tpu.matmul %980, %795, %cst_397 {dimension_numbers = #tpu.dot_dimension_numbers<[1], [0], [0], [1], [0, 0, 1, 1], [], []>} : vector<2x16xf32>, vector<16x16xf32>, vector<2x16xf32> -> vector<2x16xf32>
    %985 = arith.addf %983, %984 : vector<2x16xf32>
    %986 = vector.broadcast %807 : vector<1x16xf32> to vector<2x16xf32>
    %987 = arith.addf %985, %986 : vector<2x16xf32>
    %cst_398 = arith.constant 0.000000e+00 : f32
    %988 = vector.broadcast %cst_398 : f32 to vector<2x16xf32>
    %989 = arith.subf %988, %987 : vector<2x16xf32>
    %990 = math.exp %989 : vector<2x16xf32>
    %cst_399 = arith.constant 1.000000e+00 : f32
    %991 = vector.broadcast %cst_399 : f32 to vector<2x16xf32>
    %992 = arith.addf %991, %990 : vector<2x16xf32>
    %cst_400 = arith.constant 1.000000e+00 : f32
    %993 = vector.broadcast %cst_400 : f32 to vector<2x16xf32>
    %994 = arith.divf %993, %992 : vector<2x16xf32>
    %cst_401 = arith.constant dense<0.000000e+00> : vector<2x16xf32>
    %995 = tpu.matmul %784, %791, %cst_401 {dimension_numbers = #tpu.dot_dimension_numbers<[1], [0], [0], [1], [0, 0, 1, 1], [], []>} : vector<2x32xf32>, vector<32x16xf32>, vector<2x16xf32> -> vector<2x16xf32>
    %996 = vector.broadcast %803 : vector<1x16xf32> to vector<2x16xf32>
    %997 = arith.addf %995, %996 : vector<2x16xf32>
    %cst_402 = arith.constant dense<0.000000e+00> : vector<2x16xf32>
    %998 = tpu.matmul %980, %797, %cst_402 {dimension_numbers = #tpu.dot_dimension_numbers<[1], [0], [0], [1], [0, 0, 1, 1], [], []>} : vector<2x16xf32>, vector<16x16xf32>, vector<2x16xf32> -> vector<2x16xf32>
    %999 = arith.addf %997, %998 : vector<2x16xf32>
    %1000 = vector.broadcast %809 : vector<1x16xf32> to vector<2x16xf32>
    %1001 = arith.addf %999, %1000 : vector<2x16xf32>
    %cst_403 = arith.constant 0.000000e+00 : f32
    %1002 = vector.broadcast %cst_403 : f32 to vector<2x16xf32>
    %1003 = arith.subf %1002, %1001 : vector<2x16xf32>
    %1004 = math.exp %1003 : vector<2x16xf32>
    %cst_404 = arith.constant 1.000000e+00 : f32
    %1005 = vector.broadcast %cst_404 : f32 to vector<2x16xf32>
    %1006 = arith.addf %1005, %1004 : vector<2x16xf32>
    %cst_405 = arith.constant 1.000000e+00 : f32
    %1007 = vector.broadcast %cst_405 : f32 to vector<2x16xf32>
    %1008 = arith.divf %1007, %1006 : vector<2x16xf32>
    %cst_406 = arith.constant dense<0.000000e+00> : vector<2x16xf32>
    %1009 = tpu.matmul %784, %793, %cst_406 {dimension_numbers = #tpu.dot_dimension_numbers<[1], [0], [0], [1], [0, 0, 1, 1], [], []>} : vector<2x32xf32>, vector<32x16xf32>, vector<2x16xf32> -> vector<2x16xf32>
    %1010 = vector.broadcast %805 : vector<1x16xf32> to vector<2x16xf32>
    %1011 = arith.addf %1009, %1010 : vector<2x16xf32>
    %cst_407 = arith.constant dense<0.000000e+00> : vector<2x16xf32>
    %1012 = tpu.matmul %980, %799, %cst_407 {dimension_numbers = #tpu.dot_dimension_numbers<[1], [0], [0], [1], [0, 0, 1, 1], [], []>} : vector<2x16xf32>, vector<16x16xf32>, vector<2x16xf32> -> vector<2x16xf32>
    %1013 = vector.broadcast %811 : vector<1x16xf32> to vector<2x16xf32>
    %1014 = arith.addf %1012, %1013 : vector<2x16xf32>
    %1015 = arith.mulf %994, %1014 : vector<2x16xf32>
    %1016 = arith.addf %1011, %1015 : vector<2x16xf32>
    %1017 = math.tanh %1016 : vector<2x16xf32>
    %cst_408 = arith.constant 1.000000e+00 : f32
    %1018 = vector.broadcast %cst_408 : f32 to vector<2x16xf32>
    %1019 = arith.subf %1018, %1008 : vector<2x16xf32>
    %1020 = arith.mulf %1019, %1017 : vector<2x16xf32>
    %1021 = arith.mulf %1008, %980 : vector<2x16xf32>
    %1022 = arith.addf %1020, %1021 : vector<2x16xf32>
    %cst_409 = arith.constant dense<0.000000e+00> : vector<2x16xf32>
    %1023 = tpu.matmul %785, %789, %cst_409 {dimension_numbers = #tpu.dot_dimension_numbers<[1], [0], [0], [1], [0, 0, 1, 1], [], []>} : vector<2x32xf32>, vector<32x16xf32>, vector<2x16xf32> -> vector<2x16xf32>
    %1024 = vector.broadcast %801 : vector<1x16xf32> to vector<2x16xf32>
    %1025 = arith.addf %1023, %1024 : vector<2x16xf32>
    %cst_410 = arith.constant dense<0.000000e+00> : vector<2x16xf32>
    %1026 = tpu.matmul %1022, %795, %cst_410 {dimension_numbers = #tpu.dot_dimension_numbers<[1], [0], [0], [1], [0, 0, 1, 1], [], []>} : vector<2x16xf32>, vector<16x16xf32>, vector<2x16xf32> -> vector<2x16xf32>
    %1027 = arith.addf %1025, %1026 : vector<2x16xf32>
    %1028 = vector.broadcast %807 : vector<1x16xf32> to vector<2x16xf32>
    %1029 = arith.addf %1027, %1028 : vector<2x16xf32>
    %cst_411 = arith.constant 0.000000e+00 : f32
    %1030 = vector.broadcast %cst_411 : f32 to vector<2x16xf32>
    %1031 = arith.subf %1030, %1029 : vector<2x16xf32>
    %1032 = math.exp %1031 : vector<2x16xf32>
    %cst_412 = arith.constant 1.000000e+00 : f32
    %1033 = vector.broadcast %cst_412 : f32 to vector<2x16xf32>
    %1034 = arith.addf %1033, %1032 : vector<2x16xf32>
    %cst_413 = arith.constant 1.000000e+00 : f32
    %1035 = vector.broadcast %cst_413 : f32 to vector<2x16xf32>
    %1036 = arith.divf %1035, %1034 : vector<2x16xf32>
    %cst_414 = arith.constant dense<0.000000e+00> : vector<2x16xf32>
    %1037 = tpu.matmul %785, %791, %cst_414 {dimension_numbers = #tpu.dot_dimension_numbers<[1], [0], [0], [1], [0, 0, 1, 1], [], []>} : vector<2x32xf32>, vector<32x16xf32>, vector<2x16xf32> -> vector<2x16xf32>
    %1038 = vector.broadcast %803 : vector<1x16xf32> to vector<2x16xf32>
    %1039 = arith.addf %1037, %1038 : vector<2x16xf32>
    %cst_415 = arith.constant dense<0.000000e+00> : vector<2x16xf32>
    %1040 = tpu.matmul %1022, %797, %cst_415 {dimension_numbers = #tpu.dot_dimension_numbers<[1], [0], [0], [1], [0, 0, 1, 1], [], []>} : vector<2x16xf32>, vector<16x16xf32>, vector<2x16xf32> -> vector<2x16xf32>
    %1041 = arith.addf %1039, %1040 : vector<2x16xf32>
    %1042 = vector.broadcast %809 : vector<1x16xf32> to vector<2x16xf32>
    %1043 = arith.addf %1041, %1042 : vector<2x16xf32>
    %cst_416 = arith.constant 0.000000e+00 : f32
    %1044 = vector.broadcast %cst_416 : f32 to vector<2x16xf32>
    %1045 = arith.subf %1044, %1043 : vector<2x16xf32>
    %1046 = math.exp %1045 : vector<2x16xf32>
    %cst_417 = arith.constant 1.000000e+00 : f32
    %1047 = vector.broadcast %cst_417 : f32 to vector<2x16xf32>
    %1048 = arith.addf %1047, %1046 : vector<2x16xf32>
    %cst_418 = arith.constant 1.000000e+00 : f32
    %1049 = vector.broadcast %cst_418 : f32 to vector<2x16xf32>
    %1050 = arith.divf %1049, %1048 : vector<2x16xf32>
    %cst_419 = arith.constant dense<0.000000e+00> : vector<2x16xf32>
    %1051 = tpu.matmul %785, %793, %cst_419 {dimension_numbers = #tpu.dot_dimension_numbers<[1], [0], [0], [1], [0, 0, 1, 1], [], []>} : vector<2x32xf32>, vector<32x16xf32>, vector<2x16xf32> -> vector<2x16xf32>
    %1052 = vector.broadcast %805 : vector<1x16xf32> to vector<2x16xf32>
    %1053 = arith.addf %1051, %1052 : vector<2x16xf32>
    %cst_420 = arith.constant dense<0.000000e+00> : vector<2x16xf32>
    %1054 = tpu.matmul %1022, %799, %cst_420 {dimension_numbers = #tpu.dot_dimension_numbers<[1], [0], [0], [1], [0, 0, 1, 1], [], []>} : vector<2x16xf32>, vector<16x16xf32>, vector<2x16xf32> -> vector<2x16xf32>
    %1055 = vector.broadcast %811 : vector<1x16xf32> to vector<2x16xf32>
    %1056 = arith.addf %1054, %1055 : vector<2x16xf32>
    %1057 = arith.mulf %1036, %1056 : vector<2x16xf32>
    %1058 = arith.addf %1053, %1057 : vector<2x16xf32>
    %1059 = math.tanh %1058 : vector<2x16xf32>
    %cst_421 = arith.constant 1.000000e+00 : f32
    %1060 = vector.broadcast %cst_421 : f32 to vector<2x16xf32>
    %1061 = arith.subf %1060, %1050 : vector<2x16xf32>
    %1062 = arith.mulf %1061, %1059 : vector<2x16xf32>
    %1063 = arith.mulf %1050, %1022 : vector<2x16xf32>
    %1064 = arith.addf %1062, %1063 : vector<2x16xf32>
    %cst_422 = arith.constant dense<0.000000e+00> : vector<2x16xf32>
    %1065 = tpu.matmul %786, %789, %cst_422 {dimension_numbers = #tpu.dot_dimension_numbers<[1], [0], [0], [1], [0, 0, 1, 1], [], []>} : vector<2x32xf32>, vector<32x16xf32>, vector<2x16xf32> -> vector<2x16xf32>
    %1066 = vector.broadcast %801 : vector<1x16xf32> to vector<2x16xf32>
    %1067 = arith.addf %1065, %1066 : vector<2x16xf32>
    %cst_423 = arith.constant dense<0.000000e+00> : vector<2x16xf32>
    %1068 = tpu.matmul %1064, %795, %cst_423 {dimension_numbers = #tpu.dot_dimension_numbers<[1], [0], [0], [1], [0, 0, 1, 1], [], []>} : vector<2x16xf32>, vector<16x16xf32>, vector<2x16xf32> -> vector<2x16xf32>
    %1069 = arith.addf %1067, %1068 : vector<2x16xf32>
    %1070 = vector.broadcast %807 : vector<1x16xf32> to vector<2x16xf32>
    %1071 = arith.addf %1069, %1070 : vector<2x16xf32>
    %cst_424 = arith.constant 0.000000e+00 : f32
    %1072 = vector.broadcast %cst_424 : f32 to vector<2x16xf32>
    %1073 = arith.subf %1072, %1071 : vector<2x16xf32>
    %1074 = math.exp %1073 : vector<2x16xf32>
    %cst_425 = arith.constant 1.000000e+00 : f32
    %1075 = vector.broadcast %cst_425 : f32 to vector<2x16xf32>
    %1076 = arith.addf %1075, %1074 : vector<2x16xf32>
    %cst_426 = arith.constant 1.000000e+00 : f32
    %1077 = vector.broadcast %cst_426 : f32 to vector<2x16xf32>
    %1078 = arith.divf %1077, %1076 : vector<2x16xf32>
    %cst_427 = arith.constant dense<0.000000e+00> : vector<2x16xf32>
    %1079 = tpu.matmul %786, %791, %cst_427 {dimension_numbers = #tpu.dot_dimension_numbers<[1], [0], [0], [1], [0, 0, 1, 1], [], []>} : vector<2x32xf32>, vector<32x16xf32>, vector<2x16xf32> -> vector<2x16xf32>
    %1080 = vector.broadcast %803 : vector<1x16xf32> to vector<2x16xf32>
    %1081 = arith.addf %1079, %1080 : vector<2x16xf32>
    %cst_428 = arith.constant dense<0.000000e+00> : vector<2x16xf32>
    %1082 = tpu.matmul %1064, %797, %cst_428 {dimension_numbers = #tpu.dot_dimension_numbers<[1], [0], [0], [1], [0, 0, 1, 1], [], []>} : vector<2x16xf32>, vector<16x16xf32>, vector<2x16xf32> -> vector<2x16xf32>
    %1083 = arith.addf %1081, %1082 : vector<2x16xf32>
    %1084 = vector.broadcast %809 : vector<1x16xf32> to vector<2x16xf32>
    %1085 = arith.addf %1083, %1084 : vector<2x16xf32>
    %cst_429 = arith.constant 0.000000e+00 : f32
    %1086 = vector.broadcast %cst_429 : f32 to vector<2x16xf32>
    %1087 = arith.subf %1086, %1085 : vector<2x16xf32>
    %1088 = math.exp %1087 : vector<2x16xf32>
    %cst_430 = arith.constant 1.000000e+00 : f32
    %1089 = vector.broadcast %cst_430 : f32 to vector<2x16xf32>
    %1090 = arith.addf %1089, %1088 : vector<2x16xf32>
    %cst_431 = arith.constant 1.000000e+00 : f32
    %1091 = vector.broadcast %cst_431 : f32 to vector<2x16xf32>
    %1092 = arith.divf %1091, %1090 : vector<2x16xf32>
    %cst_432 = arith.constant dense<0.000000e+00> : vector<2x16xf32>
    %1093 = tpu.matmul %786, %793, %cst_432 {dimension_numbers = #tpu.dot_dimension_numbers<[1], [0], [0], [1], [0, 0, 1, 1], [], []>} : vector<2x32xf32>, vector<32x16xf32>, vector<2x16xf32> -> vector<2x16xf32>
    %1094 = vector.broadcast %805 : vector<1x16xf32> to vector<2x16xf32>
    %1095 = arith.addf %1093, %1094 : vector<2x16xf32>
    %cst_433 = arith.constant dense<0.000000e+00> : vector<2x16xf32>
    %1096 = tpu.matmul %1064, %799, %cst_433 {dimension_numbers = #tpu.dot_dimension_numbers<[1], [0], [0], [1], [0, 0, 1, 1], [], []>} : vector<2x16xf32>, vector<16x16xf32>, vector<2x16xf32> -> vector<2x16xf32>
    %1097 = vector.broadcast %811 : vector<1x16xf32> to vector<2x16xf32>
    %1098 = arith.addf %1096, %1097 : vector<2x16xf32>
    %1099 = arith.mulf %1078, %1098 : vector<2x16xf32>
    %1100 = arith.addf %1095, %1099 : vector<2x16xf32>
    %1101 = math.tanh %1100 : vector<2x16xf32>
    %cst_434 = arith.constant 1.000000e+00 : f32
    %1102 = vector.broadcast %cst_434 : f32 to vector<2x16xf32>
    %1103 = arith.subf %1102, %1092 : vector<2x16xf32>
    %1104 = arith.mulf %1103, %1101 : vector<2x16xf32>
    %1105 = arith.mulf %1092, %1064 : vector<2x16xf32>
    %1106 = arith.addf %1104, %1105 : vector<2x16xf32>
    %cst_435 = arith.constant dense<0.000000e+00> : vector<2x16xf32>
    %1107 = tpu.matmul %787, %789, %cst_435 {dimension_numbers = #tpu.dot_dimension_numbers<[1], [0], [0], [1], [0, 0, 1, 1], [], []>} : vector<2x32xf32>, vector<32x16xf32>, vector<2x16xf32> -> vector<2x16xf32>
    %1108 = vector.broadcast %801 : vector<1x16xf32> to vector<2x16xf32>
    %1109 = arith.addf %1107, %1108 : vector<2x16xf32>
    %cst_436 = arith.constant dense<0.000000e+00> : vector<2x16xf32>
    %1110 = tpu.matmul %1106, %795, %cst_436 {dimension_numbers = #tpu.dot_dimension_numbers<[1], [0], [0], [1], [0, 0, 1, 1], [], []>} : vector<2x16xf32>, vector<16x16xf32>, vector<2x16xf32> -> vector<2x16xf32>
    %1111 = arith.addf %1109, %1110 : vector<2x16xf32>
    %1112 = vector.broadcast %807 : vector<1x16xf32> to vector<2x16xf32>
    %1113 = arith.addf %1111, %1112 : vector<2x16xf32>
    %cst_437 = arith.constant 0.000000e+00 : f32
    %1114 = vector.broadcast %cst_437 : f32 to vector<2x16xf32>
    %1115 = arith.subf %1114, %1113 : vector<2x16xf32>
    %1116 = math.exp %1115 : vector<2x16xf32>
    %cst_438 = arith.constant 1.000000e+00 : f32
    %1117 = vector.broadcast %cst_438 : f32 to vector<2x16xf32>
    %1118 = arith.addf %1117, %1116 : vector<2x16xf32>
    %cst_439 = arith.constant 1.000000e+00 : f32
    %1119 = vector.broadcast %cst_439 : f32 to vector<2x16xf32>
    %1120 = arith.divf %1119, %1118 : vector<2x16xf32>
    %cst_440 = arith.constant dense<0.000000e+00> : vector<2x16xf32>
    %1121 = tpu.matmul %787, %791, %cst_440 {dimension_numbers = #tpu.dot_dimension_numbers<[1], [0], [0], [1], [0, 0, 1, 1], [], []>} : vector<2x32xf32>, vector<32x16xf32>, vector<2x16xf32> -> vector<2x16xf32>
    %1122 = vector.broadcast %803 : vector<1x16xf32> to vector<2x16xf32>
    %1123 = arith.addf %1121, %1122 : vector<2x16xf32>
    %cst_441 = arith.constant dense<0.000000e+00> : vector<2x16xf32>
    %1124 = tpu.matmul %1106, %797, %cst_441 {dimension_numbers = #tpu.dot_dimension_numbers<[1], [0], [0], [1], [0, 0, 1, 1], [], []>} : vector<2x16xf32>, vector<16x16xf32>, vector<2x16xf32> -> vector<2x16xf32>
    %1125 = arith.addf %1123, %1124 : vector<2x16xf32>
    %1126 = vector.broadcast %809 : vector<1x16xf32> to vector<2x16xf32>
    %1127 = arith.addf %1125, %1126 : vector<2x16xf32>
    %cst_442 = arith.constant 0.000000e+00 : f32
    %1128 = vector.broadcast %cst_442 : f32 to vector<2x16xf32>
    %1129 = arith.subf %1128, %1127 : vector<2x16xf32>
    %1130 = math.exp %1129 : vector<2x16xf32>
    %cst_443 = arith.constant 1.000000e+00 : f32
    %1131 = vector.broadcast %cst_443 : f32 to vector<2x16xf32>
    %1132 = arith.addf %1131, %1130 : vector<2x16xf32>
    %cst_444 = arith.constant 1.000000e+00 : f32
    %1133 = vector.broadcast %cst_444 : f32 to vector<2x16xf32>
    %1134 = arith.divf %1133, %1132 : vector<2x16xf32>
    %cst_445 = arith.constant dense<0.000000e+00> : vector<2x16xf32>
    %1135 = tpu.matmul %787, %793, %cst_445 {dimension_numbers = #tpu.dot_dimension_numbers<[1], [0], [0], [1], [0, 0, 1, 1], [], []>} : vector<2x32xf32>, vector<32x16xf32>, vector<2x16xf32> -> vector<2x16xf32>
    %1136 = vector.broadcast %805 : vector<1x16xf32> to vector<2x16xf32>
    %1137 = arith.addf %1135, %1136 : vector<2x16xf32>
    %cst_446 = arith.constant dense<0.000000e+00> : vector<2x16xf32>
    %1138 = tpu.matmul %1106, %799, %cst_446 {dimension_numbers = #tpu.dot_dimension_numbers<[1], [0], [0], [1], [0, 0, 1, 1], [], []>} : vector<2x16xf32>, vector<16x16xf32>, vector<2x16xf32> -> vector<2x16xf32>
    %1139 = vector.broadcast %811 : vector<1x16xf32> to vector<2x16xf32>
    %1140 = arith.addf %1138, %1139 : vector<2x16xf32>
    %1141 = arith.mulf %1120, %1140 : vector<2x16xf32>
    %1142 = arith.addf %1137, %1141 : vector<2x16xf32>
    %1143 = math.tanh %1142 : vector<2x16xf32>
    %cst_447 = arith.constant 1.000000e+00 : f32
    %1144 = vector.broadcast %cst_447 : f32 to vector<2x16xf32>
    %1145 = arith.subf %1144, %1134 : vector<2x16xf32>
    %1146 = arith.mulf %1145, %1143 : vector<2x16xf32>
    %1147 = arith.mulf %1134, %1106 : vector<2x16xf32>
    %1148 = arith.addf %1146, %1147 : vector<2x16xf32>
    %c3_448 = arith.constant 3 : index
    %c0_449 = arith.constant 0 : index
    %c0_450 = arith.constant 0 : index
    %1149 = vector.load %arg3[%c3_448, %c0_449, %c0_450] : memref<4x32x16xf32, #tpu.memory_space<vmem>>, vector<1x32x16xf32>
    %1150 = vector.shape_cast %1149 : vector<1x32x16xf32> to vector<32x16xf32>
    %c3_451 = arith.constant 3 : index
    %c0_452 = arith.constant 0 : index
    %c0_453 = arith.constant 0 : index
    %1151 = vector.load %arg4[%c3_451, %c0_452, %c0_453] : memref<4x32x16xf32, #tpu.memory_space<vmem>>, vector<1x32x16xf32>
    %1152 = vector.shape_cast %1151 : vector<1x32x16xf32> to vector<32x16xf32>
    %c3_454 = arith.constant 3 : index
    %c0_455 = arith.constant 0 : index
    %c0_456 = arith.constant 0 : index
    %1153 = vector.load %arg5[%c3_454, %c0_455, %c0_456] : memref<4x32x16xf32, #tpu.memory_space<vmem>>, vector<1x32x16xf32>
    %1154 = vector.shape_cast %1153 : vector<1x32x16xf32> to vector<32x16xf32>
    %c3_457 = arith.constant 3 : index
    %c0_458 = arith.constant 0 : index
    %c0_459 = arith.constant 0 : index
    %1155 = vector.load %arg6[%c3_457, %c0_458, %c0_459] : memref<4x16x16xf32, #tpu.memory_space<vmem>>, vector<1x16x16xf32>
    %1156 = vector.shape_cast %1155 : vector<1x16x16xf32> to vector<16x16xf32>
    %c3_460 = arith.constant 3 : index
    %c0_461 = arith.constant 0 : index
    %c0_462 = arith.constant 0 : index
    %1157 = vector.load %arg7[%c3_460, %c0_461, %c0_462] : memref<4x16x16xf32, #tpu.memory_space<vmem>>, vector<1x16x16xf32>
    %1158 = vector.shape_cast %1157 : vector<1x16x16xf32> to vector<16x16xf32>
    %c3_463 = arith.constant 3 : index
    %c0_464 = arith.constant 0 : index
    %c0_465 = arith.constant 0 : index
    %1159 = vector.load %arg8[%c3_463, %c0_464, %c0_465] : memref<4x16x16xf32, #tpu.memory_space<vmem>>, vector<1x16x16xf32>
    %1160 = vector.shape_cast %1159 : vector<1x16x16xf32> to vector<16x16xf32>
    %c3_466 = arith.constant 3 : index
    %c0_467 = arith.constant 0 : index
    %c0_468 = arith.constant 0 : index
    %1161 = vector.load %arg9[%c3_466, %c0_467, %c0_468] : memref<4x1x16xf32, #tpu.memory_space<vmem>>, vector<1x1x16xf32>
    %1162 = vector.shape_cast %1161 : vector<1x1x16xf32> to vector<1x16xf32>
    %c3_469 = arith.constant 3 : index
    %c0_470 = arith.constant 0 : index
    %c0_471 = arith.constant 0 : index
    %1163 = vector.load %arg10[%c3_469, %c0_470, %c0_471] : memref<4x1x16xf32, #tpu.memory_space<vmem>>, vector<1x1x16xf32>
    %1164 = vector.shape_cast %1163 : vector<1x1x16xf32> to vector<1x16xf32>
    %c3_472 = arith.constant 3 : index
    %c0_473 = arith.constant 0 : index
    %c0_474 = arith.constant 0 : index
    %1165 = vector.load %arg11[%c3_472, %c0_473, %c0_474] : memref<4x1x16xf32, #tpu.memory_space<vmem>>, vector<1x1x16xf32>
    %1166 = vector.shape_cast %1165 : vector<1x1x16xf32> to vector<1x16xf32>
    %c3_475 = arith.constant 3 : index
    %c0_476 = arith.constant 0 : index
    %c0_477 = arith.constant 0 : index
    %1167 = vector.load %arg12[%c3_475, %c0_476, %c0_477] : memref<4x1x16xf32, #tpu.memory_space<vmem>>, vector<1x1x16xf32>
    %1168 = vector.shape_cast %1167 : vector<1x1x16xf32> to vector<1x16xf32>
    %c3_478 = arith.constant 3 : index
    %c0_479 = arith.constant 0 : index
    %c0_480 = arith.constant 0 : index
    %1169 = vector.load %arg13[%c3_478, %c0_479, %c0_480] : memref<4x1x16xf32, #tpu.memory_space<vmem>>, vector<1x1x16xf32>
    %1170 = vector.shape_cast %1169 : vector<1x1x16xf32> to vector<1x16xf32>
    %c3_481 = arith.constant 3 : index
    %c0_482 = arith.constant 0 : index
    %c0_483 = arith.constant 0 : index
    %1171 = vector.load %arg14[%c3_481, %c0_482, %c0_483] : memref<4x1x16xf32, #tpu.memory_space<vmem>>, vector<1x1x16xf32>
    %1172 = vector.shape_cast %1171 : vector<1x1x16xf32> to vector<1x16xf32>
    %cst_484 = arith.constant 0.000000e+00 : f32
    %1173 = vector.broadcast %cst_484 : f32 to vector<2x16xf32>
    %cst_485 = arith.constant dense<0.000000e+00> : vector<2x16xf32>
    %1174 = tpu.matmul %787, %1150, %cst_485 {dimension_numbers = #tpu.dot_dimension_numbers<[1], [0], [0], [1], [0, 0, 1, 1], [], []>} : vector<2x32xf32>, vector<32x16xf32>, vector<2x16xf32> -> vector<2x16xf32>
    %1175 = vector.broadcast %1162 : vector<1x16xf32> to vector<2x16xf32>
    %1176 = arith.addf %1174, %1175 : vector<2x16xf32>
    %cst_486 = arith.constant dense<0.000000e+00> : vector<2x16xf32>
    %1177 = tpu.matmul %1173, %1156, %cst_486 {dimension_numbers = #tpu.dot_dimension_numbers<[1], [0], [0], [1], [0, 0, 1, 1], [], []>} : vector<2x16xf32>, vector<16x16xf32>, vector<2x16xf32> -> vector<2x16xf32>
    %1178 = arith.addf %1176, %1177 : vector<2x16xf32>
    %1179 = vector.broadcast %1168 : vector<1x16xf32> to vector<2x16xf32>
    %1180 = arith.addf %1178, %1179 : vector<2x16xf32>
    %cst_487 = arith.constant 0.000000e+00 : f32
    %1181 = vector.broadcast %cst_487 : f32 to vector<2x16xf32>
    %1182 = arith.subf %1181, %1180 : vector<2x16xf32>
    %1183 = math.exp %1182 : vector<2x16xf32>
    %cst_488 = arith.constant 1.000000e+00 : f32
    %1184 = vector.broadcast %cst_488 : f32 to vector<2x16xf32>
    %1185 = arith.addf %1184, %1183 : vector<2x16xf32>
    %cst_489 = arith.constant 1.000000e+00 : f32
    %1186 = vector.broadcast %cst_489 : f32 to vector<2x16xf32>
    %1187 = arith.divf %1186, %1185 : vector<2x16xf32>
    %cst_490 = arith.constant dense<0.000000e+00> : vector<2x16xf32>
    %1188 = tpu.matmul %787, %1152, %cst_490 {dimension_numbers = #tpu.dot_dimension_numbers<[1], [0], [0], [1], [0, 0, 1, 1], [], []>} : vector<2x32xf32>, vector<32x16xf32>, vector<2x16xf32> -> vector<2x16xf32>
    %1189 = vector.broadcast %1164 : vector<1x16xf32> to vector<2x16xf32>
    %1190 = arith.addf %1188, %1189 : vector<2x16xf32>
    %cst_491 = arith.constant dense<0.000000e+00> : vector<2x16xf32>
    %1191 = tpu.matmul %1173, %1158, %cst_491 {dimension_numbers = #tpu.dot_dimension_numbers<[1], [0], [0], [1], [0, 0, 1, 1], [], []>} : vector<2x16xf32>, vector<16x16xf32>, vector<2x16xf32> -> vector<2x16xf32>
    %1192 = arith.addf %1190, %1191 : vector<2x16xf32>
    %1193 = vector.broadcast %1170 : vector<1x16xf32> to vector<2x16xf32>
    %1194 = arith.addf %1192, %1193 : vector<2x16xf32>
    %cst_492 = arith.constant 0.000000e+00 : f32
    %1195 = vector.broadcast %cst_492 : f32 to vector<2x16xf32>
    %1196 = arith.subf %1195, %1194 : vector<2x16xf32>
    %1197 = math.exp %1196 : vector<2x16xf32>
    %cst_493 = arith.constant 1.000000e+00 : f32
    %1198 = vector.broadcast %cst_493 : f32 to vector<2x16xf32>
    %1199 = arith.addf %1198, %1197 : vector<2x16xf32>
    %cst_494 = arith.constant 1.000000e+00 : f32
    %1200 = vector.broadcast %cst_494 : f32 to vector<2x16xf32>
    %1201 = arith.divf %1200, %1199 : vector<2x16xf32>
    %cst_495 = arith.constant dense<0.000000e+00> : vector<2x16xf32>
    %1202 = tpu.matmul %787, %1154, %cst_495 {dimension_numbers = #tpu.dot_dimension_numbers<[1], [0], [0], [1], [0, 0, 1, 1], [], []>} : vector<2x32xf32>, vector<32x16xf32>, vector<2x16xf32> -> vector<2x16xf32>
    %1203 = vector.broadcast %1166 : vector<1x16xf32> to vector<2x16xf32>
    %1204 = arith.addf %1202, %1203 : vector<2x16xf32>
    %cst_496 = arith.constant dense<0.000000e+00> : vector<2x16xf32>
    %1205 = tpu.matmul %1173, %1160, %cst_496 {dimension_numbers = #tpu.dot_dimension_numbers<[1], [0], [0], [1], [0, 0, 1, 1], [], []>} : vector<2x16xf32>, vector<16x16xf32>, vector<2x16xf32> -> vector<2x16xf32>
    %1206 = vector.broadcast %1172 : vector<1x16xf32> to vector<2x16xf32>
    %1207 = arith.addf %1205, %1206 : vector<2x16xf32>
    %1208 = arith.mulf %1187, %1207 : vector<2x16xf32>
    %1209 = arith.addf %1204, %1208 : vector<2x16xf32>
    %1210 = math.tanh %1209 : vector<2x16xf32>
    %cst_497 = arith.constant 1.000000e+00 : f32
    %1211 = vector.broadcast %cst_497 : f32 to vector<2x16xf32>
    %1212 = arith.subf %1211, %1201 : vector<2x16xf32>
    %1213 = arith.mulf %1212, %1210 : vector<2x16xf32>
    %1214 = arith.mulf %1201, %1173 : vector<2x16xf32>
    %1215 = arith.addf %1213, %1214 : vector<2x16xf32>
    %cst_498 = arith.constant dense<0.000000e+00> : vector<2x16xf32>
    %1216 = tpu.matmul %786, %1150, %cst_498 {dimension_numbers = #tpu.dot_dimension_numbers<[1], [0], [0], [1], [0, 0, 1, 1], [], []>} : vector<2x32xf32>, vector<32x16xf32>, vector<2x16xf32> -> vector<2x16xf32>
    %1217 = vector.broadcast %1162 : vector<1x16xf32> to vector<2x16xf32>
    %1218 = arith.addf %1216, %1217 : vector<2x16xf32>
    %cst_499 = arith.constant dense<0.000000e+00> : vector<2x16xf32>
    %1219 = tpu.matmul %1215, %1156, %cst_499 {dimension_numbers = #tpu.dot_dimension_numbers<[1], [0], [0], [1], [0, 0, 1, 1], [], []>} : vector<2x16xf32>, vector<16x16xf32>, vector<2x16xf32> -> vector<2x16xf32>
    %1220 = arith.addf %1218, %1219 : vector<2x16xf32>
    %1221 = vector.broadcast %1168 : vector<1x16xf32> to vector<2x16xf32>
    %1222 = arith.addf %1220, %1221 : vector<2x16xf32>
    %cst_500 = arith.constant 0.000000e+00 : f32
    %1223 = vector.broadcast %cst_500 : f32 to vector<2x16xf32>
    %1224 = arith.subf %1223, %1222 : vector<2x16xf32>
    %1225 = math.exp %1224 : vector<2x16xf32>
    %cst_501 = arith.constant 1.000000e+00 : f32
    %1226 = vector.broadcast %cst_501 : f32 to vector<2x16xf32>
    %1227 = arith.addf %1226, %1225 : vector<2x16xf32>
    %cst_502 = arith.constant 1.000000e+00 : f32
    %1228 = vector.broadcast %cst_502 : f32 to vector<2x16xf32>
    %1229 = arith.divf %1228, %1227 : vector<2x16xf32>
    %cst_503 = arith.constant dense<0.000000e+00> : vector<2x16xf32>
    %1230 = tpu.matmul %786, %1152, %cst_503 {dimension_numbers = #tpu.dot_dimension_numbers<[1], [0], [0], [1], [0, 0, 1, 1], [], []>} : vector<2x32xf32>, vector<32x16xf32>, vector<2x16xf32> -> vector<2x16xf32>
    %1231 = vector.broadcast %1164 : vector<1x16xf32> to vector<2x16xf32>
    %1232 = arith.addf %1230, %1231 : vector<2x16xf32>
    %cst_504 = arith.constant dense<0.000000e+00> : vector<2x16xf32>
    %1233 = tpu.matmul %1215, %1158, %cst_504 {dimension_numbers = #tpu.dot_dimension_numbers<[1], [0], [0], [1], [0, 0, 1, 1], [], []>} : vector<2x16xf32>, vector<16x16xf32>, vector<2x16xf32> -> vector<2x16xf32>
    %1234 = arith.addf %1232, %1233 : vector<2x16xf32>
    %1235 = vector.broadcast %1170 : vector<1x16xf32> to vector<2x16xf32>
    %1236 = arith.addf %1234, %1235 : vector<2x16xf32>
    %cst_505 = arith.constant 0.000000e+00 : f32
    %1237 = vector.broadcast %cst_505 : f32 to vector<2x16xf32>
    %1238 = arith.subf %1237, %1236 : vector<2x16xf32>
    %1239 = math.exp %1238 : vector<2x16xf32>
    %cst_506 = arith.constant 1.000000e+00 : f32
    %1240 = vector.broadcast %cst_506 : f32 to vector<2x16xf32>
    %1241 = arith.addf %1240, %1239 : vector<2x16xf32>
    %cst_507 = arith.constant 1.000000e+00 : f32
    %1242 = vector.broadcast %cst_507 : f32 to vector<2x16xf32>
    %1243 = arith.divf %1242, %1241 : vector<2x16xf32>
    %cst_508 = arith.constant dense<0.000000e+00> : vector<2x16xf32>
    %1244 = tpu.matmul %786, %1154, %cst_508 {dimension_numbers = #tpu.dot_dimension_numbers<[1], [0], [0], [1], [0, 0, 1, 1], [], []>} : vector<2x32xf32>, vector<32x16xf32>, vector<2x16xf32> -> vector<2x16xf32>
    %1245 = vector.broadcast %1166 : vector<1x16xf32> to vector<2x16xf32>
    %1246 = arith.addf %1244, %1245 : vector<2x16xf32>
    %cst_509 = arith.constant dense<0.000000e+00> : vector<2x16xf32>
    %1247 = tpu.matmul %1215, %1160, %cst_509 {dimension_numbers = #tpu.dot_dimension_numbers<[1], [0], [0], [1], [0, 0, 1, 1], [], []>} : vector<2x16xf32>, vector<16x16xf32>, vector<2x16xf32> -> vector<2x16xf32>
    %1248 = vector.broadcast %1172 : vector<1x16xf32> to vector<2x16xf32>
    %1249 = arith.addf %1247, %1248 : vector<2x16xf32>
    %1250 = arith.mulf %1229, %1249 : vector<2x16xf32>
    %1251 = arith.addf %1246, %1250 : vector<2x16xf32>
    %1252 = math.tanh %1251 : vector<2x16xf32>
    %cst_510 = arith.constant 1.000000e+00 : f32
    %1253 = vector.broadcast %cst_510 : f32 to vector<2x16xf32>
    %1254 = arith.subf %1253, %1243 : vector<2x16xf32>
    %1255 = arith.mulf %1254, %1252 : vector<2x16xf32>
    %1256 = arith.mulf %1243, %1215 : vector<2x16xf32>
    %1257 = arith.addf %1255, %1256 : vector<2x16xf32>
    %cst_511 = arith.constant dense<0.000000e+00> : vector<2x16xf32>
    %1258 = tpu.matmul %785, %1150, %cst_511 {dimension_numbers = #tpu.dot_dimension_numbers<[1], [0], [0], [1], [0, 0, 1, 1], [], []>} : vector<2x32xf32>, vector<32x16xf32>, vector<2x16xf32> -> vector<2x16xf32>
    %1259 = vector.broadcast %1162 : vector<1x16xf32> to vector<2x16xf32>
    %1260 = arith.addf %1258, %1259 : vector<2x16xf32>
    %cst_512 = arith.constant dense<0.000000e+00> : vector<2x16xf32>
    %1261 = tpu.matmul %1257, %1156, %cst_512 {dimension_numbers = #tpu.dot_dimension_numbers<[1], [0], [0], [1], [0, 0, 1, 1], [], []>} : vector<2x16xf32>, vector<16x16xf32>, vector<2x16xf32> -> vector<2x16xf32>
    %1262 = arith.addf %1260, %1261 : vector<2x16xf32>
    %1263 = vector.broadcast %1168 : vector<1x16xf32> to vector<2x16xf32>
    %1264 = arith.addf %1262, %1263 : vector<2x16xf32>
    %cst_513 = arith.constant 0.000000e+00 : f32
    %1265 = vector.broadcast %cst_513 : f32 to vector<2x16xf32>
    %1266 = arith.subf %1265, %1264 : vector<2x16xf32>
    %1267 = math.exp %1266 : vector<2x16xf32>
    %cst_514 = arith.constant 1.000000e+00 : f32
    %1268 = vector.broadcast %cst_514 : f32 to vector<2x16xf32>
    %1269 = arith.addf %1268, %1267 : vector<2x16xf32>
    %cst_515 = arith.constant 1.000000e+00 : f32
    %1270 = vector.broadcast %cst_515 : f32 to vector<2x16xf32>
    %1271 = arith.divf %1270, %1269 : vector<2x16xf32>
    %cst_516 = arith.constant dense<0.000000e+00> : vector<2x16xf32>
    %1272 = tpu.matmul %785, %1152, %cst_516 {dimension_numbers = #tpu.dot_dimension_numbers<[1], [0], [0], [1], [0, 0, 1, 1], [], []>} : vector<2x32xf32>, vector<32x16xf32>, vector<2x16xf32> -> vector<2x16xf32>
    %1273 = vector.broadcast %1164 : vector<1x16xf32> to vector<2x16xf32>
    %1274 = arith.addf %1272, %1273 : vector<2x16xf32>
    %cst_517 = arith.constant dense<0.000000e+00> : vector<2x16xf32>
    %1275 = tpu.matmul %1257, %1158, %cst_517 {dimension_numbers = #tpu.dot_dimension_numbers<[1], [0], [0], [1], [0, 0, 1, 1], [], []>} : vector<2x16xf32>, vector<16x16xf32>, vector<2x16xf32> -> vector<2x16xf32>
    %1276 = arith.addf %1274, %1275 : vector<2x16xf32>
    %1277 = vector.broadcast %1170 : vector<1x16xf32> to vector<2x16xf32>
    %1278 = arith.addf %1276, %1277 : vector<2x16xf32>
    %cst_518 = arith.constant 0.000000e+00 : f32
    %1279 = vector.broadcast %cst_518 : f32 to vector<2x16xf32>
    %1280 = arith.subf %1279, %1278 : vector<2x16xf32>
    %1281 = math.exp %1280 : vector<2x16xf32>
    %cst_519 = arith.constant 1.000000e+00 : f32
    %1282 = vector.broadcast %cst_519 : f32 to vector<2x16xf32>
    %1283 = arith.addf %1282, %1281 : vector<2x16xf32>
    %cst_520 = arith.constant 1.000000e+00 : f32
    %1284 = vector.broadcast %cst_520 : f32 to vector<2x16xf32>
    %1285 = arith.divf %1284, %1283 : vector<2x16xf32>
    %cst_521 = arith.constant dense<0.000000e+00> : vector<2x16xf32>
    %1286 = tpu.matmul %785, %1154, %cst_521 {dimension_numbers = #tpu.dot_dimension_numbers<[1], [0], [0], [1], [0, 0, 1, 1], [], []>} : vector<2x32xf32>, vector<32x16xf32>, vector<2x16xf32> -> vector<2x16xf32>
    %1287 = vector.broadcast %1166 : vector<1x16xf32> to vector<2x16xf32>
    %1288 = arith.addf %1286, %1287 : vector<2x16xf32>
    %cst_522 = arith.constant dense<0.000000e+00> : vector<2x16xf32>
    %1289 = tpu.matmul %1257, %1160, %cst_522 {dimension_numbers = #tpu.dot_dimension_numbers<[1], [0], [0], [1], [0, 0, 1, 1], [], []>} : vector<2x16xf32>, vector<16x16xf32>, vector<2x16xf32> -> vector<2x16xf32>
    %1290 = vector.broadcast %1172 : vector<1x16xf32> to vector<2x16xf32>
    %1291 = arith.addf %1289, %1290 : vector<2x16xf32>
    %1292 = arith.mulf %1271, %1291 : vector<2x16xf32>
    %1293 = arith.addf %1288, %1292 : vector<2x16xf32>
    %1294 = math.tanh %1293 : vector<2x16xf32>
    %cst_523 = arith.constant 1.000000e+00 : f32
    %1295 = vector.broadcast %cst_523 : f32 to vector<2x16xf32>
    %1296 = arith.subf %1295, %1285 : vector<2x16xf32>
    %1297 = arith.mulf %1296, %1294 : vector<2x16xf32>
    %1298 = arith.mulf %1285, %1257 : vector<2x16xf32>
    %1299 = arith.addf %1297, %1298 : vector<2x16xf32>
    %cst_524 = arith.constant dense<0.000000e+00> : vector<2x16xf32>
    %1300 = tpu.matmul %784, %1150, %cst_524 {dimension_numbers = #tpu.dot_dimension_numbers<[1], [0], [0], [1], [0, 0, 1, 1], [], []>} : vector<2x32xf32>, vector<32x16xf32>, vector<2x16xf32> -> vector<2x16xf32>
    %1301 = vector.broadcast %1162 : vector<1x16xf32> to vector<2x16xf32>
    %1302 = arith.addf %1300, %1301 : vector<2x16xf32>
    %cst_525 = arith.constant dense<0.000000e+00> : vector<2x16xf32>
    %1303 = tpu.matmul %1299, %1156, %cst_525 {dimension_numbers = #tpu.dot_dimension_numbers<[1], [0], [0], [1], [0, 0, 1, 1], [], []>} : vector<2x16xf32>, vector<16x16xf32>, vector<2x16xf32> -> vector<2x16xf32>
    %1304 = arith.addf %1302, %1303 : vector<2x16xf32>
    %1305 = vector.broadcast %1168 : vector<1x16xf32> to vector<2x16xf32>
    %1306 = arith.addf %1304, %1305 : vector<2x16xf32>
    %cst_526 = arith.constant 0.000000e+00 : f32
    %1307 = vector.broadcast %cst_526 : f32 to vector<2x16xf32>
    %1308 = arith.subf %1307, %1306 : vector<2x16xf32>
    %1309 = math.exp %1308 : vector<2x16xf32>
    %cst_527 = arith.constant 1.000000e+00 : f32
    %1310 = vector.broadcast %cst_527 : f32 to vector<2x16xf32>
    %1311 = arith.addf %1310, %1309 : vector<2x16xf32>
    %cst_528 = arith.constant 1.000000e+00 : f32
    %1312 = vector.broadcast %cst_528 : f32 to vector<2x16xf32>
    %1313 = arith.divf %1312, %1311 : vector<2x16xf32>
    %cst_529 = arith.constant dense<0.000000e+00> : vector<2x16xf32>
    %1314 = tpu.matmul %784, %1152, %cst_529 {dimension_numbers = #tpu.dot_dimension_numbers<[1], [0], [0], [1], [0, 0, 1, 1], [], []>} : vector<2x32xf32>, vector<32x16xf32>, vector<2x16xf32> -> vector<2x16xf32>
    %1315 = vector.broadcast %1164 : vector<1x16xf32> to vector<2x16xf32>
    %1316 = arith.addf %1314, %1315 : vector<2x16xf32>
    %cst_530 = arith.constant dense<0.000000e+00> : vector<2x16xf32>
    %1317 = tpu.matmul %1299, %1158, %cst_530 {dimension_numbers = #tpu.dot_dimension_numbers<[1], [0], [0], [1], [0, 0, 1, 1], [], []>} : vector<2x16xf32>, vector<16x16xf32>, vector<2x16xf32> -> vector<2x16xf32>
    %1318 = arith.addf %1316, %1317 : vector<2x16xf32>
    %1319 = vector.broadcast %1170 : vector<1x16xf32> to vector<2x16xf32>
    %1320 = arith.addf %1318, %1319 : vector<2x16xf32>
    %cst_531 = arith.constant 0.000000e+00 : f32
    %1321 = vector.broadcast %cst_531 : f32 to vector<2x16xf32>
    %1322 = arith.subf %1321, %1320 : vector<2x16xf32>
    %1323 = math.exp %1322 : vector<2x16xf32>
    %cst_532 = arith.constant 1.000000e+00 : f32
    %1324 = vector.broadcast %cst_532 : f32 to vector<2x16xf32>
    %1325 = arith.addf %1324, %1323 : vector<2x16xf32>
    %cst_533 = arith.constant 1.000000e+00 : f32
    %1326 = vector.broadcast %cst_533 : f32 to vector<2x16xf32>
    %1327 = arith.divf %1326, %1325 : vector<2x16xf32>
    %cst_534 = arith.constant dense<0.000000e+00> : vector<2x16xf32>
    %1328 = tpu.matmul %784, %1154, %cst_534 {dimension_numbers = #tpu.dot_dimension_numbers<[1], [0], [0], [1], [0, 0, 1, 1], [], []>} : vector<2x32xf32>, vector<32x16xf32>, vector<2x16xf32> -> vector<2x16xf32>
    %1329 = vector.broadcast %1166 : vector<1x16xf32> to vector<2x16xf32>
    %1330 = arith.addf %1328, %1329 : vector<2x16xf32>
    %cst_535 = arith.constant dense<0.000000e+00> : vector<2x16xf32>
    %1331 = tpu.matmul %1299, %1160, %cst_535 {dimension_numbers = #tpu.dot_dimension_numbers<[1], [0], [0], [1], [0, 0, 1, 1], [], []>} : vector<2x16xf32>, vector<16x16xf32>, vector<2x16xf32> -> vector<2x16xf32>
    %1332 = vector.broadcast %1172 : vector<1x16xf32> to vector<2x16xf32>
    %1333 = arith.addf %1331, %1332 : vector<2x16xf32>
    %1334 = arith.mulf %1313, %1333 : vector<2x16xf32>
    %1335 = arith.addf %1330, %1334 : vector<2x16xf32>
    %1336 = math.tanh %1335 : vector<2x16xf32>
    %cst_536 = arith.constant 1.000000e+00 : f32
    %1337 = vector.broadcast %cst_536 : f32 to vector<2x16xf32>
    %1338 = arith.subf %1337, %1327 : vector<2x16xf32>
    %1339 = arith.mulf %1338, %1336 : vector<2x16xf32>
    %1340 = arith.mulf %1327, %1299 : vector<2x16xf32>
    %1341 = arith.addf %1339, %1340 : vector<2x16xf32>
    %cst_537 = arith.constant dense<0.000000e+00> : vector<2x16xf32>
    %1342 = tpu.matmul %783, %1150, %cst_537 {dimension_numbers = #tpu.dot_dimension_numbers<[1], [0], [0], [1], [0, 0, 1, 1], [], []>} : vector<2x32xf32>, vector<32x16xf32>, vector<2x16xf32> -> vector<2x16xf32>
    %1343 = vector.broadcast %1162 : vector<1x16xf32> to vector<2x16xf32>
    %1344 = arith.addf %1342, %1343 : vector<2x16xf32>
    %cst_538 = arith.constant dense<0.000000e+00> : vector<2x16xf32>
    %1345 = tpu.matmul %1341, %1156, %cst_538 {dimension_numbers = #tpu.dot_dimension_numbers<[1], [0], [0], [1], [0, 0, 1, 1], [], []>} : vector<2x16xf32>, vector<16x16xf32>, vector<2x16xf32> -> vector<2x16xf32>
    %1346 = arith.addf %1344, %1345 : vector<2x16xf32>
    %1347 = vector.broadcast %1168 : vector<1x16xf32> to vector<2x16xf32>
    %1348 = arith.addf %1346, %1347 : vector<2x16xf32>
    %cst_539 = arith.constant 0.000000e+00 : f32
    %1349 = vector.broadcast %cst_539 : f32 to vector<2x16xf32>
    %1350 = arith.subf %1349, %1348 : vector<2x16xf32>
    %1351 = math.exp %1350 : vector<2x16xf32>
    %cst_540 = arith.constant 1.000000e+00 : f32
    %1352 = vector.broadcast %cst_540 : f32 to vector<2x16xf32>
    %1353 = arith.addf %1352, %1351 : vector<2x16xf32>
    %cst_541 = arith.constant 1.000000e+00 : f32
    %1354 = vector.broadcast %cst_541 : f32 to vector<2x16xf32>
    %1355 = arith.divf %1354, %1353 : vector<2x16xf32>
    %cst_542 = arith.constant dense<0.000000e+00> : vector<2x16xf32>
    %1356 = tpu.matmul %783, %1152, %cst_542 {dimension_numbers = #tpu.dot_dimension_numbers<[1], [0], [0], [1], [0, 0, 1, 1], [], []>} : vector<2x32xf32>, vector<32x16xf32>, vector<2x16xf32> -> vector<2x16xf32>
    %1357 = vector.broadcast %1164 : vector<1x16xf32> to vector<2x16xf32>
    %1358 = arith.addf %1356, %1357 : vector<2x16xf32>
    %cst_543 = arith.constant dense<0.000000e+00> : vector<2x16xf32>
    %1359 = tpu.matmul %1341, %1158, %cst_543 {dimension_numbers = #tpu.dot_dimension_numbers<[1], [0], [0], [1], [0, 0, 1, 1], [], []>} : vector<2x16xf32>, vector<16x16xf32>, vector<2x16xf32> -> vector<2x16xf32>
    %1360 = arith.addf %1358, %1359 : vector<2x16xf32>
    %1361 = vector.broadcast %1170 : vector<1x16xf32> to vector<2x16xf32>
    %1362 = arith.addf %1360, %1361 : vector<2x16xf32>
    %cst_544 = arith.constant 0.000000e+00 : f32
    %1363 = vector.broadcast %cst_544 : f32 to vector<2x16xf32>
    %1364 = arith.subf %1363, %1362 : vector<2x16xf32>
    %1365 = math.exp %1364 : vector<2x16xf32>
    %cst_545 = arith.constant 1.000000e+00 : f32
    %1366 = vector.broadcast %cst_545 : f32 to vector<2x16xf32>
    %1367 = arith.addf %1366, %1365 : vector<2x16xf32>
    %cst_546 = arith.constant 1.000000e+00 : f32
    %1368 = vector.broadcast %cst_546 : f32 to vector<2x16xf32>
    %1369 = arith.divf %1368, %1367 : vector<2x16xf32>
    %cst_547 = arith.constant dense<0.000000e+00> : vector<2x16xf32>
    %1370 = tpu.matmul %783, %1154, %cst_547 {dimension_numbers = #tpu.dot_dimension_numbers<[1], [0], [0], [1], [0, 0, 1, 1], [], []>} : vector<2x32xf32>, vector<32x16xf32>, vector<2x16xf32> -> vector<2x16xf32>
    %1371 = vector.broadcast %1166 : vector<1x16xf32> to vector<2x16xf32>
    %1372 = arith.addf %1370, %1371 : vector<2x16xf32>
    %cst_548 = arith.constant dense<0.000000e+00> : vector<2x16xf32>
    %1373 = tpu.matmul %1341, %1160, %cst_548 {dimension_numbers = #tpu.dot_dimension_numbers<[1], [0], [0], [1], [0, 0, 1, 1], [], []>} : vector<2x16xf32>, vector<16x16xf32>, vector<2x16xf32> -> vector<2x16xf32>
    %1374 = vector.broadcast %1172 : vector<1x16xf32> to vector<2x16xf32>
    %1375 = arith.addf %1373, %1374 : vector<2x16xf32>
    %1376 = arith.mulf %1355, %1375 : vector<2x16xf32>
    %1377 = arith.addf %1372, %1376 : vector<2x16xf32>
    %1378 = math.tanh %1377 : vector<2x16xf32>
    %cst_549 = arith.constant 1.000000e+00 : f32
    %1379 = vector.broadcast %cst_549 : f32 to vector<2x16xf32>
    %1380 = arith.subf %1379, %1369 : vector<2x16xf32>
    %1381 = arith.mulf %1380, %1378 : vector<2x16xf32>
    %1382 = arith.mulf %1369, %1341 : vector<2x16xf32>
    %1383 = arith.addf %1381, %1382 : vector<2x16xf32>
    %cst_550 = arith.constant dense<0.000000e+00> : vector<2x16xf32>
    %1384 = tpu.matmul %782, %1150, %cst_550 {dimension_numbers = #tpu.dot_dimension_numbers<[1], [0], [0], [1], [0, 0, 1, 1], [], []>} : vector<2x32xf32>, vector<32x16xf32>, vector<2x16xf32> -> vector<2x16xf32>
    %1385 = vector.broadcast %1162 : vector<1x16xf32> to vector<2x16xf32>
    %1386 = arith.addf %1384, %1385 : vector<2x16xf32>
    %cst_551 = arith.constant dense<0.000000e+00> : vector<2x16xf32>
    %1387 = tpu.matmul %1383, %1156, %cst_551 {dimension_numbers = #tpu.dot_dimension_numbers<[1], [0], [0], [1], [0, 0, 1, 1], [], []>} : vector<2x16xf32>, vector<16x16xf32>, vector<2x16xf32> -> vector<2x16xf32>
    %1388 = arith.addf %1386, %1387 : vector<2x16xf32>
    %1389 = vector.broadcast %1168 : vector<1x16xf32> to vector<2x16xf32>
    %1390 = arith.addf %1388, %1389 : vector<2x16xf32>
    %cst_552 = arith.constant 0.000000e+00 : f32
    %1391 = vector.broadcast %cst_552 : f32 to vector<2x16xf32>
    %1392 = arith.subf %1391, %1390 : vector<2x16xf32>
    %1393 = math.exp %1392 : vector<2x16xf32>
    %cst_553 = arith.constant 1.000000e+00 : f32
    %1394 = vector.broadcast %cst_553 : f32 to vector<2x16xf32>
    %1395 = arith.addf %1394, %1393 : vector<2x16xf32>
    %cst_554 = arith.constant 1.000000e+00 : f32
    %1396 = vector.broadcast %cst_554 : f32 to vector<2x16xf32>
    %1397 = arith.divf %1396, %1395 : vector<2x16xf32>
    %cst_555 = arith.constant dense<0.000000e+00> : vector<2x16xf32>
    %1398 = tpu.matmul %782, %1152, %cst_555 {dimension_numbers = #tpu.dot_dimension_numbers<[1], [0], [0], [1], [0, 0, 1, 1], [], []>} : vector<2x32xf32>, vector<32x16xf32>, vector<2x16xf32> -> vector<2x16xf32>
    %1399 = vector.broadcast %1164 : vector<1x16xf32> to vector<2x16xf32>
    %1400 = arith.addf %1398, %1399 : vector<2x16xf32>
    %cst_556 = arith.constant dense<0.000000e+00> : vector<2x16xf32>
    %1401 = tpu.matmul %1383, %1158, %cst_556 {dimension_numbers = #tpu.dot_dimension_numbers<[1], [0], [0], [1], [0, 0, 1, 1], [], []>} : vector<2x16xf32>, vector<16x16xf32>, vector<2x16xf32> -> vector<2x16xf32>
    %1402 = arith.addf %1400, %1401 : vector<2x16xf32>
    %1403 = vector.broadcast %1170 : vector<1x16xf32> to vector<2x16xf32>
    %1404 = arith.addf %1402, %1403 : vector<2x16xf32>
    %cst_557 = arith.constant 0.000000e+00 : f32
    %1405 = vector.broadcast %cst_557 : f32 to vector<2x16xf32>
    %1406 = arith.subf %1405, %1404 : vector<2x16xf32>
    %1407 = math.exp %1406 : vector<2x16xf32>
    %cst_558 = arith.constant 1.000000e+00 : f32
    %1408 = vector.broadcast %cst_558 : f32 to vector<2x16xf32>
    %1409 = arith.addf %1408, %1407 : vector<2x16xf32>
    %cst_559 = arith.constant 1.000000e+00 : f32
    %1410 = vector.broadcast %cst_559 : f32 to vector<2x16xf32>
    %1411 = arith.divf %1410, %1409 : vector<2x16xf32>
    %cst_560 = arith.constant dense<0.000000e+00> : vector<2x16xf32>
    %1412 = tpu.matmul %782, %1154, %cst_560 {dimension_numbers = #tpu.dot_dimension_numbers<[1], [0], [0], [1], [0, 0, 1, 1], [], []>} : vector<2x32xf32>, vector<32x16xf32>, vector<2x16xf32> -> vector<2x16xf32>
    %1413 = vector.broadcast %1166 : vector<1x16xf32> to vector<2x16xf32>
    %1414 = arith.addf %1412, %1413 : vector<2x16xf32>
    %cst_561 = arith.constant dense<0.000000e+00> : vector<2x16xf32>
    %1415 = tpu.matmul %1383, %1160, %cst_561 {dimension_numbers = #tpu.dot_dimension_numbers<[1], [0], [0], [1], [0, 0, 1, 1], [], []>} : vector<2x16xf32>, vector<16x16xf32>, vector<2x16xf32> -> vector<2x16xf32>
    %1416 = vector.broadcast %1172 : vector<1x16xf32> to vector<2x16xf32>
    %1417 = arith.addf %1415, %1416 : vector<2x16xf32>
    %1418 = arith.mulf %1397, %1417 : vector<2x16xf32>
    %1419 = arith.addf %1414, %1418 : vector<2x16xf32>
    %1420 = math.tanh %1419 : vector<2x16xf32>
    %cst_562 = arith.constant 1.000000e+00 : f32
    %1421 = vector.broadcast %cst_562 : f32 to vector<2x16xf32>
    %1422 = arith.subf %1421, %1411 : vector<2x16xf32>
    %1423 = arith.mulf %1422, %1420 : vector<2x16xf32>
    %1424 = arith.mulf %1411, %1383 : vector<2x16xf32>
    %1425 = arith.addf %1423, %1424 : vector<2x16xf32>
    %cst_563 = arith.constant dense<0.000000e+00> : vector<2x16xf32>
    %1426 = tpu.matmul %781, %1150, %cst_563 {dimension_numbers = #tpu.dot_dimension_numbers<[1], [0], [0], [1], [0, 0, 1, 1], [], []>} : vector<2x32xf32>, vector<32x16xf32>, vector<2x16xf32> -> vector<2x16xf32>
    %1427 = vector.broadcast %1162 : vector<1x16xf32> to vector<2x16xf32>
    %1428 = arith.addf %1426, %1427 : vector<2x16xf32>
    %cst_564 = arith.constant dense<0.000000e+00> : vector<2x16xf32>
    %1429 = tpu.matmul %1425, %1156, %cst_564 {dimension_numbers = #tpu.dot_dimension_numbers<[1], [0], [0], [1], [0, 0, 1, 1], [], []>} : vector<2x16xf32>, vector<16x16xf32>, vector<2x16xf32> -> vector<2x16xf32>
    %1430 = arith.addf %1428, %1429 : vector<2x16xf32>
    %1431 = vector.broadcast %1168 : vector<1x16xf32> to vector<2x16xf32>
    %1432 = arith.addf %1430, %1431 : vector<2x16xf32>
    %cst_565 = arith.constant 0.000000e+00 : f32
    %1433 = vector.broadcast %cst_565 : f32 to vector<2x16xf32>
    %1434 = arith.subf %1433, %1432 : vector<2x16xf32>
    %1435 = math.exp %1434 : vector<2x16xf32>
    %cst_566 = arith.constant 1.000000e+00 : f32
    %1436 = vector.broadcast %cst_566 : f32 to vector<2x16xf32>
    %1437 = arith.addf %1436, %1435 : vector<2x16xf32>
    %cst_567 = arith.constant 1.000000e+00 : f32
    %1438 = vector.broadcast %cst_567 : f32 to vector<2x16xf32>
    %1439 = arith.divf %1438, %1437 : vector<2x16xf32>
    %cst_568 = arith.constant dense<0.000000e+00> : vector<2x16xf32>
    %1440 = tpu.matmul %781, %1152, %cst_568 {dimension_numbers = #tpu.dot_dimension_numbers<[1], [0], [0], [1], [0, 0, 1, 1], [], []>} : vector<2x32xf32>, vector<32x16xf32>, vector<2x16xf32> -> vector<2x16xf32>
    %1441 = vector.broadcast %1164 : vector<1x16xf32> to vector<2x16xf32>
    %1442 = arith.addf %1440, %1441 : vector<2x16xf32>
    %cst_569 = arith.constant dense<0.000000e+00> : vector<2x16xf32>
    %1443 = tpu.matmul %1425, %1158, %cst_569 {dimension_numbers = #tpu.dot_dimension_numbers<[1], [0], [0], [1], [0, 0, 1, 1], [], []>} : vector<2x16xf32>, vector<16x16xf32>, vector<2x16xf32> -> vector<2x16xf32>
    %1444 = arith.addf %1442, %1443 : vector<2x16xf32>
    %1445 = vector.broadcast %1170 : vector<1x16xf32> to vector<2x16xf32>
    %1446 = arith.addf %1444, %1445 : vector<2x16xf32>
    %cst_570 = arith.constant 0.000000e+00 : f32
    %1447 = vector.broadcast %cst_570 : f32 to vector<2x16xf32>
    %1448 = arith.subf %1447, %1446 : vector<2x16xf32>
    %1449 = math.exp %1448 : vector<2x16xf32>
    %cst_571 = arith.constant 1.000000e+00 : f32
    %1450 = vector.broadcast %cst_571 : f32 to vector<2x16xf32>
    %1451 = arith.addf %1450, %1449 : vector<2x16xf32>
    %cst_572 = arith.constant 1.000000e+00 : f32
    %1452 = vector.broadcast %cst_572 : f32 to vector<2x16xf32>
    %1453 = arith.divf %1452, %1451 : vector<2x16xf32>
    %cst_573 = arith.constant dense<0.000000e+00> : vector<2x16xf32>
    %1454 = tpu.matmul %781, %1154, %cst_573 {dimension_numbers = #tpu.dot_dimension_numbers<[1], [0], [0], [1], [0, 0, 1, 1], [], []>} : vector<2x32xf32>, vector<32x16xf32>, vector<2x16xf32> -> vector<2x16xf32>
    %1455 = vector.broadcast %1166 : vector<1x16xf32> to vector<2x16xf32>
    %1456 = arith.addf %1454, %1455 : vector<2x16xf32>
    %cst_574 = arith.constant dense<0.000000e+00> : vector<2x16xf32>
    %1457 = tpu.matmul %1425, %1160, %cst_574 {dimension_numbers = #tpu.dot_dimension_numbers<[1], [0], [0], [1], [0, 0, 1, 1], [], []>} : vector<2x16xf32>, vector<16x16xf32>, vector<2x16xf32> -> vector<2x16xf32>
    %1458 = vector.broadcast %1172 : vector<1x16xf32> to vector<2x16xf32>
    %1459 = arith.addf %1457, %1458 : vector<2x16xf32>
    %1460 = arith.mulf %1439, %1459 : vector<2x16xf32>
    %1461 = arith.addf %1456, %1460 : vector<2x16xf32>
    %1462 = math.tanh %1461 : vector<2x16xf32>
    %cst_575 = arith.constant 1.000000e+00 : f32
    %1463 = vector.broadcast %cst_575 : f32 to vector<2x16xf32>
    %1464 = arith.subf %1463, %1453 : vector<2x16xf32>
    %1465 = arith.mulf %1464, %1462 : vector<2x16xf32>
    %1466 = arith.mulf %1453, %1425 : vector<2x16xf32>
    %1467 = arith.addf %1465, %1466 : vector<2x16xf32>
    %cst_576 = arith.constant dense<0.000000e+00> : vector<2x16xf32>
    %1468 = tpu.matmul %780, %1150, %cst_576 {dimension_numbers = #tpu.dot_dimension_numbers<[1], [0], [0], [1], [0, 0, 1, 1], [], []>} : vector<2x32xf32>, vector<32x16xf32>, vector<2x16xf32> -> vector<2x16xf32>
    %1469 = vector.broadcast %1162 : vector<1x16xf32> to vector<2x16xf32>
    %1470 = arith.addf %1468, %1469 : vector<2x16xf32>
    %cst_577 = arith.constant dense<0.000000e+00> : vector<2x16xf32>
    %1471 = tpu.matmul %1467, %1156, %cst_577 {dimension_numbers = #tpu.dot_dimension_numbers<[1], [0], [0], [1], [0, 0, 1, 1], [], []>} : vector<2x16xf32>, vector<16x16xf32>, vector<2x16xf32> -> vector<2x16xf32>
    %1472 = arith.addf %1470, %1471 : vector<2x16xf32>
    %1473 = vector.broadcast %1168 : vector<1x16xf32> to vector<2x16xf32>
    %1474 = arith.addf %1472, %1473 : vector<2x16xf32>
    %cst_578 = arith.constant 0.000000e+00 : f32
    %1475 = vector.broadcast %cst_578 : f32 to vector<2x16xf32>
    %1476 = arith.subf %1475, %1474 : vector<2x16xf32>
    %1477 = math.exp %1476 : vector<2x16xf32>
    %cst_579 = arith.constant 1.000000e+00 : f32
    %1478 = vector.broadcast %cst_579 : f32 to vector<2x16xf32>
    %1479 = arith.addf %1478, %1477 : vector<2x16xf32>
    %cst_580 = arith.constant 1.000000e+00 : f32
    %1480 = vector.broadcast %cst_580 : f32 to vector<2x16xf32>
    %1481 = arith.divf %1480, %1479 : vector<2x16xf32>
    %cst_581 = arith.constant dense<0.000000e+00> : vector<2x16xf32>
    %1482 = tpu.matmul %780, %1152, %cst_581 {dimension_numbers = #tpu.dot_dimension_numbers<[1], [0], [0], [1], [0, 0, 1, 1], [], []>} : vector<2x32xf32>, vector<32x16xf32>, vector<2x16xf32> -> vector<2x16xf32>
    %1483 = vector.broadcast %1164 : vector<1x16xf32> to vector<2x16xf32>
    %1484 = arith.addf %1482, %1483 : vector<2x16xf32>
    %cst_582 = arith.constant dense<0.000000e+00> : vector<2x16xf32>
    %1485 = tpu.matmul %1467, %1158, %cst_582 {dimension_numbers = #tpu.dot_dimension_numbers<[1], [0], [0], [1], [0, 0, 1, 1], [], []>} : vector<2x16xf32>, vector<16x16xf32>, vector<2x16xf32> -> vector<2x16xf32>
    %1486 = arith.addf %1484, %1485 : vector<2x16xf32>
    %1487 = vector.broadcast %1170 : vector<1x16xf32> to vector<2x16xf32>
    %1488 = arith.addf %1486, %1487 : vector<2x16xf32>
    %cst_583 = arith.constant 0.000000e+00 : f32
    %1489 = vector.broadcast %cst_583 : f32 to vector<2x16xf32>
    %1490 = arith.subf %1489, %1488 : vector<2x16xf32>
    %1491 = math.exp %1490 : vector<2x16xf32>
    %cst_584 = arith.constant 1.000000e+00 : f32
    %1492 = vector.broadcast %cst_584 : f32 to vector<2x16xf32>
    %1493 = arith.addf %1492, %1491 : vector<2x16xf32>
    %cst_585 = arith.constant 1.000000e+00 : f32
    %1494 = vector.broadcast %cst_585 : f32 to vector<2x16xf32>
    %1495 = arith.divf %1494, %1493 : vector<2x16xf32>
    %cst_586 = arith.constant dense<0.000000e+00> : vector<2x16xf32>
    %1496 = tpu.matmul %780, %1154, %cst_586 {dimension_numbers = #tpu.dot_dimension_numbers<[1], [0], [0], [1], [0, 0, 1, 1], [], []>} : vector<2x32xf32>, vector<32x16xf32>, vector<2x16xf32> -> vector<2x16xf32>
    %1497 = vector.broadcast %1166 : vector<1x16xf32> to vector<2x16xf32>
    %1498 = arith.addf %1496, %1497 : vector<2x16xf32>
    %cst_587 = arith.constant dense<0.000000e+00> : vector<2x16xf32>
    %1499 = tpu.matmul %1467, %1160, %cst_587 {dimension_numbers = #tpu.dot_dimension_numbers<[1], [0], [0], [1], [0, 0, 1, 1], [], []>} : vector<2x16xf32>, vector<16x16xf32>, vector<2x16xf32> -> vector<2x16xf32>
    %1500 = vector.broadcast %1172 : vector<1x16xf32> to vector<2x16xf32>
    %1501 = arith.addf %1499, %1500 : vector<2x16xf32>
    %1502 = arith.mulf %1481, %1501 : vector<2x16xf32>
    %1503 = arith.addf %1498, %1502 : vector<2x16xf32>
    %1504 = math.tanh %1503 : vector<2x16xf32>
    %cst_588 = arith.constant 1.000000e+00 : f32
    %1505 = vector.broadcast %cst_588 : f32 to vector<2x16xf32>
    %1506 = arith.subf %1505, %1495 : vector<2x16xf32>
    %1507 = arith.mulf %1506, %1504 : vector<2x16xf32>
    %1508 = arith.mulf %1495, %1467 : vector<2x16xf32>
    %1509 = arith.addf %1507, %1508 : vector<2x16xf32>
    %1510 = tpu.concatenate %854, %1509 in 1 : vector<2x16xf32>, vector<2x16xf32> -> vector<2x32xf32>
    %1511 = tpu.concatenate %896, %1467 in 1 : vector<2x16xf32>, vector<2x16xf32> -> vector<2x32xf32>
    %1512 = tpu.concatenate %938, %1425 in 1 : vector<2x16xf32>, vector<2x16xf32> -> vector<2x32xf32>
    %1513 = tpu.concatenate %980, %1383 in 1 : vector<2x16xf32>, vector<2x16xf32> -> vector<2x32xf32>
    %1514 = tpu.concatenate %1022, %1341 in 1 : vector<2x16xf32>, vector<2x16xf32> -> vector<2x32xf32>
    %1515 = tpu.concatenate %1064, %1299 in 1 : vector<2x16xf32>, vector<2x16xf32> -> vector<2x32xf32>
    %1516 = tpu.concatenate %1106, %1257 in 1 : vector<2x16xf32>, vector<2x16xf32> -> vector<2x32xf32>
    %1517 = tpu.concatenate %1148, %1215 in 1 : vector<2x16xf32>, vector<2x16xf32> -> vector<2x32xf32>
    %c0_589 = arith.constant 0 : index
    %c0_590 = arith.constant 0 : index
    %1518 = vector.load %arg15[%c0_589, %c0_590] : memref<32x32xf32, #tpu.memory_space<vmem>>, vector<32x32xf32>
    %c0_591 = arith.constant 0 : index
    %c0_592 = arith.constant 0 : index
    %1519 = vector.load %arg16[%c0_591, %c0_592] : memref<32x1xf32, #tpu.memory_space<vmem>>, vector<32x1xf32>
    %cst_593 = arith.constant dense<0.000000e+00> : vector<2x32xf32>
    %1520 = tpu.matmul %1510, %1518, %cst_593 {dimension_numbers = #tpu.dot_dimension_numbers<[1], [0], [0], [1], [0, 0, 1, 1], [], []>} : vector<2x32xf32>, vector<32x32xf32>, vector<2x32xf32> -> vector<2x32xf32>
    %1521 = math.tanh %1520 : vector<2x32xf32>
    %cst_594 = arith.constant dense<0.000000e+00> : vector<2x1xf32>
    %1522 = tpu.matmul %1521, %1519, %cst_594 {dimension_numbers = #tpu.dot_dimension_numbers<[1], [0], [0], [1], [0, 0, 1, 1], [], []>} : vector<2x32xf32>, vector<32x1xf32>, vector<2x1xf32> -> vector<2x1xf32>
    %cst_595 = arith.constant dense<0.000000e+00> : vector<2x32xf32>
    %1523 = tpu.matmul %1511, %1518, %cst_595 {dimension_numbers = #tpu.dot_dimension_numbers<[1], [0], [0], [1], [0, 0, 1, 1], [], []>} : vector<2x32xf32>, vector<32x32xf32>, vector<2x32xf32> -> vector<2x32xf32>
    %1524 = math.tanh %1523 : vector<2x32xf32>
    %cst_596 = arith.constant dense<0.000000e+00> : vector<2x1xf32>
    %1525 = tpu.matmul %1524, %1519, %cst_596 {dimension_numbers = #tpu.dot_dimension_numbers<[1], [0], [0], [1], [0, 0, 1, 1], [], []>} : vector<2x32xf32>, vector<32x1xf32>, vector<2x1xf32> -> vector<2x1xf32>
    %cst_597 = arith.constant dense<0.000000e+00> : vector<2x32xf32>
    %1526 = tpu.matmul %1512, %1518, %cst_597 {dimension_numbers = #tpu.dot_dimension_numbers<[1], [0], [0], [1], [0, 0, 1, 1], [], []>} : vector<2x32xf32>, vector<32x32xf32>, vector<2x32xf32> -> vector<2x32xf32>
    %1527 = math.tanh %1526 : vector<2x32xf32>
    %cst_598 = arith.constant dense<0.000000e+00> : vector<2x1xf32>
    %1528 = tpu.matmul %1527, %1519, %cst_598 {dimension_numbers = #tpu.dot_dimension_numbers<[1], [0], [0], [1], [0, 0, 1, 1], [], []>} : vector<2x32xf32>, vector<32x1xf32>, vector<2x1xf32> -> vector<2x1xf32>
    %cst_599 = arith.constant dense<0.000000e+00> : vector<2x32xf32>
    %1529 = tpu.matmul %1513, %1518, %cst_599 {dimension_numbers = #tpu.dot_dimension_numbers<[1], [0], [0], [1], [0, 0, 1, 1], [], []>} : vector<2x32xf32>, vector<32x32xf32>, vector<2x32xf32> -> vector<2x32xf32>
    %1530 = math.tanh %1529 : vector<2x32xf32>
    %cst_600 = arith.constant dense<0.000000e+00> : vector<2x1xf32>
    %1531 = tpu.matmul %1530, %1519, %cst_600 {dimension_numbers = #tpu.dot_dimension_numbers<[1], [0], [0], [1], [0, 0, 1, 1], [], []>} : vector<2x32xf32>, vector<32x1xf32>, vector<2x1xf32> -> vector<2x1xf32>
    %cst_601 = arith.constant dense<0.000000e+00> : vector<2x32xf32>
    %1532 = tpu.matmul %1514, %1518, %cst_601 {dimension_numbers = #tpu.dot_dimension_numbers<[1], [0], [0], [1], [0, 0, 1, 1], [], []>} : vector<2x32xf32>, vector<32x32xf32>, vector<2x32xf32> -> vector<2x32xf32>
    %1533 = math.tanh %1532 : vector<2x32xf32>
    %cst_602 = arith.constant dense<0.000000e+00> : vector<2x1xf32>
    %1534 = tpu.matmul %1533, %1519, %cst_602 {dimension_numbers = #tpu.dot_dimension_numbers<[1], [0], [0], [1], [0, 0, 1, 1], [], []>} : vector<2x32xf32>, vector<32x1xf32>, vector<2x1xf32> -> vector<2x1xf32>
    %cst_603 = arith.constant dense<0.000000e+00> : vector<2x32xf32>
    %1535 = tpu.matmul %1515, %1518, %cst_603 {dimension_numbers = #tpu.dot_dimension_numbers<[1], [0], [0], [1], [0, 0, 1, 1], [], []>} : vector<2x32xf32>, vector<32x32xf32>, vector<2x32xf32> -> vector<2x32xf32>
    %1536 = math.tanh %1535 : vector<2x32xf32>
    %cst_604 = arith.constant dense<0.000000e+00> : vector<2x1xf32>
    %1537 = tpu.matmul %1536, %1519, %cst_604 {dimension_numbers = #tpu.dot_dimension_numbers<[1], [0], [0], [1], [0, 0, 1, 1], [], []>} : vector<2x32xf32>, vector<32x1xf32>, vector<2x1xf32> -> vector<2x1xf32>
    %cst_605 = arith.constant dense<0.000000e+00> : vector<2x32xf32>
    %1538 = tpu.matmul %1516, %1518, %cst_605 {dimension_numbers = #tpu.dot_dimension_numbers<[1], [0], [0], [1], [0, 0, 1, 1], [], []>} : vector<2x32xf32>, vector<32x32xf32>, vector<2x32xf32> -> vector<2x32xf32>
    %1539 = math.tanh %1538 : vector<2x32xf32>
    %cst_606 = arith.constant dense<0.000000e+00> : vector<2x1xf32>
    %1540 = tpu.matmul %1539, %1519, %cst_606 {dimension_numbers = #tpu.dot_dimension_numbers<[1], [0], [0], [1], [0, 0, 1, 1], [], []>} : vector<2x32xf32>, vector<32x1xf32>, vector<2x1xf32> -> vector<2x1xf32>
    %cst_607 = arith.constant dense<0.000000e+00> : vector<2x32xf32>
    %1541 = tpu.matmul %1517, %1518, %cst_607 {dimension_numbers = #tpu.dot_dimension_numbers<[1], [0], [0], [1], [0, 0, 1, 1], [], []>} : vector<2x32xf32>, vector<32x32xf32>, vector<2x32xf32> -> vector<2x32xf32>
    %1542 = math.tanh %1541 : vector<2x32xf32>
    %cst_608 = arith.constant dense<0.000000e+00> : vector<2x1xf32>
    %1543 = tpu.matmul %1542, %1519, %cst_608 {dimension_numbers = #tpu.dot_dimension_numbers<[1], [0], [0], [1], [0, 0, 1, 1], [], []>} : vector<2x32xf32>, vector<32x1xf32>, vector<2x1xf32> -> vector<2x1xf32>
    %1544 = arith.maximumf %1522, %1525 : vector<2x1xf32>
    %1545 = arith.maximumf %1544, %1528 : vector<2x1xf32>
    %1546 = arith.maximumf %1545, %1531 : vector<2x1xf32>
    %1547 = arith.maximumf %1546, %1534 : vector<2x1xf32>
    %1548 = arith.maximumf %1547, %1537 : vector<2x1xf32>
    %1549 = arith.maximumf %1548, %1540 : vector<2x1xf32>
    %1550 = arith.maximumf %1549, %1543 : vector<2x1xf32>
    %1551 = arith.subf %1522, %1550 : vector<2x1xf32>
    %1552 = math.exp %1551 : vector<2x1xf32>
    %1553 = arith.subf %1525, %1550 : vector<2x1xf32>
    %1554 = math.exp %1553 : vector<2x1xf32>
    %1555 = arith.subf %1528, %1550 : vector<2x1xf32>
    %1556 = math.exp %1555 : vector<2x1xf32>
    %1557 = arith.subf %1531, %1550 : vector<2x1xf32>
    %1558 = math.exp %1557 : vector<2x1xf32>
    %1559 = arith.subf %1534, %1550 : vector<2x1xf32>
    %1560 = math.exp %1559 : vector<2x1xf32>
    %1561 = arith.subf %1537, %1550 : vector<2x1xf32>
    %1562 = math.exp %1561 : vector<2x1xf32>
    %1563 = arith.subf %1540, %1550 : vector<2x1xf32>
    %1564 = math.exp %1563 : vector<2x1xf32>
    %1565 = arith.subf %1543, %1550 : vector<2x1xf32>
    %1566 = math.exp %1565 : vector<2x1xf32>
    %1567 = vector.broadcast %1552 : vector<2x1xf32> to vector<2x32xf32>
    %1568 = arith.mulf %1567, %1510 : vector<2x32xf32>
    %1569 = arith.addf %1552, %1554 : vector<2x1xf32>
    %1570 = vector.broadcast %1554 : vector<2x1xf32> to vector<2x32xf32>
    %1571 = arith.mulf %1570, %1511 : vector<2x32xf32>
    %1572 = arith.addf %1568, %1571 : vector<2x32xf32>
    %1573 = arith.addf %1569, %1556 : vector<2x1xf32>
    %1574 = vector.broadcast %1556 : vector<2x1xf32> to vector<2x32xf32>
    %1575 = arith.mulf %1574, %1512 : vector<2x32xf32>
    %1576 = arith.addf %1572, %1575 : vector<2x32xf32>
    %1577 = arith.addf %1573, %1558 : vector<2x1xf32>
    %1578 = vector.broadcast %1558 : vector<2x1xf32> to vector<2x32xf32>
    %1579 = arith.mulf %1578, %1513 : vector<2x32xf32>
    %1580 = arith.addf %1576, %1579 : vector<2x32xf32>
    %1581 = arith.addf %1577, %1560 : vector<2x1xf32>
    %1582 = vector.broadcast %1560 : vector<2x1xf32> to vector<2x32xf32>
    %1583 = arith.mulf %1582, %1514 : vector<2x32xf32>
    %1584 = arith.addf %1580, %1583 : vector<2x32xf32>
    %1585 = arith.addf %1581, %1562 : vector<2x1xf32>
    %1586 = vector.broadcast %1562 : vector<2x1xf32> to vector<2x32xf32>
    %1587 = arith.mulf %1586, %1515 : vector<2x32xf32>
    %1588 = arith.addf %1584, %1587 : vector<2x32xf32>
    %1589 = arith.addf %1585, %1564 : vector<2x1xf32>
    %1590 = vector.broadcast %1564 : vector<2x1xf32> to vector<2x32xf32>
    %1591 = arith.mulf %1590, %1516 : vector<2x32xf32>
    %1592 = arith.addf %1588, %1591 : vector<2x32xf32>
    %1593 = arith.addf %1589, %1566 : vector<2x1xf32>
    %1594 = vector.broadcast %1566 : vector<2x1xf32> to vector<2x32xf32>
    %1595 = arith.mulf %1594, %1517 : vector<2x32xf32>
    %1596 = arith.addf %1592, %1595 : vector<2x32xf32>
    %1597 = vector.broadcast %1593 : vector<2x1xf32> to vector<2x32xf32>
    %1598 = arith.divf %1596, %1597 : vector<2x32xf32>
    %c0_609 = arith.constant 0 : index
    %c0_610 = arith.constant 0 : index
    %1599 = vector.load %arg18[%c0_609, %c0_610] : memref<2x32xf32, #tpu.memory_space<vmem>>, vector<2x32xf32>
    tpu.vector_store %arg18[%c0_609, %c0_610], %1598 {strides = array<i32>} : memref<2x32xf32, #tpu.memory_space<vmem>>, vector<2x32xf32>,
    %c0_611 = arith.constant 0 : index
    %c0_612 = arith.constant 0 : index
    %1600 = vector.load %arg17[%c0_611, %c0_612] : memref<32x7xf32, #tpu.memory_space<vmem>>, vector<32x7xf32>
    %cst_613 = arith.constant dense<0.000000e+00> : vector<2x7xf32>
    %1601 = tpu.matmul %1598, %1600, %cst_613 {dimension_numbers = #tpu.dot_dimension_numbers<[1], [0], [0], [1], [0, 0, 1, 1], [], []>} : vector<2x32xf32>, vector<32x7xf32>, vector<2x7xf32> -> vector<2x7xf32>
    %c0_614 = arith.constant 0 : index
    %c0_615 = arith.constant 0 : index
    %1602 = vector.load %arg19[%c0_614, %c0_615] : memref<2x7xf32, #tpu.memory_space<vmem>>, vector<2x7xf32>
    tpu.vector_store %arg19[%c0_614, %c0_615], %1601 {strides = array<i32>} : memref<2x7xf32, #tpu.memory_space<vmem>>, vector<2x7xf32>,
    return
  }
  func.func @transform_0(%arg0: i32) -> (i32, i32, i32) {
    %c0_i32 = arith.constant 0 : i32
    %c0_i32_0 = arith.constant 0 : i32
    %c0_i32_1 = arith.constant 0 : i32
    %c0_i32_2 = arith.constant 0 : i32
    return %c0_i32, %c0_i32_0, %c0_i32_1 : i32, i32, i32
  }
  func.func @transform_1(%arg0: i32) -> (i32, i32) {
    %c0_i32 = arith.constant 0 : i32
    %c0_i32_0 = arith.constant 0 : i32
    %c0_i32_1 = arith.constant 0 : i32
    return %c0_i32, %c0_i32_0 : i32, i32
  }
  func.func @transform_2(%arg0: i32) -> (i32, i32, i32) {
    %c0_i32 = arith.constant 0 : i32
    %c0_i32_0 = arith.constant 0 : i32
    %c0_i32_1 = arith.constant 0 : i32
    %c0_i32_2 = arith.constant 0 : i32
    return %c0_i32, %c0_i32_0, %c0_i32_1 : i32, i32, i32
  }
  func.func @transform_3(%arg0: i32) -> (i32, i32, i32) {
    %c0_i32 = arith.constant 0 : i32
    %c0_i32_0 = arith.constant 0 : i32
    %c0_i32_1 = arith.constant 0 : i32
    %c0_i32_2 = arith.constant 0 : i32
    return %c0_i32, %c0_i32_0, %c0_i32_1 : i32, i32, i32
  }
  func.func @transform_4(%arg0: i32) -> (i32, i32, i32) {
    %c0_i32 = arith.constant 0 : i32
    %c0_i32_0 = arith.constant 0 : i32
    %c0_i32_1 = arith.constant 0 : i32
    %c0_i32_2 = arith.constant 0 : i32
    return %c0_i32, %c0_i32_0, %c0_i32_1 : i32, i32, i32
  }
  func.func @transform_5(%arg0: i32) -> (i32, i32, i32) {
    %c0_i32 = arith.constant 0 : i32
    %c0_i32_0 = arith.constant 0 : i32
    %c0_i32_1 = arith.constant 0 : i32
    %c0_i32_2 = arith.constant 0 : i32
    return %c0_i32, %c0_i32_0, %c0_i32_1 : i32, i32, i32
  }
  func.func @transform_6(%arg0: i32) -> (i32, i32, i32) {
    %c0_i32 = arith.constant 0 : i32
    %c0_i32_0 = arith.constant 0 : i32
    %c0_i32_1 = arith.constant 0 : i32
    %c0_i32_2 = arith.constant 0 : i32
    return %c0_i32, %c0_i32_0, %c0_i32_1 : i32, i32, i32
  }
  func.func @transform_7(%arg0: i32) -> (i32, i32, i32) {
    %c0_i32 = arith.constant 0 : i32
    %c0_i32_0 = arith.constant 0 : i32
    %c0_i32_1 = arith.constant 0 : i32
    %c0_i32_2 = arith.constant 0 : i32
    return %c0_i32, %c0_i32_0, %c0_i32_1 : i32, i32, i32
  }
  func.func @transform_8(%arg0: i32) -> (i32, i32, i32) {
    %c0_i32 = arith.constant 0 : i32
    %c0_i32_0 = arith.constant 0 : i32
    %c0_i32_1 = arith.constant 0 : i32
    %c0_i32_2 = arith.constant 0 : i32
    return %c0_i32, %c0_i32_0, %c0_i32_1 : i32, i32, i32
  }
  func.func @transform_9(%arg0: i32) -> (i32, i32, i32) {
    %c0_i32 = arith.constant 0 : i32
    %c0_i32_0 = arith.constant 0 : i32
    %c0_i32_1 = arith.constant 0 : i32
    %c0_i32_2 = arith.constant 0 : i32
    return %c0_i32, %c0_i32_0, %c0_i32_1 : i32, i32, i32
  }
  func.func @transform_10(%arg0: i32) -> (i32, i32, i32) {
    %c0_i32 = arith.constant 0 : i32
    %c0_i32_0 = arith.constant 0 : i32
    %c0_i32_1 = arith.constant 0 : i32
    %c0_i32_2 = arith.constant 0 : i32
    return %c0_i32, %c0_i32_0, %c0_i32_1 : i32, i32, i32
  }
  func.func @transform_11(%arg0: i32) -> (i32, i32, i32) {
    %c0_i32 = arith.constant 0 : i32
    %c0_i32_0 = arith.constant 0 : i32
    %c0_i32_1 = arith.constant 0 : i32
    %c0_i32_2 = arith.constant 0 : i32
    return %c0_i32, %c0_i32_0, %c0_i32_1 : i32, i32, i32
  }
  func.func @transform_12(%arg0: i32) -> (i32, i32, i32) {
    %c0_i32 = arith.constant 0 : i32
    %c0_i32_0 = arith.constant 0 : i32
    %c0_i32_1 = arith.constant 0 : i32
    %c0_i32_2 = arith.constant 0 : i32
    return %c0_i32, %c0_i32_0, %c0_i32_1 : i32, i32, i32
  }
  func.func @transform_13(%arg0: i32) -> (i32, i32, i32) {
    %c0_i32 = arith.constant 0 : i32
    %c0_i32_0 = arith.constant 0 : i32
    %c0_i32_1 = arith.constant 0 : i32
    %c0_i32_2 = arith.constant 0 : i32
    return %c0_i32, %c0_i32_0, %c0_i32_1 : i32, i32, i32
  }
  func.func @transform_14(%arg0: i32) -> (i32, i32) {
    %c0_i32 = arith.constant 0 : i32
    %c0_i32_0 = arith.constant 0 : i32
    %c0_i32_1 = arith.constant 0 : i32
    return %c0_i32, %c0_i32_0 : i32, i32
  }
  func.func @transform_15(%arg0: i32) -> (i32, i32) {
    %c0_i32 = arith.constant 0 : i32
    %c0_i32_0 = arith.constant 0 : i32
    %c0_i32_1 = arith.constant 0 : i32
    return %c0_i32, %c0_i32_0 : i32, i32
  }
  func.func @transform_16(%arg0: i32) -> (i32, i32) {
    %c0_i32 = arith.constant 0 : i32
    %c0_i32_0 = arith.constant 0 : i32
    %c0_i32_1 = arith.constant 0 : i32
    return %c0_i32, %c0_i32_0 : i32, i32
  }
  func.func @transform_17(%arg0: i32) -> (i32, i32) {
    %c0_i32 = arith.constant 0 : i32
    %c0_i32_0 = arith.constant 0 : i32
    %c0_i32_1 = arith.constant 0 : i32
    return %c0_i32, %c0_i32_0 : i32, i32
  }
  func.func @transform_18(%arg0: i32) -> (i32, i32) {
    %c0_i32 = arith.constant 0 : i32
    %c0_i32_0 = arith.constant 0 : i32
    %c0_i32_1 = arith.constant 0 : i32
    return %c0_i32, %c0_i32_0 : i32, i32
  }
}

</mosaic_0001>

<bundles_post_ra>
// kernel: tpu_custom_call.1
= control target key start
LH: loop header
LB: loop body
LE: loop exit
PB: predicated region body
PF: predicated region fallthrough
CT: control target
= control target key end

     0   :  { %s24763_s0 = inlined_call_operand.vmem [shape: s32[8,2,1], index: 0, kind: input, shape index: {}]   ;;  %s24764_s1 = inlined_call_operand.vmem [shape: f32[100,32], index: 1, kind: input, shape index: {}]   ;;  %s24765_s2 = inlined_call_operand.vmem [shape: f32[4,32,16], index: 2, kind: input, shape index: {}]   ;;  %s24766_s3 = inlined_call_operand.vmem [shape: f32[4,32,16], index: 3, kind: input, shape index: {}]   ;;  %s24767_s4 = inlined_call_operand.vmem [shape: f32[4,32,16], index: 4, kind: input, shape index: {}]   ;;  %s24768_s5 = inlined_call_operand.vmem [shape: f32[4,16,16], index: 5, kind: input, shape index: {}]   ;;  %s24769_s6 = inlined_call_operand.vmem [shape: f32[4,16,16], index: 6, kind: input, shape index: {}]   ;;  %s24770_s7 = inlined_call_operand.vmem [shape: f32[4,16,16], index: 7, kind: input, shape index: {}]   ;;  %s24771_s8 = inlined_call_operand.vmem [shape: f32[4,1,16], index: 8, kind: input, shape index: {}]   ;;  %s24772_s9 = inlined_call_operand.vmem [shape: f32[4,1,16], index: 9, kind: input, shape index: {}]   ;;  %s24773_s10 = inlined_call_operand.vmem [shape: f32[4,1,16], index: 10, kind: input, shape index: {}]   ;;  %s24774_s11 = inlined_call_operand.vmem [shape: f32[4,1,16], index: 11, kind: input, shape index: {}]   ;;  %s24775_s12 = inlined_call_operand.vmem [shape: f32[4,1,16], index: 12, kind: input, shape index: {}]   ;;  %s24776_s13 = inlined_call_operand.vmem [shape: f32[4,1,16], index: 13, kind: input, shape index: {}]   ;;  %s24777_s14 = inlined_call_operand.vmem [shape: f32[32,32], index: 14, kind: input, shape index: {}]   ;;  %s24778_s15 = inlined_call_operand.vmem [shape: f32[32,1], index: 15, kind: input, shape index: {}]   ;;  %s24779_s16 = inlined_call_operand.vmem [shape: f32[32,7], index: 16, kind: input, shape index: {}]   ;;  %s24780_s17 = inlined_call_operand.hbm [shape: f32[2,32], index: 17, kind: output, shape index: {0}]   ;;  %s24781_s18 = inlined_call_operand.hbm [shape: f32[2,7], index: 18, kind: output, shape index: {1}]  }
   0x1   :  { %24785 = sst [smem:[#allocation8_spill]] %s24763_s0 }
   0x2   :  { %24786 = sst [smem:[#allocation9_spill]] %s24764_s1 }
   0x3   :  { %24787 = sst [smem:[#allocation10_spill]] %s24765_s2 }
   0x4   :  { %24 = vsyncpa [#allocation3], 0  ;;  %s24788_s29 = sld [smem:[#allocation8_spill]]  ;;  %v20713_v1 = vmov 0   ;;  %vm86_vm0 = vcmask 1043456   ;;  %v20714_v6 = vmov 0.0  }
   0x5   :  { %20217 = vset.pattern.permute.xlu0 %v20713_v1  ;;  %20218 = vset.pattern.permute.xlu1 %v20713_v1  ;;  %s24789_s20 = sld [smem:[#allocation9_spill]] }
   0x6   :  { %18064 = vmatprep.subr.mxu0 %v20714_v6  ;;  %18093 = vmatprep.subr.mxu1 %v20714_v6 }
   0xa   :  { %v75_v0 = vld [vmem:[%s24788_s29] sm:$0x3]  ;;  %v16782_v2 = vld [vmem:[%s24788_s29 + $0x4] sm:$0x3]  ;;  %v16778_v4 = vld [vmem:[%s24788_s29 + $0x2] sm:$0x3] }
   0xb   :  { %77 = vperm.xlu0 %20217, %v75_v0   ;;  %244 = vperm.xlu1 %20218, %v16782_v2   ;;  %v20823_v3 = vld [vmem:[%s24789_s20 + $0x60] sm:$0xf]  ;;  %v16786_v5 = vld [vmem:[%s24788_s29 + $0x6] sm:$0x3]  ;;  %v20838_v7 = vld [vmem:[%s24789_s20 + $0x58] sm:$0xff] }
   0xc   :  { %18065 = vmatpush3.msk.msra.mxu0 %vm86_vm0, %v20823_v3  ;;  %18094 = vmatpush3.msk.msra.mxu1 %vm86_vm0, %v20823_v3  ;;  %v20847_v8 = vld [vmem:[%s24789_s20 + $0x50] sm:$0xff]  ;;  %v16790_v9 = vld [vmem:[%s24788_s29 + $0x8] sm:$0x3] }
   0xd   :  { %18066 = vmatprep.subr.mxu0 %v20714_v6  ;;  %18095 = vmatprep.subr.mxu1 %v20714_v6 }
   0xe   :  { %18067 = vmatpush3.msra.mxu0 %v20838_v7  ;;  %18096 = vmatpush3.msra.mxu1 %v20838_v7 }
   0xf   :  { %163 = vperm.xlu0 %20217, %v16778_v4   ;;  %325 = vperm.xlu1 %20218, %v16786_v5  }
  0x10   :  { %25 = vsyncpa [#allocation5], 0  ;;  %18068 = vmatprep.subr.mxu0 %v20714_v6  ;;  %v20858_v10 = vld [vmem:[%s24789_s20 + $0x48] sm:$0xff]  ;;  %18097 = vmatprep.subr.mxu1 %v20714_v6  ;;  %v20870_v12 = vld [vmem:[%s24789_s20 + $0x40] sm:$0xff]  ;;  %vm20715_vm1 = vmmov 0   ;;  %v73_v23 = vlaneseq  ;;  %vm82_vm2 = vcmask 818176  }
  0x11   :  { %v16794_v11 = vld [vmem:[%s24788_s29 + $0xa] sm:$0x3]  ;;  %18069 = vmatpush3.msra.mxu0 %v20847_v8  ;;  %18098 = vmatpush3.msra.mxu1 %v20847_v8  ;;  %v16798_v13 = vld [vmem:[%s24788_s29 + $0xc] sm:$0x3]  ;;  %v20880_v14 = vld [vmem:[%s24789_s20 + $0x38] sm:$0xff]  ;;  %s24790_s0 = sld [smem:[#allocation10_spill]] }
  0x12   :  { %18070 = vmatprep.subr.mxu0 %v20714_v6  ;;  %18099 = vmatprep.subr.mxu1 %v20714_v6  ;;  %v20889_v15 = vld [vmem:[%s24789_s20 + $0x30] sm:$0xff]  ;;  %v20898_v16 = vld [vmem:[%s24789_s20 + $0x28] sm:$0xff]  ;;  %v20907_v17 = vld [vmem:[%s24789_s20 + $0x20] sm:$0xff]  ;;  %v20963_v24 = vand.u32 127, %v73_v23  ;;  %vm757_vm11 = vcmask 261120   ;;  %vm831_vm12 = vcmask 130048  }
  0x13   :  { %406 = vperm.xlu0 %20217, %v16790_v9   ;;  %18071 = vmatpush3.msra.mxu0 %v20858_v10  ;;  %v20916_v18 = vld [vmem:[%s24789_s20 + $0x18] sm:$0xff]  ;;  %v20925_v19 = vld [vmem:[%s24789_s20 + $0x10] sm:$0xff]  ;;  %v20934_v20 = vld [vmem:[%s24789_s20 + $0x8] sm:$0xff]  ;;  %s20716_s26 = smov 16   ;;  %vm16666_vm13 = vcmask 254976  }
  0x14   :  { %487 = vperm.xlu1 %20218, %v16794_v11   ;;  %18072 = vmatprep.subr.mxu0 %v20714_v6  ;;  %v20943_v21 = vld [vmem:[%s24789_s20] sm:$0xff]  ;;  %v16802_v22 = vld [vmem:[%s24788_s29 + $0xe] sm:$0x3]  ;;  %v21210_v47 = vld [vmem:[%s24766_s3 + $0x18] sm:$0xff] }
  0x15   :  { %18073 = vmatpush3.msra.mxu0 %v20870_v12  ;;  %18100 = vmatpush3.msra.mxu1 %v20858_v10  ;;  %v21190_v45 = vld [vmem:[%s24768_s5 + $0x8] sm:$0xff]  ;;  %v21201_v46 = vld [vmem:[%s24768_s5] sm:$0xff]  ;;  %v21218_v48 = vld [vmem:[%s24766_s3 + $0x10] sm:$0xff] }
  0x16   :  { %18074 = vmatprep.subr.mxu0 %v20714_v6  ;;  %18101 = vmatprep.subr.mxu1 %v20714_v6  ;;  %v21227_v49 = vld [vmem:[%s24766_s3 + $0x8] sm:$0xff]  ;;  %v21234_v50 = vld [vmem:[%s24766_s3] sm:$0xff]  ;;  %v21248_v52 = vld [vmem:[%s24767_s4 + $0x18] sm:$0xff] }
  0x17   :  { %568 = vperm.xlu0 %20217, %v16798_v13   ;;  %18075 = vmatpush3.msra.mxu0 %v20880_v14  ;;  %v21148_v39 = vld [vmem:[%s24790_s0 + $0x18] sm:$0xff]  ;;  %v21158_v40 = vld [vmem:[%s24790_s0 + $0x10] sm:$0xff]  ;;  %v21167_v42 = vld [vmem:[%s24790_s0 + $0x8] sm:$0xff] }
  0x18   :  { %18076 = vmatprep.subr.mxu0 %v20714_v6  ;;  %18102 = vmatpush3.msra.mxu1 %v20870_v12  ;;  %v21177_v43 = vld [vmem:[%s24790_s0] sm:$0xff]  ;;  %v21243_v51 = vld [vmem:[%s24769_s6 + $0x8] sm:$0xff]  ;;  %v21264_v55 = vld [vmem:[%s24767_s4 + $0x10] sm:$0xff] }
  0x19   :  { %18077 = vmatpush3.msra.mxu0 %v20889_v15  ;;  %18103 = vmatprep.subr.mxu1 %v20714_v6  ;;  %v21259_v54 = vld [vmem:[%s24769_s6] sm:$0xff]  ;;  %v21277_v58 = vld [vmem:[%s24767_s4 + $0x8] sm:$0xff] }
  0x1a   :  { %18078 = vmatprep.subr.mxu0 %v20714_v6  ;;  %18104 = vmatpush3.msra.mxu1 %v20880_v14  ;;  %v21282_v59 = vld [vmem:[%s24770_s7 + $0x8] sm:$0xff]  ;;  %v21292_v61 = vld [vmem:[%s24767_s4] sm:$0xff] }
  0x1b   :  { %18079 = vmatpush3.msra.mxu0 %v20898_v16  ;;  %18105 = vmatprep.subr.mxu1 %v20714_v6  ;;  %v21299_v62 = vld [vmem:[%s24770_s7] sm:$0xff] }
  0x1c   :  { %18080 = vmatprep.subr.mxu0 %v20714_v6  ;;  %18106 = vmatpush3.msra.mxu1 %v20889_v15 }
  0x1d   :  { %18081 = vmatpush3.msra.mxu0 %v20907_v17  ;;  %18107 = vmatprep.subr.mxu1 %v20714_v6 }
  0x1e   :  { %18082 = vmatprep.subr.mxu0 %v20714_v6  ;;  %18108 = vmatpush3.msra.mxu1 %v20898_v16 }
  0x1f   :  { %18083 = vmatpush3.msra.mxu0 %v20916_v18  ;;  %18109 = vmatprep.subr.mxu1 %v20714_v6 }
  0x20   :  { %18084 = vmatprep.subr.mxu0 %v20714_v6  ;;  %18110 = vmatpush3.msra.mxu1 %v20907_v17 }
  0x21   :  { %18085 = vmatpush3.msra.mxu0 %v20925_v19  ;;  %18111 = vmatprep.subr.mxu1 %v20714_v6 }
  0x22   :  { %18086 = vmatprep.subr.mxu0 %v20714_v6  ;;  %18112 = vmatpush3.msra.mxu1 %v20916_v18 }
  0x23   :  { %18087 = vmatpush3.msra.mxu0 %v20934_v20  ;;  %18113 = vmatprep.subr.mxu1 %v20714_v6 }
  0x24   :  { %18088 = vmatprep.subr.mxu0 %v20714_v6  ;;  %18090 = vmatprep.mubr.msk.f32.mxu0 %vm20715_vm1, %v20714_v6 }
  0x25   :  { %18089 = vmatpush3.msra.mxu0 %v20943_v21  ;;  %18114 = vmatpush3.msra.mxu1 %v20925_v19 }
  0x26   :  { %18122 = vmatprep.subr.mxu0 %v20714_v6  ;;  %18115 = vmatprep.subr.mxu1 %v20714_v6 }
  0x27   :  { %18116 = vmatpush3.msra.mxu1 %v20934_v20  ;;  %18119 = vmatprep.mubr.msk.f32.mxu1 %vm20715_vm1, %v20714_v6 }
  0x28   :  { %18117 = vmatprep.subr.mxu1 %v20714_v6  ;;  %649 = vperm.xlu1 %20218, %v16802_v22  }
  0x29   :  { %18118 = vmatpush3.msra.mxu1 %v20943_v21 }
  0x2a   :  { %18151 = vmatprep.subr.mxu1 %v20714_v6 }
  0x86   :  { %v78_v25 = vpop.permute.xlu0 %77  ;;  %v245_v29 = vpop.permute.xlu1 %244 }
  0x87   :  { %vm79_vm3 = vcmp.eq.s32.totalorder %v78_v25, %v20963_v24  ;;  %vm246_vm5 = vcmp.eq.s32.totalorder %v245_v29, %v20963_v24 }
  0x88   :  { %v16775_v26 = vsel %vm79_vm3, 1.0, %v20714_v6  ;;  %v16783_v30 = vsel %vm246_vm5, 1.0, %v20714_v6 }
  0x89   :  { %18091 = vmatmul.mubr.msk.f32.vlgmr.msra.gmra.mxu0 %vm82_vm2, %v16775_v26  ;;  %v21371_v26 = vld [vmem:[%s24775_s12] ss:$0 sm:$0xff] }
  0x8a   :  { %18123 = vmatpush3.msk.msra.mxu0 %vm86_vm0, %v20823_v3  ;;  %v164_v27 = vpop.permute.xlu0 %163  ;;  %18148 = vmatprep.mubr.msk.f32.mxu0 %vm20715_vm1, %v20714_v6  ;;  %v326_v31 = vpop.permute.xlu1 %325 }
  0x8b   :  { %vm165_vm4 = vcmp.eq.s32.totalorder %v164_v27, %v20963_v24  ;;  %18124 = vmatprep.subr.mxu0 %v20714_v6  ;;  %vm327_vm6 = vcmp.eq.s32.totalorder %v326_v31, %v20963_v24 }
  0x8c   :  { %v16779_v28 = vsel %vm165_vm4, 1.0, %v20714_v6  ;;  %18125 = vmatpush3.msra.mxu0 %v20838_v7  ;;  %v16787_v32 = vsel %vm327_vm6, 1.0, %v20714_v6 }
  0x8d   :  { %18126 = vmatprep.subr.mxu0 %v20714_v6  ;;  %18120 = vmatmul.mubr.msk.f32.vlgmr.msra.gmra.mxu1 %vm82_vm2, %v16779_v28 }
  0x8e   :  { %18127 = vmatpush3.msra.mxu0 %v20847_v8  ;;  %18152 = vmatpush3.msk.msra.mxu1 %vm86_vm0, %v20823_v3  ;;  %v407_v33 = vpop.permute.xlu0 %406 }
  0x8f   :  { %18128 = vmatprep.subr.mxu0 %v20714_v6  ;;  %18153 = vmatprep.subr.mxu1 %v20714_v6  ;;  %vm408_vm7 = vcmp.eq.s32.totalorder %v407_v33, %v20963_v24  ;;  %v488_v35 = vpop.permute.xlu1 %487 }
  0x90   :  { %18129 = vmatpush3.msra.mxu0 %v20858_v10  ;;  %18154 = vmatpush3.msra.mxu1 %v20838_v7  ;;  %v16791_v34 = vsel %vm408_vm7, 1.0, %v20714_v6  ;;  %vm489_vm8 = vcmp.eq.s32.totalorder %v488_v35, %v20963_v24 }
  0x91   :  { %18130 = vmatprep.subr.mxu0 %v20714_v6  ;;  %18155 = vmatprep.subr.mxu1 %v20714_v6  ;;  %v16795_v36 = vsel %vm489_vm8, 1.0, %v20714_v6 }
  0x92   :  { %18131 = vmatpush3.msra.mxu0 %v20870_v12  ;;  %18156 = vmatpush3.msra.mxu1 %v20847_v8  ;;  %v569_v37 = vpop.permute.xlu0 %568 }
  0x93   :  { %18132 = vmatprep.subr.mxu0 %v20714_v6  ;;  %18157 = vmatprep.subr.mxu1 %v20714_v6  ;;  %vm570_vm9 = vcmp.eq.s32.totalorder %v569_v37, %v20963_v24 }
  0x94   :  { %18133 = vmatpush3.msra.mxu0 %v20880_v14  ;;  %18158 = vmatpush3.msra.mxu1 %v20858_v10  ;;  %v16799_v38 = vsel %vm570_vm9, 1.0, %v20714_v6 }
  0x95   :  { %18134 = vmatprep.subr.mxu0 %v20714_v6  ;;  %18159 = vmatprep.subr.mxu1 %v20714_v6 }
  0x96   :  { %18135 = vmatpush3.msra.mxu0 %v20889_v15  ;;  %18160 = vmatpush3.msra.mxu1 %v20870_v12 }
  0x97   :  { %18136 = vmatprep.subr.mxu0 %v20714_v6  ;;  %18161 = vmatprep.subr.mxu1 %v20714_v6 }
  0x98   :  { %18137 = vmatpush3.msra.mxu0 %v20898_v16  ;;  %18162 = vmatpush3.msra.mxu1 %v20880_v14 }
  0x99   :  { %18138 = vmatprep.subr.mxu0 %v20714_v6  ;;  %18163 = vmatprep.subr.mxu1 %v20714_v6 }
  0x9a   :  { %18139 = vmatpush3.msra.mxu0 %v20907_v17  ;;  %18164 = vmatpush3.msra.mxu1 %v20889_v15 }
  0x9b   :  { %18140 = vmatprep.subr.mxu0 %v20714_v6  ;;  %18165 = vmatprep.subr.mxu1 %v20714_v6 }
  0x9c   :  { %18141 = vmatpush3.msra.mxu0 %v20916_v18  ;;  %18166 = vmatpush3.msra.mxu1 %v20898_v16 }
  0x9d   :  { %18142 = vmatprep.subr.mxu0 %v20714_v6  ;;  %18167 = vmatprep.subr.mxu1 %v20714_v6 }
  0x9e   :  { %18143 = vmatpush3.msra.mxu0 %v20925_v19  ;;  %18168 = vmatpush3.msra.mxu1 %v20907_v17 }
  0x9f   :  { %18144 = vmatprep.subr.mxu0 %v20714_v6  ;;  %18169 = vmatprep.subr.mxu1 %v20714_v6 }
  0xa0   :  { %18145 = vmatpush3.msra.mxu0 %v20934_v20  ;;  %18170 = vmatpush3.msra.mxu1 %v20916_v18 }
  0xa1   :  { %18146 = vmatprep.subr.mxu0 %v20714_v6  ;;  %18171 = vmatprep.subr.mxu1 %v20714_v6 }
  0xa2   :  { %18147 = vmatpush3.msra.mxu0 %v20943_v21  ;;  %18172 = vmatpush3.msra.mxu1 %v20925_v19 }
  0xa3   :  { %18180 = vmatprep.subr.mxu0 %v20714_v6  ;;  %18149 = vmatmul.mubr.msk.f32.vlgmr.msra.gmra.mxu0 %vm82_vm2, %v16783_v30  ;;  %v650_v41 = vpop.permute.xlu1 %649 }
  0xa4   :  { %18181 = vmatpush3.msk.msra.mxu0 %vm86_vm0, %v20823_v3  ;;  %18206 = vmatprep.mubr.msk.f32.mxu0 %vm20715_vm1, %v20714_v6  ;;  %vm651_vm10 = vcmp.eq.s32.totalorder %v650_v41, %v20963_v24 }
  0xa5   :  { %18182 = vmatprep.subr.mxu0 %v20714_v6  ;;  %18173 = vmatprep.subr.mxu1 %v20714_v6  ;;  %v16803_v44 = vsel %vm651_vm10, 1.0, %v20714_v6 }
  0xa6   :  { %18183 = vmatpush3.msra.mxu0 %v20838_v7  ;;  %18174 = vmatpush3.msra.mxu1 %v20934_v20 }
  0xa7   :  { %18184 = vmatprep.subr.mxu0 %v20714_v6  ;;  %18175 = vmatprep.subr.mxu1 %v20714_v6 }
  0xa8   :  { %18185 = vmatpush3.msra.mxu0 %v20847_v8  ;;  %18176 = vmatpush3.msra.mxu1 %v20943_v21 }
  0xa9   :  { %18186 = vmatprep.subr.mxu0 %v20714_v6  ;;  %18177 = vmatprep.mubr.msk.f32.mxu1 %vm20715_vm1, %v20714_v6 }
  0xaa   :  { %18187 = vmatpush3.msra.mxu0 %v20858_v10  ;;  %18209 = vmatprep.subr.mxu1 %v20714_v6 }
  0xab   :  { %18188 = vmatprep.subr.mxu0 %v20714_v6  ;;  %18178 = vmatmul.mubr.msk.f32.vlgmr.msra.gmra.mxu1 %vm82_vm2, %v16787_v32 }
  0xac   :  { %18189 = vmatpush3.msra.mxu0 %v20870_v12  ;;  %18210 = vmatpush3.msk.msra.mxu1 %vm86_vm0, %v20823_v3 }
  0xad   :  { %18190 = vmatprep.subr.mxu0 %v20714_v6  ;;  %18211 = vmatprep.subr.mxu1 %v20714_v6 }
  0xae   :  { %18191 = vmatpush3.msra.mxu0 %v20880_v14  ;;  %18212 = vmatpush3.msra.mxu1 %v20838_v7 }
  0xaf   :  { %18192 = vmatprep.subr.mxu0 %v20714_v6  ;;  %18213 = vmatprep.subr.mxu1 %v20714_v6 }
  0xb0   :  { %18193 = vmatpush3.msra.mxu0 %v20889_v15  ;;  %18214 = vmatpush3.msra.mxu1 %v20847_v8 }
  0xb1   :  { %18194 = vmatprep.subr.mxu0 %v20714_v6  ;;  %18215 = vmatprep.subr.mxu1 %v20714_v6 }
  0xb2   :  { %18195 = vmatpush3.msra.mxu0 %v20898_v16  ;;  %18216 = vmatpush3.msra.mxu1 %v20858_v10 }
  0xb3   :  { %18196 = vmatprep.subr.mxu0 %v20714_v6  ;;  %18217 = vmatprep.subr.mxu1 %v20714_v6 }
  0xb4   :  { %18197 = vmatpush3.msra.mxu0 %v20907_v17  ;;  %18218 = vmatpush3.msra.mxu1 %v20870_v12 }
  0xb5   :  { %18198 = vmatprep.subr.mxu0 %v20714_v6  ;;  %18219 = vmatprep.subr.mxu1 %v20714_v6 }
  0xb6   :  { %18199 = vmatpush3.msra.mxu0 %v20916_v18  ;;  %18220 = vmatpush3.msra.mxu1 %v20880_v14 }
  0xb7   :  { %18200 = vmatprep.subr.mxu0 %v20714_v6  ;;  %18221 = vmatprep.subr.mxu1 %v20714_v6 }
  0xb8   :  { %18201 = vmatpush3.msra.mxu0 %v20925_v19  ;;  %18222 = vmatpush3.msra.mxu1 %v20889_v15 }
  0xb9   :  { %18202 = vmatprep.subr.mxu0 %v20714_v6  ;;  %18223 = vmatprep.subr.mxu1 %v20714_v6 }
  0xba   :  { %18203 = vmatpush3.msra.mxu0 %v20934_v20  ;;  %18224 = vmatpush3.msra.mxu1 %v20898_v16 }
  0xbb   :  { %18204 = vmatprep.subr.mxu0 %v20714_v6  ;;  %18225 = vmatprep.subr.mxu1 %v20714_v6 }
  0xbc   :  { %18205 = vmatpush3.msra.mxu0 %v20943_v21  ;;  %18226 = vmatpush3.msra.mxu1 %v20907_v17 }
  0xbd   :  { %18207 = vmatmul.mubr.msk.f32.vlgmr.msra.gmra.mxu0 %vm82_vm2, %v16791_v34  ;;  %18238 = vmatprep.subr.mxu0 %v20714_v6 }
  0xbe   :  { %18239 = vmatpush3.msk.msra.mxu0 %vm86_vm0, %v20823_v3  ;;  %18264 = vmatprep.mubr.msk.f32.mxu0 %vm20715_vm1, %v20714_v6 }
  0xbf   :  { %18240 = vmatprep.subr.mxu0 %v20714_v6  ;;  %18227 = vmatprep.subr.mxu1 %v20714_v6 }
  0xc0   :  { %18241 = vmatpush3.msra.mxu0 %v20838_v7  ;;  %18228 = vmatpush3.msra.mxu1 %v20916_v18 }
  0xc1   :  { %18242 = vmatprep.subr.mxu0 %v20714_v6  ;;  %18229 = vmatprep.subr.mxu1 %v20714_v6 }
  0xc2   :  { %18243 = vmatpush3.msra.mxu0 %v20847_v8  ;;  %18230 = vmatpush3.msra.mxu1 %v20925_v19 }
  0xc3   :  { %18244 = vmatprep.subr.mxu0 %v20714_v6  ;;  %18231 = vmatprep.subr.mxu1 %v20714_v6 }
  0xc4   :  { %18245 = vmatpush3.msra.mxu0 %v20858_v10  ;;  %18232 = vmatpush3.msra.mxu1 %v20934_v20 }
  0xc5   :  { %18246 = vmatprep.subr.mxu0 %v20714_v6  ;;  %18233 = vmatprep.subr.mxu1 %v20714_v6 }
  0xc6   :  { %18247 = vmatpush3.msra.mxu0 %v20870_v12  ;;  %18234 = vmatpush3.msra.mxu1 %v20943_v21 }
  0xc7   :  { %18248 = vmatprep.subr.mxu0 %v20714_v6  ;;  %18235 = vmatprep.mubr.msk.f32.mxu1 %vm20715_vm1, %v20714_v6 }
  0xc8   :  { %18249 = vmatpush3.msra.mxu0 %v20880_v14  ;;  %18267 = vmatprep.subr.mxu1 %v20714_v6 }
  0xc9   :  { %18250 = vmatprep.subr.mxu0 %v20714_v6  ;;  %18236 = vmatmul.mubr.msk.f32.vlgmr.msra.gmra.mxu1 %vm82_vm2, %v16795_v36 }
  0xca   :  { %18251 = vmatpush3.msra.mxu0 %v20889_v15  ;;  %18268 = vmatpush3.msk.msra.mxu1 %vm86_vm0, %v20823_v3 }
  0xcb   :  { %18252 = vmatprep.subr.mxu0 %v20714_v6  ;;  %18269 = vmatprep.subr.mxu1 %v20714_v6 }
  0xcc   :  { %18253 = vmatpush3.msra.mxu0 %v20898_v16  ;;  %18270 = vmatpush3.msra.mxu1 %v20838_v7 }
  0xcd   :  { %18254 = vmatprep.subr.mxu0 %v20714_v6  ;;  %18271 = vmatprep.subr.mxu1 %v20714_v6 }
  0xce   :  { %18255 = vmatpush3.msra.mxu0 %v20907_v17  ;;  %18272 = vmatpush3.msra.mxu1 %v20847_v8 }
  0xcf   :  { %18256 = vmatprep.subr.mxu0 %v20714_v6  ;;  %18273 = vmatprep.subr.mxu1 %v20714_v6 }
  0xd0   :  { %18257 = vmatpush3.msra.mxu0 %v20916_v18  ;;  %18274 = vmatpush3.msra.mxu1 %v20858_v10 }
  0xd1   :  { %18258 = vmatprep.subr.mxu0 %v20714_v6  ;;  %18275 = vmatprep.subr.mxu1 %v20714_v6 }
  0xd2   :  { %18259 = vmatpush3.msra.mxu0 %v20925_v19  ;;  %18276 = vmatpush3.msra.mxu1 %v20870_v12 }
  0xd3   :  { %18260 = vmatprep.subr.mxu0 %v20714_v6  ;;  %18277 = vmatprep.subr.mxu1 %v20714_v6 }
  0xd4   :  { %18261 = vmatpush3.msra.mxu0 %v20934_v20  ;;  %18278 = vmatpush3.msra.mxu1 %v20880_v14  ;;  %v21353_v14 = vld [vmem:[%s24771_s8] ss:$0 sm:$0xff] }
  0xd5   :  { %18262 = vmatprep.subr.mxu0 %v20714_v6  ;;  %18279 = vmatprep.subr.mxu1 %v20714_v6 }
  0xd6   :  { %18263 = vmatpush3.msra.mxu0 %v20943_v21  ;;  %18280 = vmatpush3.msra.mxu1 %v20889_v15 }
  0xd7   :  { %18265 = vmatmul.mubr.msk.f32.vlgmr.msra.gmra.mxu0 %vm82_vm2, %v16799_v38  ;;  %18281 = vmatprep.subr.mxu1 %v20714_v6 }
  0xd8   :  { %18282 = vmatpush3.msra.mxu1 %v20898_v16  ;;  %18293 = vmatprep.mubr.msk.f32.mxu1 %vm20715_vm1, %v20714_v6 }
  0xd9   :  { %18283 = vmatprep.subr.mxu1 %v20714_v6  ;;  %18296 = vmatprep.subr.mxu0 %v20714_v6 }
  0xda   :  { %18284 = vmatpush3.msra.mxu1 %v20907_v17  ;;  %18297 = vmatpush3.msra.mxu0 %v21148_v39 }
  0xdb   :  { %18285 = vmatprep.subr.mxu1 %v20714_v6  ;;  %18298 = vmatprep.subr.mxu0 %v20714_v6 }
  0xdc   :  { %18286 = vmatpush3.msra.mxu1 %v20916_v18  ;;  %18299 = vmatpush3.msra.mxu0 %v21158_v40  ;;  %v21359_v18 = vld [vmem:[%s24772_s9] ss:$0 sm:$0xff] }
  0xdd   :  { %18287 = vmatprep.subr.mxu1 %v20714_v6  ;;  %18300 = vmatprep.subr.mxu0 %v20714_v6 }
  0xde   :  { %18288 = vmatpush3.msra.mxu1 %v20925_v19  ;;  %18301 = vmatpush3.msra.mxu0 %v21167_v42  ;;  %v21364_v19 = vld [vmem:[%s24774_s11] ss:$0 sm:$0xff] }
  0xdf   :  { %18289 = vmatprep.subr.mxu1 %v20714_v6  ;;  %18302 = vmatprep.subr.mxu0 %v20714_v6 }
  0xe0   :  { %18290 = vmatpush3.msra.mxu1 %v20934_v20  ;;  %18303 = vmatpush3.msra.mxu0 %v21177_v43 }
  0xe1   :  { %18291 = vmatprep.subr.mxu1 %v20714_v6  ;;  %18304 = vmatprep.mubr.msk.f32.mxu0 %vm20715_vm1, %v20714_v6 }
  0xe2   :  { %18292 = vmatpush3.msra.mxu1 %v20943_v21  ;;  %18332 = vmatprep.subr.mxu0 %v20714_v6 }
  0xe3   :  { %18294 = vmatmul.mubr.msk.f32.vlgmr.msra.gmra.mxu1 %vm82_vm2, %v16803_v44  ;;  %18307 = vmatprep.subr.mxu1 %v20714_v6 }
  0xe4   :  { %18308 = vmatpush3.msra.mxu1 %v21190_v45  ;;  %18311 = vmatprep.mubr.msk.f32.mxu1 %vm20715_vm1, %v20714_v6 }
  0xe5   :  { %18309 = vmatprep.subr.mxu1 %v20714_v6 }
  0xe6   :  { %18310 = vmatpush3.msra.mxu1 %v21201_v46 }
  0xe7   :  { %18314 = vmatprep.subr.mxu1 %v20714_v6  ;;  %18312 = vmatmul.mubr.f32.vlgmr.msra.gmra.mxu1 %v20714_v6 }
  0xe8   :  { %18315 = vmatpush3.msra.mxu1 %v21210_v47  ;;  %18322 = vmatprep.mubr.msk.f32.mxu1 %vm20715_vm1, %v20714_v6 }
  0xe9   :  { %18316 = vmatprep.subr.mxu1 %v20714_v6 }
  0xea   :  { %18317 = vmatpush3.msra.mxu1 %v21218_v48 }
  0xeb   :  { %18318 = vmatprep.subr.mxu1 %v20714_v6 }
  0xec   :  { %18319 = vmatpush3.msra.mxu1 %v21227_v49 }
  0xed   :  { %18320 = vmatprep.subr.mxu1 %v20714_v6 }
  0xee   :  { %18321 = vmatpush3.msra.mxu1 %v21234_v50 }
  0xef   :  { %18325 = vmatprep.subr.mxu1 %v20714_v6 }
 0x149   :  { %v21250_v53 = vpop.f32.mrf.mxu0 }
 0x14a   :  { %18305 = vmatmul.mubr.msk.f32.vlgmr.msra.gmra.mxu0 %vm757_vm11, %v21250_v53  ;;  %18323 = vmatmul.mubr.msk.f32.vlgmr.msra.gmra.mxu1 %vm757_vm11, %v21250_v53 }
 0x14b   :  { %18326 = vmatpush3.msra.mxu1 %v21243_v51  ;;  %18333 = vmatpush3.msra.mxu0 %v21248_v52  ;;  %v18092_v56 = vpop.f32.mrf.mxu0 }
 0x14c   :  { %18327 = vmatprep.subr.mxu1 %v20714_v6  ;;  %18334 = vmatprep.subr.mxu0 %v20714_v6 }
 0x14d   :  { %18328 = vmatpush3.msra.mxu1 %v21259_v54  ;;  %18335 = vmatpush3.msra.mxu0 %v21264_v55  ;;  %v21272_v57 = vpop.f32.mrf.mxu1 }
 0x14e   :  { %18329 = vmatprep.mubr.msk.f32.mxu1 %vm20715_vm1, %v20714_v6  ;;  %18336 = vmatprep.subr.mxu0 %v20714_v6 }
 0x14f   :  { %18343 = vmatprep.subr.mxu1 %v20714_v6  ;;  %18330 = vmatmul.mubr.f32.vlgmr.msra.gmra.mxu1 %v20714_v6  ;;  %v18121_v60 = vpop.f32.mrf.mxu1 }
 0x150   :  { %18337 = vmatpush3.msra.mxu0 %v21277_v58  ;;  %18344 = vmatpush3.msra.mxu1 %v21282_v59 }
 0x151   :  { %18338 = vmatprep.subr.mxu0 %v20714_v6  ;;  %18345 = vmatprep.subr.mxu1 %v20714_v6 }
 0x152   :  { %18339 = vmatpush3.msra.mxu0 %v21292_v61  ;;  %18340 = vmatprep.mubr.msk.f32.mxu0 %vm20715_vm1, %v20714_v6 }
 0x153   :  { %18346 = vmatpush3.msra.mxu1 %v21299_v62  ;;  %18341 = vmatmul.mubr.msk.f32.vlgmr.msra.gmra.mxu0 %vm757_vm11, %v21250_v53 }
 0x154   :  { %18347 = vmatprep.mubr.msk.f32.mxu1 %vm20715_vm1, %v20714_v6  ;;  %18350 = vmatprep.subr.mxu1 %v20714_v6 }
 0x155   :  { %18348 = vmatmul.mubr.f32.vlgmr.msra.gmra.mxu1 %v20714_v6  ;;  %18361 = vmatprep.subr.mxu0 %v20714_v6 }
 0x156   :  { %18351 = vmatpush3.msra.mxu1 %v21148_v39  ;;  %18358 = vmatprep.mubr.msk.f32.mxu1 %vm20715_vm1, %v20714_v6 }
 0x157   :  { %18352 = vmatprep.subr.mxu1 %v20714_v6  ;;  %18362 = vmatpush3.msra.mxu0 %v21190_v45 }
 0x158   :  { %18353 = vmatpush3.msra.mxu1 %v21158_v40  ;;  %18363 = vmatprep.subr.mxu0 %v20714_v6 }
 0x159   :  { %18354 = vmatprep.subr.mxu1 %v20714_v6  ;;  %18364 = vmatpush3.msra.mxu0 %v21201_v46 }
 0x15a   :  { %18355 = vmatpush3.msra.mxu1 %v21167_v42  ;;  %18365 = vmatprep.mubr.msk.f32.mxu0 %vm20715_vm1, %v20714_v6 }
 0x15b   :  { %18356 = vmatprep.subr.mxu1 %v20714_v6  ;;  %18368 = vmatprep.subr.mxu0 %v20714_v6 }
 0x15c   :  { %18357 = vmatpush3.msra.mxu1 %v21177_v43 }
 0x15d   :  { %18359 = vmatmul.mubr.msk.f32.vlgmr.msra.gmra.mxu1 %vm757_vm11, %v21272_v57  ;;  %18379 = vmatprep.subr.mxu1 %v20714_v6 }
 0x15e   :  { %18380 = vmatpush3.msra.mxu1 %v21243_v51  ;;  %18383 = vmatprep.mubr.msk.f32.mxu1 %vm20715_vm1, %v20714_v6 }
 0x15f   :  { %18381 = vmatprep.subr.mxu1 %v20714_v6 }
 0x160   :  { %18382 = vmatpush3.msra.mxu1 %v21259_v54 }
 0x161   :  { %18386 = vmatprep.subr.mxu1 %v20714_v6 }
 0x163   :  { %v21338_v63 = vpop.f32.mrf.mxu0 }
 0x165   :  { %v18150_v0 = vpop.f32.mrf.mxu0 }
 0x166   :  { %v21379_v0 = vld [vmem:[%s24776_s13] ss:$0 sm:$0xff] }
 0x16b   :  { %v21340_v1 = vpop.f32.mrf.mxu1 }
 0x16d   :  { %v18179_v2 = vpop.f32.mrf.mxu1 }
 0x17d   :  { %v21342_v3 = vpop.f32.mrf.mxu0 }
 0x17f   :  { %v18208_v4 = vpop.f32.mrf.mxu0 }
 0x189   :  { %v21344_v5 = vpop.f32.mrf.mxu1 }
 0x18b   :  { %v18237_v7 = vpop.f32.mrf.mxu1 }
 0x18c   :  { %v21385_v7 = vld [vmem:[%s24773_s10] ss:$0 sm:$0xff] }
 0x197   :  { %v21346_v8 = vpop.f32.mrf.mxu0 }
 0x199   :  { %v18266_v9 = vpop.f32.mrf.mxu0 }
 0x1a3   :  { %v21348_v10 = vpop.f32.mrf.mxu1 }
 0x1a5   :  { %v18295_v11 = vpop.f32.mrf.mxu1 }
 0x1a7   :  { %v901_v12 = vpop.f32.mrf.mxu1 }
 0x1a9   :  { %v18313_v13 = vpop.f32.mrf.mxu1 }
 0x20a   :  { %v827_v15 = vpop.f32.mrf.mxu0  ;;  %v991_v16 = vpop.f32.mrf.mxu1 }
 0x20b   :  { %v828_v17 = vadd.f32 %v21353_v14, %v827_v15  ;;  %v992_v23 = vadd.f32 %v21359_v18, %v991_v16 }
 0x20c   :  { %v18306_v20 = vpop.f32.mrf.mxu0  ;;  %v18324_v21 = vpop.f32.mrf.mxu1 }
 0x20d   :  { %v905_v22 = vadd.f32 %v901_v12, %v828_v17 }
 0x20f   :  { %v912_v24 = vadd.f32 %v21364_v19, %v905_v22  ;;  %v1061_v25 = vpop.f32.mrf.mxu1 }
 0x210   :  { %v1065_v27 = vadd.f32 %v1061_v25, %v992_v23 }
 0x211   :  { %v913_v28 = vsub.f32 0.0, %v912_v24  ;;  %v18331_v29 = vpop.f32.mrf.mxu1 }
 0x212   :  { %v1072_v31 = vadd.f32 %v21371_v26, %v1065_v27 }
 0x213   :  { %v914_v30 = vmul.f32 1.442695, %v913_v28  ;;  %v1151_v32 = vpop.f32.mrf.mxu0 }
 0x214   :  { %v1073_v35 = vsub.f32 0.0, %v1072_v31  ;;  %v1152_v11 = vadd.f32 %v21385_v7, %v1151_v32 }
 0x215   :  { %20219 = vpow2.f32 %v914_v30  ;;  %v18342_v33 = vpop.f32.mrf.mxu0  ;;  %v1227_v34 = vpop.f32.mrf.mxu1 }
 0x216   :  { %v1074_v37 = vmul.f32 1.442695, %v1073_v35  ;;  %v1228_v4 = vadd.f32 %v21379_v0, %v1227_v34 }
 0x217   :  { %v18349_v36 = vpop.f32.mrf.mxu1 }
 0x218   :  { %20221 = vpow2.f32 %v1074_v37 }
 0x21d   :  { %v21374_v38 = vpop.f32.mrf.mxu1 }
 0x21e   :  { %v1308_v23 = vadd.f32 %v21353_v14, %v21374_v38 }
 0x21f   :  { %v18360_v41 = vpop.f32.mrf.mxu1 }
 0x222   :  { %v20220_v44 = vpop.eup %20219 }
 0x223   :  { %v916_v56 = vadd.f32 1.0, %v20220_v44 }
 0x225   :  { %20223 = vrcp.f32 %v916_v56  ;;  %v20222_v60 = vpop.eup %20221 }
 0x226   :  { %v1076_v2 = vadd.f32 1.0, %v20222_v60 }
 0x228   :  { %20225 = vrcp.f32 %v1076_v2 }
 0x232   :  { %v20224_v9 = vpop.eup %20223 }
 0x233   :  { %v1231_v12 = vmul.f32 %v20224_v9, %v1228_v4 }
 0x235   :  { %v1232_v13 = vadd.f32 %v1231_v12, %v1152_v11  ;;  %v20226_v15 = vpop.eup %20225 }
 0x236   :  { %v1234_v16 = vsub.f32 1.0, %v20226_v15  ;;  %v1236_v21 = vmul.f32 0.0, %v20226_v15 }
 0x237   :  { %20227 = vtanh.f32 %v1232_v13 }
 0x244   :  { %v20228_v17 = vpop.eup %20227 }
 0x245   :  { %v1235_v20 = vmul.f32 %v20228_v17, %v1234_v16 }
 0x247   :  { %v21388_v22 = vadd.f32 %v1236_v21, %v1235_v20 }
 0x249   :  { %18366 = vmatmul.mubr.msk.f32.vlgmr.msra.gmra.mxu0 %vm831_vm12, %v21388_v22  ;;  %18384 = vmatmul.mubr.msk.f32.vlgmr.msra.gmra.mxu1 %vm831_vm12, %v21388_v22 }
 0x24a   :  { %18369 = vmatpush3.msra.mxu0 %v21210_v47  ;;  %18387 = vmatpush3.msra.mxu1 %v21248_v52 }
 0x24b   :  { %18370 = vmatprep.subr.mxu0 %v20714_v6  ;;  %18388 = vmatprep.subr.mxu1 %v20714_v6 }
 0x24c   :  { %18371 = vmatpush3.msra.mxu0 %v21218_v48  ;;  %18389 = vmatpush3.msra.mxu1 %v21264_v55 }
 0x24d   :  { %18372 = vmatprep.subr.mxu0 %v20714_v6  ;;  %18390 = vmatprep.subr.mxu1 %v20714_v6 }
 0x24e   :  { %18373 = vmatpush3.msra.mxu0 %v21227_v49  ;;  %18391 = vmatpush3.msra.mxu1 %v21277_v58 }
 0x24f   :  { %18374 = vmatprep.subr.mxu0 %v20714_v6  ;;  %18392 = vmatprep.subr.mxu1 %v20714_v6 }
 0x250   :  { %18375 = vmatpush3.msra.mxu0 %v21234_v50  ;;  %18376 = vmatprep.mubr.msk.f32.mxu0 %vm20715_vm1, %v20714_v6 }
 0x251   :  { %18393 = vmatpush3.msra.mxu1 %v21292_v61  ;;  %18394 = vmatprep.mubr.msk.f32.mxu1 %vm20715_vm1, %v20714_v6 }
 0x252   :  { %18377 = vmatmul.mubr.msk.f32.vlgmr.msra.gmra.mxu0 %vm757_vm11, %v21272_v57  ;;  %18395 = vmatmul.mubr.msk.f32.vlgmr.msra.gmra.mxu1 %vm757_vm11, %v21272_v57 }
 0x253   :  { %18397 = vmatprep.subr.mxu0 %v20714_v6  ;;  %18401 = vmatprep.mubr.msk.f32.mxu0 %vm20715_vm1, %v20714_v6 }
 0x254   :  { %18398 = vmatpush3.msra.mxu0 %v21282_v59  ;;  %18415 = vmatprep.subr.mxu1 %v20714_v6 }
 0x255   :  { %18399 = vmatprep.subr.mxu0 %v20714_v6  ;;  %18416 = vmatpush3.msra.mxu1 %v21190_v45 }
 0x256   :  { %18400 = vmatpush3.msra.mxu0 %v21299_v62  ;;  %18417 = vmatprep.subr.mxu1 %v20714_v6 }
 0x257   :  { %18402 = vmatmul.mubr.msk.f32.vlgmr.msra.gmra.mxu0 %vm831_vm12, %v21388_v22  ;;  %18404 = vmatprep.subr.mxu0 %v20714_v6 }
 0x258   :  { %18405 = vmatpush3.msra.mxu0 %v21148_v39  ;;  %18412 = vmatprep.mubr.msk.f32.mxu0 %vm20715_vm1, %v20714_v6 }
 0x259   :  { %18406 = vmatprep.subr.mxu0 %v20714_v6  ;;  %18418 = vmatpush3.msra.mxu1 %v21201_v46 }
 0x25a   :  { %18407 = vmatpush3.msra.mxu0 %v21158_v40  ;;  %18419 = vmatprep.mubr.msk.f32.mxu1 %vm20715_vm1, %v20714_v6 }
 0x25b   :  { %18408 = vmatprep.subr.mxu0 %v20714_v6  ;;  %18422 = vmatprep.subr.mxu1 %v20714_v6 }
 0x25c   :  { %18409 = vmatpush3.msra.mxu0 %v21167_v42 }
 0x25d   :  { %18410 = vmatprep.subr.mxu0 %v20714_v6 }
 0x25e   :  { %18411 = vmatpush3.msra.mxu0 %v21177_v43 }
 0x25f   :  { %18413 = vmatmul.mubr.msk.f32.vlgmr.msra.gmra.mxu0 %vm757_vm11, %v21338_v63  ;;  %18433 = vmatprep.subr.mxu0 %v20714_v6 }
 0x260   :  { %18434 = vmatpush3.msra.mxu0 %v21243_v51  ;;  %18437 = vmatprep.mubr.msk.f32.mxu0 %vm20715_vm1, %v20714_v6 }
 0x261   :  { %18435 = vmatprep.subr.mxu0 %v20714_v6 }
 0x262   :  { %18436 = vmatpush3.msra.mxu0 %v21259_v54 }
 0x263   :  { %18440 = vmatprep.subr.mxu0 %v20714_v6 }
 0x309   :  { %v1380_v24 = vpop.f32.mrf.mxu0  ;;  %v1528_v25 = vpop.f32.mrf.mxu1 }
 0x30a   :  { %v1384_v27 = vadd.f32 %v1380_v24, %v1308_v23 }
 0x30b   :  { %v18367_v28 = vpop.f32.mrf.mxu0  ;;  %v18385_v29 = vpop.f32.mrf.mxu1 }
 0x30c   :  { %v1385_v30 = vadd.f32 %v21364_v19, %v1384_v27 }
 0x30e   :  { %v1386_v31 = vsub.f32 0.0, %v1385_v30 }
 0x310   :  { %v1387_v32 = vmul.f32 1.442695, %v1386_v31 }
 0x312   :  { %20229 = vpow2.f32 %v1387_v32  ;;  %v1458_v33 = vpop.f32.mrf.mxu0  ;;  %v1606_v34 = vpop.f32.mrf.mxu1 }
 0x313   :  { %v1459_v35 = vadd.f32 %v21359_v18, %v1458_v33  ;;  %v1607_v20 = vadd.f32 %v21385_v7, %v1606_v34 }
 0x314   :  { %v18378_v36 = vpop.f32.mrf.mxu0  ;;  %v18396_v37 = vpop.f32.mrf.mxu1 }
 0x315   :  { %v1532_v41 = vadd.f32 %v1528_v25, %v1459_v35 }
 0x317   :  { %v1533_v44 = vadd.f32 %v21371_v26, %v1532_v41  ;;  %v1676_v38 = vpop.f32.mrf.mxu0 }
 0x318   :  { %v1677_v16 = vadd.f32 %v21379_v0, %v1676_v38 }
 0x319   :  { %v1534_v56 = vsub.f32 0.0, %v1533_v44  ;;  %v18403_v60 = vpop.f32.mrf.mxu0 }
 0x31b   :  { %v1535_v2 = vmul.f32 1.442695, %v1534_v56 }
 0x31d   :  { %20231 = vpow2.f32 %v1535_v2 }
 0x31f   :  { %v20230_v4 = vpop.eup %20229  ;;  %v21455_v9 = vpop.f32.mrf.mxu0 }
 0x320   :  { %v1389_v11 = vadd.f32 1.0, %v20230_v4  ;;  %v1757_v31 = vadd.f32 %v21353_v14, %v21455_v9 }
 0x321   :  { %v18414_v12 = vpop.f32.mrf.mxu0 }
 0x322   :  { %20233 = vrcp.f32 %v1389_v11 }
 0x32a   :  { %v20232_v13 = vpop.eup %20231 }
 0x32b   :  { %v1537_v15 = vadd.f32 1.0, %v20232_v13 }
 0x32d   :  { %20235 = vrcp.f32 %v1537_v15 }
 0x32f   :  { %v20234_v17 = vpop.eup %20233 }
 0x330   :  { %v1680_v21 = vmul.f32 %v20234_v17, %v1677_v16 }
 0x332   :  { %v1681_v23 = vadd.f32 %v1680_v21, %v1607_v20 }
 0x334   :  { %20237 = vtanh.f32 %v1681_v23 }
 0x33a   :  { %v20236_v24 = vpop.eup %20235 }
 0x33b   :  { %v1683_v25 = vsub.f32 1.0, %v20236_v24  ;;  %v1685_v29 = vmul.f32 %v20236_v24, %v21388_v22 }
 0x341   :  { %v20238_v27 = vpop.eup %20237 }
 0x342   :  { %v1684_v28 = vmul.f32 %v20238_v27, %v1683_v25 }
 0x344   :  { %v21460_v30 = vadd.f32 %v1685_v29, %v1684_v28 }
 0x346   :  { %18420 = vmatmul.mubr.msk.f32.vlgmr.msra.gmra.mxu1 %vm831_vm12, %v21460_v30  ;;  %18438 = vmatmul.mubr.msk.f32.vlgmr.msra.gmra.mxu0 %vm831_vm12, %v21460_v30 }
 0x347   :  { %18423 = vmatpush3.msra.mxu1 %v21210_v47  ;;  %18441 = vmatpush3.msra.mxu0 %v21248_v52 }
 0x348   :  { %18424 = vmatprep.subr.mxu1 %v20714_v6  ;;  %18442 = vmatprep.subr.mxu0 %v20714_v6 }
 0x349   :  { %18425 = vmatpush3.msra.mxu1 %v21218_v48  ;;  %18443 = vmatpush3.msra.mxu0 %v21264_v55 }
 0x34a   :  { %18426 = vmatprep.subr.mxu1 %v20714_v6  ;;  %18444 = vmatprep.subr.mxu0 %v20714_v6 }
 0x34b   :  { %18427 = vmatpush3.msra.mxu1 %v21227_v49  ;;  %18445 = vmatpush3.msra.mxu0 %v21277_v58 }
 0x34c   :  { %18428 = vmatprep.subr.mxu1 %v20714_v6  ;;  %18446 = vmatprep.subr.mxu0 %v20714_v6 }
 0x34d   :  { %18429 = vmatpush3.msra.mxu1 %v21234_v50  ;;  %18430 = vmatprep.mubr.msk.f32.mxu1 %vm20715_vm1, %v20714_v6 }
 0x34e   :  { %18447 = vmatpush3.msra.mxu0 %v21292_v61  ;;  %18448 = vmatprep.mubr.msk.f32.mxu0 %vm20715_vm1, %v20714_v6 }
 0x34f   :  { %18431 = vmatmul.mubr.msk.f32.vlgmr.msra.gmra.mxu1 %vm757_vm11, %v21338_v63  ;;  %18449 = vmatmul.mubr.msk.f32.vlgmr.msra.gmra.mxu0 %vm757_vm11, %v21338_v63 }
 0x350   :  { %18451 = vmatprep.subr.mxu1 %v20714_v6  ;;  %18455 = vmatprep.mubr.msk.f32.mxu1 %vm20715_vm1, %v20714_v6 }
 0x351   :  { %18452 = vmatpush3.msra.mxu1 %v21282_v59  ;;  %18469 = vmatprep.subr.mxu0 %v20714_v6 }
 0x352   :  { %18453 = vmatprep.subr.mxu1 %v20714_v6  ;;  %18470 = vmatpush3.msra.mxu0 %v21190_v45 }
 0x353   :  { %18454 = vmatpush3.msra.mxu1 %v21299_v62  ;;  %18471 = vmatprep.subr.mxu0 %v20714_v6 }
 0x354   :  { %18456 = vmatmul.mubr.msk.f32.vlgmr.msra.gmra.mxu1 %vm831_vm12, %v21460_v30  ;;  %18458 = vmatprep.subr.mxu1 %v20714_v6 }
 0x355   :  { %18459 = vmatpush3.msra.mxu1 %v21148_v39  ;;  %18466 = vmatprep.mubr.msk.f32.mxu1 %vm20715_vm1, %v20714_v6 }
 0x356   :  { %18460 = vmatprep.subr.mxu1 %v20714_v6  ;;  %18472 = vmatpush3.msra.mxu0 %v21201_v46 }
 0x357   :  { %18461 = vmatpush3.msra.mxu1 %v21158_v40  ;;  %18473 = vmatprep.mubr.msk.f32.mxu0 %vm20715_vm1, %v20714_v6 }
 0x358   :  { %18462 = vmatprep.subr.mxu1 %v20714_v6  ;;  %18476 = vmatprep.subr.mxu0 %v20714_v6 }
 0x359   :  { %18463 = vmatpush3.msra.mxu1 %v21167_v42 }
 0x35a   :  { %18464 = vmatprep.subr.mxu1 %v20714_v6 }
 0x35b   :  { %18465 = vmatpush3.msra.mxu1 %v21177_v43 }
 0x35c   :  { %18467 = vmatmul.mubr.msk.f32.vlgmr.msra.gmra.mxu1 %vm757_vm11, %v21340_v1  ;;  %18487 = vmatprep.subr.mxu1 %v20714_v6 }
 0x35d   :  { %18488 = vmatpush3.msra.mxu1 %v21243_v51  ;;  %18491 = vmatprep.mubr.msk.f32.mxu1 %vm20715_vm1, %v20714_v6 }
 0x35e   :  { %18489 = vmatprep.subr.mxu1 %v20714_v6 }
 0x35f   :  { %18490 = vmatpush3.msra.mxu1 %v21259_v54 }
 0x360   :  { %18494 = vmatprep.subr.mxu1 %v20714_v6 }
 0x406   :  { %v1829_v32 = vpop.f32.mrf.mxu1  ;;  %v1977_v33 = vpop.f32.mrf.mxu0 }
 0x407   :  { %v1833_v34 = vadd.f32 %v1829_v32, %v1757_v31 }
 0x408   :  { %v18421_v35 = vpop.f32.mrf.mxu1  ;;  %v18439_v36 = vpop.f32.mrf.mxu0 }
 0x409   :  { %v1834_v37 = vadd.f32 %v21364_v19, %v1833_v34 }
 0x40b   :  { %v1835_v41 = vsub.f32 0.0, %v1834_v37 }
 0x40d   :  { %v1836_v44 = vmul.f32 1.442695, %v1835_v41 }
 0x40f   :  { %20239 = vpow2.f32 %v1836_v44  ;;  %v1907_v38 = vpop.f32.mrf.mxu1  ;;  %v2055_v56 = vpop.f32.mrf.mxu0 }
 0x410   :  { %v1908_v60 = vadd.f32 %v21359_v18, %v1907_v38  ;;  %v2056_v29 = vadd.f32 %v21385_v7, %v2055_v56 }
 0x411   :  { %v18432_v2 = vpop.f32.mrf.mxu1  ;;  %v18450_v4 = vpop.f32.mrf.mxu0 }
 0x412   :  { %v1981_v11 = vadd.f32 %v1977_v33, %v1908_v60 }
 0x414   :  { %v1982_v12 = vadd.f32 %v21371_v26, %v1981_v11  ;;  %v2125_v9 = vpop.f32.mrf.mxu1 }
 0x415   :  { %v2126_v27 = vadd.f32 %v21379_v0, %v2125_v9 }
 0x416   :  { %v1983_v13 = vsub.f32 0.0, %v1982_v12  ;;  %v18457_v15 = vpop.f32.mrf.mxu1 }
 0x418   :  { %v1984_v16 = vmul.f32 1.442695, %v1983_v13 }
 0x41a   :  { %20241 = vpow2.f32 %v1984_v16 }
 0x41c   :  { %v20240_v17 = vpop.eup %20239  ;;  %v21527_v20 = vpop.f32.mrf.mxu1 }
 0x41d   :  { %v1838_v21 = vadd.f32 1.0, %v20240_v17  ;;  %v2206_v44 = vadd.f32 %v21353_v14, %v21527_v20 }
 0x41e   :  { %v18468_v23 = vpop.f32.mrf.mxu1 }
 0x41f   :  { %20243 = vrcp.f32 %v1838_v21 }
 0x427   :  { %v20242_v24 = vpop.eup %20241 }
 0x428   :  { %v1986_v25 = vadd.f32 1.0, %v20242_v24 }
 0x42a   :  { %20245 = vrcp.f32 %v1986_v25 }
 0x42c   :  { %v20244_v28 = vpop.eup %20243 }
 0x42d   :  { %v2129_v31 = vmul.f32 %v20244_v28, %v2126_v27 }
 0x42f   :  { %v2130_v32 = vadd.f32 %v2129_v31, %v2056_v29 }
 0x431   :  { %20247 = vtanh.f32 %v2130_v32 }
 0x437   :  { %v20246_v33 = vpop.eup %20245 }
 0x438   :  { %v2132_v34 = vsub.f32 1.0, %v20246_v33  ;;  %v2134_v37 = vmul.f32 %v20246_v33, %v21460_v30 }
 0x43e   :  { %v20248_v35 = vpop.eup %20247 }
 0x43f   :  { %v2133_v36 = vmul.f32 %v20248_v35, %v2132_v34 }
 0x441   :  { %v21532_v41 = vadd.f32 %v2134_v37, %v2133_v36 }
 0x443   :  { %18474 = vmatmul.mubr.msk.f32.vlgmr.msra.gmra.mxu0 %vm831_vm12, %v21532_v41  ;;  %18492 = vmatmul.mubr.msk.f32.vlgmr.msra.gmra.mxu1 %vm831_vm12, %v21532_v41 }
 0x444   :  { %18477 = vmatpush3.msra.mxu0 %v21210_v47  ;;  %18495 = vmatpush3.msra.mxu1 %v21248_v52 }
 0x445   :  { %18478 = vmatprep.subr.mxu0 %v20714_v6  ;;  %18496 = vmatprep.subr.mxu1 %v20714_v6 }
 0x446   :  { %18479 = vmatpush3.msra.mxu0 %v21218_v48  ;;  %18497 = vmatpush3.msra.mxu1 %v21264_v55 }
 0x447   :  { %18480 = vmatprep.subr.mxu0 %v20714_v6  ;;  %18498 = vmatprep.subr.mxu1 %v20714_v6 }
 0x448   :  { %18481 = vmatpush3.msra.mxu0 %v21227_v49  ;;  %18499 = vmatpush3.msra.mxu1 %v21277_v58 }
 0x449   :  { %18482 = vmatprep.subr.mxu0 %v20714_v6  ;;  %18500 = vmatprep.subr.mxu1 %v20714_v6 }
 0x44a   :  { %18483 = vmatpush3.msra.mxu0 %v21234_v50  ;;  %18484 = vmatprep.mubr.msk.f32.mxu0 %vm20715_vm1, %v20714_v6 }
 0x44b   :  { %18501 = vmatpush3.msra.mxu1 %v21292_v61  ;;  %18502 = vmatprep.mubr.msk.f32.mxu1 %vm20715_vm1, %v20714_v6 }
 0x44c   :  { %18485 = vmatmul.mubr.msk.f32.vlgmr.msra.gmra.mxu0 %vm757_vm11, %v21340_v1  ;;  %18503 = vmatmul.mubr.msk.f32.vlgmr.msra.gmra.mxu1 %vm757_vm11, %v21340_v1 }
 0x44d   :  { %18505 = vmatprep.subr.mxu0 %v20714_v6  ;;  %18509 = vmatprep.mubr.msk.f32.mxu0 %vm20715_vm1, %v20714_v6 }
 0x44e   :  { %18506 = vmatpush3.msra.mxu0 %v21282_v59  ;;  %18523 = vmatprep.subr.mxu1 %v20714_v6 }
 0x44f   :  { %18507 = vmatprep.subr.mxu0 %v20714_v6  ;;  %18524 = vmatpush3.msra.mxu1 %v21190_v45 }
 0x450   :  { %18508 = vmatpush3.msra.mxu0 %v21299_v62  ;;  %18525 = vmatprep.subr.mxu1 %v20714_v6 }
 0x451   :  { %18510 = vmatmul.mubr.msk.f32.vlgmr.msra.gmra.mxu0 %vm831_vm12, %v21532_v41  ;;  %18512 = vmatprep.subr.mxu0 %v20714_v6 }
 0x452   :  { %18513 = vmatpush3.msra.mxu0 %v21148_v39  ;;  %18520 = vmatprep.mubr.msk.f32.mxu0 %vm20715_vm1, %v20714_v6 }
 0x453   :  { %18514 = vmatprep.subr.mxu0 %v20714_v6  ;;  %18526 = vmatpush3.msra.mxu1 %v21201_v46 }
 0x454   :  { %18515 = vmatpush3.msra.mxu0 %v21158_v40  ;;  %18527 = vmatprep.mubr.msk.f32.mxu1 %vm20715_vm1, %v20714_v6 }
 0x455   :  { %18516 = vmatprep.subr.mxu0 %v20714_v6  ;;  %18530 = vmatprep.subr.mxu1 %v20714_v6 }
 0x456   :  { %18517 = vmatpush3.msra.mxu0 %v21167_v42 }
 0x457   :  { %18518 = vmatprep.subr.mxu0 %v20714_v6 }
 0x458   :  { %18519 = vmatpush3.msra.mxu0 %v21177_v43 }
 0x459   :  { %18521 = vmatmul.mubr.msk.f32.vlgmr.msra.gmra.mxu0 %vm757_vm11, %v21342_v3  ;;  %18541 = vmatprep.subr.mxu0 %v20714_v6 }
 0x45a   :  { %18542 = vmatpush3.msra.mxu0 %v21243_v51  ;;  %18545 = vmatprep.mubr.msk.f32.mxu0 %vm20715_vm1, %v20714_v6 }
 0x45b   :  { %18543 = vmatprep.subr.mxu0 %v20714_v6 }
 0x45c   :  { %18544 = vmatpush3.msra.mxu0 %v21259_v54 }
 0x45d   :  { %18548 = vmatprep.subr.mxu0 %v20714_v6 }
 0x503   :  { %v2278_v38 = vpop.f32.mrf.mxu0  ;;  %v2426_v56 = vpop.f32.mrf.mxu1 }
 0x504   :  { %v2282_v60 = vadd.f32 %v2278_v38, %v2206_v44 }
 0x505   :  { %v18475_v2 = vpop.f32.mrf.mxu0  ;;  %v18493_v4 = vpop.f32.mrf.mxu1 }
 0x506   :  { %v2283_v11 = vadd.f32 %v21364_v19, %v2282_v60 }
 0x508   :  { %v2284_v12 = vsub.f32 0.0, %v2283_v11 }
 0x50a   :  { %v2285_v9 = vmul.f32 1.442695, %v2284_v12 }
 0x50c   :  { %20249 = vpow2.f32 %v2285_v9  ;;  %v2356_v13 = vpop.f32.mrf.mxu0  ;;  %v2504_v15 = vpop.f32.mrf.mxu1 }
 0x50d   :  { %v2357_v16 = vadd.f32 %v21359_v18, %v2356_v13  ;;  %v2505_v44 = vadd.f32 %v21385_v7, %v2504_v15 }
 0x50e   :  { %v18486_v17 = vpop.f32.mrf.mxu0  ;;  %v18504_v21 = vpop.f32.mrf.mxu1 }
 0x50f   :  { %v2430_v23 = vadd.f32 %v2426_v56, %v2357_v16 }
 0x511   :  { %v2431_v24 = vadd.f32 %v21371_v26, %v2430_v23  ;;  %v2574_v20 = vpop.f32.mrf.mxu0 }
 0x512   :  { %v2575_v36 = vadd.f32 %v21379_v0, %v2574_v20 }
 0x513   :  { %v2432_v25 = vsub.f32 0.0, %v2431_v24  ;;  %v18511_v27 = vpop.f32.mrf.mxu0 }
 0x515   :  { %v2433_v28 = vmul.f32 1.442695, %v2432_v25 }
 0x517   :  { %20251 = vpow2.f32 %v2433_v28 }
 0x519   :  { %v20250_v29 = vpop.eup %20249  ;;  %v21599_v31 = vpop.f32.mrf.mxu0 }
 0x51a   :  { %v2287_v32 = vadd.f32 1.0, %v20250_v29 }
 0x51b   :  { %v18522_v33 = vpop.f32.mrf.mxu0 }
 0x51c   :  { %20253 = vrcp.f32 %v2287_v32 }
 0x524   :  { %v20252_v34 = vpop.eup %20251 }
 0x525   :  { %v2435_v35 = vadd.f32 1.0, %v20252_v34 }
 0x527   :  { %20255 = vrcp.f32 %v2435_v35 }
 0x529   :  { %v20254_v37 = vpop.eup %20253 }
 0x52a   :  { %v2578_v38 = vmul.f32 %v20254_v37, %v2575_v36 }
 0x52c   :  { %v2579_v56 = vadd.f32 %v2578_v38, %v2505_v44 }
 0x52e   :  { %20257 = vtanh.f32 %v2579_v56 }
 0x534   :  { %v20256_v60 = vpop.eup %20255 }
 0x535   :  { %v2581_v2 = vsub.f32 1.0, %v20256_v60  ;;  %v2583_v12 = vmul.f32 %v20256_v60, %v21532_v41 }
 0x53b   :  { %v20258_v4 = vpop.eup %20257 }
 0x53c   :  { %v2582_v11 = vmul.f32 %v20258_v4, %v2581_v2 }
 0x53e   :  { %v21604_v9 = vadd.f32 %v2583_v12, %v2582_v11 }
 0x540   :  { %18528 = vmatmul.mubr.msk.f32.vlgmr.msra.gmra.mxu1 %vm831_vm12, %v21604_v9  ;;  %18546 = vmatmul.mubr.msk.f32.vlgmr.msra.gmra.mxu0 %vm831_vm12, %v21604_v9 }
 0x541   :  { %18531 = vmatpush3.msra.mxu1 %v21210_v47  ;;  %18549 = vmatpush3.msra.mxu0 %v21248_v52 }
 0x542   :  { %18532 = vmatprep.subr.mxu1 %v20714_v6  ;;  %18550 = vmatprep.subr.mxu0 %v20714_v6 }
 0x543   :  { %18533 = vmatpush3.msra.mxu1 %v21218_v48  ;;  %18551 = vmatpush3.msra.mxu0 %v21264_v55 }
 0x544   :  { %18534 = vmatprep.subr.mxu1 %v20714_v6  ;;  %18552 = vmatprep.subr.mxu0 %v20714_v6 }
 0x545   :  { %18535 = vmatpush3.msra.mxu1 %v21227_v49  ;;  %18553 = vmatpush3.msra.mxu0 %v21277_v58 }
 0x546   :  { %18536 = vmatprep.subr.mxu1 %v20714_v6  ;;  %18554 = vmatprep.subr.mxu0 %v20714_v6 }
 0x547   :  { %18537 = vmatpush3.msra.mxu1 %v21234_v50  ;;  %18538 = vmatprep.mubr.msk.f32.mxu1 %vm20715_vm1, %v20714_v6 }
 0x548   :  { %18555 = vmatpush3.msra.mxu0 %v21292_v61  ;;  %18556 = vmatprep.mubr.msk.f32.mxu0 %vm20715_vm1, %v20714_v6 }
 0x549   :  { %18539 = vmatmul.mubr.msk.f32.vlgmr.msra.gmra.mxu1 %vm757_vm11, %v21342_v3  ;;  %18557 = vmatmul.mubr.msk.f32.vlgmr.msra.gmra.mxu0 %vm757_vm11, %v21342_v3 }
 0x54a   :  { %18559 = vmatprep.subr.mxu1 %v20714_v6  ;;  %18563 = vmatprep.mubr.msk.f32.mxu1 %vm20715_vm1, %v20714_v6 }
 0x54b   :  { %18560 = vmatpush3.msra.mxu1 %v21282_v59  ;;  %18577 = vmatprep.subr.mxu0 %v20714_v6 }
 0x54c   :  { %18561 = vmatprep.subr.mxu1 %v20714_v6  ;;  %18578 = vmatpush3.msra.mxu0 %v21190_v45 }
 0x54d   :  { %18562 = vmatpush3.msra.mxu1 %v21299_v62  ;;  %18579 = vmatprep.subr.mxu0 %v20714_v6 }
 0x54e   :  { %18564 = vmatmul.mubr.msk.f32.vlgmr.msra.gmra.mxu1 %vm831_vm12, %v21604_v9  ;;  %18566 = vmatprep.subr.mxu1 %v20714_v6 }
 0x54f   :  { %18567 = vmatpush3.msra.mxu1 %v21148_v39  ;;  %18574 = vmatprep.mubr.msk.f32.mxu1 %vm20715_vm1, %v20714_v6  ;;  %v2655_v39 = vadd.f32 %v21353_v14, %v21599_v31 }
 0x550   :  { %18568 = vmatprep.subr.mxu1 %v20714_v6  ;;  %18580 = vmatpush3.msra.mxu0 %v21201_v46 }
 0x551   :  { %18569 = vmatpush3.msra.mxu1 %v21158_v40  ;;  %18581 = vmatprep.mubr.msk.f32.mxu0 %vm20715_vm1, %v20714_v6 }
 0x552   :  { %18570 = vmatprep.subr.mxu1 %v20714_v6  ;;  %18584 = vmatprep.subr.mxu0 %v20714_v6 }
 0x553   :  { %18571 = vmatpush3.msra.mxu1 %v21167_v42 }
 0x554   :  { %18572 = vmatprep.subr.mxu1 %v20714_v6 }
 0x555   :  { %18573 = vmatpush3.msra.mxu1 %v21177_v43 }
 0x556   :  { %18575 = vmatmul.mubr.msk.f32.vlgmr.msra.gmra.mxu1 %vm757_vm11, %v21344_v5  ;;  %18595 = vmatprep.subr.mxu1 %v20714_v6 }
 0x557   :  { %18596 = vmatpush3.msra.mxu1 %v21243_v51  ;;  %18599 = vmatprep.mubr.msk.f32.mxu1 %vm20715_vm1, %v20714_v6 }
 0x558   :  { %18597 = vmatprep.subr.mxu1 %v20714_v6 }
 0x559   :  { %18598 = vmatpush3.msra.mxu1 %v21259_v54 }
 0x55a   :  { %18602 = vmatprep.subr.mxu1 %v20714_v6 }
 0x600   :  { %v2727_v40 = vpop.f32.mrf.mxu1  ;;  %v2875_v42 = vpop.f32.mrf.mxu0 }
 0x601   :  { %v2731_v43 = vadd.f32 %v2727_v40, %v2655_v39 }
 0x602   :  { %v18529_v45 = vpop.f32.mrf.mxu1  ;;  %v18547_v46 = vpop.f32.mrf.mxu0 }
 0x603   :  { %v2732_v13 = vadd.f32 %v21364_v19, %v2731_v43 }
 0x605   :  { %v2733_v51 = vsub.f32 0.0, %v2732_v13 }
 0x607   :  { %v2734_v15 = vmul.f32 1.442695, %v2733_v51 }
 0x609   :  { %20259 = vpow2.f32 %v2734_v15  ;;  %v2805_v16 = vpop.f32.mrf.mxu1  ;;  %v2953_v17 = vpop.f32.mrf.mxu0 }
 0x60a   :  { %v2806_v21 = vadd.f32 %v21359_v18, %v2805_v16  ;;  %v2954_v38 = vadd.f32 %v21385_v7, %v2953_v17 }
 0x60b   :  { %v18540_v54 = vpop.f32.mrf.mxu1  ;;  %v18558_v23 = vpop.f32.mrf.mxu0 }
 0x60c   :  { %v2879_v24 = vadd.f32 %v2875_v42, %v2806_v21 }
 0x60e   :  { %v2880_v20 = vadd.f32 %v21371_v26, %v2879_v24  ;;  %v3023_v25 = vpop.f32.mrf.mxu1 }
 0x60f   :  { %v3024_v37 = vadd.f32 %v21379_v0, %v3023_v25 }
 0x610   :  { %v2881_v27 = vsub.f32 0.0, %v2880_v20  ;;  %v18565_v28 = vpop.f32.mrf.mxu1 }
 0x612   :  { %v2882_v29 = vmul.f32 1.442695, %v2881_v27 }
 0x614   :  { %20261 = vpow2.f32 %v2882_v29 }
 0x616   :  { %v20260_v31 = vpop.eup %20259  ;;  %v21671_v32 = vpop.f32.mrf.mxu1 }
 0x617   :  { %v2736_v33 = vadd.f32 1.0, %v20260_v31 }
 0x618   :  { %v18576_v34 = vpop.f32.mrf.mxu1 }
 0x619   :  { %20263 = vrcp.f32 %v2736_v33 }
 0x621   :  { %v20262_v35 = vpop.eup %20261 }
 0x622   :  { %v2884_v36 = vadd.f32 1.0, %v20262_v35 }
 0x624   :  { %20265 = vrcp.f32 %v2884_v36 }
 0x626   :  { %v20264_v44 = vpop.eup %20263 }
 0x627   :  { %v3027_v56 = vmul.f32 %v20264_v44, %v3024_v37 }
 0x629   :  { %v3028_v60 = vadd.f32 %v3027_v56, %v2954_v38 }
 0x62b   :  { %20267 = vtanh.f32 %v3028_v60 }
 0x631   :  { %v20266_v2 = vpop.eup %20265 }
 0x632   :  { %v3030_v4 = vsub.f32 1.0, %v20266_v2  ;;  %v3032_v39 = vmul.f32 %v20266_v2, %v21604_v9 }
 0x638   :  { %v20268_v11 = vpop.eup %20267 }
 0x639   :  { %v3031_v12 = vmul.f32 %v20268_v11, %v3030_v4  ;;  %v21811_v11 = vld [vmem:[%s24766_s3 + $0x10] sm:$0xff] }
 0x63b   :  { %v21676_v40 = vadd.f32 %v3032_v39, %v3031_v12  ;;  %v21817_v12 = vld [vmem:[%s24767_s4 + $0x10] sm:$0xff]  ;;  %v21825_v39 = vld [vmem:[%s24766_s3 + $0x8] sm:$0xff] }
 0x63d   :  { %18582 = vmatmul.mubr.msk.f32.vlgmr.msra.gmra.mxu0 %vm831_vm12, %v21676_v40  ;;  %18600 = vmatmul.mubr.msk.f32.vlgmr.msra.gmra.mxu1 %vm831_vm12, %v21676_v40 }
 0x63e   :  { %18585 = vmatpush3.msra.mxu0 %v21210_v47  ;;  %18603 = vmatpush3.msra.mxu1 %v21248_v52  ;;  %v21713_v47 = vld [vmem:[%s24768_s5 + $0x8] sm:$0xff] }
 0x63f   :  { %18586 = vmatprep.subr.mxu0 %v20714_v6  ;;  %18604 = vmatprep.subr.mxu1 %v20714_v6  ;;  %v21749_v52 = vld [vmem:[%s24790_s0 + $0x8] sm:$0xff] }
 0x640   :  { %18587 = vmatpush3.msra.mxu0 %v21218_v48  ;;  %18605 = vmatpush3.msra.mxu1 %v21264_v55  ;;  %v21724_v48 = vld [vmem:[%s24790_s0 + $0x18] sm:$0xff]  ;;  %v21756_v55 = vld [vmem:[%s24790_s0] sm:$0xff] }
 0x641   :  { %18588 = vmatprep.subr.mxu0 %v20714_v6  ;;  %18606 = vmatprep.subr.mxu1 %v20714_v6 }
 0x642   :  { %18589 = vmatpush3.msra.mxu0 %v21227_v49  ;;  %18607 = vmatpush3.msra.mxu1 %v21277_v58  ;;  %v21733_v49 = vld [vmem:[%s24768_s5] sm:$0xff]  ;;  %v21765_v58 = vld [vmem:[%s24769_s6 + $0x8] sm:$0xff] }
 0x643   :  { %18590 = vmatprep.subr.mxu0 %v20714_v6  ;;  %18608 = vmatprep.subr.mxu1 %v20714_v6 }
 0x644   :  { %18591 = vmatpush3.msra.mxu0 %v21234_v50  ;;  %18592 = vmatprep.mubr.msk.f32.mxu0 %vm20715_vm1, %v20714_v6  ;;  %v21739_v50 = vld [vmem:[%s24790_s0 + $0x10] sm:$0xff] }
 0x645   :  { %18609 = vmatpush3.msra.mxu1 %v21292_v61  ;;  %18610 = vmatprep.mubr.msk.f32.mxu1 %vm20715_vm1, %v20714_v6  ;;  %v3104_v61 = vadd.f32 %v21353_v14, %v21671_v32 }
 0x646   :  { %18593 = vmatmul.mubr.msk.f32.vlgmr.msra.gmra.mxu0 %vm757_vm11, %v21344_v5  ;;  %18611 = vmatmul.mubr.msk.f32.vlgmr.msra.gmra.mxu1 %vm757_vm11, %v21344_v5 }
 0x647   :  { %18613 = vmatprep.subr.mxu0 %v20714_v6  ;;  %18617 = vmatprep.mubr.msk.f32.mxu0 %vm20715_vm1, %v20714_v6 }
 0x648   :  { %18614 = vmatpush3.msra.mxu0 %v21282_v59  ;;  %18631 = vmatprep.subr.mxu1 %v20714_v6  ;;  %v21774_v59 = vld [vmem:[%s24769_s6] sm:$0xff] }
 0x649   :  { %18615 = vmatprep.subr.mxu0 %v20714_v6  ;;  %18632 = vmatpush3.msra.mxu1 %v21713_v47 }
 0x64a   :  { %18616 = vmatpush3.msra.mxu0 %v21299_v62  ;;  %18633 = vmatprep.subr.mxu1 %v20714_v6 }
 0x64b   :  { %18618 = vmatmul.mubr.msk.f32.vlgmr.msra.gmra.mxu0 %vm831_vm12, %v21676_v40  ;;  %18620 = vmatprep.subr.mxu0 %v20714_v6 }
 0x64c   :  { %18621 = vmatpush3.msra.mxu0 %v21724_v48  ;;  %18628 = vmatprep.mubr.msk.f32.mxu0 %vm20715_vm1, %v20714_v6 }
 0x64d   :  { %18622 = vmatprep.subr.mxu0 %v20714_v6  ;;  %18634 = vmatpush3.msra.mxu1 %v21733_v49 }
 0x64e   :  { %18623 = vmatpush3.msra.mxu0 %v21739_v50  ;;  %18635 = vmatprep.mubr.msk.f32.mxu1 %vm20715_vm1, %v20714_v6 }
 0x64f   :  { %18624 = vmatprep.subr.mxu0 %v20714_v6  ;;  %18638 = vmatprep.subr.mxu1 %v20714_v6 }
 0x650   :  { %18625 = vmatpush3.msra.mxu0 %v21749_v52 }
 0x651   :  { %18626 = vmatprep.subr.mxu0 %v20714_v6 }
 0x652   :  { %18627 = vmatpush3.msra.mxu0 %v21756_v55 }
 0x653   :  { %18629 = vmatmul.mubr.msk.f32.vlgmr.msra.gmra.mxu0 %vm757_vm11, %v21346_v8  ;;  %18649 = vmatprep.subr.mxu0 %v20714_v6 }
 0x654   :  { %18650 = vmatpush3.msra.mxu0 %v21765_v58  ;;  %18653 = vmatprep.mubr.msk.f32.mxu0 %vm20715_vm1, %v20714_v6 }
 0x655   :  { %18651 = vmatprep.subr.mxu0 %v20714_v6 }
 0x656   :  { %18652 = vmatpush3.msra.mxu0 %v21774_v59 }
 0x657   :  { %18656 = vmatprep.subr.mxu0 %v20714_v6 }
 0x6fd   :  { %v3176_v62 = vpop.f32.mrf.mxu0  ;;  %v3324_v42 = vpop.f32.mrf.mxu1 }
 0x6fe   :  { %v3180_v43 = vadd.f32 %v3176_v62, %v3104_v61  ;;  %v21831_v61 = vld [vmem:[%s24767_s4 + $0x8] sm:$0xff]  ;;  %v21839_v62 = vld [vmem:[%s24766_s3] sm:$0xff] }
 0x6ff   :  { %v18583_v45 = vpop.f32.mrf.mxu0  ;;  %v18601_v46 = vpop.f32.mrf.mxu1 }
 0x700   :  { %v3181_v13 = vadd.f32 %v21364_v19, %v3180_v43  ;;  %v21862_v43 = vld [vmem:[%s24770_s7 + $0x8] sm:$0xff]  ;;  %v21871_v45 = vld [vmem:[%s24770_s7] sm:$0xff] }
 0x701   :  { %v21910_v46 = vld [vmem:[%s24774_s11] ss:$0 sm:$0xff] }
 0x702   :  { %v3182_v51 = vsub.f32 0.0, %v3181_v13 }
 0x704   :  { %v3183_v15 = vmul.f32 1.442695, %v3182_v51 }
 0x706   :  { %20269 = vpow2.f32 %v3183_v15  ;;  %v3254_v16 = vpop.f32.mrf.mxu0  ;;  %v3402_v17 = vpop.f32.mrf.mxu1 }
 0x707   :  { %v3255_v21 = vadd.f32 %v21359_v18, %v3254_v16  ;;  %v3403_v36 = vadd.f32 %v21385_v7, %v3402_v17  ;;  %v21803_v7 = vld [vmem:[%s24767_s4 + $0x18] sm:$0xff]  ;;  %v21916_v17 = vld [vmem:[%s24772_s9] ss:$0 sm:$0xff] }
 0x708   :  { %v18594_v54 = vpop.f32.mrf.mxu0  ;;  %v18612_v23 = vpop.f32.mrf.mxu1 }
 0x709   :  { %v3328_v24 = vadd.f32 %v3324_v42, %v3255_v21  ;;  %v21847_v42 = vld [vmem:[%s24767_s4] sm:$0xff] }
 0x70b   :  { %v3329_v20 = vadd.f32 %v21371_v26, %v3328_v24  ;;  %v3472_v14 = vpop.f32.mrf.mxu0 }
 0x70c   :  { %v3473_v18 = vadd.f32 %v21379_v0, %v3472_v14  ;;  %v21797_v0 = vld [vmem:[%s24766_s3 + $0x18] sm:$0xff] }
 0x70d   :  { %v3330_v25 = vsub.f32 0.0, %v3329_v20  ;;  %v18619_v27 = vpop.f32.mrf.mxu0  ;;  %v21922_v20 = vld [vmem:[%s24775_s12] ss:$0 sm:$0xff] }
 0x70f   :  { %v3331_v28 = vmul.f32 1.442695, %v3330_v25 }
 0x711   :  { %20271 = vpow2.f32 %v3331_v28 }
 0x713   :  { %v20270_v29 = vpop.eup %20269  ;;  %v21783_v31 = vpop.f32.mrf.mxu0 }
 0x714   :  { %v3185_v19 = vadd.f32 1.0, %v20270_v29 }
 0x715   :  { %v18630_v32 = vpop.f32.mrf.mxu0 }
 0x716   :  { %20273 = vrcp.f32 %v3185_v19 }
 0x71e   :  { %v20272_v33 = vpop.eup %20271 }
 0x71f   :  { %v3333_v34 = vadd.f32 1.0, %v20272_v33 }
 0x721   :  { %20275 = vrcp.f32 %v3333_v34 }
 0x723   :  { %v20274_v35 = vpop.eup %20273 }
 0x724   :  { %v3476_v26 = vmul.f32 %v20274_v35, %v3473_v18  ;;  %v21930_v35 = vld [vmem:[%s24776_s13] ss:$0 sm:$0xff] }
 0x726   :  { %v3477_v37 = vadd.f32 %v3476_v26, %v3403_v36 }
 0x728   :  { %20277 = vtanh.f32 %v3477_v37  ;;  %v21936_v37 = vld [vmem:[%s24773_s10] ss:$0 sm:$0xff] }
 0x72e   :  { %v20276_v44 = vpop.eup %20275 }
 0x72f   :  { %v3479_v38 = vsub.f32 1.0, %v20276_v44  ;;  %v3481_v2 = vmul.f32 %v20276_v44, %v21676_v40 }
 0x735   :  { %v20278_v56 = vpop.eup %20277 }
 0x736   :  { %v3480_v60 = vmul.f32 %v20278_v56, %v3479_v38 }
 0x738   :  { %v21788_v4 = vadd.f32 %v3481_v2, %v3480_v60 }
 0x73a   :  { %18636 = vmatmul.mubr.msk.f32.vlgmr.msra.gmra.mxu1 %vm831_vm12, %v21788_v4  ;;  %18654 = vmatmul.mubr.msk.f32.vlgmr.msra.gmra.mxu0 %vm831_vm12, %v21788_v4 }
 0x73b   :  { %18639 = vmatpush3.msra.mxu1 %v21797_v0  ;;  %18657 = vmatpush3.msra.mxu0 %v21803_v7 }
 0x73c   :  { %18640 = vmatprep.subr.mxu1 %v20714_v6  ;;  %18658 = vmatprep.subr.mxu0 %v20714_v6 }
 0x73d   :  { %18641 = vmatpush3.msra.mxu1 %v21811_v11  ;;  %18659 = vmatpush3.msra.mxu0 %v21817_v12 }
 0x73e   :  { %18642 = vmatprep.subr.mxu1 %v20714_v6  ;;  %18660 = vmatprep.subr.mxu0 %v20714_v6 }
 0x73f   :  { %18643 = vmatpush3.msra.mxu1 %v21825_v39  ;;  %18661 = vmatpush3.msra.mxu0 %v21831_v61 }
 0x740   :  { %18644 = vmatprep.subr.mxu1 %v20714_v6  ;;  %18662 = vmatprep.subr.mxu0 %v20714_v6 }
 0x741   :  { %18645 = vmatpush3.msra.mxu1 %v21839_v62  ;;  %18646 = vmatprep.mubr.msk.f32.mxu1 %vm20715_vm1, %v20714_v6 }
 0x742   :  { %18663 = vmatpush3.msra.mxu0 %v21847_v42  ;;  %18664 = vmatprep.mubr.msk.f32.mxu0 %vm20715_vm1, %v20714_v6 }
 0x743   :  { %18647 = vmatmul.mubr.msk.f32.vlgmr.msra.gmra.mxu1 %vm757_vm11, %v21346_v8  ;;  %18665 = vmatmul.mubr.msk.f32.vlgmr.msra.gmra.mxu0 %vm757_vm11, %v21346_v8 }
 0x744   :  { %18667 = vmatprep.subr.mxu1 %v20714_v6  ;;  %18671 = vmatprep.mubr.msk.f32.mxu1 %vm20715_vm1, %v20714_v6 }
 0x745   :  { %18668 = vmatpush3.msra.mxu1 %v21862_v43  ;;  %18685 = vmatprep.subr.mxu0 %v20714_v6 }
 0x746   :  { %18669 = vmatprep.subr.mxu1 %v20714_v6  ;;  %18686 = vmatpush3.msra.mxu0 %v21713_v47  ;;  %v21903_v47 = vld [vmem:[%s24771_s8] ss:$0 sm:$0xff] }
 0x747   :  { %18670 = vmatpush3.msra.mxu1 %v21871_v45  ;;  %18687 = vmatprep.subr.mxu0 %v20714_v6 }
 0x748   :  { %18672 = vmatmul.mubr.msk.f32.vlgmr.msra.gmra.mxu1 %vm831_vm12, %v21788_v4  ;;  %18674 = vmatprep.subr.mxu1 %v20714_v6 }
 0x749   :  { %18675 = vmatpush3.msra.mxu1 %v21724_v48  ;;  %18682 = vmatprep.mubr.msk.f32.mxu1 %vm20715_vm1, %v20714_v6  ;;  %v3553_v48 = vadd.f32 %v21903_v47, %v21783_v31 }
 0x74a   :  { %18676 = vmatprep.subr.mxu1 %v20714_v6  ;;  %18688 = vmatpush3.msra.mxu0 %v21733_v49 }
 0x74b   :  { %18677 = vmatpush3.msra.mxu1 %v21739_v50  ;;  %18689 = vmatprep.mubr.msk.f32.mxu0 %vm20715_vm1, %v20714_v6 }
 0x74c   :  { %18678 = vmatprep.subr.mxu1 %v20714_v6  ;;  %18692 = vmatprep.subr.mxu0 %v20714_v6 }
 0x74d   :  { %18679 = vmatpush3.msra.mxu1 %v21749_v52 }
 0x74e   :  { %18680 = vmatprep.subr.mxu1 %v20714_v6 }
 0x74f   :  { %18681 = vmatpush3.msra.mxu1 %v21756_v55 }
 0x750   :  { %18683 = vmatmul.mubr.msk.f32.vlgmr.msra.gmra.mxu1 %vm757_vm11, %v21348_v10  ;;  %18703 = vmatprep.subr.mxu1 %v20714_v6 }
 0x751   :  { %18704 = vmatpush3.msra.mxu1 %v21765_v58  ;;  %18707 = vmatprep.mubr.msk.f32.mxu1 %vm20715_vm1, %v20714_v6 }
 0x752   :  { %18705 = vmatprep.subr.mxu1 %v20714_v6 }
 0x753   :  { %18706 = vmatpush3.msra.mxu1 %v21774_v59 }
 0x754   :  { %18710 = vmatprep.subr.mxu1 %v20714_v6 }
 0x7fa   :  { %v3625_v49 = vpop.f32.mrf.mxu1  ;;  %v3773_v50 = vpop.f32.mrf.mxu0 }
 0x7fb   :  { %v3629_v52 = vadd.f32 %v3625_v49, %v3553_v48 }
 0x7fc   :  { %v18637_v55 = vpop.f32.mrf.mxu1  ;;  %v18655_v58 = vpop.f32.mrf.mxu0 }
 0x7fd   :  { %v3630_v59 = vadd.f32 %v21910_v46, %v3629_v52  ;;  %v22056_v55 = vld [vmem:[%s24769_s6 + $0x18] sm:$0xff] }
 0x7fe   :  { %v22061_v58 = vld [vmem:[%s24770_s7 + $0x18] sm:$0xff] }
 0x7ff   :  { %v3631_v13 = vsub.f32 0.0, %v3630_v59  ;;  %v22072_v59 = vld [vmem:[%s24769_s6 + $0x10] sm:$0xff] }
 0x801   :  { %v3632_v51 = vmul.f32 1.442695, %v3631_v13  ;;  %v22079_v13 = vld [vmem:[%s24770_s7 + $0x10] sm:$0xff] }
 0x803   :  { %20279 = vpow2.f32 %v3632_v51  ;;  %v3703_v15 = vpop.f32.mrf.mxu1  ;;  %v3851_v16 = vpop.f32.mrf.mxu0  ;;  %v22089_v51 = vld [vmem:[%s24767_s4 + $0x38] sm:$0xff] }
 0x804   :  { %v3704_v21 = vadd.f32 %v21916_v17, %v3703_v15  ;;  %v3852_v44 = vadd.f32 %v21936_v37, %v3851_v16  ;;  %v22099_v15 = vld [vmem:[%s24767_s4 + $0x30] sm:$0xff]  ;;  %v22108_v16 = vld [vmem:[%s24767_s4 + $0x28] sm:$0xff] }
 0x805   :  { %v18648_v54 = vpop.f32.mrf.mxu1  ;;  %v18666_v23 = vpop.f32.mrf.mxu0 }
 0x806   :  { %v3777_v24 = vadd.f32 %v3773_v50, %v3704_v21  ;;  %v22117_v21 = vld [vmem:[%s24767_s4 + $0x20] sm:$0xff] }
 0x808   :  { %v3778_v14 = vadd.f32 %v21922_v20, %v3777_v24  ;;  %v3921_v25 = vpop.f32.mrf.mxu1 }
 0x809   :  { %v3922_v36 = vadd.f32 %v21930_v35, %v3921_v25 }
 0x80a   :  { %v3779_v27 = vsub.f32 0.0, %v3778_v14  ;;  %v18673_v28 = vpop.f32.mrf.mxu1 }
 0x80c   :  { %v3780_v29 = vmul.f32 1.442695, %v3779_v27 }
 0x80e   :  { %20281 = vpow2.f32 %v3780_v29 }
 0x810   :  { %v20280_v31 = vpop.eup %20279  ;;  %v21925_v19 = vpop.f32.mrf.mxu1 }
 0x811   :  { %v3634_v32 = vadd.f32 1.0, %v20280_v31 }
 0x812   :  { %v18684_v33 = vpop.f32.mrf.mxu1 }
 0x813   :  { %20283 = vrcp.f32 %v3634_v32 }
 0x81b   :  { %v20282_v34 = vpop.eup %20281 }
 0x81c   :  { %v3782_v18 = vadd.f32 1.0, %v20282_v34 }
 0x81e   :  { %20285 = vrcp.f32 %v3782_v18 }
 0x820   :  { %v20284_v26 = vpop.eup %20283 }
 0x821   :  { %v3925_v38 = vmul.f32 %v20284_v26, %v3922_v36 }
 0x823   :  { %v3926_v56 = vadd.f32 %v3925_v38, %v3852_v44 }
 0x825   :  { %20287 = vtanh.f32 %v3926_v56 }
 0x82b   :  { %v20286_v60 = vpop.eup %20285 }
 0x82c   :  { %v3928_v2 = vsub.f32 1.0, %v20286_v60  ;;  %v3930_v50 = vmul.f32 %v20286_v60, %v21788_v4 }
 0x832   :  { %v20288_v48 = vpop.eup %20287 }
 0x833   :  { %v3929_v49 = vmul.f32 %v20288_v48, %v3928_v2  ;;  %v22157_v48 = vld [vmem:[%s24771_s8 + $0x1] ss:$0 sm:$0xff] }
 0x835   :  { %v21940_v52 = vadd.f32 %v3930_v50, %v3929_v49 }
 0x837   :  { %18690 = vmatmul.mubr.msk.f32.vlgmr.msra.gmra.mxu0 %vm831_vm12, %v21940_v52  ;;  %18708 = vmatmul.mubr.msk.f32.vlgmr.msra.gmra.mxu1 %vm831_vm12, %v21940_v52 }
 0x838   :  { %18693 = vmatpush3.msra.mxu0 %v21797_v0  ;;  %18711 = vmatpush3.msra.mxu1 %v21803_v7  ;;  %v21967_v0 = vld [vmem:[%s24768_s5 + $0x18] sm:$0xff]  ;;  %v21980_v7 = vld [vmem:[%s24768_s5 + $0x10] sm:$0xff] }
 0x839   :  { %18694 = vmatprep.subr.mxu0 %v20714_v6  ;;  %18712 = vmatprep.subr.mxu1 %v20714_v6 }
 0x83a   :  { %18695 = vmatpush3.msra.mxu0 %v21811_v11  ;;  %18713 = vmatpush3.msra.mxu1 %v21817_v12  ;;  %v21990_v11 = vld [vmem:[%s24790_s0 + $0x38] sm:$0xff] }
 0x83b   :  { %18696 = vmatprep.subr.mxu0 %v20714_v6  ;;  %18714 = vmatprep.subr.mxu1 %v20714_v6  ;;  %v22001_v12 = vld [vmem:[%s24766_s3 + $0x38] sm:$0xff] }
 0x83c   :  { %18697 = vmatpush3.msra.mxu0 %v21825_v39  ;;  %18715 = vmatpush3.msra.mxu1 %v21831_v61  ;;  %v22006_v39 = vld [vmem:[%s24790_s0 + $0x30] sm:$0xff] }
 0x83d   :  { %18698 = vmatprep.subr.mxu0 %v20714_v6  ;;  %18716 = vmatprep.subr.mxu1 %v20714_v6  ;;  %v22015_v61 = vld [vmem:[%s24766_s3 + $0x30] sm:$0xff] }
 0x83e   :  { %18699 = vmatpush3.msra.mxu0 %v21839_v62  ;;  %18700 = vmatprep.mubr.msk.f32.mxu0 %vm20715_vm1, %v20714_v6  ;;  %v22020_v62 = vld [vmem:[%s24790_s0 + $0x28] sm:$0xff] }
 0x83f   :  { %18717 = vmatpush3.msra.mxu1 %v21847_v42  ;;  %18718 = vmatprep.mubr.msk.f32.mxu1 %vm20715_vm1, %v20714_v6  ;;  %v22029_v42 = vld [vmem:[%s24766_s3 + $0x28] sm:$0xff] }
 0x840   :  { %18701 = vmatmul.mubr.msk.f32.vlgmr.msra.gmra.mxu0 %vm757_vm11, %v21348_v10  ;;  %18719 = vmatmul.mubr.msk.f32.vlgmr.msra.gmra.mxu1 %vm757_vm11, %v21348_v10 }
 0x841   :  { %18721 = vmatprep.subr.mxu0 %v20714_v6  ;;  %18739 = vmatprep.subr.mxu1 %v20714_v6 }
 0x842   :  { %18722 = vmatpush3.msra.mxu0 %v21862_v43  ;;  %18740 = vmatpush3.msra.mxu1 %v21967_v0  ;;  %v22034_v43 = vld [vmem:[%s24790_s0 + $0x20] sm:$0xff] }
 0x843   :  { %18723 = vmatprep.subr.mxu0 %v20714_v6  ;;  %18741 = vmatprep.subr.mxu1 %v20714_v6 }
 0x844   :  { %18724 = vmatpush3.msra.mxu0 %v21871_v45  ;;  %18725 = vmatprep.mubr.msk.f32.mxu0 %vm20715_vm1, %v20714_v6  ;;  %v22043_v45 = vld [vmem:[%s24766_s3 + $0x20] sm:$0xff] }
 0x845   :  { %18742 = vmatpush3.msra.mxu1 %v21980_v7  ;;  %18726 = vmatmul.mubr.msk.f32.vlgmr.msra.gmra.mxu0 %vm831_vm12, %v21940_v52 }
 0x846   :  { %18728 = vmatprep.subr.mxu0 %v20714_v6  ;;  %18743 = vmatprep.mubr.msk.f32.mxu1 %vm20715_vm1, %v20714_v6 }
 0x847   :  { %18746 = vmatprep.subr.mxu1 %v20714_v6  ;;  %18729 = vmatpush3.msra.mxu0 %v21990_v11 }
 0x848   :  { %18744 = vmatmul.mubr.f32.vlgmr.msra.gmra.mxu1 %v20714_v6  ;;  %18730 = vmatprep.subr.mxu0 %v20714_v6 }
 0x849   :  { %18747 = vmatpush3.msra.mxu1 %v22001_v12  ;;  %18731 = vmatpush3.msra.mxu0 %v22006_v39 }
 0x84a   :  { %18748 = vmatprep.subr.mxu1 %v20714_v6  ;;  %18732 = vmatprep.subr.mxu0 %v20714_v6 }
 0x84b   :  { %18749 = vmatpush3.msra.mxu1 %v22015_v61  ;;  %18733 = vmatpush3.msra.mxu0 %v22020_v62 }
 0x84c   :  { %18750 = vmatprep.subr.mxu1 %v20714_v6  ;;  %18734 = vmatprep.subr.mxu0 %v20714_v6 }
 0x84d   :  { %18751 = vmatpush3.msra.mxu1 %v22029_v42  ;;  %18735 = vmatpush3.msra.mxu0 %v22034_v43 }
 0x84e   :  { %18752 = vmatprep.subr.mxu1 %v20714_v6  ;;  %18736 = vmatprep.mubr.msk.f32.mxu0 %vm20715_vm1, %v20714_v6 }
 0x84f   :  { %18753 = vmatpush3.msra.mxu1 %v22043_v45  ;;  %18754 = vmatprep.mubr.msk.f32.mxu1 %vm20715_vm1, %v20714_v6 }
 0x850   :  { %18737 = vmatmul.mubr.msk.f32.vlgmr.msra.gmra.mxu0 %vm757_vm11, %v21348_v10  ;;  %18755 = vmatmul.mubr.msk.f32.vlgmr.msra.gmra.mxu1 %vm757_vm11, %v21348_v10 }
 0x851   :  { %18757 = vmatprep.subr.mxu0 %v20714_v6  ;;  %18775 = vmatprep.subr.mxu1 %v20714_v6 }
 0x852   :  { %18758 = vmatpush3.msra.mxu0 %v22056_v55  ;;  %18776 = vmatpush3.msra.mxu1 %v22061_v58 }
 0x853   :  { %18759 = vmatprep.subr.mxu0 %v20714_v6  ;;  %18777 = vmatprep.subr.mxu1 %v20714_v6 }
 0x854   :  { %18760 = vmatpush3.msra.mxu0 %v22072_v59  ;;  %18761 = vmatprep.mubr.msk.f32.mxu0 %vm20715_vm1, %v20714_v6 }
 0x855   :  { %18778 = vmatpush3.msra.mxu1 %v22079_v13  ;;  %18762 = vmatmul.mubr.f32.vlgmr.msra.gmra.mxu0 %v20714_v6 }
 0x856   :  { %18764 = vmatprep.subr.mxu0 %v20714_v6  ;;  %18779 = vmatprep.mubr.msk.f32.mxu1 %vm20715_vm1, %v20714_v6 }
 0x857   :  { %18782 = vmatprep.subr.mxu1 %v20714_v6  ;;  %18765 = vmatpush3.msra.mxu0 %v22089_v51 }
 0x858   :  { %18780 = vmatmul.mubr.f32.vlgmr.msra.gmra.mxu1 %v20714_v6  ;;  %18766 = vmatprep.subr.mxu0 %v20714_v6 }
 0x859   :  { %18783 = vmatpush3.msra.mxu1 %v21990_v11  ;;  %18767 = vmatpush3.msra.mxu0 %v22099_v15 }
 0x85a   :  { %18784 = vmatprep.subr.mxu1 %v20714_v6  ;;  %18768 = vmatprep.subr.mxu0 %v20714_v6 }
 0x85b   :  { %18785 = vmatpush3.msra.mxu1 %v22006_v39  ;;  %18769 = vmatpush3.msra.mxu0 %v22108_v16 }
 0x85c   :  { %18786 = vmatprep.subr.mxu1 %v20714_v6  ;;  %18770 = vmatprep.subr.mxu0 %v20714_v6 }
 0x85d   :  { %18787 = vmatpush3.msra.mxu1 %v22020_v62  ;;  %18771 = vmatpush3.msra.mxu0 %v22117_v21 }
 0x85e   :  { %18788 = vmatprep.subr.mxu1 %v20714_v6  ;;  %18772 = vmatprep.mubr.msk.f32.mxu0 %vm20715_vm1, %v20714_v6 }
 0x85f   :  { %18789 = vmatpush3.msra.mxu1 %v22034_v43  ;;  %18790 = vmatprep.mubr.msk.f32.mxu1 %vm20715_vm1, %v20714_v6 }
 0x860   :  { %18773 = vmatmul.mubr.msk.f32.vlgmr.msra.gmra.mxu0 %vm757_vm11, %v21348_v10  ;;  %18791 = vmatmul.mubr.msk.f32.vlgmr.msra.gmra.mxu1 %vm757_vm11, %v21346_v8  ;;  %v4002_v10 = vadd.f32 %v21903_v47, %v21925_v19 }
 0x861   :  { %18793 = vmatprep.subr.mxu0 %v20714_v6  ;;  %18811 = vmatprep.subr.mxu1 %v20714_v6 }
 0x862   :  { %18794 = vmatpush3.msra.mxu0 %v21967_v0  ;;  %18812 = vmatpush3.msra.mxu1 %v22056_v55 }
 0x863   :  { %18795 = vmatprep.subr.mxu0 %v20714_v6  ;;  %18813 = vmatprep.subr.mxu1 %v20714_v6 }
 0x864   :  { %18796 = vmatpush3.msra.mxu0 %v21980_v7  ;;  %18814 = vmatpush3.msra.mxu1 %v22072_v59 }
 0x865   :  { %18797 = vmatprep.mubr.msk.f32.mxu0 %vm20715_vm1, %v20714_v6  ;;  %18800 = vmatprep.subr.mxu0 %v20714_v6 }
 0x866   :  { %18815 = vmatprep.mubr.msk.f32.mxu1 %vm20715_vm1, %v20714_v6  ;;  %18818 = vmatprep.subr.mxu1 %v20714_v6 }
 0x8f7   :  { %v4074_v54 = vpop.f32.mrf.mxu0  ;;  %v4222_v23 = vpop.f32.mrf.mxu1 }
 0x8f8   :  { %v4078_v24 = vadd.f32 %v4074_v54, %v4002_v10  ;;  %v22168_v10 = vld [vmem:[%s24774_s11 + $0x1] ss:$0 sm:$0xff] }
 0x8f9   :  { %v18691_v14 = vpop.f32.mrf.mxu0  ;;  %v18709_v25 = vpop.f32.mrf.mxu1 }
 0x8fa   :  { %v4079_v27 = vadd.f32 %v21910_v46, %v4078_v24 }
 0x8fc   :  { %v4080_v28 = vsub.f32 0.0, %v4079_v27 }
 0x8fe   :  { %v4081_v29 = vmul.f32 1.442695, %v4080_v28 }
 0x900   :  { %20289 = vpow2.f32 %v4081_v29  ;;  %v4152_v31 = vpop.f32.mrf.mxu0  ;;  %v4300_v32 = vpop.f32.mrf.mxu1 }
 0x901   :  { %v4153_v33 = vadd.f32 %v21916_v17, %v4152_v31  ;;  %v22175_v31 = vld [vmem:[%s24775_s12 + $0x1] ss:$0 sm:$0xff] }
 0x902   :  { %v18702_v34 = vpop.f32.mrf.mxu0  ;;  %v18720_v18 = vpop.f32.mrf.mxu1 }
 0x903   :  { %v4226_v36 = vadd.f32 %v4222_v23, %v4153_v33 }
 0x905   :  { %v4227_v26 = vadd.f32 %v21922_v20, %v4226_v36  ;;  %v4370_v47 = vpop.f32.mrf.mxu0  ;;  %v22163_v20 = vld [vmem:[%s24772_s9 + $0x1] ss:$0 sm:$0xff] }
 0x907   :  { %v4228_v19 = vsub.f32 0.0, %v4227_v26  ;;  %v18727_v44 = vpop.f32.mrf.mxu0 }
 0x908   :  { %v4559_v38 = vpop.f32.mrf.mxu1 }
 0x909   :  { %v4229_v56 = vmul.f32 1.442695, %v4228_v19 }
 0x90a   :  { %v18745_v60 = vpop.f32.mrf.mxu1 }
 0x90b   :  { %20291 = vpow2.f32 %v4229_v56  ;;  %v4301_v60 = vadd.f32 %v21936_v37, %v4300_v32 }
 0x90d   :  { %v20290_v46 = vpop.eup %20289 }
 0x90e   :  { %v4083_v2 = vadd.f32 1.0, %v20290_v46 }
 0x910   :  { %20293 = vrcp.f32 %v4083_v2  ;;  %v4489_v17 = vpop.f32.mrf.mxu0  ;;  %v4649_v49 = vpop.f32.mrf.mxu1 }
 0x911   :  { %v4490_v50 = vadd.f32 %v22157_v48, %v4489_v17  ;;  %v4650_v14 = vadd.f32 %v22163_v20, %v4649_v49 }
 0x912   :  { %v18738_v54 = vpop.f32.mrf.mxu0  ;;  %v18756_v23 = vpop.f32.mrf.mxu1 }
 0x913   :  { %v4563_v24 = vadd.f32 %v4559_v38, %v4490_v50  ;;  %v4371_v38 = vadd.f32 %v21930_v35, %v4370_v47 }
 0x915   :  { %v4570_v25 = vadd.f32 %v22168_v10, %v4563_v24  ;;  %v4719_v27 = vpop.f32.mrf.mxu0 }
 0x916   :  { %v4723_v28 = vadd.f32 %v4719_v27, %v4650_v14 }
 0x917   :  { %v4571_v29 = vsub.f32 0.0, %v4570_v25  ;;  %v18763_v33 = vpop.f32.mrf.mxu0 }
 0x918   :  { %v20292_v34 = vpop.eup %20291  ;;  %v4885_v18 = vpop.f32.mrf.mxu1  ;;  %v4730_v19 = vadd.f32 %v22175_v31, %v4723_v28  ;;  %v22188_v33 = vld [vmem:[%s24776_s13 + $0x1] ss:$0 sm:$0xff] }
 0x919   :  { %v4572_v36 = vmul.f32 1.442695, %v4571_v29  ;;  %v4231_v26 = vadd.f32 1.0, %v20292_v34 }
 0x91a   :  { %v18781_v44 = vpop.f32.mrf.mxu1  ;;  %v4731_v2 = vsub.f32 0.0, %v4730_v19 }
 0x91b   :  { %20295 = vpow2.f32 %v4572_v36  ;;  %v4886_v36 = vadd.f32 %v22188_v33, %v4885_v18 }
 0x91c   :  { %20297 = vrcp.f32 %v4231_v26  ;;  %v4732_v54 = vmul.f32 1.442695, %v4731_v2  ;;  %v22194_v26 = vld [vmem:[%s24773_s10 + $0x1] ss:$0 sm:$0xff] }
 0x91d   :  { %v20294_v56 = vpop.eup %20293 }
 0x91e   :  { %v4374_v46 = vmul.f32 %v20294_v56, %v4371_v38 }
 0x920   :  { %v4375_v17 = vadd.f32 %v4374_v46, %v4301_v60  ;;  %v4809_v49 = vpop.f32.mrf.mxu0  ;;  %v22180_v50 = vpop.f32.mrf.mxu1 }
 0x921   :  { %v4810_v38 = vadd.f32 %v22194_v26, %v4809_v49 }
 0x922   :  { %20299 = vtanh.f32 %v4375_v17  ;;  %v18774_v23 = vpop.f32.mrf.mxu0  ;;  %v18792_v24 = vpop.f32.mrf.mxu1 }
 0x923   :  { %20301 = vpow2.f32 %v4732_v54 }
 0x928   :  { %v20296_v14 = vpop.eup %20295 }
 0x929   :  { %v4574_v25 = vadd.f32 1.0, %v20296_v14  ;;  %v20298_v27 = vpop.eup %20297 }
 0x92a   :  { %v4377_v35 = vsub.f32 1.0, %v20298_v27  ;;  %v4379_v37 = vmul.f32 %v20298_v27, %v21940_v52 }
 0x92b   :  { %20303 = vrcp.f32 %v4574_v25 }
 0x92f   :  { %v20300_v47 = vpop.eup %20299 }
 0x930   :  { %v4378_v28 = vmul.f32 %v20300_v47, %v4377_v35  ;;  %v20302_v29 = vpop.eup %20301 }
 0x931   :  { %v4734_v34 = vadd.f32 1.0, %v20302_v29 }
 0x932   :  { %v22183_v32 = vadd.f32 %v4379_v37, %v4378_v28 }
 0x933   :  { %20305 = vrcp.f32 %v4734_v34 }
 0x938   :  { %v20304_v19 = vpop.eup %20303 }
 0x939   :  { %v4889_v44 = vmul.f32 %v20304_v19, %v4886_v36 }
 0x93b   :  { %v4890_v56 = vadd.f32 %v4889_v44, %v4810_v38 }
 0x93d   :  { %20307 = vtanh.f32 %v4890_v56 }
 0x940   :  { %v20306_v60 = vpop.eup %20305 }
 0x941   :  { %v4892_v46 = vsub.f32 1.0, %v20306_v60  ;;  %v4894_v54 = vmul.f32 0.0, %v20306_v60 }
 0x94a   :  { %v20308_v2 = vpop.eup %20307 }
 0x94b   :  { %v4893_v17 = vmul.f32 %v20308_v2, %v4892_v46 }
 0x94d   :  { %v22197_v23 = vadd.f32 %v4894_v54, %v4893_v17 }
 0x94f   :  { %18798 = vmatmul.mubr.msk.f32.vlgmr.msra.gmra.mxu0 %vm831_vm12, %v22197_v23  ;;  %18816 = vmatmul.mubr.msk.f32.vlgmr.msra.gmra.mxu1 %vm831_vm12, %v22197_v23 }
 0x950   :  { %18801 = vmatpush3.msra.mxu0 %v22001_v12  ;;  %18819 = vmatpush3.msra.mxu1 %v22089_v51 }
 0x951   :  { %18802 = vmatprep.subr.mxu0 %v20714_v6  ;;  %18820 = vmatprep.subr.mxu1 %v20714_v6 }
 0x952   :  { %18803 = vmatpush3.msra.mxu0 %v22015_v61  ;;  %18821 = vmatpush3.msra.mxu1 %v22099_v15 }
 0x953   :  { %18804 = vmatprep.subr.mxu0 %v20714_v6  ;;  %18822 = vmatprep.subr.mxu1 %v20714_v6 }
 0x954   :  { %18805 = vmatpush3.msra.mxu0 %v22029_v42  ;;  %18823 = vmatpush3.msra.mxu1 %v22108_v16 }
 0x955   :  { %18806 = vmatprep.subr.mxu0 %v20714_v6  ;;  %18824 = vmatprep.subr.mxu1 %v20714_v6 }
 0x956   :  { %18807 = vmatpush3.msra.mxu0 %v22043_v45  ;;  %18808 = vmatprep.mubr.msk.f32.mxu0 %vm20715_vm1, %v20714_v6 }
 0x957   :  { %18825 = vmatpush3.msra.mxu1 %v22117_v21  ;;  %18826 = vmatprep.mubr.msk.f32.mxu1 %vm20715_vm1, %v20714_v6 }
 0x958   :  { %18809 = vmatmul.mubr.msk.f32.vlgmr.msra.gmra.mxu0 %vm757_vm11, %v21346_v8  ;;  %18827 = vmatmul.mubr.msk.f32.vlgmr.msra.gmra.mxu1 %vm757_vm11, %v21346_v8  ;;  %v4963_v8 = vadd.f32 %v22157_v48, %v22180_v50 }
 0x959   :  { %18829 = vmatprep.subr.mxu0 %v20714_v6  ;;  %18833 = vmatprep.mubr.msk.f32.mxu0 %vm20715_vm1, %v20714_v6 }
 0x95a   :  { %18830 = vmatpush3.msra.mxu0 %v22061_v58  ;;  %18847 = vmatprep.subr.mxu1 %v20714_v6 }
 0x95b   :  { %18831 = vmatprep.subr.mxu0 %v20714_v6  ;;  %18848 = vmatpush3.msra.mxu1 %v21967_v0 }
 0x95c   :  { %18832 = vmatpush3.msra.mxu0 %v22079_v13  ;;  %18849 = vmatprep.subr.mxu1 %v20714_v6 }
 0x95d   :  { %18834 = vmatmul.mubr.msk.f32.vlgmr.msra.gmra.mxu0 %vm831_vm12, %v22197_v23  ;;  %18836 = vmatprep.subr.mxu0 %v20714_v6 }
 0x95e   :  { %18837 = vmatpush3.msra.mxu0 %v21990_v11  ;;  %18844 = vmatprep.mubr.msk.f32.mxu0 %vm20715_vm1, %v20714_v6 }
 0x95f   :  { %18838 = vmatprep.subr.mxu0 %v20714_v6  ;;  %18850 = vmatpush3.msra.mxu1 %v21980_v7 }
 0x960   :  { %18839 = vmatpush3.msra.mxu0 %v22006_v39  ;;  %18851 = vmatprep.mubr.msk.f32.mxu1 %vm20715_vm1, %v20714_v6 }
 0x961   :  { %18840 = vmatprep.subr.mxu0 %v20714_v6  ;;  %18854 = vmatprep.subr.mxu1 %v20714_v6 }
 0x962   :  { %18841 = vmatpush3.msra.mxu0 %v22020_v62 }
 0x963   :  { %18842 = vmatprep.subr.mxu0 %v20714_v6 }
 0x964   :  { %18843 = vmatpush3.msra.mxu0 %v22034_v43 }
 0x965   :  { %18845 = vmatmul.mubr.msk.f32.vlgmr.msra.gmra.mxu0 %vm757_vm11, %v21344_v5  ;;  %18865 = vmatprep.subr.mxu0 %v20714_v6 }
 0x966   :  { %18866 = vmatpush3.msra.mxu0 %v22056_v55  ;;  %18869 = vmatprep.mubr.msk.f32.mxu0 %vm20715_vm1, %v20714_v6 }
 0x967   :  { %18867 = vmatprep.subr.mxu0 %v20714_v6 }
 0x968   :  { %18868 = vmatpush3.msra.mxu0 %v22072_v59 }
 0x969   :  { %18872 = vmatprep.subr.mxu0 %v20714_v6 }
 0xa0f   :  { %v5035_v18 = vpop.f32.mrf.mxu0  ;;  %v5183_v49 = vpop.f32.mrf.mxu1 }
 0xa10   :  { %v5039_v24 = vadd.f32 %v5035_v18, %v4963_v8 }
 0xa11   :  { %v18799_v14 = vpop.f32.mrf.mxu0  ;;  %v18817_v25 = vpop.f32.mrf.mxu1 }
 0xa12   :  { %v5040_v27 = vadd.f32 %v22168_v10, %v5039_v24 }
 0xa14   :  { %v5041_v35 = vsub.f32 0.0, %v5040_v27 }
 0xa16   :  { %v5042_v47 = vmul.f32 1.442695, %v5041_v35 }
 0xa18   :  { %20309 = vpow2.f32 %v5042_v47  ;;  %v5113_v28 = vpop.f32.mrf.mxu0  ;;  %v5261_v37 = vpop.f32.mrf.mxu1 }
 0xa19   :  { %v5114_v29 = vadd.f32 %v22163_v20, %v5113_v28 }
 0xa1a   :  { %v18810_v34 = vpop.f32.mrf.mxu0  ;;  %v18828_v36 = vpop.f32.mrf.mxu1 }
 0xa1b   :  { %v5187_v19 = vadd.f32 %v5183_v49, %v5114_v29  ;;  %v5262_v49 = vadd.f32 %v22194_v26, %v5261_v37 }
 0xa1d   :  { %v5188_v44 = vadd.f32 %v22175_v31, %v5187_v19  ;;  %v5331_v50 = vpop.f32.mrf.mxu0 }
 0xa1e   :  { %v5332_v24 = vadd.f32 %v22188_v33, %v5331_v50 }
 0xa1f   :  { %v5189_v38 = vsub.f32 0.0, %v5188_v44  ;;  %v18835_v56 = vpop.f32.mrf.mxu0 }
 0xa21   :  { %v5190_v60 = vmul.f32 1.442695, %v5189_v38 }
 0xa23   :  { %20311 = vpow2.f32 %v5190_v60 }
 0xa25   :  { %v20310_v46 = vpop.eup %20309  ;;  %v22264_v2 = vpop.f32.mrf.mxu0 }
 0xa26   :  { %v5044_v17 = vadd.f32 1.0, %v20310_v46 }
 0xa27   :  { %v18846_v54 = vpop.f32.mrf.mxu0 }
 0xa28   :  { %20313 = vrcp.f32 %v5044_v17 }
 0xa30   :  { %v20312_v8 = vpop.eup %20311 }
 0xa31   :  { %v5192_v18 = vadd.f32 1.0, %v20312_v8 }
 0xa33   :  { %20315 = vrcp.f32 %v5192_v18 }
 0xa35   :  { %v20314_v14 = vpop.eup %20313 }
 0xa36   :  { %v5335_v25 = vmul.f32 %v20314_v14, %v5332_v24 }
 0xa38   :  { %v5336_v27 = vadd.f32 %v5335_v25, %v5262_v49 }
 0xa3a   :  { %20317 = vtanh.f32 %v5336_v27 }
 0xa40   :  { %v20316_v35 = vpop.eup %20315 }
 0xa41   :  { %v5338_v47 = vsub.f32 1.0, %v20316_v35  ;;  %v5340_v34 = vmul.f32 %v20316_v35, %v22197_v23 }
 0xa47   :  { %v20318_v28 = vpop.eup %20317 }
 0xa48   :  { %v5339_v29 = vmul.f32 %v20318_v28, %v5338_v47 }
 0xa4a   :  { %v22269_v36 = vadd.f32 %v5340_v34, %v5339_v29 }
 0xa4c   :  { %18852 = vmatmul.mubr.msk.f32.vlgmr.msra.gmra.mxu1 %vm831_vm12, %v22269_v36  ;;  %18870 = vmatmul.mubr.msk.f32.vlgmr.msra.gmra.mxu0 %vm831_vm12, %v22269_v36 }
 0xa4d   :  { %18855 = vmatpush3.msra.mxu1 %v22001_v12  ;;  %18873 = vmatpush3.msra.mxu0 %v22089_v51 }
 0xa4e   :  { %18856 = vmatprep.subr.mxu1 %v20714_v6  ;;  %18874 = vmatprep.subr.mxu0 %v20714_v6 }
 0xa4f   :  { %18857 = vmatpush3.msra.mxu1 %v22015_v61  ;;  %18875 = vmatpush3.msra.mxu0 %v22099_v15 }
 0xa50   :  { %18858 = vmatprep.subr.mxu1 %v20714_v6  ;;  %18876 = vmatprep.subr.mxu0 %v20714_v6 }
 0xa51   :  { %18859 = vmatpush3.msra.mxu1 %v22029_v42  ;;  %18877 = vmatpush3.msra.mxu0 %v22108_v16 }
 0xa52   :  { %18860 = vmatprep.subr.mxu1 %v20714_v6  ;;  %18878 = vmatprep.subr.mxu0 %v20714_v6 }
 0xa53   :  { %18861 = vmatpush3.msra.mxu1 %v22043_v45  ;;  %18862 = vmatprep.mubr.msk.f32.mxu1 %vm20715_vm1, %v20714_v6 }
 0xa54   :  { %18879 = vmatpush3.msra.mxu0 %v22117_v21  ;;  %18880 = vmatprep.mubr.msk.f32.mxu0 %vm20715_vm1, %v20714_v6 }
 0xa55   :  { %18863 = vmatmul.mubr.msk.f32.vlgmr.msra.gmra.mxu1 %vm757_vm11, %v21344_v5  ;;  %18881 = vmatmul.mubr.msk.f32.vlgmr.msra.gmra.mxu0 %vm757_vm11, %v21344_v5  ;;  %v5409_v5 = vadd.f32 %v22157_v48, %v22264_v2 }
 0xa56   :  { %18883 = vmatprep.subr.mxu1 %v20714_v6  ;;  %18887 = vmatprep.mubr.msk.f32.mxu1 %vm20715_vm1, %v20714_v6 }
 0xa57   :  { %18884 = vmatpush3.msra.mxu1 %v22061_v58  ;;  %18901 = vmatprep.subr.mxu0 %v20714_v6 }
 0xa58   :  { %18885 = vmatprep.subr.mxu1 %v20714_v6  ;;  %18902 = vmatpush3.msra.mxu0 %v21967_v0 }
 0xa59   :  { %18886 = vmatpush3.msra.mxu1 %v22079_v13  ;;  %18903 = vmatprep.subr.mxu0 %v20714_v6 }
 0xa5a   :  { %18888 = vmatmul.mubr.msk.f32.vlgmr.msra.gmra.mxu1 %vm831_vm12, %v22269_v36  ;;  %18890 = vmatprep.subr.mxu1 %v20714_v6 }
 0xa5b   :  { %18891 = vmatpush3.msra.mxu1 %v21990_v11  ;;  %18898 = vmatprep.mubr.msk.f32.mxu1 %vm20715_vm1, %v20714_v6 }
 0xa5c   :  { %18892 = vmatprep.subr.mxu1 %v20714_v6  ;;  %18904 = vmatpush3.msra.mxu0 %v21980_v7 }
 0xa5d   :  { %18893 = vmatpush3.msra.mxu1 %v22006_v39  ;;  %18905 = vmatprep.mubr.msk.f32.mxu0 %vm20715_vm1, %v20714_v6 }
 0xa5e   :  { %18894 = vmatprep.subr.mxu1 %v20714_v6  ;;  %18908 = vmatprep.subr.mxu0 %v20714_v6 }
 0xa5f   :  { %18895 = vmatpush3.msra.mxu1 %v22020_v62 }
 0xa60   :  { %18896 = vmatprep.subr.mxu1 %v20714_v6 }
 0xa61   :  { %18897 = vmatpush3.msra.mxu1 %v22034_v43 }
 0xa62   :  { %18899 = vmatmul.mubr.msk.f32.vlgmr.msra.gmra.mxu1 %vm757_vm11, %v21342_v3  ;;  %18919 = vmatprep.subr.mxu1 %v20714_v6 }
 0xa63   :  { %18920 = vmatpush3.msra.mxu1 %v22056_v55  ;;  %18923 = vmatprep.mubr.msk.f32.mxu1 %vm20715_vm1, %v20714_v6 }
 0xa64   :  { %18921 = vmatprep.subr.mxu1 %v20714_v6 }
 0xa65   :  { %18922 = vmatpush3.msra.mxu1 %v22072_v59 }
 0xa66   :  { %18926 = vmatprep.subr.mxu1 %v20714_v6 }
 0xb0c   :  { %v5481_v37 = vpop.f32.mrf.mxu1  ;;  %v5629_v19 = vpop.f32.mrf.mxu0 }
 0xb0d   :  { %v5485_v44 = vadd.f32 %v5481_v37, %v5409_v5 }
 0xb0e   :  { %v18853_v50 = vpop.f32.mrf.mxu1  ;;  %v18871_v38 = vpop.f32.mrf.mxu0 }
 0xb0f   :  { %v5486_v56 = vadd.f32 %v22168_v10, %v5485_v44 }
 0xb11   :  { %v5487_v60 = vsub.f32 0.0, %v5486_v56 }
 0xb13   :  { %v5488_v46 = vmul.f32 1.442695, %v5487_v60 }
 0xb15   :  { %20319 = vpow2.f32 %v5488_v46  ;;  %v5559_v17 = vpop.f32.mrf.mxu1  ;;  %v5707_v54 = vpop.f32.mrf.mxu0 }
 0xb16   :  { %v5560_v8 = vadd.f32 %v22163_v20, %v5559_v17 }
 0xb17   :  { %v18864_v18 = vpop.f32.mrf.mxu1  ;;  %v18882_v24 = vpop.f32.mrf.mxu0 }
 0xb18   :  { %v5633_v14 = vadd.f32 %v5629_v19, %v5560_v8  ;;  %v5708_v19 = vadd.f32 %v22194_v26, %v5707_v54 }
 0xb1a   :  { %v5634_v49 = vadd.f32 %v22175_v31, %v5633_v14  ;;  %v5777_v2 = vpop.f32.mrf.mxu1 }
 0xb1b   :  { %v5778_v44 = vadd.f32 %v22188_v33, %v5777_v2 }
 0xb1c   :  { %v5635_v25 = vsub.f32 0.0, %v5634_v49  ;;  %v18889_v27 = vpop.f32.mrf.mxu1 }
 0xb1e   :  { %v5636_v35 = vmul.f32 1.442695, %v5635_v25 }
 0xb20   :  { %20321 = vpow2.f32 %v5636_v35 }
 0xb22   :  { %v20320_v47 = vpop.eup %20319  ;;  %v22336_v28 = vpop.f32.mrf.mxu1 }
 0xb23   :  { %v5490_v29 = vadd.f32 1.0, %v20320_v47 }
 0xb24   :  { %v18900_v34 = vpop.f32.mrf.mxu1 }
 0xb25   :  { %20323 = vrcp.f32 %v5490_v29 }
 0xb2d   :  { %v20322_v5 = vpop.eup %20321 }
 0xb2e   :  { %v5638_v37 = vadd.f32 1.0, %v20322_v5 }
 0xb30   :  { %20325 = vrcp.f32 %v5638_v37 }
 0xb32   :  { %v20324_v50 = vpop.eup %20323 }
 0xb33   :  { %v5781_v38 = vmul.f32 %v20324_v50, %v5778_v44 }
 0xb35   :  { %v5782_v56 = vadd.f32 %v5781_v38, %v5708_v19 }
 0xb37   :  { %20327 = vtanh.f32 %v5782_v56 }
 0xb3d   :  { %v20326_v60 = vpop.eup %20325 }
 0xb3e   :  { %v5784_v46 = vsub.f32 1.0, %v20326_v60  ;;  %v5786_v18 = vmul.f32 %v20326_v60, %v22269_v36 }
 0xb44   :  { %v20328_v17 = vpop.eup %20327 }
 0xb45   :  { %v5785_v8 = vmul.f32 %v20328_v17, %v5784_v46 }
 0xb47   :  { %v22341_v24 = vadd.f32 %v5786_v18, %v5785_v8 }
 0xb49   :  { %18906 = vmatmul.mubr.msk.f32.vlgmr.msra.gmra.mxu0 %vm831_vm12, %v22341_v24  ;;  %18924 = vmatmul.mubr.msk.f32.vlgmr.msra.gmra.mxu1 %vm831_vm12, %v22341_v24 }
 0xb4a   :  { %18909 = vmatpush3.msra.mxu0 %v22001_v12  ;;  %18927 = vmatpush3.msra.mxu1 %v22089_v51 }
 0xb4b   :  { %18910 = vmatprep.subr.mxu0 %v20714_v6  ;;  %18928 = vmatprep.subr.mxu1 %v20714_v6 }
 0xb4c   :  { %18911 = vmatpush3.msra.mxu0 %v22015_v61  ;;  %18929 = vmatpush3.msra.mxu1 %v22099_v15 }
 0xb4d   :  { %18912 = vmatprep.subr.mxu0 %v20714_v6  ;;  %18930 = vmatprep.subr.mxu1 %v20714_v6 }
 0xb4e   :  { %18913 = vmatpush3.msra.mxu0 %v22029_v42  ;;  %18931 = vmatpush3.msra.mxu1 %v22108_v16 }
 0xb4f   :  { %18914 = vmatprep.subr.mxu0 %v20714_v6  ;;  %18932 = vmatprep.subr.mxu1 %v20714_v6 }
 0xb50   :  { %18915 = vmatpush3.msra.mxu0 %v22043_v45  ;;  %18916 = vmatprep.mubr.msk.f32.mxu0 %vm20715_vm1, %v20714_v6 }
 0xb51   :  { %18933 = vmatpush3.msra.mxu1 %v22117_v21  ;;  %18934 = vmatprep.mubr.msk.f32.mxu1 %vm20715_vm1, %v20714_v6 }
 0xb52   :  { %18917 = vmatmul.mubr.msk.f32.vlgmr.msra.gmra.mxu0 %vm757_vm11, %v21342_v3  ;;  %18935 = vmatmul.mubr.msk.f32.vlgmr.msra.gmra.mxu1 %vm757_vm11, %v21342_v3  ;;  %v5855_v3 = vadd.f32 %v22157_v48, %v22336_v28 }
 0xb53   :  { %18937 = vmatprep.subr.mxu0 %v20714_v6  ;;  %18941 = vmatprep.mubr.msk.f32.mxu0 %vm20715_vm1, %v20714_v6 }
 0xb54   :  { %18938 = vmatpush3.msra.mxu0 %v22061_v58  ;;  %18955 = vmatprep.subr.mxu1 %v20714_v6 }
 0xb55   :  { %18939 = vmatprep.subr.mxu0 %v20714_v6  ;;  %18956 = vmatpush3.msra.mxu1 %v21967_v0 }
 0xb56   :  { %18940 = vmatpush3.msra.mxu0 %v22079_v13  ;;  %18957 = vmatprep.subr.mxu1 %v20714_v6 }
 0xb57   :  { %18942 = vmatmul.mubr.msk.f32.vlgmr.msra.gmra.mxu0 %vm831_vm12, %v22341_v24  ;;  %18944 = vmatprep.subr.mxu0 %v20714_v6 }
 0xb58   :  { %18945 = vmatpush3.msra.mxu0 %v21990_v11  ;;  %18952 = vmatprep.mubr.msk.f32.mxu0 %vm20715_vm1, %v20714_v6 }
 0xb59   :  { %18946 = vmatprep.subr.mxu0 %v20714_v6  ;;  %18958 = vmatpush3.msra.mxu1 %v21980_v7 }
 0xb5a   :  { %18947 = vmatpush3.msra.mxu0 %v22006_v39  ;;  %18959 = vmatprep.mubr.msk.f32.mxu1 %vm20715_vm1, %v20714_v6 }
 0xb5b   :  { %18948 = vmatprep.subr.mxu0 %v20714_v6  ;;  %18962 = vmatprep.subr.mxu1 %v20714_v6 }
 0xb5c   :  { %18949 = vmatpush3.msra.mxu0 %v22020_v62 }
 0xb5d   :  { %18950 = vmatprep.subr.mxu0 %v20714_v6 }
 0xb5e   :  { %18951 = vmatpush3.msra.mxu0 %v22034_v43 }
 0xb5f   :  { %18953 = vmatmul.mubr.msk.f32.vlgmr.msra.gmra.mxu0 %vm757_vm11, %v21340_v1  ;;  %18973 = vmatprep.subr.mxu0 %v20714_v6 }
 0xb60   :  { %18974 = vmatpush3.msra.mxu0 %v22056_v55  ;;  %18977 = vmatprep.mubr.msk.f32.mxu0 %vm20715_vm1, %v20714_v6 }
 0xb61   :  { %18975 = vmatprep.subr.mxu0 %v20714_v6 }
 0xb62   :  { %18976 = vmatpush3.msra.mxu0 %v22072_v59 }
 0xb63   :  { %18980 = vmatprep.subr.mxu0 %v20714_v6 }
 0xc09   :  { %v5927_v54 = vpop.f32.mrf.mxu0  ;;  %v6075_v14 = vpop.f32.mrf.mxu1 }
 0xc0a   :  { %v5931_v49 = vadd.f32 %v5927_v54, %v5855_v3 }
 0xc0b   :  { %v18907_v2 = vpop.f32.mrf.mxu0  ;;  %v18925_v25 = vpop.f32.mrf.mxu1 }
 0xc0c   :  { %v5932_v27 = vadd.f32 %v22168_v10, %v5931_v49 }
 0xc0e   :  { %v5933_v35 = vsub.f32 0.0, %v5932_v27 }
 0xc10   :  { %v5934_v47 = vmul.f32 1.442695, %v5933_v35 }
 0xc12   :  { %20329 = vpow2.f32 %v5934_v47  ;;  %v6005_v29 = vpop.f32.mrf.mxu0  ;;  %v6153_v34 = vpop.f32.mrf.mxu1 }
 0xc13   :  { %v6006_v5 = vadd.f32 %v22163_v20, %v6005_v29 }
 0xc14   :  { %v18918_v37 = vpop.f32.mrf.mxu0  ;;  %v18936_v44 = vpop.f32.mrf.mxu1 }
 0xc15   :  { %v6079_v50 = vadd.f32 %v6075_v14, %v6006_v5  ;;  %v6154_v14 = vadd.f32 %v22194_v26, %v6153_v34 }
 0xc17   :  { %v6080_v19 = vadd.f32 %v22175_v31, %v6079_v50  ;;  %v6223_v28 = vpop.f32.mrf.mxu0 }
 0xc18   :  { %v6224_v49 = vadd.f32 %v22188_v33, %v6223_v28 }
 0xc19   :  { %v6081_v38 = vsub.f32 0.0, %v6080_v19  ;;  %v18943_v56 = vpop.f32.mrf.mxu0 }
 0xc1b   :  { %v6082_v60 = vmul.f32 1.442695, %v6081_v38 }
 0xc1d   :  { %20331 = vpow2.f32 %v6082_v60 }
 0xc1f   :  { %v20330_v46 = vpop.eup %20329  ;;  %v22408_v17 = vpop.f32.mrf.mxu0 }
 0xc20   :  { %v5936_v8 = vadd.f32 1.0, %v20330_v46 }
 0xc21   :  { %v18954_v18 = vpop.f32.mrf.mxu0 }
 0xc22   :  { %20333 = vrcp.f32 %v5936_v8 }
 0xc2a   :  { %v20332_v3 = vpop.eup %20331 }
 0xc2b   :  { %v6084_v54 = vadd.f32 1.0, %v20332_v3 }
 0xc2d   :  { %20335 = vrcp.f32 %v6084_v54 }
 0xc2f   :  { %v20334_v2 = vpop.eup %20333 }
 0xc30   :  { %v6227_v25 = vmul.f32 %v20334_v2, %v6224_v49 }
 0xc32   :  { %v6228_v27 = vadd.f32 %v6227_v25, %v6154_v14 }
 0xc34   :  { %20337 = vtanh.f32 %v6228_v27 }
 0xc3a   :  { %v20336_v35 = vpop.eup %20335 }
 0xc3b   :  { %v6230_v47 = vsub.f32 1.0, %v20336_v35  ;;  %v6232_v37 = vmul.f32 %v20336_v35, %v22341_v24 }
 0xc41   :  { %v20338_v29 = vpop.eup %20337 }
 0xc42   :  { %v6231_v5 = vmul.f32 %v20338_v29, %v6230_v47 }
 0xc44   :  { %v22413_v44 = vadd.f32 %v6232_v37, %v6231_v5  ;;  %v22494_v37 = vld [vmem:[%s24766_s3 + $0x38] sm:$0xff] }
 0xc46   :  { %18960 = vmatmul.mubr.msk.f32.vlgmr.msra.gmra.mxu1 %vm831_vm12, %v22413_v44  ;;  %18978 = vmatmul.mubr.msk.f32.vlgmr.msra.gmra.mxu0 %vm831_vm12, %v22413_v44 }
 0xc47   :  { %18963 = vmatpush3.msra.mxu1 %v22001_v12  ;;  %18981 = vmatpush3.msra.mxu0 %v22089_v51 }
 0xc48   :  { %18964 = vmatprep.subr.mxu1 %v20714_v6  ;;  %18982 = vmatprep.subr.mxu0 %v20714_v6 }
 0xc49   :  { %18965 = vmatpush3.msra.mxu1 %v22015_v61  ;;  %18983 = vmatpush3.msra.mxu0 %v22099_v15 }
 0xc4a   :  { %18966 = vmatprep.subr.mxu1 %v20714_v6  ;;  %18984 = vmatprep.subr.mxu0 %v20714_v6 }
 0xc4b   :  { %18967 = vmatpush3.msra.mxu1 %v22029_v42  ;;  %18985 = vmatpush3.msra.mxu0 %v22108_v16 }
 0xc4c   :  { %18968 = vmatprep.subr.mxu1 %v20714_v6  ;;  %18986 = vmatprep.subr.mxu0 %v20714_v6 }
 0xc4d   :  { %18969 = vmatpush3.msra.mxu1 %v22043_v45  ;;  %18970 = vmatprep.mubr.msk.f32.mxu1 %vm20715_vm1, %v20714_v6 }
 0xc4e   :  { %18987 = vmatpush3.msra.mxu0 %v22117_v21  ;;  %18988 = vmatprep.mubr.msk.f32.mxu0 %vm20715_vm1, %v20714_v6 }
 0xc4f   :  { %18971 = vmatmul.mubr.msk.f32.vlgmr.msra.gmra.mxu1 %vm757_vm11, %v21340_v1  ;;  %18989 = vmatmul.mubr.msk.f32.vlgmr.msra.gmra.mxu0 %vm757_vm11, %v21340_v1  ;;  %v6301_v1 = vadd.f32 %v22157_v48, %v22408_v17 }
 0xc50   :  { %18991 = vmatprep.subr.mxu1 %v20714_v6  ;;  %18995 = vmatprep.mubr.msk.f32.mxu1 %vm20715_vm1, %v20714_v6 }
 0xc51   :  { %18992 = vmatpush3.msra.mxu1 %v22061_v58  ;;  %19009 = vmatprep.subr.mxu0 %v20714_v6 }
 0xc52   :  { %18993 = vmatprep.subr.mxu1 %v20714_v6  ;;  %19010 = vmatpush3.msra.mxu0 %v21967_v0 }
 0xc53   :  { %18994 = vmatpush3.msra.mxu1 %v22079_v13  ;;  %19011 = vmatprep.subr.mxu0 %v20714_v6 }
 0xc54   :  { %18996 = vmatmul.mubr.msk.f32.vlgmr.msra.gmra.mxu1 %vm831_vm12, %v22413_v44  ;;  %18998 = vmatprep.subr.mxu1 %v20714_v6 }
 0xc55   :  { %18999 = vmatpush3.msra.mxu1 %v21990_v11  ;;  %19006 = vmatprep.mubr.msk.f32.mxu1 %vm20715_vm1, %v20714_v6 }
 0xc56   :  { %19000 = vmatprep.subr.mxu1 %v20714_v6  ;;  %19012 = vmatpush3.msra.mxu0 %v21980_v7 }
 0xc57   :  { %19001 = vmatpush3.msra.mxu1 %v22006_v39  ;;  %19013 = vmatprep.mubr.msk.f32.mxu0 %vm20715_vm1, %v20714_v6 }
 0xc58   :  { %19002 = vmatprep.subr.mxu1 %v20714_v6  ;;  %19016 = vmatprep.subr.mxu0 %v20714_v6 }
 0xc59   :  { %19003 = vmatpush3.msra.mxu1 %v22020_v62 }
 0xc5a   :  { %19004 = vmatprep.subr.mxu1 %v20714_v6 }
 0xc5b   :  { %19005 = vmatpush3.msra.mxu1 %v22034_v43 }
 0xc5c   :  { %19007 = vmatmul.mubr.msk.f32.vlgmr.msra.gmra.mxu1 %vm757_vm11, %v21338_v63  ;;  %19027 = vmatprep.subr.mxu1 %v20714_v6 }
 0xc5d   :  { %19028 = vmatpush3.msra.mxu1 %v22056_v55  ;;  %19031 = vmatprep.mubr.msk.f32.mxu1 %vm20715_vm1, %v20714_v6 }
 0xc5e   :  { %19029 = vmatprep.subr.mxu1 %v20714_v6 }
 0xc5f   :  { %19030 = vmatpush3.msra.mxu1 %v22072_v59 }
 0xc60   :  { %19034 = vmatprep.subr.mxu1 %v20714_v6 }
 0xd06   :  { %v6373_v0 = vpop.f32.mrf.mxu1  ;;  %v6521_v7 = vpop.f32.mrf.mxu0 }
 0xd07   :  { %v6377_v11 = vadd.f32 %v6373_v0, %v6301_v1  ;;  %v22503_v1 = vld [vmem:[%s24766_s3 + $0x30] sm:$0xff]  ;;  %v22563_v0 = vld [vmem:[%s24790_s0 + $0x38] sm:$0xff] }
 0xd08   :  { %v18961_v12 = vpop.f32.mrf.mxu1  ;;  %v18979_v39 = vpop.f32.mrf.mxu0 }
 0xd09   :  { %v6378_v61 = vadd.f32 %v22168_v10, %v6377_v11  ;;  %v22578_v11 = vld [vmem:[%s24790_s0 + $0x30] sm:$0xff]  ;;  %v22588_v12 = vld [vmem:[%s24790_s0 + $0x28] sm:$0xff]  ;;  %v22595_v39 = vld [vmem:[%s24790_s0 + $0x20] sm:$0xff] }
 0xd0b   :  { %v6379_v62 = vsub.f32 0.0, %v6378_v61  ;;  %v22604_v61 = vld [vmem:[%s24769_s6 + $0x18] sm:$0xff] }
 0xd0d   :  { %v6380_v42 = vmul.f32 1.442695, %v6379_v62  ;;  %v22613_v62 = vld [vmem:[%s24769_s6 + $0x10] sm:$0xff] }
 0xd0f   :  { %20339 = vpow2.f32 %v6380_v42  ;;  %v6451_v43 = vpop.f32.mrf.mxu1  ;;  %v6599_v45 = vpop.f32.mrf.mxu0 }
 0xd10   :  { %v6452_v55 = vadd.f32 %v22163_v20, %v6451_v43  ;;  %v6600_v49 = vadd.f32 %v22194_v26, %v6599_v45 }
 0xd11   :  { %v18972_v58 = vpop.f32.mrf.mxu1  ;;  %v18990_v59 = vpop.f32.mrf.mxu0 }
 0xd12   :  { %v6525_v13 = vadd.f32 %v6521_v7, %v6452_v55  ;;  %v22572_v7 = vld [vmem:[%s24768_s5 + $0x10] sm:$0xff] }
 0xd14   :  { %v6526_v34 = vadd.f32 %v22175_v31, %v6525_v13  ;;  %v6669_v50 = vpop.f32.mrf.mxu1 }
 0xd15   :  { %v6670_v3 = vadd.f32 %v22188_v33, %v6669_v50 }
 0xd16   :  { %v6527_v19 = vsub.f32 0.0, %v6526_v34  ;;  %v18997_v28 = vpop.f32.mrf.mxu1 }
 0xd18   :  { %v6528_v38 = vmul.f32 1.442695, %v6527_v19 }
 0xd1a   :  { %20341 = vpow2.f32 %v6528_v38 }
 0xd1c   :  { %v20340_v56 = vpop.eup %20339  ;;  %v22480_v60 = vpop.f32.mrf.mxu1 }
 0xd1d   :  { %v6382_v46 = vadd.f32 1.0, %v20340_v56  ;;  %v6747_v42 = vadd.f32 %v22157_v48, %v22480_v60 }
 0xd1e   :  { %v19008_v17 = vpop.f32.mrf.mxu1 }
 0xd1f   :  { %20343 = vrcp.f32 %v6382_v46 }
 0xd27   :  { %v20342_v8 = vpop.eup %20341 }
 0xd28   :  { %v6530_v18 = vadd.f32 1.0, %v20342_v8 }
 0xd2a   :  { %20345 = vrcp.f32 %v6530_v18 }
 0xd2c   :  { %v20344_v54 = vpop.eup %20343 }
 0xd2d   :  { %v6673_v2 = vmul.f32 %v20344_v54, %v6670_v3 }
 0xd2f   :  { %v6674_v14 = vadd.f32 %v6673_v2, %v6600_v49 }
 0xd31   :  { %20347 = vtanh.f32 %v6674_v14 }
 0xd37   :  { %v20346_v25 = vpop.eup %20345 }
 0xd38   :  { %v6676_v27 = vsub.f32 1.0, %v20346_v25  ;;  %v6678_v29 = vmul.f32 %v20346_v25, %v22413_v44 }
 0xd3e   :  { %v20348_v35 = vpop.eup %20347 }
 0xd3f   :  { %v6677_v47 = vmul.f32 %v20348_v35, %v6676_v27 }
 0xd41   :  { %v22485_v5 = vadd.f32 %v6678_v29, %v6677_v47 }
 0xd43   :  { %19014 = vmatmul.mubr.msk.f32.vlgmr.msra.gmra.mxu0 %vm831_vm12, %v22485_v5  ;;  %19032 = vmatmul.mubr.msk.f32.vlgmr.msra.gmra.mxu1 %vm831_vm12, %v22485_v5 }
 0xd44   :  { %19017 = vmatpush3.msra.mxu0 %v22494_v37  ;;  %19035 = vmatpush3.msra.mxu1 %v22089_v51  ;;  %v22512_v51 = vld [vmem:[%s24766_s3 + $0x28] sm:$0xff] }
 0xd45   :  { %19018 = vmatprep.subr.mxu0 %v20714_v6  ;;  %19036 = vmatprep.subr.mxu1 %v20714_v6 }
 0xd46   :  { %19019 = vmatpush3.msra.mxu0 %v22503_v1  ;;  %19037 = vmatpush3.msra.mxu1 %v22099_v15  ;;  %v22521_v15 = vld [vmem:[%s24766_s3 + $0x20] sm:$0xff] }
 0xd47   :  { %19020 = vmatprep.subr.mxu0 %v20714_v6  ;;  %19038 = vmatprep.subr.mxu1 %v20714_v6 }
 0xd48   :  { %19021 = vmatpush3.msra.mxu0 %v22512_v51  ;;  %19039 = vmatpush3.msra.mxu1 %v22108_v16  ;;  %v22539_v16 = vld [vmem:[%s24770_s7 + $0x18] sm:$0xff] }
 0xd49   :  { %19022 = vmatprep.subr.mxu0 %v20714_v6  ;;  %19040 = vmatprep.subr.mxu1 %v20714_v6 }
 0xd4a   :  { %19023 = vmatpush3.msra.mxu0 %v22521_v15  ;;  %19024 = vmatprep.mubr.msk.f32.mxu0 %vm20715_vm1, %v20714_v6 }
 0xd4b   :  { %19041 = vmatpush3.msra.mxu1 %v22117_v21  ;;  %19042 = vmatprep.mubr.msk.f32.mxu1 %vm20715_vm1, %v20714_v6  ;;  %v22553_v21 = vld [vmem:[%s24770_s7 + $0x10] sm:$0xff] }
 0xd4c   :  { %19025 = vmatmul.mubr.msk.f32.vlgmr.msra.gmra.mxu0 %vm757_vm11, %v21338_v63  ;;  %19043 = vmatmul.mubr.msk.f32.vlgmr.msra.gmra.mxu1 %vm757_vm11, %v21338_v63  ;;  %v22547_v63 = vld [vmem:[%s24768_s5 + $0x18] sm:$0xff] }
 0xd4d   :  { %19045 = vmatprep.subr.mxu0 %v20714_v6  ;;  %19049 = vmatprep.mubr.msk.f32.mxu0 %vm20715_vm1, %v20714_v6 }
 0xd4e   :  { %19046 = vmatpush3.msra.mxu0 %v22539_v16  ;;  %19063 = vmatprep.subr.mxu1 %v20714_v6 }
 0xd4f   :  { %19047 = vmatprep.subr.mxu0 %v20714_v6  ;;  %19064 = vmatpush3.msra.mxu1 %v22547_v63 }
 0xd50   :  { %19048 = vmatpush3.msra.mxu0 %v22553_v21  ;;  %19065 = vmatprep.subr.mxu1 %v20714_v6 }
 0xd51   :  { %19050 = vmatmul.mubr.msk.f32.vlgmr.msra.gmra.mxu0 %vm831_vm12, %v22485_v5  ;;  %19052 = vmatprep.subr.mxu0 %v20714_v6 }
 0xd52   :  { %19053 = vmatpush3.msra.mxu0 %v22563_v0  ;;  %19060 = vmatprep.mubr.msk.f32.mxu0 %vm20715_vm1, %v20714_v6 }
 0xd53   :  { %19054 = vmatprep.subr.mxu0 %v20714_v6  ;;  %19066 = vmatpush3.msra.mxu1 %v22572_v7 }
 0xd54   :  { %19055 = vmatpush3.msra.mxu0 %v22578_v11  ;;  %19067 = vmatprep.mubr.msk.f32.mxu1 %vm20715_vm1, %v20714_v6 }
 0xd55   :  { %19056 = vmatprep.subr.mxu0 %v20714_v6  ;;  %19070 = vmatprep.subr.mxu1 %v20714_v6 }
 0xd56   :  { %19057 = vmatpush3.msra.mxu0 %v22588_v12 }
 0xd57   :  { %19058 = vmatprep.subr.mxu0 %v20714_v6 }
 0xd58   :  { %19059 = vmatpush3.msra.mxu0 %v22595_v39 }
 0xd59   :  { %19061 = vmatmul.mubr.msk.f32.vlgmr.msra.gmra.mxu0 %vm757_vm11, %v21272_v57  ;;  %19081 = vmatprep.subr.mxu0 %v20714_v6 }
 0xd5a   :  { %19082 = vmatpush3.msra.mxu0 %v22604_v61  ;;  %19085 = vmatprep.mubr.msk.f32.mxu0 %vm20715_vm1, %v20714_v6 }
 0xd5b   :  { %19083 = vmatprep.subr.mxu0 %v20714_v6 }
 0xd5c   :  { %19084 = vmatpush3.msra.mxu0 %v22613_v62 }
 0xd5d   :  { %19088 = vmatprep.subr.mxu0 %v20714_v6 }
 0xe03   :  { %v6819_v43 = vpop.f32.mrf.mxu0  ;;  %v6967_v45 = vpop.f32.mrf.mxu1 }
 0xe04   :  { %v6823_v55 = vadd.f32 %v6819_v43, %v6747_v42 }
 0xe05   :  { %v19015_v58 = vpop.f32.mrf.mxu0  ;;  %v19033_v59 = vpop.f32.mrf.mxu1 }
 0xe06   :  { %v6824_v13 = vadd.f32 %v22168_v10, %v6823_v55  ;;  %v22655_v59 = vld [vmem:[%s24767_s4 + $0x28] sm:$0xff] }
 0xe08   :  { %v6825_v34 = vsub.f32 0.0, %v6824_v13  ;;  %v22666_v13 = vld [vmem:[%s24767_s4 + $0x20] sm:$0xff] }
 0xe0a   :  { %v6826_v50 = vmul.f32 1.442695, %v6825_v34 }
 0xe0c   :  { %20349 = vpow2.f32 %v6826_v50  ;;  %v6897_v19 = vpop.f32.mrf.mxu0  ;;  %v7045_v28 = vpop.f32.mrf.mxu1 }
 0xe0d   :  { %v6898_v38 = vadd.f32 %v22163_v20, %v6897_v19  ;;  %v7046_v35 = vadd.f32 %v22194_v26, %v7045_v28  ;;  %v22646_v26 = vld [vmem:[%s24767_s4 + $0x30] sm:$0xff] }
 0xe0e   :  { %v19026_v56 = vpop.f32.mrf.mxu0  ;;  %v19044_v46 = vpop.f32.mrf.mxu1 }
 0xe0f   :  { %v6971_v17 = vadd.f32 %v6967_v45, %v6898_v38  ;;  %v22725_v38 = vld [vmem:[%s24772_s9 + $0x1] ss:$0 sm:$0xff] }
 0xe11   :  { %v6972_v8 = vadd.f32 %v22175_v31, %v6971_v17  ;;  %v7115_v48 = vpop.f32.mrf.mxu0 }
 0xe12   :  { %v7116_v20 = vadd.f32 %v22188_v33, %v7115_v48  ;;  %v22637_v33 = vld [vmem:[%s24767_s4 + $0x38] sm:$0xff]  ;;  %v22731_v48 = vld [vmem:[%s24775_s12 + $0x1] ss:$0 sm:$0xff] }
 0xe13   :  { %v6973_v60 = vsub.f32 0.0, %v6972_v8  ;;  %v19051_v18 = vpop.f32.mrf.mxu0 }
 0xe15   :  { %v6974_v3 = vmul.f32 1.442695, %v6973_v60 }
 0xe17   :  { %20351 = vpow2.f32 %v6974_v3 }
 0xe19   :  { %v20350_v54 = vpop.eup %20349  ;;  %v22622_v49 = vpop.f32.mrf.mxu0 }
 0xe1a   :  { %v6828_v10 = vadd.f32 1.0, %v20350_v54 }
 0xe1b   :  { %v19062_v2 = vpop.f32.mrf.mxu0 }
 0xe1c   :  { %20353 = vrcp.f32 %v6828_v10 }
 0xe24   :  { %v20352_v14 = vpop.eup %20351 }
 0xe25   :  { %v6976_v25 = vadd.f32 1.0, %v20352_v14 }
 0xe27   :  { %20355 = vrcp.f32 %v6976_v25 }
 0xe29   :  { %v20354_v27 = vpop.eup %20353 }
 0xe2a   :  { %v7119_v31 = vmul.f32 %v20354_v27, %v7116_v20 }
 0xe2c   :  { %v7120_v47 = vadd.f32 %v7119_v31, %v7046_v35  ;;  %v22739_v35 = vld [vmem:[%s24776_s13 + $0x1] ss:$0 sm:$0xff] }
 0xe2e   :  { %20357 = vtanh.f32 %v7120_v47 }
 0xe34   :  { %v20356_v29 = vpop.eup %20355 }
 0xe35   :  { %v7122_v42 = vsub.f32 1.0, %v20356_v29  ;;  %v7124_v55 = vmul.f32 %v20356_v29, %v22485_v5  ;;  %v22745_v29 = vld [vmem:[%s24773_s10 + $0x1] ss:$0 sm:$0xff] }
 0xe3b   :  { %v20358_v43 = vpop.eup %20357 }
 0xe3c   :  { %v7123_v45 = vmul.f32 %v20358_v43, %v7122_v42 }
 0xe3e   :  { %v22627_v58 = vadd.f32 %v7124_v55, %v7123_v45 }
 0xe40   :  { %19068 = vmatmul.mubr.msk.f32.vlgmr.msra.gmra.mxu1 %vm831_vm12, %v22627_v58  ;;  %19086 = vmatmul.mubr.msk.f32.vlgmr.msra.gmra.mxu0 %vm831_vm12, %v22627_v58 }
 0xe41   :  { %19071 = vmatpush3.msra.mxu1 %v22494_v37  ;;  %19089 = vmatpush3.msra.mxu0 %v22637_v33 }
 0xe42   :  { %19072 = vmatprep.subr.mxu1 %v20714_v6  ;;  %19090 = vmatprep.subr.mxu0 %v20714_v6 }
 0xe43   :  { %19073 = vmatpush3.msra.mxu1 %v22503_v1  ;;  %19091 = vmatpush3.msra.mxu0 %v22646_v26 }
 0xe44   :  { %19074 = vmatprep.subr.mxu1 %v20714_v6  ;;  %19092 = vmatprep.subr.mxu0 %v20714_v6 }
 0xe45   :  { %19075 = vmatpush3.msra.mxu1 %v22512_v51  ;;  %19093 = vmatpush3.msra.mxu0 %v22655_v59 }
 0xe46   :  { %19076 = vmatprep.subr.mxu1 %v20714_v6  ;;  %19094 = vmatprep.subr.mxu0 %v20714_v6 }
 0xe47   :  { %19077 = vmatpush3.msra.mxu1 %v22521_v15  ;;  %19078 = vmatprep.mubr.msk.f32.mxu1 %vm20715_vm1, %v20714_v6 }
 0xe48   :  { %19095 = vmatpush3.msra.mxu0 %v22666_v13  ;;  %19096 = vmatprep.mubr.msk.f32.mxu0 %vm20715_vm1, %v20714_v6 }
 0xe49   :  { %19079 = vmatmul.mubr.msk.f32.vlgmr.msra.gmra.mxu1 %vm757_vm11, %v21272_v57  ;;  %19097 = vmatmul.mubr.msk.f32.vlgmr.msra.gmra.mxu0 %vm757_vm11, %v21272_v57  ;;  %v22712_v57 = vld [vmem:[%s24771_s8 + $0x1] ss:$0 sm:$0xff] }
 0xe4a   :  { %19099 = vmatprep.subr.mxu1 %v20714_v6  ;;  %19103 = vmatprep.mubr.msk.f32.mxu1 %vm20715_vm1, %v20714_v6 }
 0xe4b   :  { %19100 = vmatpush3.msra.mxu1 %v22539_v16  ;;  %19117 = vmatprep.subr.mxu0 %v20714_v6 }
 0xe4c   :  { %19101 = vmatprep.subr.mxu1 %v20714_v6  ;;  %19118 = vmatpush3.msra.mxu0 %v22547_v63  ;;  %v7193_v63 = vadd.f32 %v22712_v57, %v22622_v49 }
 0xe4d   :  { %19102 = vmatpush3.msra.mxu1 %v22553_v21  ;;  %19119 = vmatprep.subr.mxu0 %v20714_v6 }
 0xe4e   :  { %19104 = vmatmul.mubr.msk.f32.vlgmr.msra.gmra.mxu1 %vm831_vm12, %v22627_v58  ;;  %19106 = vmatprep.subr.mxu1 %v20714_v6 }
 0xe4f   :  { %19107 = vmatpush3.msra.mxu1 %v22563_v0  ;;  %19114 = vmatprep.mubr.msk.f32.mxu1 %vm20715_vm1, %v20714_v6 }
 0xe50   :  { %19108 = vmatprep.subr.mxu1 %v20714_v6  ;;  %19120 = vmatpush3.msra.mxu0 %v22572_v7 }
 0xe51   :  { %19109 = vmatpush3.msra.mxu1 %v22578_v11  ;;  %19121 = vmatprep.mubr.msk.f32.mxu0 %vm20715_vm1, %v20714_v6 }
 0xe52   :  { %19110 = vmatprep.subr.mxu1 %v20714_v6  ;;  %19124 = vmatprep.subr.mxu0 %v20714_v6 }
 0xe53   :  { %19111 = vmatpush3.msra.mxu1 %v22588_v12 }
 0xe54   :  { %19112 = vmatprep.subr.mxu1 %v20714_v6 }
 0xe55   :  { %19113 = vmatpush3.msra.mxu1 %v22595_v39 }
 0xe56   :  { %19115 = vmatmul.mubr.msk.f32.vlgmr.msra.gmra.mxu1 %vm757_vm11, %v21250_v53  ;;  %19135 = vmatprep.subr.mxu1 %v20714_v6 }
 0xe57   :  { %19136 = vmatpush3.msra.mxu1 %v22604_v61  ;;  %19139 = vmatprep.mubr.msk.f32.mxu1 %vm20715_vm1, %v20714_v6  ;;  %v22719_v61 = vld [vmem:[%s24774_s11 + $0x1] ss:$0 sm:$0xff] }
 0xe58   :  { %19137 = vmatprep.subr.mxu1 %v20714_v6 }
 0xe59   :  { %19138 = vmatpush3.msra.mxu1 %v22613_v62 }
 0xe5a   :  { %19142 = vmatprep.subr.mxu1 %v20714_v6 }
 0xf00   :  { %v7265_v0 = vpop.f32.mrf.mxu1  ;;  %v7413_v7 = vpop.f32.mrf.mxu0 }
 0xf01   :  { %v7269_v11 = vadd.f32 %v7265_v0, %v7193_v63 }
 0xf02   :  { %v19069_v12 = vpop.f32.mrf.mxu1  ;;  %v19087_v39 = vpop.f32.mrf.mxu0 }
 0xf03   :  { %v7270_v62 = vadd.f32 %v22719_v61, %v7269_v11 }
 0xf05   :  { %v7271_v34 = vsub.f32 0.0, %v7270_v62 }
 0xf07   :  { %v7272_v50 = vmul.f32 1.442695, %v7271_v34 }
 0xf09   :  { %20359 = vpow2.f32 %v7272_v50  ;;  %v7343_v19 = vpop.f32.mrf.mxu1  ;;  %v7491_v28 = vpop.f32.mrf.mxu0 }
 0xf0a   :  { %v7344_v56 = vadd.f32 %v22725_v38, %v7343_v19  ;;  %v7492_v42 = vadd.f32 %v22745_v29, %v7491_v28 }
 0xf0b   :  { %v19080_v46 = vpop.f32.mrf.mxu1  ;;  %v19098_v17 = vpop.f32.mrf.mxu0 }
 0xf0c   :  { %v7417_v8 = vadd.f32 %v7413_v7, %v7344_v56 }
 0xf0e   :  { %v7418_v60 = vadd.f32 %v22731_v48, %v7417_v8  ;;  %v7561_v18 = vpop.f32.mrf.mxu1 }
 0xf0f   :  { %v7562_v31 = vadd.f32 %v22739_v35, %v7561_v18 }
 0xf10   :  { %v7419_v3 = vsub.f32 0.0, %v7418_v60  ;;  %v19105_v54 = vpop.f32.mrf.mxu1 }
 0xf12   :  { %v7420_v49 = vmul.f32 1.442695, %v7419_v3 }
 0xf14   :  { %20361 = vpow2.f32 %v7420_v49 }
 0xf16   :  { %v20360_v10 = vpop.eup %20359  ;;  %v22734_v2 = vpop.f32.mrf.mxu1 }
 0xf17   :  { %v7274_v14 = vadd.f32 1.0, %v20360_v10 }
 0xf18   :  { %v19116_v25 = vpop.f32.mrf.mxu1 }
 0xf19   :  { %20363 = vrcp.f32 %v7274_v14 }
 0xf21   :  { %v20362_v20 = vpop.eup %20361 }
 0xf22   :  { %v7422_v27 = vadd.f32 1.0, %v20362_v20 }
 0xf24   :  { %20365 = vrcp.f32 %v7422_v27 }
 0xf26   :  { %v20364_v47 = vpop.eup %20363 }
 0xf27   :  { %v7565_v43 = vmul.f32 %v20364_v47, %v7562_v31 }
 0xf29   :  { %v7566_v45 = vadd.f32 %v7565_v43, %v7492_v42 }
 0xf2b   :  { %20367 = vtanh.f32 %v7566_v45 }
 0xf31   :  { %v20366_v55 = vpop.eup %20365 }
 0xf32   :  { %v7568_v63 = vsub.f32 1.0, %v20366_v55  ;;  %v7570_v11 = vmul.f32 %v20366_v55, %v22627_v58 }
 0xf38   :  { %v20368_v0 = vpop.eup %20367 }
 0xf39   :  { %v7569_v7 = vmul.f32 %v20368_v0, %v7568_v63  ;;  %v22892_v0 = vld [vmem:[%s24769_s6 + $0x28] sm:$0xff] }
 0xf3b   :  { %v22749_v12 = vadd.f32 %v7570_v11, %v7569_v7  ;;  %v22897_v7 = vld [vmem:[%s24770_s7 + $0x28] sm:$0xff]  ;;  %v22939_v11 = vld [vmem:[%s24767_s4 + $0x50] sm:$0xff] }
 0xf3d   :  { %8023 = vrot.lane.b32.xlu1 %v22749_v12, %s20716_s26  ;;  %19122 = vmatmul.mubr.msk.f32.vlgmr.msra.gmra.mxu0 %vm831_vm12, %v22749_v12 }
 0xf3e   :  { %19125 = vmatpush3.msra.mxu0 %v22494_v37  ;;  %19140 = vmatmul.mubr.msk.f32.vlgmr.msra.gmra.mxu1 %vm831_vm12, %v22749_v12  ;;  %v22825_v37 = vld [vmem:[%s24766_s3 + $0x58] sm:$0xff] }
 0xf3f   :  { %19143 = vmatpush3.msra.mxu1 %v22637_v33  ;;  %19126 = vmatprep.subr.mxu0 %v20714_v6  ;;  %v7639_v33 = vadd.f32 %v22712_v57, %v22734_v2 }
 0xf40   :  { %19144 = vmatprep.subr.mxu1 %v20714_v6  ;;  %19127 = vmatpush3.msra.mxu0 %v22503_v1  ;;  %v22833_v1 = vld [vmem:[%s24790_s0 + $0x48] sm:$0xff] }
 0xf41   :  { %19145 = vmatpush3.msra.mxu1 %v22646_v26  ;;  %19128 = vmatprep.subr.mxu0 %v20714_v6 }
 0xf42   :  { %19146 = vmatprep.subr.mxu1 %v20714_v6  ;;  %8031 = vrot.lane.b32.xlu1 %v22485_v5, %s20716_s26  ;;  %v22812_v5 = vld [vmem:[%s24790_s0 + $0x58] sm:$0xff] }
 0xf43   :  { %19129 = vmatpush3.msra.mxu0 %v22512_v51  ;;  %19147 = vmatpush3.msra.mxu1 %v22655_v59  ;;  %v22840_v51 = vld [vmem:[%s24766_s3 + $0x50] sm:$0xff] }
 0xf44   :  { %19130 = vmatprep.subr.mxu0 %v20714_v6  ;;  %19148 = vmatprep.subr.mxu1 %v20714_v6 }
 0xf45   :  { %19131 = vmatpush3.msra.mxu0 %v22521_v15  ;;  %19132 = vmatprep.mubr.msk.f32.mxu0 %vm20715_vm1, %v20714_v6  ;;  %v22847_v15 = vld [vmem:[%s24790_s0 + $0x40] sm:$0xff] }
 0xf46   :  { %19149 = vmatpush3.msra.mxu1 %v22666_v13  ;;  %19150 = vmatprep.mubr.msk.f32.mxu1 %vm20715_vm1, %v20714_v6 }
 0xf47   :  { %19133 = vmatmul.mubr.msk.f32.vlgmr.msra.gmra.mxu0 %vm757_vm11, %v21250_v53  ;;  %19151 = vmatmul.mubr.msk.f32.vlgmr.msra.gmra.mxu1 %vm757_vm11, %v21250_v53  ;;  %v22802_v53 = vld [vmem:[%s24768_s5 + $0x28] sm:$0xff] }
 0xf48   :  { %19153 = vmatprep.subr.mxu0 %v20714_v6  ;;  %8039 = vrot.lane.b32.xlu1 %v22341_v24, %s20716_s26  ;;  %v22807_v24 = vld [vmem:[%s24768_s5 + $0x20] sm:$0xff] }
 0xf49   :  { %19154 = vmatpush3.msra.mxu0 %v22539_v16  ;;  %19157 = vmatprep.mubr.msk.f32.mxu0 %vm20715_vm1, %v20714_v6  ;;  %v22854_v16 = vld [vmem:[%s24766_s3 + $0x48] sm:$0xff] }
 0xf4a   :  { %19155 = vmatprep.subr.mxu0 %v20714_v6  ;;  %19171 = vmatprep.subr.mxu1 %v20714_v6 }
 0xf4b   :  { %19156 = vmatpush3.msra.mxu0 %v22553_v21  ;;  %19175 = vmatprep.mubr.msk.f32.mxu1 %vm20715_vm1, %v20714_v6  ;;  %v22863_v21 = vld [vmem:[%s24766_s3 + $0x40] sm:$0xff] }
 0xf4c   :  { %19158 = vmatmul.mubr.msk.f32.vlgmr.msra.gmra.mxu0 %vm831_vm12, %v22749_v12  ;;  %8047 = vrot.lane.b32.xlu1 %v22197_v23, %s20716_s26  ;;  %v22819_v23 = vld [vmem:[%s24790_s0 + $0x50] sm:$0xff] }
 0xf4d   :  { %19160 = vmatprep.subr.mxu0 %v20714_v6  ;;  %19168 = vmatprep.mubr.msk.f32.mxu0 %vm20715_vm1, %v20714_v6 }
 0xf4e   :  { %19172 = vmatpush3.msra.mxu1 %v22802_v53  ;;  %19161 = vmatpush3.msra.mxu0 %v22812_v5 }
 0xf4f   :  { %19173 = vmatprep.subr.mxu1 %v20714_v6  ;;  %19162 = vmatprep.subr.mxu0 %v20714_v6 }
 0xf50   :  { %19174 = vmatpush3.msra.mxu1 %v22807_v24  ;;  %19163 = vmatpush3.msra.mxu0 %v22819_v23 }
 0xf51   :  { %19178 = vmatprep.subr.mxu1 %v20714_v6  ;;  %19176 = vmatmul.mubr.f32.vlgmr.msra.gmra.mxu1 %v20714_v6 }
 0xf52   :  { %19179 = vmatpush3.msra.mxu1 %v22825_v37  ;;  %19164 = vmatprep.subr.mxu0 %v20714_v6 }
 0xf53   :  { %19180 = vmatprep.subr.mxu1 %v20714_v6  ;;  %19165 = vmatpush3.msra.mxu0 %v22833_v1 }
 0xf54   :  { %19181 = vmatpush3.msra.mxu1 %v22840_v51  ;;  %19166 = vmatprep.subr.mxu0 %v20714_v6 }
 0xf55   :  { %19182 = vmatprep.subr.mxu1 %v20714_v6  ;;  %19167 = vmatpush3.msra.mxu0 %v22847_v15 }
 0xf56   :  { %19183 = vmatpush3.msra.mxu1 %v22854_v16  ;;  %19186 = vmatprep.mubr.msk.f32.mxu1 %vm20715_vm1, %v20714_v6 }
 0xf57   :  { %19184 = vmatprep.subr.mxu1 %v20714_v6  ;;  %19189 = vmatprep.subr.mxu0 %v20714_v6 }
 0xf58   :  { %19185 = vmatpush3.msra.mxu1 %v22863_v21 }
 0xf59   :  { %19207 = vmatprep.subr.mxu1 %v20714_v6 }
 0xffd   :  { %v7711_v26 = vpop.f32.mrf.mxu0 }
 0xffe   :  { %v7715_v59 = vadd.f32 %v7711_v26, %v7639_v33  ;;  %v7859_v13 = vpop.f32.mrf.mxu1  ;;  %v22957_v33 = vld [vmem:[%s24767_s4 + $0x40] sm:$0xff]  ;;  %v8024_v26 = vpop.permute.xlu1 %8023 }
 0xfff   :  { %v19123_v39 = vpop.f32.mrf.mxu0 }
0x1000   :  { %v7716_v62 = vadd.f32 %v22719_v61, %v7715_v59  ;;  %v19141_v34 = vpop.f32.mrf.mxu1  ;;  %v22968_v59 = vsel %vm831_vm12, %v21460_v30, %v8024_v26  ;;  %v22994_v30 = vld [vmem:[%s24771_s8 + $0x2] ss:$0 sm:$0xff] }
0x1001   :  { %v23000_v34 = vld [vmem:[%s24774_s11 + $0x2] ss:$0 sm:$0xff] }
0x1002   :  { %v7717_v50 = vsub.f32 0.0, %v7716_v62 }
0x1004   :  { %v7718_v19 = vmul.f32 1.442695, %v7717_v50  ;;  %v23005_v50 = vld [vmem:[%s24772_s9 + $0x2] ss:$0 sm:$0xff] }
0x1006   :  { %20369 = vpow2.f32 %v7718_v19 }
0x1007   :  { %v7789_v28 = vpop.f32.mrf.mxu0  ;;  %v7937_v56 = vpop.f32.mrf.mxu1 }
0x1008   :  { %v7790_v46 = vadd.f32 %v22725_v38, %v7789_v28  ;;  %v7938_v38 = vadd.f32 %v22745_v29, %v7937_v56 }
0x1009   :  { %v19134_v17 = vpop.f32.mrf.mxu0  ;;  %v19152_v8 = vpop.f32.mrf.mxu1 }
0x100a   :  { %v7863_v60 = vadd.f32 %v7859_v13, %v7790_v46  ;;  %v23013_v8 = vld [vmem:[%s24775_s12 + $0x2] ss:$0 sm:$0xff] }
0x100c   :  { %v7864_v18 = vadd.f32 %v22731_v48, %v7863_v60  ;;  %v8007_v57 = vpop.f32.mrf.mxu0 }
0x100d   :  { %v8008_v25 = vadd.f32 %v22739_v35, %v8007_v57 }
0x100e   :  { %v7865_v3 = vsub.f32 0.0, %v7864_v18  ;;  %v19159_v54 = vpop.f32.mrf.mxu0 }
0x1010   :  { %v7866_v49 = vmul.f32 1.442695, %v7865_v3 }
0x1011   :  { %v22887_v35 = vpop.f32.mrf.mxu1 }
0x1012   :  { %20371 = vpow2.f32 %v7866_v49 }
0x1013   :  { %v20370_v10 = vpop.eup %20369  ;;  %v19177_v29 = vpop.f32.mrf.mxu1 }
0x1014   :  { %v7720_v61 = vadd.f32 1.0, %v20370_v10 }
0x1016   :  { %20373 = vrcp.f32 %v7720_v61 }
0x101f   :  { %v20372_v2 = vpop.eup %20371 }
0x1020   :  { %v7868_v14 = vadd.f32 1.0, %v20372_v2 }
0x1022   :  { %20375 = vrcp.f32 %v7868_v14 }
0x1023   :  { %v20374_v20 = vpop.eup %20373 }
0x1024   :  { %v8011_v27 = vmul.f32 %v20374_v20, %v8008_v25 }
0x1026   :  { %v8012_v31 = vadd.f32 %v8011_v27, %v7938_v38 }
0x1028   :  { %20377 = vtanh.f32 %v8012_v31 }
0x102f   :  { %v20376_v48 = vpop.eup %20375 }
0x1030   :  { %v8014_v47 = vsub.f32 1.0, %v20376_v48  ;;  %v8016_v45 = vmul.f32 %v20376_v48, %v22749_v12  ;;  %v22948_v12 = vld [vmem:[%s24767_s4 + $0x48] sm:$0xff] }
0x1035   :  { %v20378_v42 = vpop.eup %20377 }
0x1036   :  { %v8015_v43 = vmul.f32 %v20378_v42, %v8014_v47  ;;  %v23021_v42 = vld [vmem:[%s24776_s13 + $0x2] ss:$0 sm:$0xff] }
0x1038   :  { %v8017_v55 = vadd.f32 %v8016_v45, %v8015_v43 }
0x103a   :  { %8019 = vrot.lane.b32.xlu0 %v8017_v55, %s20716_s26  ;;  %v23027_v55 = vld [vmem:[%s24773_s10 + $0x2] ss:$0 sm:$0xff] }
0x103e   :  { %8027 = vrot.lane.b32.xlu0 %v22627_v58, %s20716_s26  ;;  %v22915_v58 = vld [vmem:[%s24770_s7 + $0x20] sm:$0xff] }
0x1042   :  { %8035 = vrot.lane.b32.xlu0 %v22413_v44, %s20716_s26 }
0x1046   :  { %8043 = vrot.lane.b32.xlu0 %v22269_v36, %s20716_s26  ;;  %v22910_v36 = vld [vmem:[%s24769_s6 + $0x20] sm:$0xff] }
0x10ac   :  { %v8020_v63 = vpop.permute.xlu0 %8019 }
0x10ad   :  { %v22901_v44 = vsel %vm831_vm12, %v21388_v22, %v8020_v63  ;;  %v22929_v22 = vld [vmem:[%s24767_s4 + $0x58] sm:$0xff] }
0x10ae   :  { %19169 = vmatmul.mubr.msk.f32.vlgmr.msra.gmra.mxu0 %vm757_vm11, %v22901_v44  ;;  %19187 = vmatmul.mubr.msk.f32.vlgmr.msra.gmra.mxu1 %vm757_vm11, %v22901_v44 }
0x10af   :  { %19190 = vmatpush3.msra.mxu0 %v22892_v0  ;;  %19208 = vmatpush3.msra.mxu1 %v22897_v7 }
0x10b0   :  { %19191 = vmatprep.subr.mxu0 %v20714_v6  ;;  %19209 = vmatprep.subr.mxu1 %v20714_v6 }
0x10b1   :  { %19192 = vmatpush3.msra.mxu0 %v22910_v36  ;;  %19210 = vmatpush3.msra.mxu1 %v22915_v58 }
0x10b2   :  { %19193 = vmatprep.mubr.msk.f32.mxu0 %vm20715_vm1, %v20714_v6  ;;  %19196 = vmatprep.subr.mxu0 %v20714_v6 }
0x10b3   :  { %19211 = vmatprep.mubr.msk.f32.mxu1 %vm20715_vm1, %v20714_v6  ;;  %19214 = vmatprep.subr.mxu1 %v20714_v6 }
0x10b4   :  { %19194 = vmatmul.mubr.f32.vlgmr.msra.gmra.mxu0 %v20714_v6  ;;  %19212 = vmatmul.mubr.f32.vlgmr.msra.gmra.mxu1 %v20714_v6 }
0x10b5   :  { %19197 = vmatpush3.msra.mxu0 %v22929_v22  ;;  %19215 = vmatpush3.msra.mxu1 %v22812_v5 }
0x10b6   :  { %19198 = vmatprep.subr.mxu0 %v20714_v6  ;;  %19216 = vmatprep.subr.mxu1 %v20714_v6 }
0x10b7   :  { %19199 = vmatpush3.msra.mxu0 %v22939_v11  ;;  %19217 = vmatpush3.msra.mxu1 %v22819_v23 }
0x10b8   :  { %19200 = vmatprep.subr.mxu0 %v20714_v6  ;;  %19218 = vmatprep.subr.mxu1 %v20714_v6 }
0x10b9   :  { %19201 = vmatpush3.msra.mxu0 %v22948_v12  ;;  %19219 = vmatpush3.msra.mxu1 %v22833_v1 }
0x10ba   :  { %19202 = vmatprep.subr.mxu0 %v20714_v6  ;;  %19220 = vmatprep.subr.mxu1 %v20714_v6 }
0x10bb   :  { %19203 = vmatpush3.msra.mxu0 %v22957_v33  ;;  %19204 = vmatprep.mubr.msk.f32.mxu0 %vm20715_vm1, %v20714_v6 }
0x10bc   :  { %19221 = vmatpush3.msra.mxu1 %v22847_v15  ;;  %19222 = vmatprep.mubr.msk.f32.mxu1 %vm20715_vm1, %v20714_v6 }
0x10bd   :  { %19205 = vmatmul.mubr.msk.f32.vlgmr.msra.gmra.mxu0 %vm757_vm11, %v22901_v44  ;;  %19223 = vmatmul.mubr.msk.f32.vlgmr.msra.gmra.mxu1 %vm757_vm11, %v22968_v59 }
0x10be   :  { %19225 = vmatprep.subr.mxu0 %v20714_v6  ;;  %19243 = vmatprep.subr.mxu1 %v20714_v6 }
0x10bf   :  { %19226 = vmatpush3.msra.mxu0 %v22802_v53  ;;  %19244 = vmatpush3.msra.mxu1 %v22892_v0 }
0x10c0   :  { %19227 = vmatprep.subr.mxu0 %v20714_v6  ;;  %19245 = vmatprep.subr.mxu1 %v20714_v6 }
0x10c1   :  { %19228 = vmatpush3.msra.mxu0 %v22807_v24  ;;  %19246 = vmatpush3.msra.mxu1 %v22910_v36 }
0x10c2   :  { %19229 = vmatprep.mubr.msk.f32.mxu0 %vm20715_vm1, %v20714_v6  ;;  %19232 = vmatprep.subr.mxu0 %v20714_v6 }
0x10c3   :  { %19247 = vmatprep.mubr.msk.f32.mxu1 %vm20715_vm1, %v20714_v6  ;;  %19250 = vmatprep.subr.mxu1 %v20714_v6 }
0x116e   :  { %v8162_v13 = vpop.f32.mrf.mxu0  ;;  %v8322_v39 = vpop.f32.mrf.mxu1 }
0x116f   :  { %v8163_v62 = vadd.f32 %v22994_v30, %v8162_v13  ;;  %v8323_v17 = vadd.f32 %v23005_v50, %v8322_v39 }
0x1170   :  { %v19170_v19 = vpop.f32.mrf.mxu0  ;;  %v19188_v28 = vpop.f32.mrf.mxu1 }
0x1171   :  { %v8236_v56 = vadd.f32 %v22887_v35, %v8163_v62 }
0x1173   :  { %v8243_v46 = vadd.f32 %v23000_v34, %v8236_v56 }
0x1174   :  { %v8392_v60 = vpop.f32.mrf.mxu0  ;;  %v8558_v18 = vpop.f32.mrf.mxu1 }
0x1175   :  { %v8244_v57 = vsub.f32 0.0, %v8243_v46  ;;  %v8396_v3 = vadd.f32 %v8392_v60, %v8323_v17  ;;  %v8559_v45 = vadd.f32 %v23021_v42, %v8558_v18  ;;  %v8028_v46 = vpop.permute.xlu0 %8027 }
0x1176   :  { %v19195_v54 = vpop.f32.mrf.mxu0  ;;  %v19213_v49 = vpop.f32.mrf.mxu1  ;;  %v23084_v17 = vsel %vm831_vm12, %v21532_v41, %v8028_v46 }
0x1177   :  { %v8245_v10 = vmul.f32 1.442695, %v8244_v57  ;;  %v8403_v61 = vadd.f32 %v23013_v8, %v8396_v3 }
0x1179   :  { %20379 = vpow2.f32 %v8245_v10  ;;  %v8404_v2 = vsub.f32 0.0, %v8403_v61 }
0x117b   :  { %v8405_v20 = vmul.f32 1.442695, %v8404_v2 }
0x117d   :  { %v8482_v14 = vpop.f32.mrf.mxu0  ;;  %v23016_v25 = vpop.f32.mrf.mxu1  ;;  %20381 = vpow2.f32 %v8405_v20 }
0x117e   :  { %v8483_v63 = vadd.f32 %v23027_v55, %v8482_v14  ;;  %v8639_v41 = vadd.f32 %v22994_v30, %v23016_v25 }
0x117f   :  { %v19206_v38 = vpop.f32.mrf.mxu0  ;;  %v19224_v27 = vpop.f32.mrf.mxu1 }
0x1186   :  { %v20380_v31 = vpop.eup %20379 }
0x1187   :  { %v8247_v48 = vadd.f32 1.0, %v20380_v31 }
0x1189   :  { %20383 = vrcp.f32 %v8247_v48 }
0x118a   :  { %v20382_v47 = vpop.eup %20381 }
0x118b   :  { %v8407_v43 = vadd.f32 1.0, %v20382_v47 }
0x118d   :  { %20385 = vrcp.f32 %v8407_v43 }
0x1196   :  { %v20384_v35 = vpop.eup %20383 }
0x1197   :  { %v8562_v29 = vmul.f32 %v20384_v35, %v8559_v45 }
0x1199   :  { %v8563_v26 = vadd.f32 %v8562_v29, %v8483_v63 }
0x119a   :  { %v20386_v13 = vpop.eup %20385 }
0x119b   :  { %20387 = vtanh.f32 %v8563_v26  ;;  %v8565_v39 = vsub.f32 1.0, %v20386_v13  ;;  %v8567_v28 = vmul.f32 0.0, %v20386_v13 }
0x11a8   :  { %v20388_v62 = vpop.eup %20387 }
0x11a9   :  { %v8566_v19 = vmul.f32 %v20388_v62, %v8565_v39 }
0x11ab   :  { %v23030_v56 = vadd.f32 %v8567_v28, %v8566_v19 }
0x11ad   :  { %19230 = vmatmul.mubr.msk.f32.vlgmr.msra.gmra.mxu0 %vm831_vm12, %v23030_v56  ;;  %19248 = vmatmul.mubr.msk.f32.vlgmr.msra.gmra.mxu1 %vm831_vm12, %v23030_v56 }
0x11ae   :  { %19233 = vmatpush3.msra.mxu0 %v22825_v37  ;;  %19251 = vmatpush3.msra.mxu1 %v22929_v22 }
0x11af   :  { %19234 = vmatprep.subr.mxu0 %v20714_v6  ;;  %19252 = vmatprep.subr.mxu1 %v20714_v6 }
0x11b0   :  { %19235 = vmatpush3.msra.mxu0 %v22840_v51  ;;  %19253 = vmatpush3.msra.mxu1 %v22939_v11 }
0x11b1   :  { %19236 = vmatprep.subr.mxu0 %v20714_v6  ;;  %19254 = vmatprep.subr.mxu1 %v20714_v6 }
0x11b2   :  { %19237 = vmatpush3.msra.mxu0 %v22854_v16  ;;  %19255 = vmatpush3.msra.mxu1 %v22948_v12 }
0x11b3   :  { %19238 = vmatprep.subr.mxu0 %v20714_v6  ;;  %19256 = vmatprep.subr.mxu1 %v20714_v6 }
0x11b4   :  { %19239 = vmatpush3.msra.mxu0 %v22863_v21  ;;  %19240 = vmatprep.mubr.msk.f32.mxu0 %vm20715_vm1, %v20714_v6 }
0x11b5   :  { %19257 = vmatpush3.msra.mxu1 %v22957_v33  ;;  %19258 = vmatprep.mubr.msk.f32.mxu1 %vm20715_vm1, %v20714_v6 }
0x11b6   :  { %19241 = vmatmul.mubr.msk.f32.vlgmr.msra.gmra.mxu0 %vm757_vm11, %v22968_v59  ;;  %19259 = vmatmul.mubr.msk.f32.vlgmr.msra.gmra.mxu1 %vm757_vm11, %v22968_v59 }
0x11b7   :  { %19261 = vmatprep.subr.mxu0 %v20714_v6  ;;  %19265 = vmatprep.mubr.msk.f32.mxu0 %vm20715_vm1, %v20714_v6 }
0x11b8   :  { %19262 = vmatpush3.msra.mxu0 %v22897_v7  ;;  %19279 = vmatprep.subr.mxu1 %v20714_v6 }
0x11b9   :  { %19263 = vmatprep.subr.mxu0 %v20714_v6  ;;  %19280 = vmatpush3.msra.mxu1 %v22802_v53 }
0x11ba   :  { %19264 = vmatpush3.msra.mxu0 %v22915_v58  ;;  %19281 = vmatprep.subr.mxu1 %v20714_v6 }
0x11bb   :  { %19266 = vmatmul.mubr.msk.f32.vlgmr.msra.gmra.mxu0 %vm831_vm12, %v23030_v56  ;;  %19268 = vmatprep.subr.mxu0 %v20714_v6 }
0x11bc   :  { %19269 = vmatpush3.msra.mxu0 %v22812_v5  ;;  %19276 = vmatprep.mubr.msk.f32.mxu0 %vm20715_vm1, %v20714_v6 }
0x11bd   :  { %19270 = vmatprep.subr.mxu0 %v20714_v6  ;;  %19282 = vmatpush3.msra.mxu1 %v22807_v24 }
0x11be   :  { %19271 = vmatpush3.msra.mxu0 %v22819_v23  ;;  %19283 = vmatprep.mubr.msk.f32.mxu1 %vm20715_vm1, %v20714_v6 }
0x11bf   :  { %19272 = vmatprep.subr.mxu0 %v20714_v6  ;;  %19286 = vmatprep.subr.mxu1 %v20714_v6 }
0x11c0   :  { %19273 = vmatpush3.msra.mxu0 %v22833_v1 }
0x11c1   :  { %19274 = vmatprep.subr.mxu0 %v20714_v6 }
0x11c2   :  { %19275 = vmatpush3.msra.mxu0 %v22847_v15 }
0x11c3   :  { %19277 = vmatmul.mubr.msk.f32.vlgmr.msra.gmra.mxu0 %vm757_vm11, %v23084_v17  ;;  %19297 = vmatprep.subr.mxu0 %v20714_v6 }
0x11c4   :  { %19298 = vmatpush3.msra.mxu0 %v22892_v0  ;;  %19301 = vmatprep.mubr.msk.f32.mxu0 %vm20715_vm1, %v20714_v6 }
0x11c5   :  { %19299 = vmatprep.subr.mxu0 %v20714_v6 }
0x11c6   :  { %19300 = vmatpush3.msra.mxu0 %v22910_v36 }
0x11c7   :  { %19304 = vmatprep.subr.mxu0 %v20714_v6 }
0x126d   :  { %v8711_v60 = vpop.f32.mrf.mxu0  ;;  %v8859_v18 = vpop.f32.mrf.mxu1 }
0x126e   :  { %v8715_v57 = vadd.f32 %v8711_v60, %v8639_v41 }
0x126f   :  { %v19231_v3 = vpop.f32.mrf.mxu0  ;;  %v19249_v54 = vpop.f32.mrf.mxu1 }
0x1270   :  { %v8716_v49 = vadd.f32 %v23000_v34, %v8715_v57 }
0x1272   :  { %v8717_v10 = vsub.f32 0.0, %v8716_v49 }
0x1274   :  { %v8718_v61 = vmul.f32 1.442695, %v8717_v10  ;;  %v8032_v10 = vpop.permute.xlu1 %8031 }
0x1276   :  { %20389 = vpow2.f32 %v8718_v61  ;;  %v8789_v2 = vpop.f32.mrf.mxu0  ;;  %v8937_v14 = vpop.f32.mrf.mxu1  ;;  %v23160_v61 = vsel %vm831_vm12, %v21604_v9, %v8032_v10 }
0x1277   :  { %v8790_v20 = vadd.f32 %v23005_v50, %v8789_v2  ;;  %v8938_v28 = vadd.f32 %v23027_v55, %v8937_v14 }
0x1278   :  { %v19242_v38 = vpop.f32.mrf.mxu0  ;;  %v19260_v27 = vpop.f32.mrf.mxu1 }
0x1279   :  { %v8863_v31 = vadd.f32 %v8859_v18, %v8790_v20 }
0x127b   :  { %v8864_v48 = vadd.f32 %v23013_v8, %v8863_v31  ;;  %v9007_v25 = vpop.f32.mrf.mxu0 }
0x127c   :  { %v9008_v62 = vadd.f32 %v23021_v42, %v9007_v25 }
0x127d   :  { %v8865_v47 = vsub.f32 0.0, %v8864_v48  ;;  %v19267_v43 = vpop.f32.mrf.mxu0 }
0x127f   :  { %v8866_v45 = vmul.f32 1.442695, %v8865_v47 }
0x1281   :  { %20391 = vpow2.f32 %v8866_v45 }
0x1283   :  { %v20390_v35 = vpop.eup %20389  ;;  %v23101_v29 = vpop.f32.mrf.mxu0 }
0x1284   :  { %v8720_v63 = vadd.f32 1.0, %v20390_v35  ;;  %v9088_v9 = vadd.f32 %v22994_v30, %v23101_v29 }
0x1285   :  { %v19278_v26 = vpop.f32.mrf.mxu0 }
0x1286   :  { %20393 = vrcp.f32 %v8720_v63 }
0x128e   :  { %v20392_v13 = vpop.eup %20391 }
0x128f   :  { %v8868_v39 = vadd.f32 1.0, %v20392_v13 }
0x1291   :  { %20395 = vrcp.f32 %v8868_v39 }
0x1293   :  { %v20394_v19 = vpop.eup %20393 }
0x1294   :  { %v9011_v46 = vmul.f32 %v20394_v19, %v9008_v62 }
0x1296   :  { %v9012_v41 = vadd.f32 %v9011_v46, %v8938_v28 }
0x1298   :  { %20397 = vtanh.f32 %v9012_v41 }
0x129e   :  { %v20396_v60 = vpop.eup %20395 }
0x129f   :  { %v9014_v18 = vsub.f32 1.0, %v20396_v60  ;;  %v9016_v54 = vmul.f32 %v20396_v60, %v23030_v56 }
0x12a5   :  { %v20398_v57 = vpop.eup %20397 }
0x12a6   :  { %v9015_v3 = vmul.f32 %v20398_v57, %v9014_v18 }
0x12a8   :  { %v23106_v49 = vadd.f32 %v9016_v54, %v9015_v3 }
0x12aa   :  { %19284 = vmatmul.mubr.msk.f32.vlgmr.msra.gmra.mxu1 %vm831_vm12, %v23106_v49  ;;  %19302 = vmatmul.mubr.msk.f32.vlgmr.msra.gmra.mxu0 %vm831_vm12, %v23106_v49 }
0x12ab   :  { %19287 = vmatpush3.msra.mxu1 %v22825_v37  ;;  %19305 = vmatpush3.msra.mxu0 %v22929_v22 }
0x12ac   :  { %19288 = vmatprep.subr.mxu1 %v20714_v6  ;;  %19306 = vmatprep.subr.mxu0 %v20714_v6 }
0x12ad   :  { %19289 = vmatpush3.msra.mxu1 %v22840_v51  ;;  %19307 = vmatpush3.msra.mxu0 %v22939_v11 }
0x12ae   :  { %19290 = vmatprep.subr.mxu1 %v20714_v6  ;;  %19308 = vmatprep.subr.mxu0 %v20714_v6 }
0x12af   :  { %19291 = vmatpush3.msra.mxu1 %v22854_v16  ;;  %19309 = vmatpush3.msra.mxu0 %v22948_v12 }
0x12b0   :  { %19292 = vmatprep.subr.mxu1 %v20714_v6  ;;  %19310 = vmatprep.subr.mxu0 %v20714_v6 }
0x12b1   :  { %19293 = vmatpush3.msra.mxu1 %v22863_v21  ;;  %19294 = vmatprep.mubr.msk.f32.mxu1 %vm20715_vm1, %v20714_v6 }
0x12b2   :  { %19311 = vmatpush3.msra.mxu0 %v22957_v33  ;;  %19312 = vmatprep.mubr.msk.f32.mxu0 %vm20715_vm1, %v20714_v6 }
0x12b3   :  { %19295 = vmatmul.mubr.msk.f32.vlgmr.msra.gmra.mxu1 %vm757_vm11, %v23084_v17  ;;  %19313 = vmatmul.mubr.msk.f32.vlgmr.msra.gmra.mxu0 %vm757_vm11, %v23084_v17 }
0x12b4   :  { %19315 = vmatprep.subr.mxu1 %v20714_v6  ;;  %19319 = vmatprep.mubr.msk.f32.mxu1 %vm20715_vm1, %v20714_v6 }
0x12b5   :  { %19316 = vmatpush3.msra.mxu1 %v22897_v7  ;;  %19333 = vmatprep.subr.mxu0 %v20714_v6 }
0x12b6   :  { %19317 = vmatprep.subr.mxu1 %v20714_v6  ;;  %19334 = vmatpush3.msra.mxu0 %v22802_v53 }
0x12b7   :  { %19318 = vmatpush3.msra.mxu1 %v22915_v58  ;;  %19335 = vmatprep.subr.mxu0 %v20714_v6 }
0x12b8   :  { %19320 = vmatmul.mubr.msk.f32.vlgmr.msra.gmra.mxu1 %vm831_vm12, %v23106_v49  ;;  %19322 = vmatprep.subr.mxu1 %v20714_v6 }
0x12b9   :  { %19323 = vmatpush3.msra.mxu1 %v22812_v5  ;;  %19330 = vmatprep.mubr.msk.f32.mxu1 %vm20715_vm1, %v20714_v6 }
0x12ba   :  { %19324 = vmatprep.subr.mxu1 %v20714_v6  ;;  %19336 = vmatpush3.msra.mxu0 %v22807_v24 }
0x12bb   :  { %19325 = vmatpush3.msra.mxu1 %v22819_v23  ;;  %19337 = vmatprep.mubr.msk.f32.mxu0 %vm20715_vm1, %v20714_v6 }
0x12bc   :  { %19326 = vmatprep.subr.mxu1 %v20714_v6  ;;  %19340 = vmatprep.subr.mxu0 %v20714_v6 }
0x12bd   :  { %19327 = vmatpush3.msra.mxu1 %v22833_v1 }
0x12be   :  { %19328 = vmatprep.subr.mxu1 %v20714_v6 }
0x12bf   :  { %19329 = vmatpush3.msra.mxu1 %v22847_v15 }
0x12c0   :  { %19331 = vmatmul.mubr.msk.f32.vlgmr.msra.gmra.mxu1 %vm757_vm11, %v23160_v61  ;;  %19351 = vmatprep.subr.mxu1 %v20714_v6 }
0x12c1   :  { %19352 = vmatpush3.msra.mxu1 %v22892_v0  ;;  %19355 = vmatprep.mubr.msk.f32.mxu1 %vm20715_vm1, %v20714_v6 }
0x12c2   :  { %19353 = vmatprep.subr.mxu1 %v20714_v6 }
0x12c3   :  { %19354 = vmatpush3.msra.mxu1 %v22910_v36 }
0x12c4   :  { %19358 = vmatprep.subr.mxu1 %v20714_v6 }
0x136a   :  { %v9160_v2 = vpop.f32.mrf.mxu1  ;;  %v9308_v14 = vpop.f32.mrf.mxu0 }
0x136b   :  { %v9164_v20 = vadd.f32 %v9160_v2, %v9088_v9 }
0x136c   :  { %v19285_v38 = vpop.f32.mrf.mxu1  ;;  %v19303_v27 = vpop.f32.mrf.mxu0 }
0x136d   :  { %v9165_v31 = vadd.f32 %v23000_v34, %v9164_v20 }
0x136f   :  { %v9166_v48 = vsub.f32 0.0, %v9165_v31 }
0x1371   :  { %v9167_v25 = vmul.f32 1.442695, %v9166_v48 }
0x1373   :  { %20399 = vpow2.f32 %v9167_v25  ;;  %v9238_v47 = vpop.f32.mrf.mxu1  ;;  %v9386_v43 = vpop.f32.mrf.mxu0 }
0x1374   :  { %v9239_v45 = vadd.f32 %v23005_v50, %v9238_v47  ;;  %v9387_v10 = vadd.f32 %v23027_v55, %v9386_v43  ;;  %v8036_v25 = vpop.permute.xlu0 %8035 }
0x1375   :  { %v19296_v35 = vpop.f32.mrf.mxu1  ;;  %v19314_v63 = vpop.f32.mrf.mxu0  ;;  %v23236_v47 = vsel %vm831_vm12, %v21676_v40, %v8036_v25 }
0x1376   :  { %v9312_v26 = vadd.f32 %v9308_v14, %v9239_v45 }
0x1378   :  { %v9313_v13 = vadd.f32 %v23013_v8, %v9312_v26  ;;  %v9456_v29 = vpop.f32.mrf.mxu1 }
0x1379   :  { %v9457_v3 = vadd.f32 %v23021_v42, %v9456_v29 }
0x137a   :  { %v9314_v39 = vsub.f32 0.0, %v9313_v13  ;;  %v19321_v62 = vpop.f32.mrf.mxu1 }
0x137c   :  { %v9315_v19 = vmul.f32 1.442695, %v9314_v39 }
0x137e   :  { %20401 = vpow2.f32 %v9315_v19 }
0x1380   :  { %v20400_v28 = vpop.eup %20399  ;;  %v23177_v46 = vpop.f32.mrf.mxu1 }
0x1381   :  { %v9169_v41 = vadd.f32 1.0, %v20400_v28  ;;  %v9537_v40 = vadd.f32 %v22994_v30, %v23177_v46 }
0x1382   :  { %v19332_v60 = vpop.f32.mrf.mxu1 }
0x1383   :  { %20403 = vrcp.f32 %v9169_v41 }
0x138b   :  { %v20402_v18 = vpop.eup %20401 }
0x138c   :  { %v9317_v57 = vadd.f32 1.0, %v20402_v18 }
0x138e   :  { %20405 = vrcp.f32 %v9317_v57 }
0x1390   :  { %v20404_v54 = vpop.eup %20403 }
0x1391   :  { %v9460_v9 = vmul.f32 %v20404_v54, %v9457_v3 }
0x1393   :  { %v9461_v2 = vadd.f32 %v9460_v9, %v9387_v10 }
0x1395   :  { %20407 = vtanh.f32 %v9461_v2 }
0x139b   :  { %v20406_v14 = vpop.eup %20405 }
0x139c   :  { %v9463_v20 = vsub.f32 1.0, %v20406_v14  ;;  %v9465_v31 = vmul.f32 %v20406_v14, %v23106_v49 }
0x13a2   :  { %v20408_v38 = vpop.eup %20407 }
0x13a3   :  { %v9464_v27 = vmul.f32 %v20408_v38, %v9463_v20 }
0x13a5   :  { %v23182_v48 = vadd.f32 %v9465_v31, %v9464_v27 }
0x13a7   :  { %19338 = vmatmul.mubr.msk.f32.vlgmr.msra.gmra.mxu0 %vm831_vm12, %v23182_v48  ;;  %19356 = vmatmul.mubr.msk.f32.vlgmr.msra.gmra.mxu1 %vm831_vm12, %v23182_v48 }
0x13a8   :  { %19341 = vmatpush3.msra.mxu0 %v22825_v37  ;;  %19359 = vmatpush3.msra.mxu1 %v22929_v22 }
0x13a9   :  { %19342 = vmatprep.subr.mxu0 %v20714_v6  ;;  %19360 = vmatprep.subr.mxu1 %v20714_v6 }
0x13aa   :  { %19343 = vmatpush3.msra.mxu0 %v22840_v51  ;;  %19361 = vmatpush3.msra.mxu1 %v22939_v11 }
0x13ab   :  { %19344 = vmatprep.subr.mxu0 %v20714_v6  ;;  %19362 = vmatprep.subr.mxu1 %v20714_v6 }
0x13ac   :  { %19345 = vmatpush3.msra.mxu0 %v22854_v16  ;;  %19363 = vmatpush3.msra.mxu1 %v22948_v12 }
0x13ad   :  { %19346 = vmatprep.subr.mxu0 %v20714_v6  ;;  %19364 = vmatprep.subr.mxu1 %v20714_v6 }
0x13ae   :  { %19347 = vmatpush3.msra.mxu0 %v22863_v21  ;;  %19348 = vmatprep.mubr.msk.f32.mxu0 %vm20715_vm1, %v20714_v6 }
0x13af   :  { %19365 = vmatpush3.msra.mxu1 %v22957_v33  ;;  %19366 = vmatprep.mubr.msk.f32.mxu1 %vm20715_vm1, %v20714_v6 }
0x13b0   :  { %19349 = vmatmul.mubr.msk.f32.vlgmr.msra.gmra.mxu0 %vm757_vm11, %v23160_v61  ;;  %19367 = vmatmul.mubr.msk.f32.vlgmr.msra.gmra.mxu1 %vm757_vm11, %v23160_v61 }
0x13b1   :  { %19369 = vmatprep.subr.mxu0 %v20714_v6  ;;  %19373 = vmatprep.mubr.msk.f32.mxu0 %vm20715_vm1, %v20714_v6 }
0x13b2   :  { %19370 = vmatpush3.msra.mxu0 %v22897_v7  ;;  %19387 = vmatprep.subr.mxu1 %v20714_v6 }
0x13b3   :  { %19371 = vmatprep.subr.mxu0 %v20714_v6  ;;  %19388 = vmatpush3.msra.mxu1 %v22802_v53 }
0x13b4   :  { %19372 = vmatpush3.msra.mxu0 %v22915_v58  ;;  %19389 = vmatprep.subr.mxu1 %v20714_v6 }
0x13b5   :  { %19374 = vmatmul.mubr.msk.f32.vlgmr.msra.gmra.mxu0 %vm831_vm12, %v23182_v48  ;;  %19376 = vmatprep.subr.mxu0 %v20714_v6 }
0x13b6   :  { %19377 = vmatpush3.msra.mxu0 %v22812_v5  ;;  %19384 = vmatprep.mubr.msk.f32.mxu0 %vm20715_vm1, %v20714_v6 }
0x13b7   :  { %19378 = vmatprep.subr.mxu0 %v20714_v6  ;;  %19390 = vmatpush3.msra.mxu1 %v22807_v24 }
0x13b8   :  { %19379 = vmatpush3.msra.mxu0 %v22819_v23  ;;  %19391 = vmatprep.mubr.msk.f32.mxu1 %vm20715_vm1, %v20714_v6 }
0x13b9   :  { %19380 = vmatprep.subr.mxu0 %v20714_v6  ;;  %19394 = vmatprep.subr.mxu1 %v20714_v6 }
0x13ba   :  { %19381 = vmatpush3.msra.mxu0 %v22833_v1 }
0x13bb   :  { %19382 = vmatprep.subr.mxu0 %v20714_v6 }
0x13bc   :  { %19383 = vmatpush3.msra.mxu0 %v22847_v15 }
0x13bd   :  { %19385 = vmatmul.mubr.msk.f32.vlgmr.msra.gmra.mxu0 %vm757_vm11, %v23236_v47  ;;  %19405 = vmatprep.subr.mxu0 %v20714_v6 }
0x13be   :  { %19406 = vmatpush3.msra.mxu0 %v22892_v0  ;;  %19409 = vmatprep.mubr.msk.f32.mxu0 %vm20715_vm1, %v20714_v6 }
0x13bf   :  { %19407 = vmatprep.subr.mxu0 %v20714_v6 }
0x13c0   :  { %19408 = vmatpush3.msra.mxu0 %v22910_v36 }
0x13c1   :  { %19412 = vmatprep.subr.mxu0 %v20714_v6 }
0x1467   :  { %v9609_v43 = vpop.f32.mrf.mxu0  ;;  %v9757_v45 = vpop.f32.mrf.mxu1 }
0x1468   :  { %v9613_v35 = vadd.f32 %v9609_v43, %v9537_v40 }
0x1469   :  { %v19339_v63 = vpop.f32.mrf.mxu0  ;;  %v19357_v26 = vpop.f32.mrf.mxu1 }
0x146a   :  { %v9614_v13 = vadd.f32 %v23000_v34, %v9613_v35 }
0x146c   :  { %v9615_v29 = vsub.f32 0.0, %v9614_v13 }
0x146e   :  { %v9616_v39 = vmul.f32 1.442695, %v9615_v29 }
0x1470   :  { %20409 = vpow2.f32 %v9616_v39  ;;  %v9687_v62 = vpop.f32.mrf.mxu0  ;;  %v9835_v19 = vpop.f32.mrf.mxu1 }
0x1471   :  { %v9688_v28 = vadd.f32 %v23005_v50, %v9687_v62  ;;  %v9836_v40 = vadd.f32 %v23027_v55, %v9835_v19 }
0x1472   :  { %v19350_v41 = vpop.f32.mrf.mxu0  ;;  %v19368_v60 = vpop.f32.mrf.mxu1 }
0x1473   :  { %v9761_v18 = vadd.f32 %v9757_v45, %v9688_v28 }
0x1475   :  { %v9762_v57 = vadd.f32 %v23013_v8, %v9761_v18  ;;  %v9905_v46 = vpop.f32.mrf.mxu0 }
0x1476   :  { %v9906_v31 = vadd.f32 %v23021_v42, %v9905_v46 }
0x1477   :  { %v9763_v3 = vsub.f32 0.0, %v9762_v57  ;;  %v19375_v54 = vpop.f32.mrf.mxu0 }
0x1479   :  { %v9764_v10 = vmul.f32 1.442695, %v9763_v3 }
0x147b   :  { %20411 = vpow2.f32 %v9764_v10 }
0x147d   :  { %v20410_v9 = vpop.eup %20409  ;;  %v23253_v2 = vpop.f32.mrf.mxu0 }
0x147e   :  { %v9618_v14 = vadd.f32 1.0, %v20410_v9 }
0x147f   :  { %v19386_v20 = vpop.f32.mrf.mxu0 }
0x1480   :  { %20413 = vrcp.f32 %v9618_v14 }
0x1488   :  { %v20412_v38 = vpop.eup %20411 }
0x1489   :  { %v9766_v27 = vadd.f32 1.0, %v20412_v38 }
0x148b   :  { %20415 = vrcp.f32 %v9766_v27 }
0x148d   :  { %v20414_v25 = vpop.eup %20413 }
0x148e   :  { %v9909_v43 = vmul.f32 %v20414_v25, %v9906_v31 }
0x1490   :  { %v9910_v45 = vadd.f32 %v9909_v43, %v9836_v40 }
0x1492   :  { %20417 = vtanh.f32 %v9910_v45 }
0x1498   :  { %v20416_v35 = vpop.eup %20415 }
0x1499   :  { %v9912_v63 = vsub.f32 1.0, %v20416_v35  ;;  %v9914_v29 = vmul.f32 %v20416_v35, %v23182_v48 }
0x149f   :  { %v20418_v26 = vpop.eup %20417 }
0x14a0   :  { %v9913_v13 = vmul.f32 %v20418_v26, %v9912_v63 }
0x14a2   :  { %v23258_v39 = vadd.f32 %v9914_v29, %v9913_v13  ;;  %v23343_v29 = vld [vmem:[%s24766_s3 + $0x58] sm:$0xff] }
0x14a4   :  { %19392 = vmatmul.mubr.msk.f32.vlgmr.msra.gmra.mxu1 %vm831_vm12, %v23258_v39  ;;  %19410 = vmatmul.mubr.msk.f32.vlgmr.msra.gmra.mxu0 %vm831_vm12, %v23258_v39 }
0x14a5   :  { %19395 = vmatpush3.msra.mxu1 %v22825_v37  ;;  %19413 = vmatpush3.msra.mxu0 %v22929_v22 }
0x14a6   :  { %19396 = vmatprep.subr.mxu1 %v20714_v6  ;;  %19414 = vmatprep.subr.mxu0 %v20714_v6 }
0x14a7   :  { %19397 = vmatpush3.msra.mxu1 %v22840_v51  ;;  %19415 = vmatpush3.msra.mxu0 %v22939_v11 }
0x14a8   :  { %19398 = vmatprep.subr.mxu1 %v20714_v6  ;;  %19416 = vmatprep.subr.mxu0 %v20714_v6 }
0x14a9   :  { %19399 = vmatpush3.msra.mxu1 %v22854_v16  ;;  %19417 = vmatpush3.msra.mxu0 %v22948_v12 }
0x14aa   :  { %19400 = vmatprep.subr.mxu1 %v20714_v6  ;;  %19418 = vmatprep.subr.mxu0 %v20714_v6 }
0x14ab   :  { %19401 = vmatpush3.msra.mxu1 %v22863_v21  ;;  %19402 = vmatprep.mubr.msk.f32.mxu1 %vm20715_vm1, %v20714_v6 }
0x14ac   :  { %19419 = vmatpush3.msra.mxu0 %v22957_v33  ;;  %19420 = vmatprep.mubr.msk.f32.mxu0 %vm20715_vm1, %v20714_v6 }
0x14ad   :  { %19403 = vmatmul.mubr.msk.f32.vlgmr.msra.gmra.mxu1 %vm757_vm11, %v23236_v47  ;;  %19421 = vmatmul.mubr.msk.f32.vlgmr.msra.gmra.mxu0 %vm757_vm11, %v23236_v47 }
0x14ae   :  { %19423 = vmatprep.subr.mxu1 %v20714_v6  ;;  %19427 = vmatprep.mubr.msk.f32.mxu1 %vm20715_vm1, %v20714_v6 }
0x14af   :  { %19424 = vmatpush3.msra.mxu1 %v22897_v7  ;;  %19441 = vmatprep.subr.mxu0 %v20714_v6 }
0x14b0   :  { %19425 = vmatprep.subr.mxu1 %v20714_v6  ;;  %19442 = vmatpush3.msra.mxu0 %v22802_v53  ;;  %v8040_v53 = vpop.permute.xlu1 %8039 }
0x14b1   :  { %19426 = vmatpush3.msra.mxu1 %v22915_v58  ;;  %19443 = vmatprep.subr.mxu0 %v20714_v6 }
0x14b2   :  { %19428 = vmatmul.mubr.msk.f32.vlgmr.msra.gmra.mxu1 %vm831_vm12, %v23258_v39  ;;  %19430 = vmatprep.subr.mxu1 %v20714_v6 }
0x14b3   :  { %19431 = vmatpush3.msra.mxu1 %v22812_v5  ;;  %19438 = vmatprep.mubr.msk.f32.mxu1 %vm20715_vm1, %v20714_v6  ;;  %v23312_v5 = vsel %vm831_vm12, %v21788_v4, %v8040_v53  ;;  %v9986_v4 = vadd.f32 %v22994_v30, %v23253_v2  ;;  %v23352_v53 = vld [vmem:[%s24766_s3 + $0x50] sm:$0xff] }
0x14b4   :  { %19432 = vmatprep.subr.mxu1 %v20714_v6  ;;  %19444 = vmatpush3.msra.mxu0 %v22807_v24 }
0x14b5   :  { %19433 = vmatpush3.msra.mxu1 %v22819_v23  ;;  %19445 = vmatprep.mubr.msk.f32.mxu0 %vm20715_vm1, %v20714_v6 }
0x14b6   :  { %19434 = vmatprep.subr.mxu1 %v20714_v6  ;;  %19448 = vmatprep.subr.mxu0 %v20714_v6 }
0x14b7   :  { %19435 = vmatpush3.msra.mxu1 %v22833_v1 }
0x14b8   :  { %19436 = vmatprep.subr.mxu1 %v20714_v6 }
0x14b9   :  { %19437 = vmatpush3.msra.mxu1 %v22847_v15 }
0x14ba   :  { %19439 = vmatmul.mubr.msk.f32.vlgmr.msra.gmra.mxu1 %vm757_vm11, %v23312_v5  ;;  %19459 = vmatprep.subr.mxu1 %v20714_v6 }
0x14bb   :  { %19460 = vmatpush3.msra.mxu1 %v22892_v0  ;;  %19463 = vmatprep.mubr.msk.f32.mxu1 %vm20715_vm1, %v20714_v6 }
0x14bc   :  { %19461 = vmatprep.subr.mxu1 %v20714_v6 }
0x14bd   :  { %19462 = vmatpush3.msra.mxu1 %v22910_v36 }
0x14be   :  { %19466 = vmatprep.subr.mxu1 %v20714_v6 }
0x1564   :  { %v10058_v24 = vpop.f32.mrf.mxu1  ;;  %v10206_v23 = vpop.f32.mrf.mxu0 }
0x1565   :  { %v10062_v37 = vadd.f32 %v10058_v24, %v9986_v4  ;;  %v8044_v4 = vpop.permute.xlu0 %8043  ;;  %v23427_v24 = vld [vmem:[%s24790_s0 + $0x48] sm:$0xff] }
0x1566   :  { %v19393_v1 = vpop.f32.mrf.mxu1  ;;  %v19411_v51 = vpop.f32.mrf.mxu0 }
0x1567   :  { %v10063_v15 = vadd.f32 %v23000_v34, %v10062_v37  ;;  %v23438_v37 = vld [vmem:[%s24790_s0 + $0x40] sm:$0xff]  ;;  %v23447_v1 = vld [vmem:[%s24769_s6 + $0x28] sm:$0xff] }
0x1569   :  { %v10064_v16 = vsub.f32 0.0, %v10063_v15 }
0x156b   :  { %v10065_v21 = vmul.f32 1.442695, %v10064_v16 }
0x156d   :  { %20419 = vpow2.f32 %v10065_v21  ;;  %v10136_v0 = vpop.f32.mrf.mxu1  ;;  %v10284_v62 = vpop.f32.mrf.mxu0 }
0x156e   :  { %v10137_v19 = vadd.f32 %v23005_v50, %v10136_v0  ;;  %v10285_v31 = vadd.f32 %v23027_v55, %v10284_v62 }
0x156f   :  { %v19404_v36 = vpop.f32.mrf.mxu1  ;;  %v19422_v28 = vpop.f32.mrf.mxu0 }
0x1570   :  { %v10210_v41 = vadd.f32 %v10206_v23, %v10137_v19  ;;  %v23433_v23 = vsel %vm831_vm12, %v21940_v52, %v8044_v4  ;;  %v23456_v52 = vld [vmem:[%s24769_s6 + $0x20] sm:$0xff] }
0x1572   :  { %v10211_v60 = vadd.f32 %v23013_v8, %v10210_v41  ;;  %v10354_v18 = vpop.f32.mrf.mxu1 }
0x1573   :  { %v10355_v38 = vadd.f32 %v23021_v42, %v10354_v18 }
0x1574   :  { %v10212_v57 = vsub.f32 0.0, %v10211_v60  ;;  %v19429_v46 = vpop.f32.mrf.mxu1 }
0x1576   :  { %v10213_v3 = vmul.f32 1.442695, %v10212_v57 }
0x1578   :  { %20421 = vpow2.f32 %v10213_v3 }
0x157a   :  { %v20420_v54 = vpop.eup %20419  ;;  %v23329_v10 = vpop.f32.mrf.mxu1 }
0x157b   :  { %v10067_v9 = vadd.f32 1.0, %v20420_v54  ;;  %v10435_v51 = vadd.f32 %v22994_v30, %v23329_v10 }
0x157c   :  { %v19440_v2 = vpop.f32.mrf.mxu1 }
0x157d   :  { %20423 = vrcp.f32 %v10067_v9 }
0x1585   :  { %v20422_v14 = vpop.eup %20421 }
0x1586   :  { %v10215_v20 = vadd.f32 1.0, %v20422_v14 }
0x1588   :  { %20425 = vrcp.f32 %v10215_v20 }
0x158a   :  { %v20424_v27 = vpop.eup %20423 }
0x158b   :  { %v10358_v25 = vmul.f32 %v20424_v27, %v10355_v38 }
0x158d   :  { %v10359_v40 = vadd.f32 %v10358_v25, %v10285_v31 }
0x158f   :  { %20427 = vtanh.f32 %v10359_v40 }
0x1595   :  { %v20426_v43 = vpop.eup %20425 }
0x1596   :  { %v10361_v45 = vsub.f32 1.0, %v20426_v43  ;;  %v10363_v26 = vmul.f32 %v20426_v43, %v23258_v39 }
0x159c   :  { %v20428_v35 = vpop.eup %20427 }
0x159d   :  { %v10362_v63 = vmul.f32 %v20428_v35, %v10361_v45 }
0x159f   :  { %v23334_v13 = vadd.f32 %v10363_v26, %v10362_v63 }
0x15a1   :  { %19446 = vmatmul.mubr.msk.f32.vlgmr.msra.gmra.mxu0 %vm831_vm12, %v23334_v13  ;;  %19464 = vmatmul.mubr.msk.f32.vlgmr.msra.gmra.mxu1 %vm831_vm12, %v23334_v13 }
0x15a2   :  { %19449 = vmatpush3.msra.mxu0 %v23343_v29  ;;  %19467 = vmatpush3.msra.mxu1 %v22929_v22  ;;  %v23361_v22 = vld [vmem:[%s24766_s3 + $0x48] sm:$0xff] }
0x15a3   :  { %19450 = vmatprep.subr.mxu0 %v20714_v6  ;;  %19468 = vmatprep.subr.mxu1 %v20714_v6 }
0x15a4   :  { %19451 = vmatpush3.msra.mxu0 %v23352_v53  ;;  %19469 = vmatpush3.msra.mxu1 %v22939_v11  ;;  %v23370_v11 = vld [vmem:[%s24766_s3 + $0x40] sm:$0xff] }
0x15a5   :  { %19452 = vmatprep.subr.mxu0 %v20714_v6  ;;  %19470 = vmatprep.subr.mxu1 %v20714_v6 }
0x15a6   :  { %19453 = vmatpush3.msra.mxu0 %v23361_v22  ;;  %19471 = vmatpush3.msra.mxu1 %v22948_v12  ;;  %v23391_v12 = vld [vmem:[%s24768_s5 + $0x28] sm:$0xff] }
0x15a7   :  { %19454 = vmatprep.subr.mxu0 %v20714_v6  ;;  %19472 = vmatprep.subr.mxu1 %v20714_v6 }
0x15a8   :  { %19455 = vmatpush3.msra.mxu0 %v23370_v11  ;;  %19456 = vmatprep.mubr.msk.f32.mxu0 %vm20715_vm1, %v20714_v6 }
0x15a9   :  { %19473 = vmatpush3.msra.mxu1 %v22957_v33  ;;  %19474 = vmatprep.mubr.msk.f32.mxu1 %vm20715_vm1, %v20714_v6  ;;  %v23417_v33 = vld [vmem:[%s24790_s0 + $0x50] sm:$0xff] }
0x15aa   :  { %19457 = vmatmul.mubr.msk.f32.vlgmr.msra.gmra.mxu0 %vm757_vm11, %v23312_v5  ;;  %19475 = vmatmul.mubr.msk.f32.vlgmr.msra.gmra.mxu1 %vm757_vm11, %v23312_v5 }
0x15ab   :  { %19477 = vmatprep.subr.mxu0 %v20714_v6  ;;  %19481 = vmatprep.mubr.msk.f32.mxu0 %vm20715_vm1, %v20714_v6 }
0x15ac   :  { %19478 = vmatpush3.msra.mxu0 %v22897_v7  ;;  %19495 = vmatprep.subr.mxu1 %v20714_v6  ;;  %v23402_v7 = vld [vmem:[%s24790_s0 + $0x58] sm:$0xff] }
0x15ad   :  { %19479 = vmatprep.subr.mxu0 %v20714_v6  ;;  %19496 = vmatpush3.msra.mxu1 %v23391_v12 }
0x15ae   :  { %19480 = vmatpush3.msra.mxu0 %v22915_v58  ;;  %19497 = vmatprep.subr.mxu1 %v20714_v6  ;;  %v23411_v58 = vld [vmem:[%s24768_s5 + $0x20] sm:$0xff] }
0x15af   :  { %19482 = vmatmul.mubr.msk.f32.vlgmr.msra.gmra.mxu0 %vm831_vm12, %v23334_v13  ;;  %19484 = vmatprep.subr.mxu0 %v20714_v6 }
0x15b0   :  { %19485 = vmatpush3.msra.mxu0 %v23402_v7  ;;  %19492 = vmatprep.mubr.msk.f32.mxu0 %vm20715_vm1, %v20714_v6 }
0x15b1   :  { %19486 = vmatprep.subr.mxu0 %v20714_v6  ;;  %19498 = vmatpush3.msra.mxu1 %v23411_v58 }
0x15b2   :  { %19487 = vmatpush3.msra.mxu0 %v23417_v33  ;;  %19499 = vmatprep.mubr.msk.f32.mxu1 %vm20715_vm1, %v20714_v6 }
0x15b3   :  { %19488 = vmatprep.subr.mxu0 %v20714_v6  ;;  %19502 = vmatprep.subr.mxu1 %v20714_v6 }
0x15b4   :  { %19489 = vmatpush3.msra.mxu0 %v23427_v24 }
0x15b5   :  { %19490 = vmatprep.subr.mxu0 %v20714_v6 }
0x15b6   :  { %19491 = vmatpush3.msra.mxu0 %v23438_v37 }
0x15b7   :  { %19493 = vmatmul.mubr.msk.f32.vlgmr.msra.gmra.mxu0 %vm757_vm11, %v23433_v23  ;;  %19513 = vmatprep.subr.mxu0 %v20714_v6 }
0x15b8   :  { %19514 = vmatpush3.msra.mxu0 %v23447_v1  ;;  %19517 = vmatprep.mubr.msk.f32.mxu0 %vm20715_vm1, %v20714_v6 }
0x15b9   :  { %19515 = vmatprep.subr.mxu0 %v20714_v6 }
0x15ba   :  { %19516 = vmatpush3.msra.mxu0 %v23456_v52 }
0x15bb   :  { %19520 = vmatprep.subr.mxu0 %v20714_v6 }
0x1661   :  { %v10507_v15 = vpop.f32.mrf.mxu0  ;;  %v10655_v16 = vpop.f32.mrf.mxu1 }
0x1662   :  { %v10511_v21 = vadd.f32 %v10507_v15, %v10435_v51  ;;  %v23498_v15 = vld [vmem:[%s24767_s4 + $0x48] sm:$0xff] }
0x1663   :  { %v19447_v0 = vpop.f32.mrf.mxu0  ;;  %v19465_v62 = vpop.f32.mrf.mxu1 }
0x1664   :  { %v10512_v19 = vadd.f32 %v23000_v34, %v10511_v21  ;;  %v23524_v21 = vld [vmem:[%s24770_s7 + $0x28] sm:$0xff]  ;;  %v23533_v0 = vld [vmem:[%s24770_s7 + $0x20] sm:$0xff] }
0x1666   :  { %v10513_v36 = vsub.f32 0.0, %v10512_v19  ;;  %v23576_v19 = vld [vmem:[%s24774_s11 + $0x2] ss:$0 sm:$0xff] }
0x1668   :  { %v10514_v28 = vmul.f32 1.442695, %v10513_v36 }
0x166a   :  { %20429 = vpow2.f32 %v10514_v28  ;;  %v10585_v41 = vpop.f32.mrf.mxu0  ;;  %v10733_v60 = vpop.f32.mrf.mxu1 }
0x166b   :  { %v10586_v18 = vadd.f32 %v23005_v50, %v10585_v41  ;;  %v10734_v40 = vadd.f32 %v23027_v55, %v10733_v60  ;;  %v23489_v55 = vld [vmem:[%s24767_s4 + $0x50] sm:$0xff] }
0x166c   :  { %v19458_v57 = vpop.f32.mrf.mxu0  ;;  %v19476_v46 = vpop.f32.mrf.mxu1 }
0x166d   :  { %v10659_v3 = vadd.f32 %v10655_v16, %v10586_v18  ;;  %v23509_v16 = vld [vmem:[%s24767_s4 + $0x40] sm:$0xff] }
0x166e   :  { %v23582_v18 = vld [vmem:[%s24772_s9 + $0x2] ss:$0 sm:$0xff] }
0x166f   :  { %v10660_v54 = vadd.f32 %v23013_v8, %v10659_v3  ;;  %v10803_v30 = vpop.f32.mrf.mxu0 }
0x1670   :  { %v10804_v50 = vadd.f32 %v23021_v42, %v10803_v30  ;;  %v23480_v42 = vld [vmem:[%s24767_s4 + $0x58] sm:$0xff]  ;;  %v23588_v30 = vld [vmem:[%s24775_s12 + $0x2] ss:$0 sm:$0xff] }
0x1671   :  { %v10661_v10 = vsub.f32 0.0, %v10660_v54  ;;  %v19483_v9 = vpop.f32.mrf.mxu0 }
0x1673   :  { %v10662_v2 = vmul.f32 1.442695, %v10661_v10 }
0x1675   :  { %20431 = vpow2.f32 %v10662_v2 }
0x1677   :  { %v20430_v14 = vpop.eup %20429  ;;  %v23465_v20 = vpop.f32.mrf.mxu0 }
0x1678   :  { %v10516_v34 = vadd.f32 1.0, %v20430_v14 }
0x1679   :  { %v19494_v38 = vpop.f32.mrf.mxu0 }
0x167a   :  { %20433 = vrcp.f32 %v10516_v34 }
0x1682   :  { %v20432_v27 = vpop.eup %20431 }
0x1683   :  { %v10664_v31 = vadd.f32 1.0, %v20432_v27 }
0x1685   :  { %20435 = vrcp.f32 %v10664_v31 }
0x1687   :  { %v20434_v25 = vpop.eup %20433 }
0x1688   :  { %v10807_v8 = vmul.f32 %v20434_v25, %v10804_v50 }
0x168a   :  { %v10808_v43 = vadd.f32 %v10807_v8, %v10734_v40  ;;  %v23596_v40 = vld [vmem:[%s24776_s13 + $0x2] ss:$0 sm:$0xff] }
0x168c   :  { %20437 = vtanh.f32 %v10808_v43 }
0x1692   :  { %v20436_v45 = vpop.eup %20435 }
0x1693   :  { %v10810_v35 = vsub.f32 1.0, %v20436_v45  ;;  %v10812_v4 = vmul.f32 %v20436_v45, %v23334_v13  ;;  %v23602_v45 = vld [vmem:[%s24773_s10 + $0x2] ss:$0 sm:$0xff] }
0x1699   :  { %v20438_v63 = vpop.eup %20437 }
0x169a   :  { %v10811_v26 = vmul.f32 %v20438_v63, %v10810_v35 }
0x169c   :  { %v23470_v51 = vadd.f32 %v10812_v4, %v10811_v26 }
0x169e   :  { %19500 = vmatmul.mubr.msk.f32.vlgmr.msra.gmra.mxu1 %vm831_vm12, %v23470_v51  ;;  %19518 = vmatmul.mubr.msk.f32.vlgmr.msra.gmra.mxu0 %vm831_vm12, %v23470_v51 }
0x169f   :  { %19503 = vmatpush3.msra.mxu1 %v23343_v29  ;;  %19521 = vmatpush3.msra.mxu0 %v23480_v42 }
0x16a0   :  { %19504 = vmatprep.subr.mxu1 %v20714_v6  ;;  %19522 = vmatprep.subr.mxu0 %v20714_v6 }
0x16a1   :  { %19505 = vmatpush3.msra.mxu1 %v23352_v53  ;;  %19523 = vmatpush3.msra.mxu0 %v23489_v55 }
0x16a2   :  { %19506 = vmatprep.subr.mxu1 %v20714_v6  ;;  %19524 = vmatprep.subr.mxu0 %v20714_v6 }
0x16a3   :  { %19507 = vmatpush3.msra.mxu1 %v23361_v22  ;;  %19525 = vmatpush3.msra.mxu0 %v23498_v15 }
0x16a4   :  { %19508 = vmatprep.subr.mxu1 %v20714_v6  ;;  %19526 = vmatprep.subr.mxu0 %v20714_v6 }
0x16a5   :  { %19509 = vmatpush3.msra.mxu1 %v23370_v11  ;;  %19510 = vmatprep.mubr.msk.f32.mxu1 %vm20715_vm1, %v20714_v6 }
0x16a6   :  { %19527 = vmatpush3.msra.mxu0 %v23509_v16  ;;  %19528 = vmatprep.mubr.msk.f32.mxu0 %vm20715_vm1, %v20714_v6 }
0x16a7   :  { %19511 = vmatmul.mubr.msk.f32.vlgmr.msra.gmra.mxu1 %vm757_vm11, %v23433_v23  ;;  %19529 = vmatmul.mubr.msk.f32.vlgmr.msra.gmra.mxu0 %vm757_vm11, %v23433_v23 }
0x16a8   :  { %19531 = vmatprep.subr.mxu1 %v20714_v6  ;;  %19535 = vmatprep.mubr.msk.f32.mxu1 %vm20715_vm1, %v20714_v6 }
0x16a9   :  { %19532 = vmatpush3.msra.mxu1 %v23524_v21  ;;  %19549 = vmatprep.subr.mxu0 %v20714_v6 }
0x16aa   :  { %19533 = vmatprep.subr.mxu1 %v20714_v6  ;;  %19550 = vmatpush3.msra.mxu0 %v23391_v12  ;;  %v8048_v12 = vpop.permute.xlu1 %8047 }
0x16ab   :  { %19534 = vmatpush3.msra.mxu1 %v23533_v0  ;;  %19551 = vmatprep.subr.mxu0 %v20714_v6 }
0x16ac   :  { %19536 = vmatmul.mubr.msk.f32.vlgmr.msra.gmra.mxu1 %vm831_vm12, %v23470_v51  ;;  %19538 = vmatprep.subr.mxu1 %v20714_v6 }
0x16ad   :  { %19539 = vmatpush3.msra.mxu1 %v23402_v7  ;;  %19546 = vmatprep.mubr.msk.f32.mxu1 %vm20715_vm1, %v20714_v6  ;;  %v23554_v7 = vsel %vm831_vm12, %v22183_v32, %v8048_v12  ;;  %v23569_v32 = vld [vmem:[%s24771_s8 + $0x2] ss:$0 sm:$0xff] }
0x16ae   :  { %19540 = vmatprep.subr.mxu1 %v20714_v6  ;;  %19552 = vmatpush3.msra.mxu0 %v23411_v58  ;;  %v10884_v58 = vadd.f32 %v23569_v32, %v23465_v20 }
0x16af   :  { %19541 = vmatpush3.msra.mxu1 %v23417_v33  ;;  %19553 = vmatprep.mubr.msk.f32.mxu0 %vm20715_vm1, %v20714_v6 }
0x16b0   :  { %19542 = vmatprep.subr.mxu1 %v20714_v6  ;;  %19556 = vmatprep.subr.mxu0 %v20714_v6 }
0x16b1   :  { %19543 = vmatpush3.msra.mxu1 %v23427_v24 }
0x16b2   :  { %19544 = vmatprep.subr.mxu1 %v20714_v6 }
0x16b3   :  { %19545 = vmatpush3.msra.mxu1 %v23438_v37 }
0x16b4   :  { %19547 = vmatmul.mubr.msk.f32.vlgmr.msra.gmra.mxu1 %vm757_vm11, %v23554_v7  ;;  %19567 = vmatprep.subr.mxu1 %v20714_v6 }
0x16b5   :  { %19568 = vmatpush3.msra.mxu1 %v23447_v1  ;;  %19571 = vmatprep.mubr.msk.f32.mxu1 %vm20715_vm1, %v20714_v6 }
0x16b6   :  { %19569 = vmatprep.subr.mxu1 %v20714_v6 }
0x16b7   :  { %19570 = vmatpush3.msra.mxu1 %v23456_v52 }
0x16b8   :  { %19574 = vmatprep.subr.mxu1 %v20714_v6 }
0x175e   :  { %v10956_v33 = vpop.f32.mrf.mxu1  ;;  %v11104_v24 = vpop.f32.mrf.mxu0 }
0x175f   :  { %v10960_v37 = vadd.f32 %v10956_v33, %v10884_v58 }
0x1760   :  { %v19501_v1 = vpop.f32.mrf.mxu1  ;;  %v19519_v62 = vpop.f32.mrf.mxu0 }
0x1761   :  { %v10961_v52 = vadd.f32 %v23576_v19, %v10960_v37  ;;  %v23722_v1 = vld [vmem:[%s24769_s6 + $0x38] sm:$0xff] }
0x1762   :  { %v23727_v62 = vld [vmem:[%s24770_s7 + $0x38] sm:$0xff] }
0x1763   :  { %v10962_v36 = vsub.f32 0.0, %v10961_v52  ;;  %v23738_v52 = vld [vmem:[%s24769_s6 + $0x30] sm:$0xff] }
0x1765   :  { %v10963_v28 = vmul.f32 1.442695, %v10962_v36  ;;  %v23745_v36 = vld [vmem:[%s24770_s7 + $0x30] sm:$0xff] }
0x1767   :  { %20439 = vpow2.f32 %v10963_v28  ;;  %v11034_v41 = vpop.f32.mrf.mxu1  ;;  %v11182_v60 = vpop.f32.mrf.mxu0  ;;  %v23755_v28 = vld [vmem:[%s24767_s4 + $0x78] sm:$0xff] }
0x1768   :  { %v11035_v57 = vadd.f32 %v23582_v18, %v11034_v41  ;;  %v11183_v35 = vadd.f32 %v23602_v45, %v11182_v60  ;;  %v23765_v41 = vld [vmem:[%s24767_s4 + $0x70] sm:$0xff]  ;;  %v23774_v60 = vld [vmem:[%s24767_s4 + $0x68] sm:$0xff] }
0x1769   :  { %v19512_v46 = vpop.f32.mrf.mxu1  ;;  %v19530_v3 = vpop.f32.mrf.mxu0 }
0x176a   :  { %v11108_v54 = vadd.f32 %v11104_v24, %v11035_v57  ;;  %v23783_v57 = vld [vmem:[%s24767_s4 + $0x60] sm:$0xff] }
0x176c   :  { %v11109_v10 = vadd.f32 %v23588_v30, %v11108_v54  ;;  %v11252_v9 = vpop.f32.mrf.mxu1 }
0x176d   :  { %v11253_v8 = vadd.f32 %v23596_v40, %v11252_v9 }
0x176e   :  { %v11110_v2 = vsub.f32 0.0, %v11109_v10  ;;  %v19537_v14 = vpop.f32.mrf.mxu1 }
0x1770   :  { %v11111_v20 = vmul.f32 1.442695, %v11110_v2 }
0x1772   :  { %20441 = vpow2.f32 %v11111_v20 }
0x1774   :  { %v20440_v34 = vpop.eup %20439  ;;  %v23591_v38 = vpop.f32.mrf.mxu1 }
0x1775   :  { %v10965_v27 = vadd.f32 1.0, %v20440_v34 }
0x1776   :  { %v19548_v31 = vpop.f32.mrf.mxu1 }
0x1777   :  { %20443 = vrcp.f32 %v10965_v27 }
0x177f   :  { %v20442_v50 = vpop.eup %20441 }
0x1780   :  { %v11113_v25 = vadd.f32 1.0, %v20442_v50 }
0x1782   :  { %20445 = vrcp.f32 %v11113_v25 }
0x1784   :  { %v20444_v43 = vpop.eup %20443 }
0x1785   :  { %v11256_v63 = vmul.f32 %v20444_v43, %v11253_v8 }
0x1787   :  { %v11257_v26 = vadd.f32 %v11256_v63, %v11183_v35 }
0x1789   :  { %20447 = vtanh.f32 %v11257_v26 }
0x178f   :  { %v20446_v4 = vpop.eup %20445 }
0x1790   :  { %v11259_v12 = vsub.f32 1.0, %v20446_v4  ;;  %v11261_v24 = vmul.f32 %v20446_v4, %v23470_v51 }
0x1796   :  { %v20448_v58 = vpop.eup %20447 }
0x1797   :  { %v11260_v33 = vmul.f32 %v20448_v58, %v11259_v12  ;;  %v23823_v58 = vld [vmem:[%s24771_s8 + $0x3] ss:$0 sm:$0xff] }
0x1799   :  { %v23606_v37 = vadd.f32 %v11261_v24, %v11260_v33 }
0x179b   :  { %19554 = vmatmul.mubr.msk.f32.vlgmr.msra.gmra.mxu0 %vm831_vm12, %v23606_v37  ;;  %19572 = vmatmul.mubr.msk.f32.vlgmr.msra.gmra.mxu1 %vm831_vm12, %v23606_v37 }
0x179c   :  { %19557 = vmatpush3.msra.mxu0 %v23343_v29  ;;  %19575 = vmatpush3.msra.mxu1 %v23480_v42  ;;  %v23633_v29 = vld [vmem:[%s24768_s5 + $0x38] sm:$0xff]  ;;  %v23672_v42 = vld [vmem:[%s24790_s0 + $0x70] sm:$0xff] }
0x179d   :  { %19558 = vmatprep.subr.mxu0 %v20714_v6  ;;  %19576 = vmatprep.subr.mxu1 %v20714_v6 }
0x179e   :  { %19559 = vmatpush3.msra.mxu0 %v23352_v53  ;;  %19577 = vmatpush3.msra.mxu1 %v23489_v55  ;;  %v23646_v53 = vld [vmem:[%s24768_s5 + $0x30] sm:$0xff] }
0x179f   :  { %19560 = vmatprep.subr.mxu0 %v20714_v6  ;;  %19578 = vmatprep.subr.mxu1 %v20714_v6  ;;  %v23681_v55 = vld [vmem:[%s24766_s3 + $0x70] sm:$0xff] }
0x17a0   :  { %19561 = vmatpush3.msra.mxu0 %v23361_v22  ;;  %19579 = vmatpush3.msra.mxu1 %v23498_v15  ;;  %v23656_v22 = vld [vmem:[%s24790_s0 + $0x78] sm:$0xff]  ;;  %v23686_v15 = vld [vmem:[%s24790_s0 + $0x68] sm:$0xff] }
0x17a1   :  { %19562 = vmatprep.subr.mxu0 %v20714_v6  ;;  %19580 = vmatprep.subr.mxu1 %v20714_v6 }
0x17a2   :  { %19563 = vmatpush3.msra.mxu0 %v23370_v11  ;;  %19564 = vmatprep.mubr.msk.f32.mxu0 %vm20715_vm1, %v20714_v6  ;;  %v23667_v11 = vld [vmem:[%s24766_s3 + $0x78] sm:$0xff] }
0x17a3   :  { %19581 = vmatpush3.msra.mxu1 %v23509_v16  ;;  %19582 = vmatprep.mubr.msk.f32.mxu1 %vm20715_vm1, %v20714_v6  ;;  %v23695_v16 = vld [vmem:[%s24766_s3 + $0x68] sm:$0xff] }
0x17a4   :  { %19565 = vmatmul.mubr.msk.f32.vlgmr.msra.gmra.mxu0 %vm757_vm11, %v23554_v7  ;;  %19583 = vmatmul.mubr.msk.f32.vlgmr.msra.gmra.mxu1 %vm757_vm11, %v23554_v7 }
0x17a5   :  { %19585 = vmatprep.subr.mxu0 %v20714_v6  ;;  %19603 = vmatprep.subr.mxu1 %v20714_v6 }
0x17a6   :  { %19586 = vmatpush3.msra.mxu0 %v23524_v21  ;;  %19604 = vmatpush3.msra.mxu1 %v23633_v29  ;;  %v23700_v21 = vld [vmem:[%s24790_s0 + $0x60] sm:$0xff] }
0x17a7   :  { %19587 = vmatprep.subr.mxu0 %v20714_v6  ;;  %19605 = vmatprep.subr.mxu1 %v20714_v6 }
0x17a8   :  { %19588 = vmatpush3.msra.mxu0 %v23533_v0  ;;  %19589 = vmatprep.mubr.msk.f32.mxu0 %vm20715_vm1, %v20714_v6  ;;  %v23709_v0 = vld [vmem:[%s24766_s3 + $0x60] sm:$0xff] }
0x17a9   :  { %19606 = vmatpush3.msra.mxu1 %v23646_v53  ;;  %19590 = vmatmul.mubr.msk.f32.vlgmr.msra.gmra.mxu0 %vm831_vm12, %v23606_v37 }
0x17aa   :  { %19592 = vmatprep.subr.mxu0 %v20714_v6  ;;  %19607 = vmatprep.mubr.msk.f32.mxu1 %vm20715_vm1, %v20714_v6 }
0x17ab   :  { %19610 = vmatprep.subr.mxu1 %v20714_v6  ;;  %19593 = vmatpush3.msra.mxu0 %v23656_v22 }
0x17ac   :  { %19608 = vmatmul.mubr.f32.vlgmr.msra.gmra.mxu1 %v20714_v6  ;;  %19594 = vmatprep.subr.mxu0 %v20714_v6 }
0x17ad   :  { %19611 = vmatpush3.msra.mxu1 %v23667_v11  ;;  %19595 = vmatpush3.msra.mxu0 %v23672_v42 }
0x17ae   :  { %19612 = vmatprep.subr.mxu1 %v20714_v6  ;;  %19596 = vmatprep.subr.mxu0 %v20714_v6 }
0x17af   :  { %19613 = vmatpush3.msra.mxu1 %v23681_v55  ;;  %19597 = vmatpush3.msra.mxu0 %v23686_v15 }
0x17b0   :  { %19614 = vmatprep.subr.mxu1 %v20714_v6  ;;  %19598 = vmatprep.subr.mxu0 %v20714_v6 }
0x17b1   :  { %19615 = vmatpush3.msra.mxu1 %v23695_v16  ;;  %19599 = vmatpush3.msra.mxu0 %v23700_v21 }
0x17b2   :  { %19616 = vmatprep.subr.mxu1 %v20714_v6  ;;  %19600 = vmatprep.mubr.msk.f32.mxu0 %vm20715_vm1, %v20714_v6 }
0x17b3   :  { %19617 = vmatpush3.msra.mxu1 %v23709_v0  ;;  %19618 = vmatprep.mubr.msk.f32.mxu1 %vm20715_vm1, %v20714_v6 }
0x17b4   :  { %19601 = vmatmul.mubr.msk.f32.vlgmr.msra.gmra.mxu0 %vm757_vm11, %v23554_v7  ;;  %19619 = vmatmul.mubr.msk.f32.vlgmr.msra.gmra.mxu1 %vm757_vm11, %v23554_v7 }
0x17b5   :  { %19621 = vmatprep.subr.mxu0 %v20714_v6  ;;  %19639 = vmatprep.subr.mxu1 %v20714_v6 }
0x17b6   :  { %19622 = vmatpush3.msra.mxu0 %v23722_v1  ;;  %19640 = vmatpush3.msra.mxu1 %v23727_v62 }
0x17b7   :  { %19623 = vmatprep.subr.mxu0 %v20714_v6  ;;  %19641 = vmatprep.subr.mxu1 %v20714_v6 }
0x17b8   :  { %19624 = vmatpush3.msra.mxu0 %v23738_v52  ;;  %19625 = vmatprep.mubr.msk.f32.mxu0 %vm20715_vm1, %v20714_v6 }
0x17b9   :  { %19642 = vmatpush3.msra.mxu1 %v23745_v36  ;;  %19626 = vmatmul.mubr.f32.vlgmr.msra.gmra.mxu0 %v20714_v6 }
0x17ba   :  { %19628 = vmatprep.subr.mxu0 %v20714_v6  ;;  %19643 = vmatprep.mubr.msk.f32.mxu1 %vm20715_vm1, %v20714_v6 }
0x17bb   :  { %19646 = vmatprep.subr.mxu1 %v20714_v6  ;;  %19629 = vmatpush3.msra.mxu0 %v23755_v28 }
0x17bc   :  { %19644 = vmatmul.mubr.f32.vlgmr.msra.gmra.mxu1 %v20714_v6  ;;  %19630 = vmatprep.subr.mxu0 %v20714_v6 }
0x17bd   :  { %19647 = vmatpush3.msra.mxu1 %v23656_v22  ;;  %19631 = vmatpush3.msra.mxu0 %v23765_v41 }
0x17be   :  { %19648 = vmatprep.subr.mxu1 %v20714_v6  ;;  %19632 = vmatprep.subr.mxu0 %v20714_v6 }
0x17bf   :  { %19649 = vmatpush3.msra.mxu1 %v23672_v42  ;;  %19633 = vmatpush3.msra.mxu0 %v23774_v60 }
0x17c0   :  { %19650 = vmatprep.subr.mxu1 %v20714_v6  ;;  %19634 = vmatprep.subr.mxu0 %v20714_v6 }
0x17c1   :  { %19651 = vmatpush3.msra.mxu1 %v23686_v15  ;;  %19635 = vmatpush3.msra.mxu0 %v23783_v57 }
0x17c2   :  { %19652 = vmatprep.subr.mxu1 %v20714_v6  ;;  %19636 = vmatprep.mubr.msk.f32.mxu0 %vm20715_vm1, %v20714_v6 }
0x17c3   :  { %19653 = vmatpush3.msra.mxu1 %v23700_v21  ;;  %19654 = vmatprep.mubr.msk.f32.mxu1 %vm20715_vm1, %v20714_v6 }
0x17c4   :  { %19637 = vmatmul.mubr.msk.f32.vlgmr.msra.gmra.mxu0 %vm757_vm11, %v23554_v7  ;;  %19655 = vmatmul.mubr.msk.f32.vlgmr.msra.gmra.mxu1 %vm757_vm11, %v23433_v23  ;;  %v11333_v7 = vadd.f32 %v23569_v32, %v23591_v38 }
0x17c5   :  { %19657 = vmatprep.subr.mxu0 %v20714_v6  ;;  %19675 = vmatprep.subr.mxu1 %v20714_v6 }
0x17c6   :  { %19658 = vmatpush3.msra.mxu0 %v23633_v29  ;;  %19676 = vmatpush3.msra.mxu1 %v23722_v1 }
0x17c7   :  { %19659 = vmatprep.subr.mxu0 %v20714_v6  ;;  %19677 = vmatprep.subr.mxu1 %v20714_v6 }
0x17c8   :  { %19660 = vmatpush3.msra.mxu0 %v23646_v53  ;;  %19678 = vmatpush3.msra.mxu1 %v23738_v52 }
0x17c9   :  { %19661 = vmatprep.mubr.msk.f32.mxu0 %vm20715_vm1, %v20714_v6  ;;  %19664 = vmatprep.subr.mxu0 %v20714_v6 }
0x17ca   :  { %19679 = vmatprep.mubr.msk.f32.mxu1 %vm20715_vm1, %v20714_v6  ;;  %19682 = vmatprep.subr.mxu1 %v20714_v6 }
0x185b   :  { %v11405_v46 = vpop.f32.mrf.mxu0  ;;  %v11553_v3 = vpop.f32.mrf.mxu1 }
0x185c   :  { %v11409_v54 = vadd.f32 %v11405_v46, %v11333_v7  ;;  %v23834_v7 = vld [vmem:[%s24774_s11 + $0x3] ss:$0 sm:$0xff] }
0x185d   :  { %v19555_v10 = vpop.f32.mrf.mxu0  ;;  %v19573_v9 = vpop.f32.mrf.mxu1 }
0x185e   :  { %v11410_v2 = vadd.f32 %v23576_v19, %v11409_v54 }
0x1860   :  { %v11411_v14 = vsub.f32 0.0, %v11410_v2 }
0x1862   :  { %v11412_v20 = vmul.f32 1.442695, %v11411_v14 }
0x1864   :  { %20449 = vpow2.f32 %v11412_v20  ;;  %v11483_v34 = vpop.f32.mrf.mxu0  ;;  %v11631_v27 = vpop.f32.mrf.mxu1 }
0x1865   :  { %v11484_v31 = vadd.f32 %v23582_v18, %v11483_v34  ;;  %v23841_v34 = vld [vmem:[%s24775_s12 + $0x3] ss:$0 sm:$0xff] }
0x1866   :  { %v19566_v50 = vpop.f32.mrf.mxu0  ;;  %v19584_v25 = vpop.f32.mrf.mxu1 }
0x1867   :  { %v11557_v8 = vadd.f32 %v11553_v3, %v11484_v31 }
0x1869   :  { %v11558_v43 = vadd.f32 %v23588_v30, %v11557_v8  ;;  %v11701_v32 = vpop.f32.mrf.mxu0  ;;  %v23829_v30 = vld [vmem:[%s24772_s9 + $0x3] ss:$0 sm:$0xff] }
0x186b   :  { %v11559_v38 = vsub.f32 0.0, %v11558_v43  ;;  %v19591_v35 = vpop.f32.mrf.mxu0 }
0x186c   :  { %v11890_v63 = vpop.f32.mrf.mxu1 }
0x186d   :  { %v11560_v26 = vmul.f32 1.442695, %v11559_v38 }
0x186e   :  { %v19609_v4 = vpop.f32.mrf.mxu1 }
0x186f   :  { %20451 = vpow2.f32 %v11560_v26  ;;  %v11632_v4 = vadd.f32 %v23602_v45, %v11631_v27 }
0x1871   :  { %v20450_v19 = vpop.eup %20449 }
0x1872   :  { %v11414_v12 = vadd.f32 1.0, %v20450_v19 }
0x1874   :  { %20453 = vrcp.f32 %v11414_v12  ;;  %v11820_v18 = vpop.f32.mrf.mxu0  ;;  %v11980_v33 = vpop.f32.mrf.mxu1 }
0x1875   :  { %v11821_v24 = vadd.f32 %v23823_v58, %v11820_v18  ;;  %v11981_v10 = vadd.f32 %v23829_v30, %v11980_v33 }
0x1876   :  { %v19602_v46 = vpop.f32.mrf.mxu0  ;;  %v19620_v3 = vpop.f32.mrf.mxu1 }
0x1877   :  { %v11894_v54 = vadd.f32 %v11890_v63, %v11821_v24  ;;  %v11702_v63 = vadd.f32 %v23596_v40, %v11701_v32 }
0x1879   :  { %v11901_v9 = vadd.f32 %v23834_v7, %v11894_v54  ;;  %v12050_v2 = vpop.f32.mrf.mxu0 }
0x187a   :  { %v12054_v14 = vadd.f32 %v12050_v2, %v11981_v10 }
0x187b   :  { %v11902_v20 = vsub.f32 0.0, %v11901_v9  ;;  %v19627_v31 = vpop.f32.mrf.mxu0 }
0x187c   :  { %v20452_v50 = vpop.eup %20451  ;;  %v12216_v25 = vpop.f32.mrf.mxu1  ;;  %v12061_v38 = vadd.f32 %v23841_v34, %v12054_v14  ;;  %v23854_v31 = vld [vmem:[%s24776_s13 + $0x3] ss:$0 sm:$0xff] }
0x187d   :  { %v11903_v8 = vmul.f32 1.442695, %v11902_v20  ;;  %v11562_v43 = vadd.f32 1.0, %v20452_v50 }
0x187e   :  { %v19645_v35 = vpop.f32.mrf.mxu1  ;;  %v12062_v12 = vsub.f32 0.0, %v12061_v38 }
0x187f   :  { %20455 = vpow2.f32 %v11903_v8  ;;  %v12217_v8 = vadd.f32 %v23854_v31, %v12216_v25 }
0x1880   :  { %20457 = vrcp.f32 %v11562_v43  ;;  %v12063_v46 = vmul.f32 1.442695, %v12062_v12  ;;  %v23860_v43 = vld [vmem:[%s24773_s10 + $0x3] ss:$0 sm:$0xff] }
0x1881   :  { %v20454_v26 = vpop.eup %20453 }
0x1882   :  { %v11705_v19 = vmul.f32 %v20454_v26, %v11702_v63 }
0x1884   :  { %v11706_v18 = vadd.f32 %v11705_v19, %v11632_v4  ;;  %v12140_v33 = vpop.f32.mrf.mxu0  ;;  %v23846_v24 = vpop.f32.mrf.mxu1 }
0x1885   :  { %v12141_v63 = vadd.f32 %v23860_v43, %v12140_v33 }
0x1886   :  { %20459 = vtanh.f32 %v11706_v18  ;;  %v19638_v3 = vpop.f32.mrf.mxu0  ;;  %v19656_v54 = vpop.f32.mrf.mxu1 }
0x1887   :  { %20461 = vpow2.f32 %v12063_v46 }
0x188c   :  { %v20456_v10 = vpop.eup %20455 }
0x188d   :  { %v11905_v9 = vadd.f32 1.0, %v20456_v10  ;;  %v20458_v2 = vpop.eup %20457 }
0x188e   :  { %v11708_v40 = vsub.f32 1.0, %v20458_v2  ;;  %v11710_v45 = vmul.f32 %v20458_v2, %v23606_v37 }
0x188f   :  { %20463 = vrcp.f32 %v11905_v9 }
0x1893   :  { %v20460_v32 = vpop.eup %20459 }
0x1894   :  { %v11709_v14 = vmul.f32 %v20460_v32, %v11708_v40  ;;  %v20462_v20 = vpop.eup %20461 }
0x1895   :  { %v12065_v50 = vadd.f32 1.0, %v20462_v20 }
0x1896   :  { %v23849_v27 = vadd.f32 %v11710_v45, %v11709_v14 }
0x1897   :  { %20465 = vrcp.f32 %v12065_v50 }
0x189c   :  { %v20464_v38 = vpop.eup %20463 }
0x189d   :  { %v12220_v35 = vmul.f32 %v20464_v38, %v12217_v8 }
0x189f   :  { %v12221_v26 = vadd.f32 %v12220_v35, %v12141_v63 }
0x18a1   :  { %20467 = vtanh.f32 %v12221_v26 }
0x18a4   :  { %v20466_v4 = vpop.eup %20465 }
0x18a5   :  { %v12223_v19 = vsub.f32 1.0, %v20466_v4  ;;  %v12225_v46 = vmul.f32 0.0, %v20466_v4 }
0x18ae   :  { %v20468_v12 = vpop.eup %20467 }
0x18af   :  { %v12224_v18 = vmul.f32 %v20468_v12, %v12223_v19 }
0x18b1   :  { %v23863_v3 = vadd.f32 %v12225_v46, %v12224_v18 }
0x18b3   :  { %19662 = vmatmul.mubr.msk.f32.vlgmr.msra.gmra.mxu0 %vm831_vm12, %v23863_v3  ;;  %19680 = vmatmul.mubr.msk.f32.vlgmr.msra.gmra.mxu1 %vm831_vm12, %v23863_v3 }
0x18b4   :  { %19665 = vmatpush3.msra.mxu0 %v23667_v11  ;;  %19683 = vmatpush3.msra.mxu1 %v23755_v28 }
0x18b5   :  { %19666 = vmatprep.subr.mxu0 %v20714_v6  ;;  %19684 = vmatprep.subr.mxu1 %v20714_v6 }
0x18b6   :  { %19667 = vmatpush3.msra.mxu0 %v23681_v55  ;;  %19685 = vmatpush3.msra.mxu1 %v23765_v41 }
0x18b7   :  { %19668 = vmatprep.subr.mxu0 %v20714_v6  ;;  %19686 = vmatprep.subr.mxu1 %v20714_v6 }
0x18b8   :  { %19669 = vmatpush3.msra.mxu0 %v23695_v16  ;;  %19687 = vmatpush3.msra.mxu1 %v23774_v60 }
0x18b9   :  { %19670 = vmatprep.subr.mxu0 %v20714_v6  ;;  %19688 = vmatprep.subr.mxu1 %v20714_v6 }
0x18ba   :  { %19671 = vmatpush3.msra.mxu0 %v23709_v0  ;;  %19672 = vmatprep.mubr.msk.f32.mxu0 %vm20715_vm1, %v20714_v6 }
0x18bb   :  { %19689 = vmatpush3.msra.mxu1 %v23783_v57  ;;  %19690 = vmatprep.mubr.msk.f32.mxu1 %vm20715_vm1, %v20714_v6 }
0x18bc   :  { %19673 = vmatmul.mubr.msk.f32.vlgmr.msra.gmra.mxu0 %vm757_vm11, %v23433_v23  ;;  %19691 = vmatmul.mubr.msk.f32.vlgmr.msra.gmra.mxu1 %vm757_vm11, %v23433_v23  ;;  %v12294_v23 = vadd.f32 %v23823_v58, %v23846_v24 }
0x18bd   :  { %19693 = vmatprep.subr.mxu0 %v20714_v6  ;;  %19697 = vmatprep.mubr.msk.f32.mxu0 %vm20715_vm1, %v20714_v6 }
0x18be   :  { %19694 = vmatpush3.msra.mxu0 %v23727_v62  ;;  %19711 = vmatprep.subr.mxu1 %v20714_v6 }
0x18bf   :  { %19695 = vmatprep.subr.mxu0 %v20714_v6  ;;  %19712 = vmatpush3.msra.mxu1 %v23633_v29 }
0x18c0   :  { %19696 = vmatpush3.msra.mxu0 %v23745_v36  ;;  %19713 = vmatprep.subr.mxu1 %v20714_v6 }
0x18c1   :  { %19698 = vmatmul.mubr.msk.f32.vlgmr.msra.gmra.mxu0 %vm831_vm12, %v23863_v3  ;;  %19700 = vmatprep.subr.mxu0 %v20714_v6 }
0x18c2   :  { %19701 = vmatpush3.msra.mxu0 %v23656_v22  ;;  %19708 = vmatprep.mubr.msk.f32.mxu0 %vm20715_vm1, %v20714_v6 }
0x18c3   :  { %19702 = vmatprep.subr.mxu0 %v20714_v6  ;;  %19714 = vmatpush3.msra.mxu1 %v23646_v53 }
0x18c4   :  { %19703 = vmatpush3.msra.mxu0 %v23672_v42  ;;  %19715 = vmatprep.mubr.msk.f32.mxu1 %vm20715_vm1, %v20714_v6 }
0x18c5   :  { %19704 = vmatprep.subr.mxu0 %v20714_v6  ;;  %19718 = vmatprep.subr.mxu1 %v20714_v6 }
0x18c6   :  { %19705 = vmatpush3.msra.mxu0 %v23686_v15 }
0x18c7   :  { %19706 = vmatprep.subr.mxu0 %v20714_v6 }
0x18c8   :  { %19707 = vmatpush3.msra.mxu0 %v23700_v21 }
0x18c9   :  { %19709 = vmatmul.mubr.msk.f32.vlgmr.msra.gmra.mxu0 %vm757_vm11, %v23312_v5  ;;  %19729 = vmatprep.subr.mxu0 %v20714_v6 }
0x18ca   :  { %19730 = vmatpush3.msra.mxu0 %v23722_v1  ;;  %19733 = vmatprep.mubr.msk.f32.mxu0 %vm20715_vm1, %v20714_v6 }
0x18cb   :  { %19731 = vmatprep.subr.mxu0 %v20714_v6 }
0x18cc   :  { %19732 = vmatpush3.msra.mxu0 %v23738_v52 }
0x18cd   :  { %19736 = vmatprep.subr.mxu0 %v20714_v6 }
0x1973   :  { %v12366_v25 = vpop.f32.mrf.mxu0  ;;  %v12514_v33 = vpop.f32.mrf.mxu1 }
0x1974   :  { %v12370_v54 = vadd.f32 %v12366_v25, %v12294_v23 }
0x1975   :  { %v19663_v10 = vpop.f32.mrf.mxu0  ;;  %v19681_v9 = vpop.f32.mrf.mxu1 }
0x1976   :  { %v12371_v2 = vadd.f32 %v23834_v7, %v12370_v54 }
0x1978   :  { %v12372_v40 = vsub.f32 0.0, %v12371_v2 }
0x197a   :  { %v12373_v32 = vmul.f32 1.442695, %v12372_v40 }
0x197c   :  { %20469 = vpow2.f32 %v12373_v32  ;;  %v12444_v14 = vpop.f32.mrf.mxu0  ;;  %v12592_v45 = vpop.f32.mrf.mxu1 }
0x197d   :  { %v12445_v20 = vadd.f32 %v23829_v30, %v12444_v14 }
0x197e   :  { %v19674_v50 = vpop.f32.mrf.mxu0  ;;  %v19692_v8 = vpop.f32.mrf.mxu1 }
0x197f   :  { %v12518_v38 = vadd.f32 %v12514_v33, %v12445_v20  ;;  %v12593_v33 = vadd.f32 %v23860_v43, %v12592_v45 }
0x1981   :  { %v12519_v35 = vadd.f32 %v23841_v34, %v12518_v38  ;;  %v12662_v24 = vpop.f32.mrf.mxu0 }
0x1982   :  { %v12663_v54 = vadd.f32 %v23854_v31, %v12662_v24 }
0x1983   :  { %v12520_v63 = vsub.f32 0.0, %v12519_v35  ;;  %v19699_v26 = vpop.f32.mrf.mxu0 }
0x1985   :  { %v12521_v4 = vmul.f32 1.442695, %v12520_v63 }
0x1987   :  { %20471 = vpow2.f32 %v12521_v4 }
0x1989   :  { %v20470_v19 = vpop.eup %20469  ;;  %v23930_v12 = vpop.f32.mrf.mxu0 }
0x198a   :  { %v12375_v18 = vadd.f32 1.0, %v20470_v19 }
0x198b   :  { %v19710_v46 = vpop.f32.mrf.mxu0 }
0x198c   :  { %20473 = vrcp.f32 %v12375_v18 }
0x1994   :  { %v20472_v23 = vpop.eup %20471 }
0x1995   :  { %v12523_v25 = vadd.f32 1.0, %v20472_v23 }
0x1997   :  { %20475 = vrcp.f32 %v12523_v25 }
0x1999   :  { %v20474_v10 = vpop.eup %20473 }
0x199a   :  { %v12666_v9 = vmul.f32 %v20474_v10, %v12663_v54 }
0x199c   :  { %v12667_v2 = vadd.f32 %v12666_v9, %v12593_v33 }
0x199e   :  { %20477 = vtanh.f32 %v12667_v2 }
0x19a4   :  { %v20476_v40 = vpop.eup %20475 }
0x19a5   :  { %v12669_v32 = vsub.f32 1.0, %v20476_v40  ;;  %v12671_v50 = vmul.f32 %v20476_v40, %v23863_v3 }
0x19ab   :  { %v20478_v14 = vpop.eup %20477 }
0x19ac   :  { %v12670_v20 = vmul.f32 %v20478_v14, %v12669_v32 }
0x19ae   :  { %v23935_v8 = vadd.f32 %v12671_v50, %v12670_v20 }
0x19b0   :  { %19716 = vmatmul.mubr.msk.f32.vlgmr.msra.gmra.mxu1 %vm831_vm12, %v23935_v8  ;;  %19734 = vmatmul.mubr.msk.f32.vlgmr.msra.gmra.mxu0 %vm831_vm12, %v23935_v8 }
0x19b1   :  { %19719 = vmatpush3.msra.mxu1 %v23667_v11  ;;  %19737 = vmatpush3.msra.mxu0 %v23755_v28 }
0x19b2   :  { %19720 = vmatprep.subr.mxu1 %v20714_v6  ;;  %19738 = vmatprep.subr.mxu0 %v20714_v6 }
0x19b3   :  { %19721 = vmatpush3.msra.mxu1 %v23681_v55  ;;  %19739 = vmatpush3.msra.mxu0 %v23765_v41 }
0x19b4   :  { %19722 = vmatprep.subr.mxu1 %v20714_v6  ;;  %19740 = vmatprep.subr.mxu0 %v20714_v6 }
0x19b5   :  { %19723 = vmatpush3.msra.mxu1 %v23695_v16  ;;  %19741 = vmatpush3.msra.mxu0 %v23774_v60 }
0x19b6   :  { %19724 = vmatprep.subr.mxu1 %v20714_v6  ;;  %19742 = vmatprep.subr.mxu0 %v20714_v6 }
0x19b7   :  { %19725 = vmatpush3.msra.mxu1 %v23709_v0  ;;  %19726 = vmatprep.mubr.msk.f32.mxu1 %vm20715_vm1, %v20714_v6 }
0x19b8   :  { %19743 = vmatpush3.msra.mxu0 %v23783_v57  ;;  %19744 = vmatprep.mubr.msk.f32.mxu0 %vm20715_vm1, %v20714_v6 }
0x19b9   :  { %19727 = vmatmul.mubr.msk.f32.vlgmr.msra.gmra.mxu1 %vm757_vm11, %v23312_v5  ;;  %19745 = vmatmul.mubr.msk.f32.vlgmr.msra.gmra.mxu0 %vm757_vm11, %v23312_v5  ;;  %v12740_v5 = vadd.f32 %v23823_v58, %v23930_v12 }
0x19ba   :  { %19747 = vmatprep.subr.mxu1 %v20714_v6  ;;  %19751 = vmatprep.mubr.msk.f32.mxu1 %vm20715_vm1, %v20714_v6 }
0x19bb   :  { %19748 = vmatpush3.msra.mxu1 %v23727_v62  ;;  %19765 = vmatprep.subr.mxu0 %v20714_v6 }
0x19bc   :  { %19749 = vmatprep.subr.mxu1 %v20714_v6  ;;  %19766 = vmatpush3.msra.mxu0 %v23633_v29 }
0x19bd   :  { %19750 = vmatpush3.msra.mxu1 %v23745_v36  ;;  %19767 = vmatprep.subr.mxu0 %v20714_v6 }
0x19be   :  { %19752 = vmatmul.mubr.msk.f32.vlgmr.msra.gmra.mxu1 %vm831_vm12, %v23935_v8  ;;  %19754 = vmatprep.subr.mxu1 %v20714_v6 }
0x19bf   :  { %19755 = vmatpush3.msra.mxu1 %v23656_v22  ;;  %19762 = vmatprep.mubr.msk.f32.mxu1 %vm20715_vm1, %v20714_v6 }
0x19c0   :  { %19756 = vmatprep.subr.mxu1 %v20714_v6  ;;  %19768 = vmatpush3.msra.mxu0 %v23646_v53 }
0x19c1   :  { %19757 = vmatpush3.msra.mxu1 %v23672_v42  ;;  %19769 = vmatprep.mubr.msk.f32.mxu0 %vm20715_vm1, %v20714_v6 }
0x19c2   :  { %19758 = vmatprep.subr.mxu1 %v20714_v6  ;;  %19772 = vmatprep.subr.mxu0 %v20714_v6 }
0x19c3   :  { %19759 = vmatpush3.msra.mxu1 %v23686_v15 }
0x19c4   :  { %19760 = vmatprep.subr.mxu1 %v20714_v6 }
0x19c5   :  { %19761 = vmatpush3.msra.mxu1 %v23700_v21 }
0x19c6   :  { %19763 = vmatmul.mubr.msk.f32.vlgmr.msra.gmra.mxu1 %vm757_vm11, %v23236_v47  ;;  %19783 = vmatprep.subr.mxu1 %v20714_v6 }
0x19c7   :  { %19784 = vmatpush3.msra.mxu1 %v23722_v1  ;;  %19787 = vmatprep.mubr.msk.f32.mxu1 %vm20715_vm1, %v20714_v6 }
0x19c8   :  { %19785 = vmatprep.subr.mxu1 %v20714_v6 }
0x19c9   :  { %19786 = vmatpush3.msra.mxu1 %v23738_v52 }
0x19ca   :  { %19790 = vmatprep.subr.mxu1 %v20714_v6 }
0x1a70   :  { %v12812_v45 = vpop.f32.mrf.mxu1  ;;  %v12960_v38 = vpop.f32.mrf.mxu0 }
0x1a71   :  { %v12816_v35 = vadd.f32 %v12812_v45, %v12740_v5 }
0x1a72   :  { %v19717_v24 = vpop.f32.mrf.mxu1  ;;  %v19735_v63 = vpop.f32.mrf.mxu0 }
0x1a73   :  { %v12817_v26 = vadd.f32 %v23834_v7, %v12816_v35 }
0x1a75   :  { %v12818_v4 = vsub.f32 0.0, %v12817_v26 }
0x1a77   :  { %v12819_v19 = vmul.f32 1.442695, %v12818_v4 }
0x1a79   :  { %20479 = vpow2.f32 %v12819_v19  ;;  %v12890_v18 = vpop.f32.mrf.mxu1  ;;  %v13038_v46 = vpop.f32.mrf.mxu0 }
0x1a7a   :  { %v12891_v23 = vadd.f32 %v23829_v30, %v12890_v18 }
0x1a7b   :  { %v19728_v25 = vpop.f32.mrf.mxu1  ;;  %v19746_v54 = vpop.f32.mrf.mxu0 }
0x1a7c   :  { %v12964_v10 = vadd.f32 %v12960_v38, %v12891_v23  ;;  %v13039_v38 = vadd.f32 %v23860_v43, %v13038_v46 }
0x1a7e   :  { %v12965_v33 = vadd.f32 %v23841_v34, %v12964_v10  ;;  %v13108_v12 = vpop.f32.mrf.mxu1 }
0x1a7f   :  { %v13109_v35 = vadd.f32 %v23854_v31, %v13108_v12 }
0x1a80   :  { %v12966_v9 = vsub.f32 0.0, %v12965_v33  ;;  %v19753_v2 = vpop.f32.mrf.mxu1 }
0x1a82   :  { %v12967_v40 = vmul.f32 1.442695, %v12966_v9 }
0x1a84   :  { %20481 = vpow2.f32 %v12967_v40 }
0x1a86   :  { %v20480_v32 = vpop.eup %20479  ;;  %v24002_v14 = vpop.f32.mrf.mxu1 }
0x1a87   :  { %v12821_v20 = vadd.f32 1.0, %v20480_v32 }
0x1a88   :  { %v19764_v50 = vpop.f32.mrf.mxu1 }
0x1a89   :  { %20483 = vrcp.f32 %v12821_v20 }
0x1a91   :  { %v20482_v5 = vpop.eup %20481 }
0x1a92   :  { %v12969_v45 = vadd.f32 1.0, %v20482_v5 }
0x1a94   :  { %20485 = vrcp.f32 %v12969_v45 }
0x1a96   :  { %v20484_v24 = vpop.eup %20483 }
0x1a97   :  { %v13112_v63 = vmul.f32 %v20484_v24, %v13109_v35 }
0x1a99   :  { %v13113_v26 = vadd.f32 %v13112_v63, %v13039_v38 }
0x1a9b   :  { %20487 = vtanh.f32 %v13113_v26 }
0x1aa1   :  { %v20486_v4 = vpop.eup %20485 }
0x1aa2   :  { %v13115_v19 = vsub.f32 1.0, %v20486_v4  ;;  %v13117_v25 = vmul.f32 %v20486_v4, %v23935_v8 }
0x1aa8   :  { %v20488_v18 = vpop.eup %20487 }
0x1aa9   :  { %v13116_v23 = vmul.f32 %v20488_v18, %v13115_v19 }
0x1aab   :  { %v24007_v54 = vadd.f32 %v13117_v25, %v13116_v23 }
0x1aad   :  { %19770 = vmatmul.mubr.msk.f32.vlgmr.msra.gmra.mxu0 %vm831_vm12, %v24007_v54  ;;  %19788 = vmatmul.mubr.msk.f32.vlgmr.msra.gmra.mxu1 %vm831_vm12, %v24007_v54 }
0x1aae   :  { %19773 = vmatpush3.msra.mxu0 %v23667_v11  ;;  %19791 = vmatpush3.msra.mxu1 %v23755_v28 }
0x1aaf   :  { %19774 = vmatprep.subr.mxu0 %v20714_v6  ;;  %19792 = vmatprep.subr.mxu1 %v20714_v6 }
0x1ab0   :  { %19775 = vmatpush3.msra.mxu0 %v23681_v55  ;;  %19793 = vmatpush3.msra.mxu1 %v23765_v41 }
0x1ab1   :  { %19776 = vmatprep.subr.mxu0 %v20714_v6  ;;  %19794 = vmatprep.subr.mxu1 %v20714_v6 }
0x1ab2   :  { %19777 = vmatpush3.msra.mxu0 %v23695_v16  ;;  %19795 = vmatpush3.msra.mxu1 %v23774_v60 }
0x1ab3   :  { %19778 = vmatprep.subr.mxu0 %v20714_v6  ;;  %19796 = vmatprep.subr.mxu1 %v20714_v6 }
0x1ab4   :  { %19779 = vmatpush3.msra.mxu0 %v23709_v0  ;;  %19780 = vmatprep.mubr.msk.f32.mxu0 %vm20715_vm1, %v20714_v6 }
0x1ab5   :  { %19797 = vmatpush3.msra.mxu1 %v23783_v57  ;;  %19798 = vmatprep.mubr.msk.f32.mxu1 %vm20715_vm1, %v20714_v6 }
0x1ab6   :  { %19781 = vmatmul.mubr.msk.f32.vlgmr.msra.gmra.mxu0 %vm757_vm11, %v23236_v47  ;;  %19799 = vmatmul.mubr.msk.f32.vlgmr.msra.gmra.mxu1 %vm757_vm11, %v23236_v47  ;;  %v13186_v47 = vadd.f32 %v23823_v58, %v24002_v14 }
0x1ab7   :  { %19801 = vmatprep.subr.mxu0 %v20714_v6  ;;  %19805 = vmatprep.mubr.msk.f32.mxu0 %vm20715_vm1, %v20714_v6 }
0x1ab8   :  { %19802 = vmatpush3.msra.mxu0 %v23727_v62  ;;  %19819 = vmatprep.subr.mxu1 %v20714_v6 }
0x1ab9   :  { %19803 = vmatprep.subr.mxu0 %v20714_v6  ;;  %19820 = vmatpush3.msra.mxu1 %v23633_v29 }
0x1aba   :  { %19804 = vmatpush3.msra.mxu0 %v23745_v36  ;;  %19821 = vmatprep.subr.mxu1 %v20714_v6 }
0x1abb   :  { %19806 = vmatmul.mubr.msk.f32.vlgmr.msra.gmra.mxu0 %vm831_vm12, %v24007_v54  ;;  %19808 = vmatprep.subr.mxu0 %v20714_v6 }
0x1abc   :  { %19809 = vmatpush3.msra.mxu0 %v23656_v22  ;;  %19816 = vmatprep.mubr.msk.f32.mxu0 %vm20715_vm1, %v20714_v6 }
0x1abd   :  { %19810 = vmatprep.subr.mxu0 %v20714_v6  ;;  %19822 = vmatpush3.msra.mxu1 %v23646_v53 }
0x1abe   :  { %19811 = vmatpush3.msra.mxu0 %v23672_v42  ;;  %19823 = vmatprep.mubr.msk.f32.mxu1 %vm20715_vm1, %v20714_v6 }
0x1abf   :  { %19812 = vmatprep.subr.mxu0 %v20714_v6  ;;  %19826 = vmatprep.subr.mxu1 %v20714_v6 }
0x1ac0   :  { %19813 = vmatpush3.msra.mxu0 %v23686_v15 }
0x1ac1   :  { %19814 = vmatprep.subr.mxu0 %v20714_v6 }
0x1ac2   :  { %19815 = vmatpush3.msra.mxu0 %v23700_v21 }
0x1ac3   :  { %19817 = vmatmul.mubr.msk.f32.vlgmr.msra.gmra.mxu0 %vm757_vm11, %v23160_v61  ;;  %19837 = vmatprep.subr.mxu0 %v20714_v6 }
0x1ac4   :  { %19838 = vmatpush3.msra.mxu0 %v23722_v1  ;;  %19841 = vmatprep.mubr.msk.f32.mxu0 %vm20715_vm1, %v20714_v6 }
0x1ac5   :  { %19839 = vmatprep.subr.mxu0 %v20714_v6 }
0x1ac6   :  { %19840 = vmatpush3.msra.mxu0 %v23738_v52 }
0x1ac7   :  { %19844 = vmatprep.subr.mxu0 %v20714_v6 }
0x1b6d   :  { %v13258_v46 = vpop.f32.mrf.mxu0  ;;  %v13406_v10 = vpop.f32.mrf.mxu1 }
0x1b6e   :  { %v13262_v33 = vadd.f32 %v13258_v46, %v13186_v47 }
0x1b6f   :  { %v19771_v12 = vpop.f32.mrf.mxu0  ;;  %v19789_v9 = vpop.f32.mrf.mxu1 }
0x1b70   :  { %v13263_v2 = vadd.f32 %v23834_v7, %v13262_v33 }
0x1b72   :  { %v13264_v40 = vsub.f32 0.0, %v13263_v2 }
0x1b74   :  { %v13265_v32 = vmul.f32 1.442695, %v13264_v40 }
0x1b76   :  { %20489 = vpow2.f32 %v13265_v32  ;;  %v13336_v20 = vpop.f32.mrf.mxu0  ;;  %v13484_v50 = vpop.f32.mrf.mxu1 }
0x1b77   :  { %v13337_v5 = vadd.f32 %v23829_v30, %v13336_v20 }
0x1b78   :  { %v19782_v45 = vpop.f32.mrf.mxu0  ;;  %v19800_v35 = vpop.f32.mrf.mxu1 }
0x1b79   :  { %v13410_v24 = vadd.f32 %v13406_v10, %v13337_v5  ;;  %v13485_v10 = vadd.f32 %v23860_v43, %v13484_v50 }
0x1b7b   :  { %v13411_v38 = vadd.f32 %v23841_v34, %v13410_v24  ;;  %v13554_v14 = vpop.f32.mrf.mxu0 }
0x1b7c   :  { %v13555_v33 = vadd.f32 %v23854_v31, %v13554_v14 }
0x1b7d   :  { %v13412_v63 = vsub.f32 0.0, %v13411_v38  ;;  %v19807_v26 = vpop.f32.mrf.mxu0 }
0x1b7f   :  { %v13413_v4 = vmul.f32 1.442695, %v13412_v63 }
0x1b81   :  { %20491 = vpow2.f32 %v13413_v4 }
0x1b83   :  { %v20490_v19 = vpop.eup %20489  ;;  %v24074_v18 = vpop.f32.mrf.mxu0 }
0x1b84   :  { %v13267_v23 = vadd.f32 1.0, %v20490_v19 }
0x1b85   :  { %v19818_v25 = vpop.f32.mrf.mxu0 }
0x1b86   :  { %20493 = vrcp.f32 %v13267_v23 }
0x1b8e   :  { %v20492_v47 = vpop.eup %20491 }
0x1b8f   :  { %v13415_v46 = vadd.f32 1.0, %v20492_v47 }
0x1b91   :  { %20495 = vrcp.f32 %v13415_v46 }
0x1b93   :  { %v20494_v12 = vpop.eup %20493 }
0x1b94   :  { %v13558_v9 = vmul.f32 %v20494_v12, %v13555_v33 }
0x1b96   :  { %v13559_v2 = vadd.f32 %v13558_v9, %v13485_v10 }
0x1b98   :  { %20497 = vtanh.f32 %v13559_v2 }
0x1b9e   :  { %v20496_v40 = vpop.eup %20495 }
0x1b9f   :  { %v13561_v32 = vsub.f32 1.0, %v20496_v40  ;;  %v13563_v45 = vmul.f32 %v20496_v40, %v24007_v54 }
0x1ba5   :  { %v20498_v20 = vpop.eup %20497 }
0x1ba6   :  { %v13562_v5 = vmul.f32 %v20498_v20, %v13561_v32 }
0x1ba8   :  { %v24079_v35 = vadd.f32 %v13563_v45, %v13562_v5  ;;  %v24160_v45 = vld [vmem:[%s24766_s3 + $0x78] sm:$0xff] }
0x1baa   :  { %19824 = vmatmul.mubr.msk.f32.vlgmr.msra.gmra.mxu1 %vm831_vm12, %v24079_v35  ;;  %19842 = vmatmul.mubr.msk.f32.vlgmr.msra.gmra.mxu0 %vm831_vm12, %v24079_v35 }
0x1bab   :  { %19827 = vmatpush3.msra.mxu1 %v23667_v11  ;;  %19845 = vmatpush3.msra.mxu0 %v23755_v28 }
0x1bac   :  { %19828 = vmatprep.subr.mxu1 %v20714_v6  ;;  %19846 = vmatprep.subr.mxu0 %v20714_v6 }
0x1bad   :  { %19829 = vmatpush3.msra.mxu1 %v23681_v55  ;;  %19847 = vmatpush3.msra.mxu0 %v23765_v41 }
0x1bae   :  { %19830 = vmatprep.subr.mxu1 %v20714_v6  ;;  %19848 = vmatprep.subr.mxu0 %v20714_v6 }
0x1baf   :  { %19831 = vmatpush3.msra.mxu1 %v23695_v16  ;;  %19849 = vmatpush3.msra.mxu0 %v23774_v60 }
0x1bb0   :  { %19832 = vmatprep.subr.mxu1 %v20714_v6  ;;  %19850 = vmatprep.subr.mxu0 %v20714_v6 }
0x1bb1   :  { %19833 = vmatpush3.msra.mxu1 %v23709_v0  ;;  %19834 = vmatprep.mubr.msk.f32.mxu1 %vm20715_vm1, %v20714_v6 }
0x1bb2   :  { %19851 = vmatpush3.msra.mxu0 %v23783_v57  ;;  %19852 = vmatprep.mubr.msk.f32.mxu0 %vm20715_vm1, %v20714_v6 }
0x1bb3   :  { %19835 = vmatmul.mubr.msk.f32.vlgmr.msra.gmra.mxu1 %vm757_vm11, %v23160_v61  ;;  %19853 = vmatmul.mubr.msk.f32.vlgmr.msra.gmra.mxu0 %vm757_vm11, %v23160_v61  ;;  %v13632_v61 = vadd.f32 %v23823_v58, %v24074_v18 }
0x1bb4   :  { %19855 = vmatprep.subr.mxu1 %v20714_v6  ;;  %19859 = vmatprep.mubr.msk.f32.mxu1 %vm20715_vm1, %v20714_v6 }
0x1bb5   :  { %19856 = vmatpush3.msra.mxu1 %v23727_v62  ;;  %19873 = vmatprep.subr.mxu0 %v20714_v6 }
0x1bb6   :  { %19857 = vmatprep.subr.mxu1 %v20714_v6  ;;  %19874 = vmatpush3.msra.mxu0 %v23633_v29 }
0x1bb7   :  { %19858 = vmatpush3.msra.mxu1 %v23745_v36  ;;  %19875 = vmatprep.subr.mxu0 %v20714_v6 }
0x1bb8   :  { %19860 = vmatmul.mubr.msk.f32.vlgmr.msra.gmra.mxu1 %vm831_vm12, %v24079_v35  ;;  %19862 = vmatprep.subr.mxu1 %v20714_v6 }
0x1bb9   :  { %19863 = vmatpush3.msra.mxu1 %v23656_v22  ;;  %19870 = vmatprep.mubr.msk.f32.mxu1 %vm20715_vm1, %v20714_v6 }
0x1bba   :  { %19864 = vmatprep.subr.mxu1 %v20714_v6  ;;  %19876 = vmatpush3.msra.mxu0 %v23646_v53 }
0x1bbb   :  { %19865 = vmatpush3.msra.mxu1 %v23672_v42  ;;  %19877 = vmatprep.mubr.msk.f32.mxu0 %vm20715_vm1, %v20714_v6 }
0x1bbc   :  { %19866 = vmatprep.subr.mxu1 %v20714_v6  ;;  %19880 = vmatprep.subr.mxu0 %v20714_v6 }
0x1bbd   :  { %19867 = vmatpush3.msra.mxu1 %v23686_v15 }
0x1bbe   :  { %19868 = vmatprep.subr.mxu1 %v20714_v6 }
0x1bbf   :  { %19869 = vmatpush3.msra.mxu1 %v23700_v21 }
0x1bc0   :  { %19871 = vmatmul.mubr.msk.f32.vlgmr.msra.gmra.mxu1 %vm757_vm11, %v23084_v17  ;;  %19891 = vmatprep.subr.mxu1 %v20714_v6 }
0x1bc1   :  { %19892 = vmatpush3.msra.mxu1 %v23722_v1  ;;  %19895 = vmatprep.mubr.msk.f32.mxu1 %vm20715_vm1, %v20714_v6 }
0x1bc2   :  { %19893 = vmatprep.subr.mxu1 %v20714_v6 }
0x1bc3   :  { %19894 = vmatpush3.msra.mxu1 %v23738_v52 }
0x1bc4   :  { %19898 = vmatprep.subr.mxu1 %v20714_v6 }
0x1c6a   :  { %v13704_v29 = vpop.f32.mrf.mxu1  ;;  %v13852_v53 = vpop.f32.mrf.mxu0 }
0x1c6b   :  { %v13708_v22 = vadd.f32 %v13704_v29, %v13632_v61  ;;  %v24169_v61 = vld [vmem:[%s24766_s3 + $0x70] sm:$0xff]  ;;  %v24229_v29 = vld [vmem:[%s24790_s0 + $0x78] sm:$0xff] }
0x1c6c   :  { %v19825_v11 = vpop.f32.mrf.mxu1  ;;  %v19843_v42 = vpop.f32.mrf.mxu0 }
0x1c6d   :  { %v13709_v55 = vadd.f32 %v23834_v7, %v13708_v22  ;;  %v24244_v22 = vld [vmem:[%s24790_s0 + $0x70] sm:$0xff]  ;;  %v24254_v11 = vld [vmem:[%s24790_s0 + $0x68] sm:$0xff]  ;;  %v24261_v42 = vld [vmem:[%s24790_s0 + $0x60] sm:$0xff] }
0x1c6f   :  { %v13710_v15 = vsub.f32 0.0, %v13709_v55  ;;  %v24270_v55 = vld [vmem:[%s24769_s6 + $0x38] sm:$0xff] }
0x1c71   :  { %v13711_v16 = vmul.f32 1.442695, %v13710_v15  ;;  %v24279_v15 = vld [vmem:[%s24769_s6 + $0x30] sm:$0xff] }
0x1c73   :  { %20499 = vpow2.f32 %v13711_v16  ;;  %v13782_v21 = vpop.f32.mrf.mxu1  ;;  %v13930_v0 = vpop.f32.mrf.mxu0 }
0x1c74   :  { %v13783_v1 = vadd.f32 %v23829_v30, %v13782_v21  ;;  %v13931_v33 = vadd.f32 %v23860_v43, %v13930_v0 }
0x1c75   :  { %v19836_v62 = vpop.f32.mrf.mxu1  ;;  %v19854_v52 = vpop.f32.mrf.mxu0 }
0x1c76   :  { %v13856_v36 = vadd.f32 %v13852_v53, %v13783_v1  ;;  %v24238_v53 = vld [vmem:[%s24768_s5 + $0x30] sm:$0xff] }
0x1c78   :  { %v13857_v50 = vadd.f32 %v23841_v34, %v13856_v36  ;;  %v14000_v24 = vpop.f32.mrf.mxu1 }
0x1c79   :  { %v14001_v47 = vadd.f32 %v23854_v31, %v14000_v24 }
0x1c7a   :  { %v13858_v38 = vsub.f32 0.0, %v13857_v50  ;;  %v19861_v14 = vpop.f32.mrf.mxu1 }
0x1c7c   :  { %v13859_v63 = vmul.f32 1.442695, %v13858_v38 }
0x1c7e   :  { %20501 = vpow2.f32 %v13859_v63 }
0x1c80   :  { %v20500_v26 = vpop.eup %20499  ;;  %v24146_v4 = vpop.f32.mrf.mxu1 }
0x1c81   :  { %v13713_v19 = vadd.f32 1.0, %v20500_v26  ;;  %v14078_v16 = vadd.f32 %v23823_v58, %v24146_v4 }
0x1c82   :  { %v19872_v18 = vpop.f32.mrf.mxu1 }
0x1c83   :  { %20503 = vrcp.f32 %v13713_v19 }
0x1c8b   :  { %v20502_v23 = vpop.eup %20501 }
0x1c8c   :  { %v13861_v25 = vadd.f32 1.0, %v20502_v23 }
0x1c8e   :  { %20505 = vrcp.f32 %v13861_v25 }
0x1c90   :  { %v20504_v46 = vpop.eup %20503 }
0x1c91   :  { %v14004_v12 = vmul.f32 %v20504_v46, %v14001_v47 }
0x1c93   :  { %v14005_v10 = vadd.f32 %v14004_v12, %v13931_v33 }
0x1c95   :  { %20507 = vtanh.f32 %v14005_v10 }
0x1c9b   :  { %v20506_v9 = vpop.eup %20505 }
0x1c9c   :  { %v14007_v2 = vsub.f32 1.0, %v20506_v9  ;;  %v14009_v20 = vmul.f32 %v20506_v9, %v24079_v35 }
0x1ca2   :  { %v20508_v40 = vpop.eup %20507 }
0x1ca3   :  { %v14008_v32 = vmul.f32 %v20508_v40, %v14007_v2 }
0x1ca5   :  { %v24151_v5 = vadd.f32 %v14009_v20, %v14008_v32 }
0x1ca7   :  { %19878 = vmatmul.mubr.msk.f32.vlgmr.msra.gmra.mxu0 %vm831_vm12, %v24151_v5  ;;  %19896 = vmatmul.mubr.msk.f32.vlgmr.msra.gmra.mxu1 %vm831_vm12, %v24151_v5 }
0x1ca8   :  { %19881 = vmatpush3.msra.mxu0 %v24160_v45  ;;  %19899 = vmatpush3.msra.mxu1 %v23755_v28  ;;  %v24178_v28 = vld [vmem:[%s24766_s3 + $0x68] sm:$0xff] }
0x1ca9   :  { %19882 = vmatprep.subr.mxu0 %v20714_v6  ;;  %19900 = vmatprep.subr.mxu1 %v20714_v6 }
0x1caa   :  { %19883 = vmatpush3.msra.mxu0 %v24169_v61  ;;  %19901 = vmatpush3.msra.mxu1 %v23765_v41  ;;  %v24187_v41 = vld [vmem:[%s24766_s3 + $0x60] sm:$0xff] }
0x1cab   :  { %19884 = vmatprep.subr.mxu0 %v20714_v6  ;;  %19902 = vmatprep.subr.mxu1 %v20714_v6 }
0x1cac   :  { %19885 = vmatpush3.msra.mxu0 %v24178_v28  ;;  %19903 = vmatpush3.msra.mxu1 %v23774_v60  ;;  %v24205_v60 = vld [vmem:[%s24770_s7 + $0x38] sm:$0xff] }
0x1cad   :  { %19886 = vmatprep.subr.mxu0 %v20714_v6  ;;  %19904 = vmatprep.subr.mxu1 %v20714_v6 }
0x1cae   :  { %19887 = vmatpush3.msra.mxu0 %v24187_v41  ;;  %19888 = vmatprep.mubr.msk.f32.mxu0 %vm20715_vm1, %v20714_v6 }
0x1caf   :  { %19905 = vmatpush3.msra.mxu1 %v23783_v57  ;;  %19906 = vmatprep.mubr.msk.f32.mxu1 %vm20715_vm1, %v20714_v6  ;;  %v24219_v57 = vld [vmem:[%s24770_s7 + $0x30] sm:$0xff] }
0x1cb0   :  { %19889 = vmatmul.mubr.msk.f32.vlgmr.msra.gmra.mxu0 %vm757_vm11, %v23084_v17  ;;  %19907 = vmatmul.mubr.msk.f32.vlgmr.msra.gmra.mxu1 %vm757_vm11, %v23084_v17  ;;  %v24213_v17 = vld [vmem:[%s24768_s5 + $0x38] sm:$0xff] }
0x1cb1   :  { %19909 = vmatprep.subr.mxu0 %v20714_v6  ;;  %19913 = vmatprep.mubr.msk.f32.mxu0 %vm20715_vm1, %v20714_v6 }
0x1cb2   :  { %19910 = vmatpush3.msra.mxu0 %v24205_v60  ;;  %19927 = vmatprep.subr.mxu1 %v20714_v6 }
0x1cb3   :  { %19911 = vmatprep.subr.mxu0 %v20714_v6  ;;  %19928 = vmatpush3.msra.mxu1 %v24213_v17 }
0x1cb4   :  { %19912 = vmatpush3.msra.mxu0 %v24219_v57  ;;  %19929 = vmatprep.subr.mxu1 %v20714_v6 }
0x1cb5   :  { %19914 = vmatmul.mubr.msk.f32.vlgmr.msra.gmra.mxu0 %vm831_vm12, %v24151_v5  ;;  %19916 = vmatprep.subr.mxu0 %v20714_v6 }
0x1cb6   :  { %19917 = vmatpush3.msra.mxu0 %v24229_v29  ;;  %19924 = vmatprep.mubr.msk.f32.mxu0 %vm20715_vm1, %v20714_v6 }
0x1cb7   :  { %19918 = vmatprep.subr.mxu0 %v20714_v6  ;;  %19930 = vmatpush3.msra.mxu1 %v24238_v53 }
0x1cb8   :  { %19919 = vmatpush3.msra.mxu0 %v24244_v22  ;;  %19931 = vmatprep.mubr.msk.f32.mxu1 %vm20715_vm1, %v20714_v6 }
0x1cb9   :  { %19920 = vmatprep.subr.mxu0 %v20714_v6  ;;  %19934 = vmatprep.subr.mxu1 %v20714_v6 }
0x1cba   :  { %19921 = vmatpush3.msra.mxu0 %v24254_v11 }
0x1cbb   :  { %19922 = vmatprep.subr.mxu0 %v20714_v6 }
0x1cbc   :  { %19923 = vmatpush3.msra.mxu0 %v24261_v42 }
0x1cbd   :  { %19925 = vmatmul.mubr.msk.f32.vlgmr.msra.gmra.mxu0 %vm757_vm11, %v22968_v59  ;;  %19945 = vmatprep.subr.mxu0 %v20714_v6 }
0x1cbe   :  { %19946 = vmatpush3.msra.mxu0 %v24270_v55  ;;  %19949 = vmatprep.mubr.msk.f32.mxu0 %vm20715_vm1, %v20714_v6 }
0x1cbf   :  { %19947 = vmatprep.subr.mxu0 %v20714_v6 }
0x1cc0   :  { %19948 = vmatpush3.msra.mxu0 %v24279_v15 }
0x1cc1   :  { %19952 = vmatprep.subr.mxu0 %v20714_v6 }
0x1d67   :  { %v14150_v21 = vpop.f32.mrf.mxu0  ;;  %v14298_v0 = vpop.f32.mrf.mxu1 }
0x1d68   :  { %v14154_v1 = vadd.f32 %v14150_v21, %v14078_v16 }
0x1d69   :  { %v19879_v62 = vpop.f32.mrf.mxu0  ;;  %v19897_v52 = vpop.f32.mrf.mxu1 }
0x1d6a   :  { %v14155_v36 = vadd.f32 %v23834_v7, %v14154_v1  ;;  %v24321_v52 = vld [vmem:[%s24767_s4 + $0x68] sm:$0xff] }
0x1d6c   :  { %v14156_v50 = vsub.f32 0.0, %v14155_v36  ;;  %v24332_v36 = vld [vmem:[%s24767_s4 + $0x60] sm:$0xff] }
0x1d6e   :  { %v14157_v24 = vmul.f32 1.442695, %v14156_v50 }
0x1d70   :  { %20509 = vpow2.f32 %v14157_v24  ;;  %v14228_v38 = vpop.f32.mrf.mxu0  ;;  %v14376_v14 = vpop.f32.mrf.mxu1 }
0x1d71   :  { %v14229_v63 = vadd.f32 %v23829_v30, %v14228_v38  ;;  %v14377_v40 = vadd.f32 %v23860_v43, %v14376_v14  ;;  %v24312_v43 = vld [vmem:[%s24767_s4 + $0x70] sm:$0xff] }
0x1d72   :  { %v19890_v26 = vpop.f32.mrf.mxu0  ;;  %v19908_v19 = vpop.f32.mrf.mxu1 }
0x1d73   :  { %v14302_v18 = vadd.f32 %v14298_v0, %v14229_v63  ;;  %v24391_v63 = vld [vmem:[%s24772_s9 + $0x3] ss:$0 sm:$0xff] }
0x1d75   :  { %v14303_v23 = vadd.f32 %v23841_v34, %v14302_v18  ;;  %v14446_v58 = vpop.f32.mrf.mxu0 }
0x1d76   :  { %v14447_v30 = vadd.f32 %v23854_v31, %v14446_v58  ;;  %v24303_v31 = vld [vmem:[%s24767_s4 + $0x78] sm:$0xff]  ;;  %v24397_v58 = vld [vmem:[%s24775_s12 + $0x3] ss:$0 sm:$0xff] }
0x1d77   :  { %v14304_v4 = vsub.f32 0.0, %v14303_v23  ;;  %v19915_v25 = vpop.f32.mrf.mxu0 }
0x1d79   :  { %v14305_v47 = vmul.f32 1.442695, %v14304_v4 }
0x1d7b   :  { %20511 = vpow2.f32 %v14305_v47 }
0x1d7d   :  { %v20510_v46 = vpop.eup %20509  ;;  %v24288_v33 = vpop.f32.mrf.mxu0 }
0x1d7e   :  { %v14159_v7 = vadd.f32 1.0, %v20510_v46 }
0x1d7f   :  { %v19926_v12 = vpop.f32.mrf.mxu0 }
0x1d80   :  { %20513 = vrcp.f32 %v14159_v7 }
0x1d88   :  { %v20512_v10 = vpop.eup %20511 }
0x1d89   :  { %v14307_v9 = vadd.f32 1.0, %v20512_v10 }
0x1d8b   :  { %20515 = vrcp.f32 %v14307_v9 }
0x1d8d   :  { %v20514_v2 = vpop.eup %20513 }
0x1d8e   :  { %v14450_v34 = vmul.f32 %v20514_v2, %v14447_v30 }
0x1d90   :  { %v14451_v32 = vadd.f32 %v14450_v34, %v14377_v40  ;;  %v24405_v40 = vld [vmem:[%s24776_s13 + $0x3] ss:$0 sm:$0xff] }
0x1d92   :  { %20517 = vtanh.f32 %v14451_v32 }
0x1d98   :  { %v20516_v20 = vpop.eup %20515 }
0x1d99   :  { %v14453_v16 = vsub.f32 1.0, %v20516_v20  ;;  %v14455_v1 = vmul.f32 %v20516_v20, %v24151_v5  ;;  %v24411_v20 = vld [vmem:[%s24773_s10 + $0x3] ss:$0 sm:$0xff] }
0x1d9f   :  { %v20518_v21 = vpop.eup %20517 }
0x1da0   :  { %v14454_v0 = vmul.f32 %v20518_v21, %v14453_v16 }
0x1da2   :  { %v24293_v62 = vadd.f32 %v14455_v1, %v14454_v0 }
0x1da4   :  { %19932 = vmatmul.mubr.msk.f32.vlgmr.msra.gmra.mxu1 %vm831_vm12, %v24293_v62  ;;  %19950 = vmatmul.mubr.msk.f32.vlgmr.msra.gmra.mxu0 %vm831_vm12, %v24293_v62 }
0x1da5   :  { %19935 = vmatpush3.msra.mxu1 %v24160_v45  ;;  %19953 = vmatpush3.msra.mxu0 %v24303_v31 }
0x1da6   :  { %19936 = vmatprep.subr.mxu1 %v20714_v6  ;;  %19954 = vmatprep.subr.mxu0 %v20714_v6 }
0x1da7   :  { %19937 = vmatpush3.msra.mxu1 %v24169_v61  ;;  %19955 = vmatpush3.msra.mxu0 %v24312_v43 }
0x1da8   :  { %19938 = vmatprep.subr.mxu1 %v20714_v6  ;;  %19956 = vmatprep.subr.mxu0 %v20714_v6 }
0x1da9   :  { %19939 = vmatpush3.msra.mxu1 %v24178_v28  ;;  %19957 = vmatpush3.msra.mxu0 %v24321_v52 }
0x1daa   :  { %19940 = vmatprep.subr.mxu1 %v20714_v6  ;;  %19958 = vmatprep.subr.mxu0 %v20714_v6 }
0x1dab   :  { %19941 = vmatpush3.msra.mxu1 %v24187_v41  ;;  %19942 = vmatprep.mubr.msk.f32.mxu1 %vm20715_vm1, %v20714_v6 }
0x1dac   :  { %19959 = vmatpush3.msra.mxu0 %v24332_v36  ;;  %19960 = vmatprep.mubr.msk.f32.mxu0 %vm20715_vm1, %v20714_v6 }
0x1dad   :  { %19943 = vmatmul.mubr.msk.f32.vlgmr.msra.gmra.mxu1 %vm757_vm11, %v22968_v59  ;;  %19961 = vmatmul.mubr.msk.f32.vlgmr.msra.gmra.mxu0 %vm757_vm11, %v22968_v59  ;;  %v24378_v59 = vld [vmem:[%s24771_s8 + $0x3] ss:$0 sm:$0xff] }
0x1dae   :  { %19963 = vmatprep.subr.mxu1 %v20714_v6  ;;  %19967 = vmatprep.mubr.msk.f32.mxu1 %vm20715_vm1, %v20714_v6 }
0x1daf   :  { %19964 = vmatpush3.msra.mxu1 %v24205_v60  ;;  %19981 = vmatprep.subr.mxu0 %v20714_v6 }
0x1db0   :  { %19965 = vmatprep.subr.mxu1 %v20714_v6  ;;  %19982 = vmatpush3.msra.mxu0 %v24213_v17  ;;  %v14524_v17 = vadd.f32 %v24378_v59, %v24288_v33 }
0x1db1   :  { %19966 = vmatpush3.msra.mxu1 %v24219_v57  ;;  %19983 = vmatprep.subr.mxu0 %v20714_v6 }
0x1db2   :  { %19968 = vmatmul.mubr.msk.f32.vlgmr.msra.gmra.mxu1 %vm831_vm12, %v24293_v62  ;;  %19970 = vmatprep.subr.mxu1 %v20714_v6 }
0x1db3   :  { %19971 = vmatpush3.msra.mxu1 %v24229_v29  ;;  %19978 = vmatprep.mubr.msk.f32.mxu1 %vm20715_vm1, %v20714_v6 }
0x1db4   :  { %19972 = vmatprep.subr.mxu1 %v20714_v6  ;;  %19984 = vmatpush3.msra.mxu0 %v24238_v53 }
0x1db5   :  { %19973 = vmatpush3.msra.mxu1 %v24244_v22  ;;  %19985 = vmatprep.mubr.msk.f32.mxu0 %vm20715_vm1, %v20714_v6 }
0x1db6   :  { %19974 = vmatprep.subr.mxu1 %v20714_v6  ;;  %19988 = vmatprep.subr.mxu0 %v20714_v6 }
0x1db7   :  { %19975 = vmatpush3.msra.mxu1 %v24254_v11 }
0x1db8   :  { %19976 = vmatprep.subr.mxu1 %v20714_v6 }
0x1db9   :  { %19977 = vmatpush3.msra.mxu1 %v24261_v42 }
0x1dba   :  { %19979 = vmatmul.mubr.msk.f32.vlgmr.msra.gmra.mxu1 %vm757_vm11, %v22901_v44  ;;  %19999 = vmatprep.subr.mxu1 %v20714_v6 }
0x1dbb   :  { %20000 = vmatpush3.msra.mxu1 %v24270_v55  ;;  %20003 = vmatprep.mubr.msk.f32.mxu1 %vm20715_vm1, %v20714_v6  ;;  %v24385_v55 = vld [vmem:[%s24774_s11 + $0x3] ss:$0 sm:$0xff] }
0x1dbc   :  { %20001 = vmatprep.subr.mxu1 %v20714_v6 }
0x1dbd   :  { %20002 = vmatpush3.msra.mxu1 %v24279_v15 }
0x1dbe   :  { %20006 = vmatprep.subr.mxu1 %v20714_v6 }
0x1e64   :  { %v14596_v29 = vpop.f32.mrf.mxu1  ;;  %v14744_v53 = vpop.f32.mrf.mxu0 }
0x1e65   :  { %v14600_v22 = vadd.f32 %v14596_v29, %v14524_v17 }
0x1e66   :  { %v19933_v11 = vpop.f32.mrf.mxu1  ;;  %v19951_v42 = vpop.f32.mrf.mxu0 }
0x1e67   :  { %v14601_v15 = vadd.f32 %v24385_v55, %v14600_v22 }
0x1e69   :  { %v14602_v50 = vsub.f32 0.0, %v14601_v15 }
0x1e6b   :  { %v14603_v24 = vmul.f32 1.442695, %v14602_v50 }
0x1e6d   :  { %20519 = vpow2.f32 %v14603_v24  ;;  %v14674_v38 = vpop.f32.mrf.mxu1  ;;  %v14822_v14 = vpop.f32.mrf.mxu0 }
0x1e6e   :  { %v14675_v26 = vadd.f32 %v24391_v63, %v14674_v38  ;;  %v14823_v16 = vadd.f32 %v24411_v20, %v14822_v14 }
0x1e6f   :  { %v19944_v19 = vpop.f32.mrf.mxu1  ;;  %v19962_v18 = vpop.f32.mrf.mxu0 }
0x1e70   :  { %v14748_v23 = vadd.f32 %v14744_v53, %v14675_v26 }
0x1e72   :  { %v14749_v4 = vadd.f32 %v24397_v58, %v14748_v23  ;;  %v14892_v25 = vpop.f32.mrf.mxu1 }
0x1e73   :  { %v14893_v34 = vadd.f32 %v24405_v40, %v14892_v25 }
0x1e74   :  { %v14750_v47 = vsub.f32 0.0, %v14749_v4  ;;  %v19969_v46 = vpop.f32.mrf.mxu1 }
0x1e76   :  { %v14751_v33 = vmul.f32 1.442695, %v14750_v47 }
0x1e78   :  { %20521 = vpow2.f32 %v14751_v33 }
0x1e7a   :  { %v20520_v7 = vpop.eup %20519  ;;  %v24400_v12 = vpop.f32.mrf.mxu1 }
0x1e7b   :  { %v14605_v10 = vadd.f32 1.0, %v20520_v7 }
0x1e7c   :  { %v19980_v9 = vpop.f32.mrf.mxu1 }
0x1e7d   :  { %20523 = vrcp.f32 %v14605_v10 }
0x1e85   :  { %v20522_v30 = vpop.eup %20521 }
0x1e86   :  { %v14753_v2 = vadd.f32 1.0, %v20522_v30 }
0x1e88   :  { %20525 = vrcp.f32 %v14753_v2 }
0x1e8a   :  { %v20524_v32 = vpop.eup %20523 }
0x1e8b   :  { %v14896_v21 = vmul.f32 %v20524_v32, %v14893_v34 }
0x1e8d   :  { %v14897_v0 = vadd.f32 %v14896_v21, %v14823_v16 }
0x1e8f   :  { %20527 = vtanh.f32 %v14897_v0  ;;  %v24631_v0 = vld [vmem:[%s24778_s15 + $0x18] sm:$0xff] }
0x1e95   :  { %v20526_v1 = vpop.eup %20525 }
0x1e96   :  { %v14899_v17 = vsub.f32 1.0, %v20526_v1  ;;  %v14901_v22 = vmul.f32 %v20526_v1, %v24293_v62  ;;  %v24644_v1 = vld [vmem:[%s24778_s15 + $0x8] sm:$0xff] }
0x1e9c   :  { %v20528_v29 = vpop.eup %20527 }
0x1e9d   :  { %v14900_v53 = vmul.f32 %v20528_v29, %v14899_v17  ;;  %v24650_v17 = vld [vmem:[%s24778_s15] sm:$0xff] }
0x1e9f   :  { %v24415_v11 = vadd.f32 %v14901_v22, %v14900_v53 }
0x1ea1   :  { %15354 = vrot.lane.b32.xlu1 %v24415_v11, %s20716_s26  ;;  %19986 = vmatmul.mubr.msk.f32.vlgmr.msra.gmra.mxu0 %vm831_vm12, %v24415_v11 }
0x1ea2   :  { %19989 = vmatpush3.msra.mxu0 %v24160_v45  ;;  %20004 = vmatmul.mubr.msk.f32.vlgmr.msra.gmra.mxu1 %vm831_vm12, %v24415_v11  ;;  %v14970_v45 = vadd.f32 %v24378_v59, %v24400_v12 }
0x1ea3   :  { %20007 = vmatpush3.msra.mxu1 %v24303_v31  ;;  %19990 = vmatprep.subr.mxu0 %v20714_v6 }
0x1ea4   :  { %20008 = vmatprep.subr.mxu1 %v20714_v6  ;;  %19991 = vmatpush3.msra.mxu0 %v24169_v61 }
0x1ea5   :  { %20009 = vmatpush3.msra.mxu1 %v24312_v43  ;;  %19992 = vmatprep.subr.mxu0 %v20714_v6 }
0x1ea6   :  { %20010 = vmatprep.subr.mxu1 %v20714_v6  ;;  %15362 = vrot.lane.b32.xlu1 %v24151_v5, %s20716_s26  ;;  %v24487_v5 = vld [vmem:[%s24777_s14] sm:$0xff] }
0x1ea7   :  { %19993 = vmatpush3.msra.mxu0 %v24178_v28  ;;  %20011 = vmatpush3.msra.mxu1 %v24321_v52 }
0x1ea8   :  { %19994 = vmatprep.subr.mxu0 %v20714_v6  ;;  %20012 = vmatprep.subr.mxu1 %v20714_v6 }
0x1ea9   :  { %19995 = vmatpush3.msra.mxu0 %v24187_v41  ;;  %19996 = vmatprep.mubr.msk.f32.mxu0 %vm20715_vm1, %v20714_v6 }
0x1eaa   :  { %20013 = vmatpush3.msra.mxu1 %v24332_v36  ;;  %20014 = vmatprep.mubr.msk.f32.mxu1 %vm20715_vm1, %v20714_v6 }
0x1eab   :  { %19997 = vmatmul.mubr.msk.f32.vlgmr.msra.gmra.mxu0 %vm757_vm11, %v22901_v44  ;;  %20015 = vmatmul.mubr.msk.f32.vlgmr.msra.gmra.mxu1 %vm757_vm11, %v22901_v44  ;;  %v24468_v44 = vld [vmem:[%s24777_s14 + $0x18] sm:$0xff] }
0x1eac   :  { %20017 = vmatprep.subr.mxu0 %v20714_v6  ;;  %15370 = vrot.lane.b32.xlu1 %v24007_v54, %s20716_s26  ;;  %v24473_v54 = vld [vmem:[%s24777_s14 + $0x10] sm:$0xff] }
0x1ead   :  { %20018 = vmatpush3.msra.mxu0 %v24205_v60  ;;  %20021 = vmatprep.mubr.msk.f32.mxu0 %vm20715_vm1, %v20714_v6 }
0x1eae   :  { %20019 = vmatprep.subr.mxu0 %v20714_v6  ;;  %20035 = vmatprep.subr.mxu1 %v20714_v6 }
0x1eaf   :  { %20020 = vmatpush3.msra.mxu0 %v24219_v57  ;;  %20043 = vmatprep.mubr.msk.f32.mxu1 %vm20715_vm1, %v20714_v6 }
0x1eb0   :  { %20022 = vmatmul.mubr.msk.f32.vlgmr.msra.gmra.mxu0 %vm831_vm12, %v24415_v11  ;;  %15378 = vrot.lane.b32.xlu1 %v23863_v3, %s20716_s26  ;;  %v24480_v3 = vld [vmem:[%s24777_s14 + $0x8] sm:$0xff] }
0x1eb1   :  { %20024 = vmatprep.subr.mxu0 %v20714_v6  ;;  %20032 = vmatprep.mubr.msk.f32.mxu0 %vm20715_vm1, %v20714_v6 }
0x1eb2   :  { %20025 = vmatpush3.msra.mxu0 %v24468_v44  ;;  %20036 = vmatpush3.msra.mxu1 %v24631_v0 }
0x1eb3   :  { %20026 = vmatprep.subr.mxu0 %v20714_v6  ;;  %20037 = vmatprep.subr.mxu1 %v20714_v6 }
0x1eb4   :  { %20027 = vmatpush3.msra.mxu0 %v24473_v54 }
0x1eb5   :  { %20028 = vmatprep.subr.mxu0 %v20714_v6 }
0x1eb6   :  { %20029 = vmatpush3.msra.mxu0 %v24480_v3 }
0x1eb7   :  { %20030 = vmatprep.subr.mxu0 %v20714_v6 }
0x1eb8   :  { %20031 = vmatpush3.msra.mxu0 %v24487_v5 }
0x1eb9   :  { %20046 = vmatprep.subr.mxu0 %v20714_v6 }
0x1f61   :  { %v15042_v61 = vpop.f32.mrf.mxu0 }
0x1f62   :  { %v15046_v28 = vadd.f32 %v15042_v61, %v14970_v45  ;;  %v15190_v41 = vpop.f32.mrf.mxu1 }
0x1f63   :  { %v19987_v60 = vpop.f32.mrf.mxu0 }
0x1f64   :  { %v15047_v57 = vadd.f32 %v24385_v55, %v15046_v28  ;;  %v20005_v31 = vpop.f32.mrf.mxu1 }
0x1f66   :  { %v15048_v43 = vsub.f32 0.0, %v15047_v57 }
0x1f68   :  { %v15049_v52 = vmul.f32 1.442695, %v15048_v43 }
0x1f6a   :  { %20529 = vpow2.f32 %v15049_v52 }
0x1f6b   :  { %v15120_v36 = vpop.f32.mrf.mxu0  ;;  %v15268_v42 = vpop.f32.mrf.mxu1 }
0x1f6c   :  { %v15121_v15 = vadd.f32 %v24391_v63, %v15120_v36  ;;  %v15269_v63 = vadd.f32 %v24411_v20, %v15268_v42 }
0x1f6d   :  { %v19998_v50 = vpop.f32.mrf.mxu0  ;;  %v20016_v24 = vpop.f32.mrf.mxu1 }
0x1f6e   :  { %v15194_v38 = vadd.f32 %v15190_v41, %v15121_v15 }
0x1f70   :  { %v15195_v14 = vadd.f32 %v24397_v58, %v15194_v38  ;;  %v15338_v59 = vpop.f32.mrf.mxu0 }
0x1f71   :  { %v15339_v47 = vadd.f32 %v24405_v40, %v15338_v59 }
0x1f72   :  { %v15196_v26 = vsub.f32 0.0, %v15195_v14  ;;  %v20023_v19 = vpop.f32.mrf.mxu0 }
0x1f74   :  { %v15197_v18 = vmul.f32 1.442695, %v15196_v26 }
0x1f76   :  { %20531 = vpow2.f32 %v15197_v18 }
0x1f77   :  { %v20530_v23 = vpop.eup %20529 }
0x1f78   :  { %v15051_v55 = vadd.f32 1.0, %v20530_v23 }
0x1f7a   :  { %20533 = vrcp.f32 %v15051_v55 }
0x1f83   :  { %v20532_v4 = vpop.eup %20531 }
0x1f84   :  { %v15199_v25 = vadd.f32 1.0, %v20532_v4 }
0x1f86   :  { %20535 = vrcp.f32 %v15199_v25 }
0x1f87   :  { %v20534_v46 = vpop.eup %20533 }
0x1f88   :  { %v15342_v33 = vmul.f32 %v20534_v46, %v15339_v47 }
0x1f8a   :  { %v15343_v7 = vadd.f32 %v15342_v33, %v15269_v63 }
0x1f8c   :  { %20537 = vtanh.f32 %v15343_v7 }
0x1f93   :  { %v20536_v58 = vpop.eup %20535 }
0x1f94   :  { %v15345_v12 = vsub.f32 1.0, %v20536_v58  ;;  %v15347_v30 = vmul.f32 %v20536_v58, %v24415_v11 }
0x1f99   :  { %v20538_v10 = vpop.eup %20537 }
0x1f9a   :  { %v15346_v9 = vmul.f32 %v20538_v10, %v15345_v12 }
0x1f9c   :  { %v15348_v2 = vadd.f32 %v15347_v30, %v15346_v9 }
0x1f9e   :  { %15350 = vrot.lane.b32.xlu0 %v15348_v2, %s20716_s26 }
0x1fa2   :  { %15358 = vrot.lane.b32.xlu0 %v24293_v62, %s20716_s26 }
0x1fa6   :  { %15366 = vrot.lane.b32.xlu0 %v24079_v35, %s20716_s26  ;;  %v15355_v35 = vpop.permute.xlu1 %15354 }
0x1faa   :  { %15374 = vrot.lane.b32.xlu0 %v23935_v8, %s20716_s26  ;;  %v15363_v62 = vpop.permute.xlu1 %15362 }
0x1fae   :  { %v15371_v20 = vpop.permute.xlu1 %15370 }
0x1fb2   :  { %v15379_v21 = vpop.permute.xlu1 %15378 }
0x2010   :  { %v15351_v40 = vpop.permute.xlu0 %15350 }
0x2011   :  { %v24510_v34 = vsel %vm831_vm12, %v23030_v56, %v15351_v40  ;;  %v24524_v56 = vsel %vm831_vm12, %v23106_v49, %v15355_v35 }
0x2012   :  { %20033 = vmatmul.mubr.msk.f32.vlgmr.msra.gmra.mxu0 %vm757_vm11, %v24510_v34 }
0x2013   :  { %20047 = vmatpush3.msra.mxu0 %v24468_v44  ;;  %20054 = vmatprep.mubr.msk.f32.mxu0 %vm20715_vm1, %v20714_v6 }
0x2014   :  { %20048 = vmatprep.subr.mxu0 %v20714_v6  ;;  %v15359_v8 = vpop.permute.xlu0 %15358 }
0x2015   :  { %20049 = vmatpush3.msra.mxu0 %v24473_v54  ;;  %v24540_v49 = vsel %vm831_vm12, %v23182_v48, %v15359_v8  ;;  %v24556_v48 = vsel %vm831_vm12, %v23258_v39, %v15363_v62 }
0x2016   :  { %20050 = vmatprep.subr.mxu0 %v20714_v6 }
0x2017   :  { %20051 = vmatpush3.msra.mxu0 %v24480_v3 }
0x2018   :  { %20052 = vmatprep.subr.mxu0 %v20714_v6  ;;  %v15367_v32 = vpop.permute.xlu0 %15366 }
0x2019   :  { %20053 = vmatpush3.msra.mxu0 %v24487_v5  ;;  %v24572_v39 = vsel %vm831_vm12, %v23334_v13, %v15367_v32  ;;  %v24588_v13 = vsel %vm831_vm12, %v23470_v51, %v15371_v20 }
0x201a   :  { %20055 = vmatmul.mubr.msk.f32.vlgmr.msra.gmra.mxu0 %vm757_vm11, %v24524_v56  ;;  %20068 = vmatprep.subr.mxu0 %v20714_v6 }
0x201b   :  { %20069 = vmatpush3.msra.mxu0 %v24468_v44  ;;  %20076 = vmatprep.mubr.msk.f32.mxu0 %vm20715_vm1, %v20714_v6 }
0x201c   :  { %20070 = vmatprep.subr.mxu0 %v20714_v6  ;;  %v15375_v16 = vpop.permute.xlu0 %15374 }
0x201d   :  { %20071 = vmatpush3.msra.mxu0 %v24473_v54  ;;  %v24604_v51 = vsel %vm831_vm12, %v23606_v37, %v15375_v16  ;;  %v24620_v37 = vsel %vm831_vm12, %v23849_v27, %v15379_v21  ;;  %v24638_v27 = vld [vmem:[%s24778_s15 + $0x10] sm:$0xff] }
0x201e   :  { %20072 = vmatprep.subr.mxu0 %v20714_v6  ;;  %20038 = vmatpush3.msra.mxu1 %v24638_v27 }
0x201f   :  { %20073 = vmatpush3.msra.mxu0 %v24480_v3  ;;  %20039 = vmatprep.subr.mxu1 %v20714_v6 }
0x2020   :  { %20074 = vmatprep.subr.mxu0 %v20714_v6  ;;  %20040 = vmatpush3.msra.mxu1 %v24644_v1 }
0x2021   :  { %20075 = vmatpush3.msra.mxu0 %v24487_v5  ;;  %20041 = vmatprep.subr.mxu1 %v20714_v6 }
0x2022   :  { %20077 = vmatmul.mubr.msk.f32.vlgmr.msra.gmra.mxu0 %vm757_vm11, %v24540_v49  ;;  %20090 = vmatprep.subr.mxu0 %v20714_v6 }
0x2023   :  { %20091 = vmatpush3.msra.mxu0 %v24468_v44  ;;  %20098 = vmatprep.mubr.msk.f32.mxu0 %vm20715_vm1, %v20714_v6 }
0x2024   :  { %20092 = vmatprep.subr.mxu0 %v20714_v6  ;;  %20042 = vmatpush3.msra.mxu1 %v24650_v17 }
0x2025   :  { %20093 = vmatpush3.msra.mxu0 %v24473_v54  ;;  %20057 = vmatprep.subr.mxu1 %v20714_v6 }
0x2026   :  { %20094 = vmatprep.subr.mxu0 %v20714_v6 }
0x2027   :  { %20095 = vmatpush3.msra.mxu0 %v24480_v3 }
0x2028   :  { %20096 = vmatprep.subr.mxu0 %v20714_v6 }
0x2029   :  { %20097 = vmatpush3.msra.mxu0 %v24487_v5 }
0x202a   :  { %20099 = vmatmul.mubr.msk.f32.vlgmr.msra.gmra.mxu0 %vm757_vm11, %v24556_v48  ;;  %20112 = vmatprep.subr.mxu0 %v20714_v6 }
0x202b   :  { %20113 = vmatpush3.msra.mxu0 %v24468_v44  ;;  %20120 = vmatprep.mubr.msk.f32.mxu0 %vm20715_vm1, %v20714_v6 }
0x202c   :  { %20114 = vmatprep.subr.mxu0 %v20714_v6 }
0x202d   :  { %20115 = vmatpush3.msra.mxu0 %v24473_v54 }
0x202e   :  { %20116 = vmatprep.subr.mxu0 %v20714_v6 }
0x202f   :  { %20117 = vmatpush3.msra.mxu0 %v24480_v3 }
0x2030   :  { %20118 = vmatprep.subr.mxu0 %v20714_v6 }
0x2031   :  { %20119 = vmatpush3.msra.mxu0 %v24487_v5 }
0x2032   :  { %20121 = vmatmul.mubr.msk.f32.vlgmr.msra.gmra.mxu0 %vm757_vm11, %v24572_v39  ;;  %20134 = vmatprep.subr.mxu0 %v20714_v6 }
0x2033   :  { %20135 = vmatpush3.msra.mxu0 %v24468_v44  ;;  %20142 = vmatprep.mubr.msk.f32.mxu0 %vm20715_vm1, %v20714_v6 }
0x2034   :  { %20136 = vmatprep.subr.mxu0 %v20714_v6 }
0x2035   :  { %20137 = vmatpush3.msra.mxu0 %v24473_v54 }
0x2036   :  { %20138 = vmatprep.subr.mxu0 %v20714_v6 }
0x2037   :  { %20139 = vmatpush3.msra.mxu0 %v24480_v3 }
0x2038   :  { %20140 = vmatprep.subr.mxu0 %v20714_v6 }
0x2039   :  { %20141 = vmatpush3.msra.mxu0 %v24487_v5 }
0x203a   :  { %20143 = vmatmul.mubr.msk.f32.vlgmr.msra.gmra.mxu0 %vm757_vm11, %v24588_v13  ;;  %20156 = vmatprep.subr.mxu0 %v20714_v6 }
0x203b   :  { %20157 = vmatpush3.msra.mxu0 %v24468_v44  ;;  %20164 = vmatprep.mubr.msk.f32.mxu0 %vm20715_vm1, %v20714_v6 }
0x203c   :  { %20158 = vmatprep.subr.mxu0 %v20714_v6 }
0x203d   :  { %20159 = vmatpush3.msra.mxu0 %v24473_v54 }
0x203e   :  { %20160 = vmatprep.subr.mxu0 %v20714_v6 }
0x203f   :  { %20161 = vmatpush3.msra.mxu0 %v24480_v3 }
0x2040   :  { %20162 = vmatprep.subr.mxu0 %v20714_v6 }
0x2041   :  { %20163 = vmatpush3.msra.mxu0 %v24487_v5 }
0x2042   :  { %20165 = vmatmul.mubr.msk.f32.vlgmr.msra.gmra.mxu0 %vm757_vm11, %v24604_v51  ;;  %20178 = vmatprep.subr.mxu0 %v20714_v6 }
0x2043   :  { %20179 = vmatpush3.msra.mxu0 %v24468_v44  ;;  %20186 = vmatprep.mubr.msk.f32.mxu0 %vm20715_vm1, %v20714_v6 }
0x2044   :  { %20180 = vmatprep.subr.mxu0 %v20714_v6 }
0x2045   :  { %20181 = vmatpush3.msra.mxu0 %v24473_v54 }
0x2046   :  { %20182 = vmatprep.subr.mxu0 %v20714_v6 }
0x2047   :  { %20183 = vmatpush3.msra.mxu0 %v24480_v3 }
0x2048   :  { %20184 = vmatprep.subr.mxu0 %v20714_v6 }
0x2049   :  { %20185 = vmatpush3.msra.mxu0 %v24487_v5 }
0x204a   :  { %20187 = vmatmul.mubr.msk.f32.vlgmr.msra.gmra.mxu0 %vm757_vm11, %v24620_v37  ;;  %20200 = vmatprep.subr.mxu0 %v20714_v6 }
0x204b   :  { %20208 = vmatprep.mubr.msk.f32.mxu0 %vm20715_vm1, %v20714_v6 }
0x20d2   :  { %v15459_v29 = vpop.f32.mrf.mxu0 }
0x20d3   :  { %20539 = vtanh.f32 %v15459_v29 }
0x20d4   :  { %v20034_v53 = vpop.f32.mrf.mxu0 }
0x20da   :  { %v15606_v22 = vpop.f32.mrf.mxu0 }
0x20db   :  { %20541 = vtanh.f32 %v15606_v22 }
0x20dc   :  { %v20056_v11 = vpop.f32.mrf.mxu0 }
0x20e0   :  { %v20540_v44 = vpop.eup %20539 }
0x20e1   :  { %20044 = vmatmul.mubr.msk.f32.vlgmr.msra.gmra.mxu1 %vm757_vm11, %v20540_v44 }
0x20e2   :  { %20058 = vmatpush3.msra.mxu1 %v24631_v0  ;;  %v15753_v54 = vpop.f32.mrf.mxu0  ;;  %20065 = vmatprep.mubr.msk.f32.mxu1 %vm20715_vm1, %v20714_v6 }
0x20e3   :  { %20543 = vtanh.f32 %v15753_v54  ;;  %20059 = vmatprep.subr.mxu1 %v20714_v6 }
0x20e4   :  { %20060 = vmatpush3.msra.mxu1 %v24638_v27  ;;  %v20078_v3 = vpop.f32.mrf.mxu0 }
0x20e5   :  { %20061 = vmatprep.subr.mxu1 %v20714_v6 }
0x20e6   :  { %20062 = vmatpush3.msra.mxu1 %v24644_v1 }
0x20e7   :  { %20063 = vmatprep.subr.mxu1 %v20714_v6 }
0x20e8   :  { %v20542_v5 = vpop.eup %20541  ;;  %20064 = vmatpush3.msra.mxu1 %v24650_v17 }
0x20e9   :  { %20066 = vmatmul.mubr.msk.f32.vlgmr.msra.gmra.mxu1 %vm757_vm11, %v20542_v5  ;;  %20079 = vmatprep.subr.mxu1 %v20714_v6 }
0x20ea   :  { %20080 = vmatpush3.msra.mxu1 %v24631_v0  ;;  %v15900_v45 = vpop.f32.mrf.mxu0  ;;  %20087 = vmatprep.mubr.msk.f32.mxu1 %vm20715_vm1, %v20714_v6 }
0x20eb   :  { %20545 = vtanh.f32 %v15900_v45  ;;  %20081 = vmatprep.subr.mxu1 %v20714_v6 }
0x20ec   :  { %20082 = vmatpush3.msra.mxu1 %v24638_v27  ;;  %v20100_v61 = vpop.f32.mrf.mxu0 }
0x20ed   :  { %20083 = vmatprep.subr.mxu1 %v20714_v6 }
0x20ee   :  { %20084 = vmatpush3.msra.mxu1 %v24644_v1 }
0x20ef   :  { %20085 = vmatprep.subr.mxu1 %v20714_v6 }
0x20f0   :  { %v20544_v28 = vpop.eup %20543  ;;  %20086 = vmatpush3.msra.mxu1 %v24650_v17 }
0x20f1   :  { %20088 = vmatmul.mubr.msk.f32.vlgmr.msra.gmra.mxu1 %vm757_vm11, %v20544_v28  ;;  %20101 = vmatprep.subr.mxu1 %v20714_v6 }
0x20f2   :  { %20102 = vmatpush3.msra.mxu1 %v24631_v0  ;;  %v16047_v41 = vpop.f32.mrf.mxu0  ;;  %20109 = vmatprep.mubr.msk.f32.mxu1 %vm20715_vm1, %v20714_v6 }
0x20f3   :  { %20547 = vtanh.f32 %v16047_v41  ;;  %20103 = vmatprep.subr.mxu1 %v20714_v6 }
0x20f4   :  { %20104 = vmatpush3.msra.mxu1 %v24638_v27  ;;  %v20122_v60 = vpop.f32.mrf.mxu0 }
0x20f5   :  { %20105 = vmatprep.subr.mxu1 %v20714_v6 }
0x20f6   :  { %20106 = vmatpush3.msra.mxu1 %v24644_v1 }
0x20f7   :  { %20107 = vmatprep.subr.mxu1 %v20714_v6 }
0x20f8   :  { %v20546_v57 = vpop.eup %20545  ;;  %20108 = vmatpush3.msra.mxu1 %v24650_v17 }
0x20f9   :  { %20110 = vmatmul.mubr.msk.f32.vlgmr.msra.gmra.mxu1 %vm757_vm11, %v20546_v57  ;;  %20123 = vmatprep.subr.mxu1 %v20714_v6 }
0x20fa   :  { %20124 = vmatpush3.msra.mxu1 %v24631_v0  ;;  %v16194_v31 = vpop.f32.mrf.mxu0  ;;  %20131 = vmatprep.mubr.msk.f32.mxu1 %vm20715_vm1, %v20714_v6 }
0x20fb   :  { %20549 = vtanh.f32 %v16194_v31  ;;  %20125 = vmatprep.subr.mxu1 %v20714_v6 }
0x20fc   :  { %20126 = vmatpush3.msra.mxu1 %v24638_v27  ;;  %v20144_v43 = vpop.f32.mrf.mxu0 }
0x20fd   :  { %20127 = vmatprep.subr.mxu1 %v20714_v6 }
0x20fe   :  { %20128 = vmatpush3.msra.mxu1 %v24644_v1 }
0x20ff   :  { %20129 = vmatprep.subr.mxu1 %v20714_v6 }
0x2100   :  { %v20548_v52 = vpop.eup %20547  ;;  %20130 = vmatpush3.msra.mxu1 %v24650_v17 }
0x2101   :  { %20132 = vmatmul.mubr.msk.f32.vlgmr.msra.gmra.mxu1 %vm757_vm11, %v20548_v52  ;;  %20145 = vmatprep.subr.mxu1 %v20714_v6 }
0x2102   :  { %20146 = vmatpush3.msra.mxu1 %v24631_v0  ;;  %v16341_v36 = vpop.f32.mrf.mxu0  ;;  %20153 = vmatprep.mubr.msk.f32.mxu1 %vm20715_vm1, %v20714_v6 }
0x2103   :  { %20551 = vtanh.f32 %v16341_v36  ;;  %20147 = vmatprep.subr.mxu1 %v20714_v6 }
0x2104   :  { %20148 = vmatpush3.msra.mxu1 %v24638_v27  ;;  %v20166_v42 = vpop.f32.mrf.mxu0 }
0x2105   :  { %20149 = vmatprep.subr.mxu1 %v20714_v6 }
0x2106   :  { %20150 = vmatpush3.msra.mxu1 %v24644_v1 }
0x2107   :  { %20151 = vmatprep.subr.mxu1 %v20714_v6 }
0x2108   :  { %v20550_v15 = vpop.eup %20549  ;;  %20152 = vmatpush3.msra.mxu1 %v24650_v17 }
0x2109   :  { %20154 = vmatmul.mubr.msk.f32.vlgmr.msra.gmra.mxu1 %vm757_vm11, %v20550_v15  ;;  %20167 = vmatprep.subr.mxu1 %v20714_v6 }
0x210a   :  { %20168 = vmatpush3.msra.mxu1 %v24631_v0  ;;  %v16488_v50 = vpop.f32.mrf.mxu0  ;;  %20175 = vmatprep.mubr.msk.f32.mxu1 %vm20715_vm1, %v20714_v6 }
0x210b   :  { %20553 = vtanh.f32 %v16488_v50  ;;  %20169 = vmatprep.subr.mxu1 %v20714_v6 }
0x210c   :  { %20170 = vmatpush3.msra.mxu1 %v24638_v27  ;;  %v20188_v24 = vpop.f32.mrf.mxu0 }
0x210d   :  { %20171 = vmatprep.subr.mxu1 %v20714_v6 }
0x210e   :  { %20172 = vmatpush3.msra.mxu1 %v24644_v1 }
0x210f   :  { %20173 = vmatprep.subr.mxu1 %v20714_v6 }
0x2110   :  { %v20552_v38 = vpop.eup %20551  ;;  %20174 = vmatpush3.msra.mxu1 %v24650_v17 }
0x2111   :  { %20176 = vmatmul.mubr.msk.f32.vlgmr.msra.gmra.mxu1 %vm757_vm11, %v20552_v38  ;;  %20189 = vmatprep.subr.mxu1 %v20714_v6 }
0x2112   :  { %20190 = vmatpush3.msra.mxu1 %v24631_v0  ;;  %20197 = vmatprep.mubr.msk.f32.mxu1 %vm20715_vm1, %v20714_v6 }
0x2113   :  { %20191 = vmatprep.subr.mxu1 %v20714_v6 }
0x2114   :  { %20192 = vmatpush3.msra.mxu1 %v24638_v27 }
0x2115   :  { %20193 = vmatprep.subr.mxu1 %v20714_v6 }
0x2116   :  { %20194 = vmatpush3.msra.mxu1 %v24644_v1 }
0x2117   :  { %20195 = vmatprep.subr.mxu1 %v20714_v6 }
0x2118   :  { %v20554_v14 = vpop.eup %20553  ;;  %20196 = vmatpush3.msra.mxu1 %v24650_v17 }
0x2119   :  { %20198 = vmatmul.mubr.msk.f32.vlgmr.msra.gmra.mxu1 %vm757_vm11, %v20554_v14  ;;  %v16671_v14 = vld [vmem:[%s24779_s16 + $0x18] sm:$0xff] }
0x211a   :  { %20201 = vmatpush3.msra.mxu0 %v16671_v14 }
0x211b   :  { %20202 = vmatprep.subr.mxu0 %v20714_v6 }
0x21a1   :  { %v15533_v59 = vpop.f32.mrf.mxu1 }
0x21a3   :  { %v20045_v26 = vpop.f32.mrf.mxu1 }
0x21a4   :  { %v16669_v26 = vld [vmem:[%s24779_s16 + $0x8] sm:$0xff] }
0x21a9   :  { %v15680_v19 = vpop.f32.mrf.mxu1 }
0x21aa   :  { %v16566_v7 = vmax.f32 %v15533_v59, %v15680_v19 }
0x21ab   :  { %v20067_v18 = vpop.f32.mrf.mxu1 }
0x21b1   :  { %v15827_v23 = vpop.f32.mrf.mxu1 }
0x21b2   :  { %v16567_v58 = vmax.f32 %v16566_v7, %v15827_v23 }
0x21b3   :  { %v20089_v55 = vpop.f32.mrf.mxu1 }
0x21b9   :  { %v15974_v4 = vpop.f32.mrf.mxu1 }
0x21ba   :  { %v16568_v10 = vmax.f32 %v16567_v58, %v15974_v4 }
0x21bb   :  { %v20111_v25 = vpop.f32.mrf.mxu1 }
0x21c1   :  { %v16121_v47 = vpop.f32.mrf.mxu1 }
0x21c2   :  { %v16569_v30 = vmax.f32 %v16568_v10, %v16121_v47 }
0x21c3   :  { %v20133_v46 = vpop.f32.mrf.mxu1 }
0x21c9   :  { %v16268_v63 = vpop.f32.mrf.mxu1 }
0x21ca   :  { %v16570_v2 = vmax.f32 %v16569_v30, %v16268_v63 }
0x21cb   :  { %v20155_v33 = vpop.f32.mrf.mxu1 }
0x21d1   :  { %v16415_v12 = vpop.f32.mrf.mxu1 }
0x21d2   :  { %v16571_v40 = vmax.f32 %v16570_v2, %v16415_v12 }
0x21d3   :  { %v20177_v9 = vpop.f32.mrf.mxu1 }
0x21d9   :  { %v16562_v35 = vpop.f32.mrf.mxu1 }
0x21da   :  { %v16572_v8 = vmax.f32 %v16571_v40, %v16562_v35 }
0x21db   :  { %v20199_v62 = vpop.f32.mrf.mxu1 }
0x21dc   :  { %v16576_v32 = vsub.f32 %v15680_v19, %v16572_v8  ;;  %v16573_v20 = vsub.f32 %v15533_v59, %v16572_v8  ;;  %v16579_v16 = vsub.f32 %v15827_v23, %v16572_v8  ;;  %v16582_v27 = vsub.f32 %v15974_v4, %v16572_v8  ;;  %v16670_v59 = vld [vmem:[%s24779_s16 + $0x10] sm:$0xff]  ;;  %v16668_v19 = vld [vmem:[%s24779_s16] sm:$0xff]  ;;  %s20717_s16 = smov [#allocation2]  }
0x21dd   :  { %v16585_v17 = vsub.f32 %v16121_v47, %v16572_v8  ;;  %v16588_v53 = vsub.f32 %v16268_v63, %v16572_v8  ;;  %v16591_v11 = vsub.f32 %v16415_v12, %v16572_v8  ;;  %v16594_v44 = vsub.f32 %v16562_v35, %v16572_v8  ;;  %20203 = vmatpush3.msra.mxu0 %v16670_v59  ;;  %s16753_s9 = sshll.u32 %s20717_s16, 4  ;;  %s16754_s9 = int_to_ptr.vmem [resolvable:$true] %s16753_s9 }
0x21de   :  { %v16577_v21 = vmul.f32 1.442695, %v16576_v32  ;;  %v16574_v0 = vmul.f32 1.442695, %v16573_v20  ;;  %v16580_v1 = vmul.f32 1.442695, %v16579_v16  ;;  %20204 = vmatprep.subr.mxu0 %v20714_v6  ;;  %p20674_p1 = scmp.lt.s32.totalorder %s16754_s9, %s16754_s9 }
0x21df   :  { %v16583_v29 = vmul.f32 1.442695, %v16582_v27  ;;  %v16586_v22 = vmul.f32 1.442695, %v16585_v17  ;;  %v16589_v54 = vmul.f32 1.442695, %v16588_v53  ;;  %20205 = vmatpush3.msra.mxu0 %v16669_v26 }
0x21e0   :  { %20555 = vpow2.f32 %v16577_v21  ;;  %v16592_v3 = vmul.f32 1.442695, %v16591_v11  ;;  %v16595_v5 = vmul.f32 1.442695, %v16594_v44  ;;  %20206 = vmatprep.subr.mxu0 %v20714_v6  ;;  %s20669_s22 = scalar_lea.vmem %s16754_s9, 32 }
0x21e1   :  { %20557 = vpow2.f32 %v16574_v0  ;;  %20207 = vmatpush3.msra.mxu0 %v16668_v19  ;;  %p20670_p0 = scmp.ne.s32.totalorder %s16754_s9, %s20669_s22  ;;  %p20675_p2 = scmp.lt.s32.totalorder %s20669_s22, %s20669_s22 }
0x21e2   :  { %20559 = vpow2.f32 %v16580_v1 }
0x21e3   :  { %20561 = vpow2.f32 %v16583_v29  ;;  %p20676_p3 = por %p20675_p2, %p20674_p1 }
0x21e4   :  { %20563 = vpow2.f32 %v16586_v22 }
0x21e5   :  { %20565 = vpow2.f32 %v16589_v54  ;;  %p20677_p4 = pnand %p20676_p3, %p20670_p0 }
0x21e6   :  { %20567 = vpow2.f32 %v16592_v3 }
0x21e7   :  { %20569 = vpow2.f32 %v16595_v5 }
0x21ed   :  { %v20556_v45 = vpop.eup %20555 }
0x21ee   :  { %v20558_v61 = vpop.eup %20557  ;;  %16606 = vperm.xlu1 %20218, %v20556_v45  }
0x21ef   :  { %16599 = vperm.xlu0 %20217, %v20558_v61   ;;  %v16603_v28 = vadd.f32 %v20558_v61, %v20556_v45  ;;  %v20560_v41 = vpop.eup %20559 }
0x21f0   :  { %v20562_v57 = vpop.eup %20561 }
0x21f1   :  { %v16611_v60 = vadd.f32 %v20560_v41, %v16603_v28  ;;  %v20564_v43 = vpop.eup %20563 }
0x21f2   :  { %v20566_v36 = vpop.eup %20565 }
0x21f3   :  { %16614 = vperm.xlu0 %20217, %v20560_v41   ;;  %v16619_v31 = vadd.f32 %v20562_v57, %v16611_v60  ;;  %v20568_v15 = vpop.eup %20567 }
0x21f4   :  { %v20570_v24 = vpop.eup %20569 }
0x21f5   :  { %v16627_v52 = vadd.f32 %v20564_v43, %v16619_v31 }
0x21f7   :  { %16622 = vperm.xlu0 %20217, %v20562_v57   ;;  %v16635_v42 = vadd.f32 %v20566_v36, %v16627_v52 }
0x21f9   :  { %v16643_v50 = vadd.f32 %v20568_v15, %v16635_v42 }
0x21fb   :  { %16638 = vperm.xlu0 %20217, %v20566_v36   ;;  %v16651_v38 = vadd.f32 %v20570_v24, %v16643_v50 }
0x21fd   :  { %16661 = vperm.xlu1 %20218, %v16651_v38  }
0x21ff   :  { %16654 = vperm.xlu0 %20217, %v20570_v24  }
0x2201   :  { %16630 = vperm.xlu1 %20218, %v20564_v43  }
0x2205   :  { %16646 = vperm.xlu1 %20218, %v20568_v15  }
0x2269   :  { %v16607_v55 = vpop.permute.xlu1 %16606 }
0x226a   :  { %v16600_v18 = vpop.permute.xlu0 %16599  ;;  %v16609_v25 = vmul.f32 %v16607_v55, %v24524_v56 }
0x226b   :  { %v16602_v47 = vmul.f32 %v16600_v18, %v24510_v34 }
0x226d   :  { %v16610_v33 = vadd.f32 %v16609_v25, %v16602_v47 }
0x226e   :  { %v16615_v23 = vpop.permute.xlu0 %16614 }
0x226f   :  { %v16617_v46 = vmul.f32 %v16615_v23, %v24540_v49 }
0x2271   :  { %v16618_v12 = vadd.f32 %v16617_v46, %v16610_v33 }
0x2272   :  { %v16623_v4 = vpop.permute.xlu0 %16622 }
0x2273   :  { %v16625_v7 = vmul.f32 %v16623_v4, %v24556_v48 }
0x2275   :  { %v16626_v6 = vadd.f32 %v16625_v7, %v16618_v12 }
0x2276   :  { %v16639_v58 = vpop.permute.xlu0 %16638 }
0x2277   :  { %v16641_v30 = vmul.f32 %v16639_v58, %v24588_v13 }
0x2278   :  { %v16662_v63 = vpop.permute.xlu1 %16661 }
0x2279   :  { %20571 = vrcp.f32 %v16662_v63 }
0x227a   :  { %v16655_v40 = vpop.permute.xlu0 %16654 }
0x227b   :  { %v16657_v49 = vmul.f32 %v16655_v40, %v24620_v37 }
0x227c   :  { %v16631_v10 = vpop.permute.xlu1 %16630 }
0x227d   :  { %v16633_v9 = vmul.f32 %v16631_v10, %v24572_v39 }
0x227f   :  { %v16634_v2 = vadd.f32 %v16633_v9, %v16626_v6 }
0x2280   :  { %v16647_v56 = vpop.permute.xlu1 %16646 }
0x2281   :  { %v16642_v35 = vadd.f32 %v16641_v30, %v16634_v2  ;;  %v16649_v34 = vmul.f32 %v16647_v56, %v24604_v51 }
0x2283   :  { %v16650_v8 = vadd.f32 %v16649_v34, %v16642_v35 }
0x2285   :  { %v16658_v62 = vadd.f32 %v16657_v49, %v16650_v8 }
0x2286   :  { %v20572_v48 = vpop.eup %20571 }
0x2287   :  { %v16665_v32 = vmul.f32 %v20572_v48, %v16658_v62 }
0x2289   :  { %20209 = vmatmul.mubr.msk.f32.vlgmr.msra.gmra.mxu0 %vm757_vm11, %v16665_v32  ;;  %16667 = vst.msk [vmem:[#allocation2] sm:$0x3] %vm16666_vm13, %v16665_v32 }
0x228a   :  { %20680 = shalt.err (!%p20677_p4)
}
0x228b   :  { %16756 = dma.vmem_to_hbm [thread:$0]  %s16754_s9, 32, %s24780_s17, [#allocation3]   ;;  %vm16745_vm14 = vcmask 50176  }
0x228c   :  { %s20718_s10 = smov [#allocation4]  }
0x228d   :  { %s16763_s13 = sshll.u32 %s20718_s10, 4  ;;  %s16764_s13 = int_to_ptr.vmem [resolvable:$true] %s16763_s13 }
0x228e   :  { %s20689_s2 = scalar_lea.vmem %s16764_s13, 32  ;;  %p20694_p6 = scmp.lt.s32.totalorder %s16764_s13, %s16764_s13 }
0x228f   :  { %p20690_p5 = scmp.ne.s32.totalorder %s16764_s13, %s20689_s2  ;;  %p20695_p7 = scmp.lt.s32.totalorder %s20689_s2, %s20689_s2 }
0x2291   :  { %p20696_p8 = por %p20695_p7, %p20694_p6 }
0x2293   :  { %p20697_p9 = pnand %p20696_p8, %p20690_p5 }
0x2349   :  { %v16741_v39 = vpop.f32.mrf.mxu0 }
0x234a   :  { %16746 = vst.msk [vmem:[#allocation4] sm:$0x3] %vm16745_vm14, %v16741_v39 }
0x234b   :  { %v20210_v13 = vpop.f32.mrf.mxu0 }
0x234c   :  { %20700 = shalt.err (!%p20697_p9)
}
0x234d   :  { %16766 = dma.vmem_to_hbm [thread:$0]  %s16764_s13, 32, %s24781_s18, [#allocation5]  }
0x234e   :  { %20709 = dma.done.wait [#allocation3], 32  }
0x234f   :  { %20710 = vsyncadd [#allocation3], 4294967264 }
0x2350   :  { %20711 = dma.done.wait [#allocation5], 32  }
0x2351   :  { %20712 = vsyncadd [#allocation5], 4294967264 }
0x2352   :  { %16773 = vsyncpa [#allocation3], 1 }
0x2353   :  { %16774 = vsyncpa [#allocation5], 1 }

</bundles_post_ra>
